<compile_context>
chip_gen: v7x
topology: tpu7x:2x2x1
jax: 0.10.0
libtpu: 0.0.40
codegen_flags: <defaults>
</compile_context>

<pallas_src>
import math

import jax
import jax.numpy as jnp
from jax.experimental import pallas as pl
from jax.experimental.pallas import tpu as pltpu


LAYER_SIZES = ((2, 256), (256, 256), (256, 256), (256, 256), (256, 256), (256, 1))


def _fused_mlp_kernel(x_ref, *refs):
    """refs = (w1, b1, w2, b2, ..., w6, b6, o_ref)."""
    o_ref = refs[-1]
    wb = refs[:-1]
    n_layers = len(wb) // 2

    # Layer 1: Linear(2 -> 256) + ReLU.  K = 2 is tiny, so do it on the VPU as
    # two rank-1 broadcasts in f32 instead of a degenerate MXU matmul.
    w1 = wb[0][...]            # (2, 256) f32
    b1 = wb[1][...]            # (1, 256) f32
    x = x_ref[...]             # (TM, 2)  f32
    h = x[:, 0:1] * w1[0:1, :] + x[:, 1:2] * w1[1:2, :] + b1
    h = jnp.maximum(h, 0.0)

    # Layers 2..6: MXU matmuls, bf16 operands, f32 accumulation; ReLU on all
    # but the last layer.
    for li in range(1, n_layers):
        w_ref = wb[2 * li]
        b_ref = wb[2 * li + 1]
        y = jnp.dot(h.astype(w_ref.dtype), w_ref[...],
                    preferred_element_type=jnp.float32) + b_ref[...]
        h = jnp.maximum(y, 0.0) if li < n_layers - 1 else y

    o_ref[...] = h.astype(o_ref.dtype)   # (TM, 1)


def _device_tile_defaults():
    """(tile_m, vmem_limit_bytes), chosen per TPU generation."""
    try:
        kind = jax.devices()[0].device_kind.lower()
    except Exception:
        kind = ""
    if "v7" in kind:
        # v7x: 64 MiB VMEM per TensorCore -> keep tile / scoped limit modest.
        return 1024, 32 * 1024 * 1024
    if "v5" in kind or "v6" in kind:
        # v5e / v6e: 128 MiB VMEM -> bigger tiles amortize per-step overhead.
        return 2048, 64 * 1024 * 1024
    return 1024, 32 * 1024 * 1024


def init_params(key):
    """PyTorch nn.Linear default init (weight bound = bias bound = 1/sqrt(fan_in)).
    Weights stored transposed as (in_features, out_features); biases as (1, out)."""
    params = []
    for fan_in, fan_out in LAYER_SIZES:
        key, kw, kb = jax.random.split(key, 3)
        bound = 1.0 / math.sqrt(fan_in)
        w = jax.random.uniform(kw, (fan_in, fan_out), jnp.float32, -bound, bound)
        b = jax.random.uniform(kb, (1, fan_out), jnp.float32, -bound, bound)
        params.append((w, b))
    return params


def prepare_params(params_f32):
    """One-time parameter prep (not per-call work): keep the tiny first-layer
    weight in f32 (applied on the VPU), cast MXU-facing weights to bf16, keep
    all biases f32 (bias add + ReLU run in f32)."""
    prepped = []
    for li, (w, b) in enumerate(params_f32):
        w_dev = w if li == 0 else w.astype(jnp.bfloat16)
        prepped.append((w_dev, b.astype(jnp.float32)))
    return prepped


def mlp_inr_forward(coords, params, *, tile_m=None):
    """coords: (M, 2) f32; params: list of (weight (in,out), bias (1,out)).
    Returns (M,) f32, matching SmallMLP_INR.forward(coords)."""
    M, K = coords.shape
    assert K == 2
    tm, vmem_limit = _device_tile_defaults()
    if tile_m is not None:
        tm = tile_m

    num_tiles = pl.cdiv(M, tm)
    m_pad = num_tiles * tm
    if m_pad != M:
        coords = jnp.pad(coords, ((0, m_pad - M), (0, 0)))

    in_specs = [pl.BlockSpec((tm, 2), lambda i: (i, 0))]
    flat_args = [coords]
    for (w, b) in params:
        fi, fo = w.shape
        in_specs.append(pl.BlockSpec((fi, fo), lambda i: (0, 0)))   # VMEM-resident
        in_specs.append(pl.BlockSpec((1, fo), lambda i: (0, 0)))    # VMEM-resident
        flat_args += [w, b]

    out = pl.pallas_call(
        _fused_mlp_kernel,
        out_shape=jax.ShapeDtypeStruct((m_pad, 1), jnp.float32),
        grid=(num_tiles,),
        in_specs=in_specs,
        out_specs=pl.BlockSpec((tm, 1), lambda i: (i, 0)),
        compiler_params=pltpu.CompilerParams(
            dimension_semantics=("parallel",),
            vmem_limit_bytes=vmem_limit),
    )(*flat_args)

    return out[:M, 0]


def reference_forward(coords, params_f32):
    """Plain-JAX reference with the same numerics as the kernel (f32 VPU first
    layer, bf16-operand / f32-accumulate matmuls afterwards)."""
    w1, b1 = params_f32[0]
    h = jnp.maximum(coords[:, 0:1] * w1[0:1, :] + coords[:, 1:2] * w1[1:2, :] + b1, 0.0)
    n = len(params_f32)
    for li in range(1, n):
        w, b = params_f32[li]
        y = jnp.dot(h.astype(jnp.bfloat16), w.astype(jnp.bfloat16),
                    preferred_element_type=jnp.float32) + b
        h = jnp.maximum(y, 0.0) if li < n - 1 else y
    return h[:, 0]


if __name__ == "__main__":
    key = jax.random.PRNGKey(0)
    k_params, k_coords = jax.random.split(key)

    params = init_params(k_params)
    params_dev = prepare_params(params)

    # Small deterministic demo: 3000 (x, y) coords in [0, 1]; 3000 is not a
    # multiple of the tile size, so the padding path is exercised as well.
    M = 3000
    coords = jax.random.uniform(k_coords, (M, 2), jnp.float32, 0.0, 1.0)

    out = mlp_inr_forward(coords, params_dev)
    out = jax.block_until_ready(out)

    ref = reference_forward(coords, params)
    assert out.shape == (M,)
    max_err = float(jnp.max(jnp.abs(out - ref)))
    assert jnp.allclose(out, ref, atol=2e-3, rtol=2e-3), f"max abs err {max_err}"

    print("KERNEL_OK")
</pallas_src>

<mosaic_0001>
module attributes {stable_mosaic.version = 11 : i64} {
  func.func @_fused_mlp_kernel(%arg0: i32, %arg1: memref<1024x2xf32, #tpu.memory_space<vmem>>, %arg2: memref<2x256xf32, #tpu.memory_space<vmem>>, %arg3: memref<1x256xf32, #tpu.memory_space<vmem>>, %arg4: memref<256x256xbf16, #tpu.memory_space<vmem>>, %arg5: memref<1x256xf32, #tpu.memory_space<vmem>>, %arg6: memref<256x256xbf16, #tpu.memory_space<vmem>>, %arg7: memref<1x256xf32, #tpu.memory_space<vmem>>, %arg8: memref<256x256xbf16, #tpu.memory_space<vmem>>, %arg9: memref<1x256xf32, #tpu.memory_space<vmem>>, %arg10: memref<256x256xbf16, #tpu.memory_space<vmem>>, %arg11: memref<1x256xf32, #tpu.memory_space<vmem>>, %arg12: memref<256x1xbf16, #tpu.memory_space<vmem>>, %arg13: memref<1x1xf32, #tpu.memory_space<vmem>>, %arg14: memref<1024x1xf32, #tpu.memory_space<vmem>>) attributes {dimension_semantics = [#tpu.dimension_semantics<parallel>], iteration_bounds = array<i64: 3>, scalar_prefetch = 0 : i64, scratch_operands = 0 : i64, tpu.core_type = #tpu.core_type<tc>, window_params = [{transform_indices = @transform_0, window_bounds = array<i64: 1024, 2>}, {pipeline_mode = #tpu.pipeline_mode<synchronous>, transform_indices = @transform_1, window_bounds = array<i64: 2, 256>}, {pipeline_mode = #tpu.pipeline_mode<synchronous>, transform_indices = @transform_2, window_bounds = array<i64: 1, 256>}, {pipeline_mode = #tpu.pipeline_mode<synchronous>, transform_indices = @transform_3, window_bounds = array<i64: 256, 256>}, {pipeline_mode = #tpu.pipeline_mode<synchronous>, transform_indices = @transform_4, window_bounds = array<i64: 1, 256>}, {pipeline_mode = #tpu.pipeline_mode<synchronous>, transform_indices = @transform_5, window_bounds = array<i64: 256, 256>}, {pipeline_mode = #tpu.pipeline_mode<synchronous>, transform_indices = @transform_6, window_bounds = array<i64: 1, 256>}, {pipeline_mode = #tpu.pipeline_mode<synchronous>, transform_indices = @transform_7, window_bounds = array<i64: 256, 256>}, {pipeline_mode = #tpu.pipeline_mode<synchronous>, transform_indices = @transform_8, window_bounds = array<i64: 1, 256>}, {pipeline_mode = #tpu.pipeline_mode<synchronous>, transform_indices = @transform_9, window_bounds = array<i64: 256, 256>}, {pipeline_mode = #tpu.pipeline_mode<synchronous>, transform_indices = @transform_10, window_bounds = array<i64: 1, 256>}, {pipeline_mode = #tpu.pipeline_mode<synchronous>, transform_indices = @transform_11, window_bounds = array<i64: 256, 1>}, {pipeline_mode = #tpu.pipeline_mode<synchronous>, transform_indices = @transform_12, window_bounds = array<i64: 1, 1>}, {transform_indices = @transform_13, window_bounds = array<i64: 1024, 1>}]} {
    %c0 = arith.constant 0 : index
    %c0_0 = arith.constant 0 : index
    %0 = vector.load %arg2[%c0, %c0_0] : memref<2x256xf32, #tpu.memory_space<vmem>>, vector<2x256xf32>
    %c0_1 = arith.constant 0 : index
    %c0_2 = arith.constant 0 : index
    %1 = vector.load %arg3[%c0_1, %c0_2] : memref<1x256xf32, #tpu.memory_space<vmem>>, vector<1x256xf32>
    %c0_3 = arith.constant 0 : index
    %c0_4 = arith.constant 0 : index
    %2 = vector.load %arg1[%c0_3, %c0_4] : memref<1024x2xf32, #tpu.memory_space<vmem>>, vector<1024x2xf32>
    %3 = vector.extract_strided_slice %2 {offsets = [0, 0], sizes = [1024, 1], strides = [1, 1]} : vector<1024x2xf32> to vector<1024x1xf32>
    %4 = vector.extract_strided_slice %0 {offsets = [0, 0], sizes = [1, 256], strides = [1, 1]} : vector<2x256xf32> to vector<1x256xf32>
    %5 = vector.broadcast %3 : vector<1024x1xf32> to vector<1024x256xf32>
    %6 = vector.broadcast %4 : vector<1x256xf32> to vector<1024x256xf32>
    %7 = arith.mulf %5, %6 : vector<1024x256xf32>
    %8 = vector.extract_strided_slice %2 {offsets = [0, 1], sizes = [1024, 1], strides = [1, 1]} : vector<1024x2xf32> to vector<1024x1xf32>
    %9 = vector.extract_strided_slice %0 {offsets = [1, 0], sizes = [1, 256], strides = [1, 1]} : vector<2x256xf32> to vector<1x256xf32>
    %10 = vector.broadcast %8 : vector<1024x1xf32> to vector<1024x256xf32>
    %11 = vector.broadcast %9 : vector<1x256xf32> to vector<1024x256xf32>
    %12 = arith.mulf %10, %11 : vector<1024x256xf32>
    %13 = arith.addf %7, %12 : vector<1024x256xf32>
    %14 = vector.broadcast %1 : vector<1x256xf32> to vector<1024x256xf32>
    %15 = arith.addf %13, %14 : vector<1024x256xf32>
    %cst = arith.constant 0.000000e+00 : f32
    %16 = vector.broadcast %cst : f32 to vector<1024x256xf32>
    %17 = arith.maximumf %15, %16 : vector<1024x256xf32>
    %18 = arith.truncf %17 : vector<1024x256xf32> to vector<1024x256xbf16>
    %c0_5 = arith.constant 0 : index
    %c0_6 = arith.constant 0 : index
    %19 = vector.load %arg4[%c0_5, %c0_6] : memref<256x256xbf16, #tpu.memory_space<vmem>>, vector<256x256xbf16>
    %cst_7 = arith.constant dense<0.000000e+00> : vector<1024x256xf32>
    %20 = tpu.matmul %18, %19, %cst_7 {dimension_numbers = #tpu.dot_dimension_numbers<[1], [0], [0], [1], [0, 0, 1, 1], [], []>} : vector<1024x256xbf16>, vector<256x256xbf16>, vector<1024x256xf32> -> vector<1024x256xf32>
    %c0_8 = arith.constant 0 : index
    %c0_9 = arith.constant 0 : index
    %21 = vector.load %arg5[%c0_8, %c0_9] : memref<1x256xf32, #tpu.memory_space<vmem>>, vector<1x256xf32>
    %22 = vector.broadcast %21 : vector<1x256xf32> to vector<1024x256xf32>
    %23 = arith.addf %20, %22 : vector<1024x256xf32>
    %cst_10 = arith.constant 0.000000e+00 : f32
    %24 = vector.broadcast %cst_10 : f32 to vector<1024x256xf32>
    %25 = arith.maximumf %23, %24 : vector<1024x256xf32>
    %26 = arith.truncf %25 : vector<1024x256xf32> to vector<1024x256xbf16>
    %c0_11 = arith.constant 0 : index
    %c0_12 = arith.constant 0 : index
    %27 = vector.load %arg6[%c0_11, %c0_12] : memref<256x256xbf16, #tpu.memory_space<vmem>>, vector<256x256xbf16>
    %cst_13 = arith.constant dense<0.000000e+00> : vector<1024x256xf32>
    %28 = tpu.matmul %26, %27, %cst_13 {dimension_numbers = #tpu.dot_dimension_numbers<[1], [0], [0], [1], [0, 0, 1, 1], [], []>} : vector<1024x256xbf16>, vector<256x256xbf16>, vector<1024x256xf32> -> vector<1024x256xf32>
    %c0_14 = arith.constant 0 : index
    %c0_15 = arith.constant 0 : index
    %29 = vector.load %arg7[%c0_14, %c0_15] : memref<1x256xf32, #tpu.memory_space<vmem>>, vector<1x256xf32>
    %30 = vector.broadcast %29 : vector<1x256xf32> to vector<1024x256xf32>
    %31 = arith.addf %28, %30 : vector<1024x256xf32>
    %cst_16 = arith.constant 0.000000e+00 : f32
    %32 = vector.broadcast %cst_16 : f32 to vector<1024x256xf32>
    %33 = arith.maximumf %31, %32 : vector<1024x256xf32>
    %34 = arith.truncf %33 : vector<1024x256xf32> to vector<1024x256xbf16>
    %c0_17 = arith.constant 0 : index
    %c0_18 = arith.constant 0 : index
    %35 = vector.load %arg8[%c0_17, %c0_18] : memref<256x256xbf16, #tpu.memory_space<vmem>>, vector<256x256xbf16>
    %cst_19 = arith.constant dense<0.000000e+00> : vector<1024x256xf32>
    %36 = tpu.matmul %34, %35, %cst_19 {dimension_numbers = #tpu.dot_dimension_numbers<[1], [0], [0], [1], [0, 0, 1, 1], [], []>} : vector<1024x256xbf16>, vector<256x256xbf16>, vector<1024x256xf32> -> vector<1024x256xf32>
    %c0_20 = arith.constant 0 : index
    %c0_21 = arith.constant 0 : index
    %37 = vector.load %arg9[%c0_20, %c0_21] : memref<1x256xf32, #tpu.memory_space<vmem>>, vector<1x256xf32>
    %38 = vector.broadcast %37 : vector<1x256xf32> to vector<1024x256xf32>
    %39 = arith.addf %36, %38 : vector<1024x256xf32>
    %cst_22 = arith.constant 0.000000e+00 : f32
    %40 = vector.broadcast %cst_22 : f32 to vector<1024x256xf32>
    %41 = arith.maximumf %39, %40 : vector<1024x256xf32>
    %42 = arith.truncf %41 : vector<1024x256xf32> to vector<1024x256xbf16>
    %c0_23 = arith.constant 0 : index
    %c0_24 = arith.constant 0 : index
    %43 = vector.load %arg10[%c0_23, %c0_24] : memref<256x256xbf16, #tpu.memory_space<vmem>>, vector<256x256xbf16>
    %cst_25 = arith.constant dense<0.000000e+00> : vector<1024x256xf32>
    %44 = tpu.matmul %42, %43, %cst_25 {dimension_numbers = #tpu.dot_dimension_numbers<[1], [0], [0], [1], [0, 0, 1, 1], [], []>} : vector<1024x256xbf16>, vector<256x256xbf16>, vector<1024x256xf32> -> vector<1024x256xf32>
    %c0_26 = arith.constant 0 : index
    %c0_27 = arith.constant 0 : index
    %45 = vector.load %arg11[%c0_26, %c0_27] : memref<1x256xf32, #tpu.memory_space<vmem>>, vector<1x256xf32>
    %46 = vector.broadcast %45 : vector<1x256xf32> to vector<1024x256xf32>
    %47 = arith.addf %44, %46 : vector<1024x256xf32>
    %cst_28 = arith.constant 0.000000e+00 : f32
    %48 = vector.broadcast %cst_28 : f32 to vector<1024x256xf32>
    %49 = arith.maximumf %47, %48 : vector<1024x256xf32>
    %50 = arith.truncf %49 : vector<1024x256xf32> to vector<1024x256xbf16>
    %c0_29 = arith.constant 0 : index
    %c0_30 = arith.constant 0 : index
    %51 = vector.load %arg12[%c0_29, %c0_30] : memref<256x1xbf16, #tpu.memory_space<vmem>>, vector<256x1xbf16>
    %cst_31 = arith.constant dense<0.000000e+00> : vector<1024x1xf32>
    %52 = tpu.matmul %50, %51, %cst_31 {dimension_numbers = #tpu.dot_dimension_numbers<[1], [0], [0], [1], [0, 0, 1, 1], [], []>} : vector<1024x256xbf16>, vector<256x1xbf16>, vector<1024x1xf32> -> vector<1024x1xf32>
    %c0_32 = arith.constant 0 : index
    %c0_33 = arith.constant 0 : index
    %53 = vector.load %arg13[%c0_32, %c0_33] : memref<1x1xf32, #tpu.memory_space<vmem>>, vector<1x1xf32>
    %54 = vector.broadcast %53 : vector<1x1xf32> to vector<1024x1xf32>
    %55 = arith.addf %52, %54 : vector<1024x1xf32>
    %c0_34 = arith.constant 0 : index
    %c0_35 = arith.constant 0 : index
    %56 = vector.load %arg14[%c0_34, %c0_35] : memref<1024x1xf32, #tpu.memory_space<vmem>>, vector<1024x1xf32>
    tpu.vector_store %arg14[%c0_34, %c0_35], %55 {strides = array<i32>} : memref<1024x1xf32, #tpu.memory_space<vmem>>, vector<1024x1xf32>,
    return
  }
  func.func @transform_0(%arg0: i32) -> (i32, i32) {
    %c0_i32 = arith.constant 0 : i32
    %c0_i32_0 = arith.constant 0 : i32
    return %arg0, %c0_i32 : i32, i32
  }
  func.func @transform_1(%arg0: i32) -> (i32, i32) {
    %c0_i32 = arith.constant 0 : i32
    %c0_i32_0 = arith.constant 0 : i32
    %c0_i32_1 = arith.constant 0 : i32
    return %c0_i32, %c0_i32_0 : i32, i32
  }
  func.func @transform_2(%arg0: i32) -> (i32, i32) {
    %c0_i32 = arith.constant 0 : i32
    %c0_i32_0 = arith.constant 0 : i32
    %c0_i32_1 = arith.constant 0 : i32
    return %c0_i32, %c0_i32_0 : i32, i32
  }
  func.func @transform_3(%arg0: i32) -> (i32, i32) {
    %c0_i32 = arith.constant 0 : i32
    %c0_i32_0 = arith.constant 0 : i32
    %c0_i32_1 = arith.constant 0 : i32
    return %c0_i32, %c0_i32_0 : i32, i32
  }
  func.func @transform_4(%arg0: i32) -> (i32, i32) {
    %c0_i32 = arith.constant 0 : i32
    %c0_i32_0 = arith.constant 0 : i32
    %c0_i32_1 = arith.constant 0 : i32
    return %c0_i32, %c0_i32_0 : i32, i32
  }
  func.func @transform_5(%arg0: i32) -> (i32, i32) {
    %c0_i32 = arith.constant 0 : i32
    %c0_i32_0 = arith.constant 0 : i32
    %c0_i32_1 = arith.constant 0 : i32
    return %c0_i32, %c0_i32_0 : i32, i32
  }
  func.func @transform_6(%arg0: i32) -> (i32, i32) {
    %c0_i32 = arith.constant 0 : i32
    %c0_i32_0 = arith.constant 0 : i32
    %c0_i32_1 = arith.constant 0 : i32
    return %c0_i32, %c0_i32_0 : i32, i32
  }
  func.func @transform_7(%arg0: i32) -> (i32, i32) {
    %c0_i32 = arith.constant 0 : i32
    %c0_i32_0 = arith.constant 0 : i32
    %c0_i32_1 = arith.constant 0 : i32
    return %c0_i32, %c0_i32_0 : i32, i32
  }
  func.func @transform_8(%arg0: i32) -> (i32, i32) {
    %c0_i32 = arith.constant 0 : i32
    %c0_i32_0 = arith.constant 0 : i32
    %c0_i32_1 = arith.constant 0 : i32
    return %c0_i32, %c0_i32_0 : i32, i32
  }
  func.func @transform_9(%arg0: i32) -> (i32, i32) {
    %c0_i32 = arith.constant 0 : i32
    %c0_i32_0 = arith.constant 0 : i32
    %c0_i32_1 = arith.constant 0 : i32
    return %c0_i32, %c0_i32_0 : i32, i32
  }
  func.func @transform_10(%arg0: i32) -> (i32, i32) {
    %c0_i32 = arith.constant 0 : i32
    %c0_i32_0 = arith.constant 0 : i32
    %c0_i32_1 = arith.constant 0 : i32
    return %c0_i32, %c0_i32_0 : i32, i32
  }
  func.func @transform_11(%arg0: i32) -> (i32, i32) {
    %c0_i32 = arith.constant 0 : i32
    %c0_i32_0 = arith.constant 0 : i32
    %c0_i32_1 = arith.constant 0 : i32
    return %c0_i32, %c0_i32_0 : i32, i32
  }
  func.func @transform_12(%arg0: i32) -> (i32, i32) {
    %c0_i32 = arith.constant 0 : i32
    %c0_i32_0 = arith.constant 0 : i32
    %c0_i32_1 = arith.constant 0 : i32
    return %c0_i32, %c0_i32_0 : i32, i32
  }
  func.func @transform_13(%arg0: i32) -> (i32, i32) {
    %c0_i32 = arith.constant 0 : i32
    %c0_i32_0 = arith.constant 0 : i32
    return %arg0, %c0_i32 : i32, i32
  }
}

</mosaic_0001>

<bundles_post_ra>
// kernel: tpu_custom_call.1
= control target key start
LH: loop header
LB: loop body
LE: loop exit
PB: predicated region body
PF: predicated region fallthrough
CT: control target
= control target key end

     0   :  { %s9745_s27 = smov 0   ;;  %s14099_s0 = inlined_call_operand.vmem [shape: f32[3072,2], index: 0, kind: input, shape index: {}]   ;;  %s14100_s1 = inlined_call_operand.vmem [shape: f32[2,256], index: 1, kind: input, shape index: {}]   ;;  %s14101_s2 = inlined_call_operand.vmem [shape: f32[1,256], index: 2, kind: input, shape index: {}]   ;;  %s14102_s3 = inlined_call_operand.vmem [shape: bf16[256,256], index: 3, kind: input, shape index: {}]   ;;  %s14103_s4 = inlined_call_operand.vmem [shape: f32[1,256], index: 4, kind: input, shape index: {}]   ;;  %s14104_s5 = inlined_call_operand.vmem [shape: bf16[256,256], index: 5, kind: input, shape index: {}]   ;;  %s14105_s6 = inlined_call_operand.vmem [shape: f32[1,256], index: 6, kind: input, shape index: {}]   ;;  %s14106_s7 = inlined_call_operand.vmem [shape: bf16[256,256], index: 7, kind: input, shape index: {}]   ;;  %s14107_s8 = inlined_call_operand.vmem [shape: f32[1,256], index: 8, kind: input, shape index: {}]   ;;  %s14108_s9 = inlined_call_operand.vmem [shape: bf16[256,256], index: 9, kind: input, shape index: {}]   ;;  %s14109_s10 = inlined_call_operand.vmem [shape: f32[1,256], index: 10, kind: input, shape index: {}]   ;;  %s14110_s11 = inlined_call_operand.vmem [shape: bf16[256,1], index: 11, kind: input, shape index: {}]   ;;  %s14111_s12 = inlined_call_operand.<no memory space> [shape: f32[1,1], index: 12, kind: input, shape index: {}]   ;;  %s14112_s13 = inlined_call_operand.vmem [shape: f32[3072,1], index: 13, kind: output, shape index: {}]  }
   0x1   :  { %v18_v0 = vstv %s14111_s12 }
   0x2   :  { %19 = vst [vmem:[#allocation2] sm:$0x1] %v18_v0 }
   0x3 LB: > { %s9094_s28 = sadd.s32 4294967295, %s9668_s27   ;;  %p9098_p0 = scmp.ge.s32.totalorder %s9668_s27, 1  ;;  %s9668_s27 = sphi %s9745_s27, %s25_s27  }
   0x4   : > { %p390_p1 = scmp.lt.s32.totalorder %s9668_s27, 4 }
   0x6   : > { %p391_p2 = pnand %p9098_p0, %p390_p1 }
   0x8   : > { %394 = sbr.rel (%p391_p2) target bundleno = 2352 (0x930), region = 72 }
   0xf   : > { %s9099_s29 = sshll.u32 %s9094_s28, 7  ;;  %v14120_v1 = vmov 1   ;;  %v14114_v2 = vmov 0   ;;  %v9425_v3 = vld [vmem:[%s14102_s3 + $0x4] ss:$8 sps:$4 sm:$0xff]   ;;  %vm8909_vm0 = vcmask 7168  }
  0x10   : > { %9293 = vset.pattern.permute.xlu1 %v14120_v1  ;;  %9292 = vset.pattern.permute.xlu0 %v14114_v2  ;;  %p435_p3 = scmp.lt.s32.totalorder %s9099_s29, 383  ;;  %v9427_v4 = vld [vmem:[%s14102_s3] ss:$8 sps:$4 sm:$0xff]   ;;  %v9428_v5 = vld [vmem:[%s14102_s3 + $0x14] ss:$8 sps:$4 sm:$0xff]  }
  0x11   : > { %9250 = vmatprep.subr.bf16.mxu1 %v9425_v3  ;;  %3389 = vmatprep.subr.bf16.mxu0 %v9425_v3  ;;  %v9430_v6 = vld [vmem:[%s14102_s3 + $0x10] ss:$8 sps:$4 sm:$0xff]   ;;  %v9431_v7 = vld [vmem:[%s14102_s3 + $0x24] ss:$8 sps:$4 sm:$0xff]   ;;  %v9433_v10 = vld [vmem:[%s14102_s3 + $0x20] ss:$8 sps:$4 sm:$0xff]  }
  0x12   : > { %s14337_s29 = smov (!%p435_p3, %s9099_s29), 383  ;;  %9266 = vmatpush1.bf16.msra.mxu1 %v9427_v4  ;;  %3390 = vmatpush1.bf16.msra.mxu0 %v9427_v4  ;;  %v9434_v11 = vld [vmem:[%s14102_s3 + $0x34] ss:$8 sps:$4 sm:$0xff]   ;;  %v9436_v13 = vld [vmem:[%s14102_s3 + $0x30] ss:$8 sps:$4 sm:$0xff]  }
  0x13   : > { %s9100_s18 = sshll.u32 %s14337_s29, 3  ;;  %9251 = vmatprep.subr.bf16.mxu1 %v9428_v5  ;;  %3391 = vmatprep.subr.bf16.mxu0 %v9428_v5  ;;  %v9437_v15 = vld [vmem:[%s14102_s3 + $0x44] ss:$8 sps:$4 sm:$0xff]   ;;  %v9439_v17 = vld [vmem:[%s14102_s3 + $0x40] ss:$8 sps:$4 sm:$0xff]  }
  0x14   : > { %s9775_s23 = scalar_lea.vmem %s14099_s0, %s9100_s18  ;;  %v9440_v18 = vld [vmem:[%s14102_s3 + $0x54] ss:$8 sps:$4 sm:$0xff]   ;;  %v9442_v19 = vld [vmem:[%s14102_s3 + $0x50] ss:$8 sps:$4 sm:$0xff]   ;;  %v9443_v20 = vld [vmem:[%s14102_s3 + $0x64] ss:$8 sps:$4 sm:$0xff]   ;;  %s13543_s28 = scalar_lea.vmem %s14112_s13, %s9100_s18 }
  0x15   : > { %v513_v8 = vld [vmem:[%s9775_s23 + $0x200] sm:$0xff]  ;;  %v514_v9 = vld [vmem:[%s9775_s23 + $0x208] sm:$0xff]  ;;  %v515_v12 = vld [vmem:[%s9775_s23 + $0x210] sm:$0xff] }
  0x16   : > { %1749 = vperm.xlu1 %9293, %v513_v8   ;;  %899 = vperm.xlu0 %9292, %v513_v8   ;;  %v516_v14 = vld [vmem:[%s9775_s23 + $0x218] sm:$0xff]  ;;  %v518_v16 = vld [vmem:[%s9775_s23 + $0x228] sm:$0xff]  ;;  %v517_v21 = vld [vmem:[%s9775_s23 + $0x220] sm:$0xff] }
  0x17   : > { %9267 = vmatpush1.bf16.msra.mxu1 %v9430_v6  ;;  %3392 = vmatpush1.bf16.msra.mxu0 %v9430_v6  ;;  %v9445_v22 = vld [vmem:[%s14102_s3 + $0x60] ss:$8 sps:$4 sm:$0xff]   ;;  %v9818_v23 = vld [vmem:[%s9775_s23 + $0x230] sm:$0xff]  ;;  %v9449_v27 = vld [vmem:[%s14102_s3 + $0x84] ss:$8 sps:$4 sm:$0xff]  }
  0x18   : > { %9252 = vmatprep.subr.bf16.mxu1 %v9431_v7  ;;  %3393 = vmatprep.subr.bf16.mxu0 %v9431_v7  ;;  %v9446_v24 = vld [vmem:[%s14102_s3 + $0x74] ss:$8 sps:$4 sm:$0xff]   ;;  %v9448_v25 = vld [vmem:[%s14102_s3 + $0x70] ss:$8 sps:$4 sm:$0xff]   ;;  %v9828_v26 = vld [vmem:[%s9775_s23] sm:$0xff] }
  0x19   : > { %v9451_v28 = vld [vmem:[%s14102_s3 + $0x80] ss:$8 sps:$4 sm:$0xff]   ;;  %v9839_v29 = vld [vmem:[%s9775_s23 + $0x10] sm:$0xff]  ;;  %v520_v31 = vld [vmem:[%s9775_s23 + $0x238] sm:$0xff] }
  0x1a   : > { %1753 = vperm.xlu1 %9293, %v514_v9   ;;  %904 = vperm.xlu0 %9292, %v514_v9   ;;  %v9452_v30 = vld [vmem:[%s14102_s3 + $0x94] ss:$8 sps:$4 sm:$0xff]   ;;  %v9847_v32 = vld [vmem:[%s9775_s23 + $0x20] sm:$0xff]  ;;  %v9454_v33 = vld [vmem:[%s14102_s3 + $0x90] ss:$8 sps:$4 sm:$0xff]  }
  0x1b   : > { %9268 = vmatpush1.bf16.msra.mxu1 %v9433_v10  ;;  %3394 = vmatpush1.bf16.msra.mxu0 %v9433_v10  ;;  %v9455_v34 = vld [vmem:[%s14102_s3 + $0xa4] ss:$8 sps:$4 sm:$0xff]   ;;  %v9857_v35 = vld [vmem:[%s9775_s23 + $0x30] sm:$0xff]  ;;  %v9457_v36 = vld [vmem:[%s14102_s3 + $0xa0] ss:$8 sps:$4 sm:$0xff]  }
  0x1c   : > { %9253 = vmatprep.subr.bf16.mxu1 %v9434_v11  ;;  %3395 = vmatprep.subr.bf16.mxu0 %v9434_v11  ;;  %v9458_v37 = vld [vmem:[%s14102_s3 + $0xb4] ss:$8 sps:$4 sm:$0xff]   ;;  %v9867_v38 = vld [vmem:[%s9775_s23 + $0x40] sm:$0xff]  ;;  %v9460_v39 = vld [vmem:[%s14102_s3 + $0xb0] ss:$8 sps:$4 sm:$0xff]  }
  0x1d   : > { %v9461_v40 = vld [vmem:[%s14102_s3 + $0xc4] ss:$8 sps:$4 sm:$0xff]   ;;  %v9879_v42 = vld [vmem:[%s9775_s23 + $0x50] sm:$0xff]  ;;  %v9463_v43 = vld [vmem:[%s14102_s3 + $0xc0] ss:$8 sps:$4 sm:$0xff]  }
  0x1e   : > { %9294 = vset.pattern.permute.xlu1 %v14114_v2  ;;  %909 = vperm.xlu0 %9292, %v515_v12   ;;  %v521_v41 = vld [vmem:[%s9775_s23 + $0x240] sm:$0xff]  ;;  %v9464_v44 = vld [vmem:[%s14102_s3 + $0xd4] ss:$8 sps:$4 sm:$0xff]   ;;  %v9466_v46 = vld [vmem:[%s14102_s3 + $0xd0] ss:$8 sps:$4 sm:$0xff]  }
  0x1f   : > { %914 = vperm.xlu1 %9294, %v516_v14   ;;  %9269 = vmatpush1.bf16.msra.mxu1 %v9436_v13  ;;  %v9890_v45 = vld [vmem:[%s9775_s23 + $0x60] sm:$0xff]  ;;  %v9901_v48 = vld [vmem:[%s9775_s23 + $0x248] sm:$0xff]  ;;  %v9904_v49 = vld [vmem:[%s9775_s23 + $0x70] sm:$0xff] }
  0x20   : > { %9254 = vmatprep.subr.bf16.mxu1 %v9437_v15  ;;  %3396 = vmatpush1.bf16.msra.mxu0 %v9436_v13  ;;  %v9467_v47 = vld [vmem:[%s14102_s3 + $0xe4] ss:$8 sps:$4 sm:$0xff]   ;;  %v9469_v50 = vld [vmem:[%s14102_s3 + $0xe0] ss:$8 sps:$4 sm:$0xff]   ;;  %v9470_v51 = vld [vmem:[%s14102_s3 + $0xf4] ss:$8 sps:$4 sm:$0xff]  }
  0x21   : > { %3397 = vmatprep.subr.bf16.mxu0 %v9437_v15  ;;  %v450_v52 = vld [vmem:[%s9775_s23 + $0x8] sm:$0xff]  ;;  %v9916_v53 = vld [vmem:[%s9775_s23 + $0x80] sm:$0xff]  ;;  %v9472_v54 = vld [vmem:[%s14102_s3 + $0xf0] ss:$8 sps:$4 sm:$0xff]  }
  0x22   : > { %924 = vperm.xlu0 %9292, %v518_v16   ;;  %v9925_v55 = vld [vmem:[%s9775_s23 + $0x90] sm:$0xff]  ;;  %v9928_v56 = vld [vmem:[%s9775_s23 + $0xa0] sm:$0xff]  ;;  %v9944_v60 = vld [vmem:[%s9775_s23 + $0x258] sm:$0xff] }
  0x23   : > { %9295 = vset.pattern.permute.xlu1 %v14120_v1  ;;  %9270 = vmatpush1.bf16.msra.mxu1 %v9439_v17  ;;  %v523_v57 = vld [vmem:[%s9775_s23 + $0x250] sm:$0xff]  ;;  %v9939_v59 = vld [vmem:[%s9775_s23 + $0xc0] sm:$0xff]  ;;  %v452_v62 = vld [vmem:[%s9775_s23 + $0x18] sm:$0xff] }
  0x24   : > { %1761 = vperm.xlu1 %9295, %v516_v14   ;;  %9255 = vmatprep.subr.bf16.mxu1 %v9440_v18  ;;  %v9934_v58 = vld [vmem:[%s9775_s23 + $0xb0] sm:$0xff]  ;;  %v9954_v63 = vld [vmem:[%s9775_s23 + $0xe0] sm:$0xff]  ;;  %v9976_v7 = vld [vmem:[%s9775_s23 + $0x268] sm:$0xff] }
  0x25   : > { %3398 = vmatpush1.bf16.msra.mxu0 %v9439_v17  ;;  %v9948_v61 = vld [vmem:[%s9775_s23 + $0xd0] sm:$0xff]  ;;  %v9964_v3 = vld [vmem:[%s9775_s23 + $0x100] sm:$0xff]  ;;  %v454_v9 = vld [vmem:[%s9775_s23 + $0x28] sm:$0xff] }
  0x26   : > { %9297 = vset.pattern.permute.xlu0 %v14120_v1  ;;  %3399 = vmatprep.subr.bf16.mxu0 %v9440_v18  ;;  %v9959_v0 = vld [vmem:[%s9775_s23 + $0xf0] sm:$0xff]  ;;  %v525_v4 = vld [vmem:[%s9775_s23 + $0x260] sm:$0xff] }
  0x27   : > { %1757 = vperm.xlu0 %9297, %v515_v12   ;;  %9271 = vmatpush1.bf16.msra.mxu1 %v9442_v19  ;;  %v9970_v5 = vld [vmem:[%s9775_s23 + $0x110] sm:$0xff]  ;;  %v485_v6 = vld [vmem:[%s9775_s23 + $0x120] sm:$0xff]  ;;  %v1218_v12 = vlaneseq }
  0x28   : > { %9296 = vset.pattern.permute.xlu1 %v14114_v2  ;;  %9256 = vmatprep.subr.bf16.mxu1 %v9443_v20  ;;  %v487_v8 = vld [vmem:[%s9775_s23 + $0x130] sm:$0xff]  ;;  %v489_v10 = vld [vmem:[%s9775_s23 + $0x140] sm:$0xff] }
  0x29   : > { %919 = vperm.xlu1 %9296, %v517_v21   ;;  %3400 = vmatpush1.bf16.msra.mxu0 %v9442_v19  ;;  %v491_v11 = vld [vmem:[%s9775_s23 + $0x150] sm:$0xff]  ;;  %v493_v13 = vld [vmem:[%s9775_s23 + $0x160] sm:$0xff]  ;;  %v1219_v15 = vshrl.u32 %v1218_v12, 7 }
  0x2a   : > { %3401 = vmatprep.subr.bf16.mxu0 %v9443_v20  ;;  %v527_v14 = vld [vmem:[%s9775_s23 + $0x270] sm:$0xff] }
  0x2b   : > { %1773 = vperm.xlu0 %9297, %v9818_v23   ;;  %9272 = vmatpush1.bf16.msra.mxu1 %v9445_v22  ;;  %v9989_v17 = vsub.s32 1, %v1219_v15  ;;  %v2010_v18 = vsub.s32 3, %v1219_v15  ;;  %v9991_v19 = vsub.s32 0, %v1219_v15  ;;  %v1224_v20 = vsub.s32 2, %v1219_v15 }
  0x2c   : > { %9257 = vmatprep.subr.bf16.mxu1 %v9446_v24 }
  0x2d   : > { %9298 = vset.pattern.permute.xlu1 %v14120_v1  ;;  %3402 = vmatpush1.bf16.msra.mxu0 %v9445_v22  ;;  %14145 = vst [vmem:[#allocation3_spill] sm:$0xff] %v9989_v17  ;;  %14146 = vst [vmem:[#allocation4_spill] sm:$0xff] %v9991_v19  ;;  %v497_v22 = vld [vmem:[%s9775_s23 + $0x180] sm:$0xff] }
  0x2e   : > { %1765 = vperm.xlu1 %9298, %v517_v21   ;;  %3403 = vmatprep.subr.bf16.mxu0 %v9446_v24  ;;  %v447_v21 = vld [vmem:[%s14100_s1] sm:$0xf] }
  0x2f   : > { %1493 = vperm.xlu0 %9297, %v9828_v26   ;;  %9273 = vmatpush1.bf16.msra.mxu1 %v9448_v25  ;;  %v2007_v24 = vrot.slane %v447_v21, %v9989_v17 }
  0x30   : > { %9258 = vmatprep.subr.bf16.mxu1 %v9449_v27 }
  0x31   : > { %3404 = vmatpush1.bf16.msra.mxu0 %v9448_v25  ;;  %v2011_v25 = vrot.slane %v447_v21, %v2010_v18 }
  0x32   : > { %1769 = vperm.xlu1 %9298, %v518_v16   ;;  %3405 = vmatprep.subr.bf16.mxu0 %v9449_v27  ;;  %v495_v16 = vld [vmem:[%s9775_s23 + $0x170] sm:$0xff]  ;;  %v1221_v27 = vrot.slane %v447_v21, %v9991_v19 }
  0x33   : > { %1501 = vperm.xlu0 %9297, %v9839_v29   ;;  %9274 = vmatpush1.bf16.msra.mxu1 %v9451_v28 }
  0x34   : > { %9259 = vmatprep.subr.bf16.mxu1 %v9452_v30 }
  0x35   : > { %3406 = vmatpush1.bf16.msra.mxu0 %v9451_v28  ;;  %v1225_v28 = vrot.slane %v447_v21, %v1224_v20  ;;  %v529_v21 = vld [vmem:[%s9775_s23 + $0x280] sm:$0xff] }
  0x36   : > { %9299 = vset.pattern.permute.xlu1 %v14114_v2  ;;  %3407 = vmatprep.subr.bf16.mxu0 %v9452_v30  ;;  %v10001_v30 = vld [vmem:[%s9775_s23 + $0x278] sm:$0xff] }
  0x37   : > { %934 = vperm.xlu1 %9299, %v520_v31   ;;  %1509 = vperm.xlu0 %9297, %v9847_v32  }
  0x38   : > { %9275 = vmatpush1.bf16.msra.mxu1 %v9454_v33 }
  0x39   : > { %9260 = vmatprep.subr.bf16.mxu1 %v9455_v34  ;;  %3408 = vmatpush1.bf16.msra.mxu0 %v9454_v33  ;;  %v10006_v33 = vrot.slane %v2007_v24, %v9989_v17 }
  0x3a   : > { %3409 = vmatprep.subr.bf16.mxu0 %v9455_v34  ;;  %v10009_v34 = vrot.slane %v2011_v25, %v9989_v17 }
  0x3b   : > { %9300 = vset.pattern.permute.xlu1 %v14120_v1  ;;  %1517 = vperm.xlu0 %9297, %v9857_v35  }
  0x3c   : > { %1777 = vperm.xlu1 %9300, %v520_v31   ;;  %9276 = vmatpush1.bf16.msra.mxu1 %v9457_v36  ;;  %v499_v31 = vld [vmem:[%s9775_s23 + $0x190] sm:$0xff] }
  0x3d   : > { %9261 = vmatprep.subr.bf16.mxu1 %v9458_v37  ;;  %3410 = vmatpush1.bf16.msra.mxu0 %v9457_v36  ;;  %v10012_v36 = vrot.slane %v1221_v27, %v9991_v19 }
  0x3e   : > { %3411 = vmatprep.subr.bf16.mxu0 %v9458_v37  ;;  %v10015_v37 = vrot.slane %v1225_v28, %v9991_v19 }
  0x3f   : > { %1525 = vperm.xlu0 %9297, %v9867_v38  }
  0x40   : > { %9301 = vset.pattern.permute.xlu1 %v14114_v2  ;;  %9277 = vmatpush1.bf16.msra.mxu1 %v9460_v39 }
  0x41   : > { %939 = vperm.xlu1 %9301, %v521_v41   ;;  %9262 = vmatprep.subr.bf16.mxu1 %v9461_v40 }
  0x42   : > { %3412 = vmatpush1.bf16.msra.mxu0 %v9460_v39  ;;  %v456_v39 = vld [vmem:[%s9775_s23 + $0x38] sm:$0xff] }
  0x43   : > { %1533 = vperm.xlu0 %9297, %v9879_v42   ;;  %3413 = vmatprep.subr.bf16.mxu0 %v9461_v40  ;;  %v501_v40 = vld [vmem:[%s9775_s23 + $0x1a0] sm:$0xff] }
  0x44   : > { %9278 = vmatpush1.bf16.msra.mxu1 %v9463_v43 }
  0x45   : > { %9302 = vset.pattern.permute.xlu1 %v14120_v1  ;;  %9263 = vmatprep.subr.bf16.mxu1 %v9464_v44 }
  0x46   : > { %1781 = vperm.xlu1 %9302, %v521_v41   ;;  %3414 = vmatpush1.bf16.msra.mxu0 %v9463_v43 }
  0x47   : > { %1541 = vperm.xlu0 %9297, %v9890_v45   ;;  %3415 = vmatprep.subr.bf16.mxu0 %v9464_v44  ;;  %v448_v44 = vld [vmem:[%s14101_s2] sm:$0x3] }
  0x48   : > { %9279 = vmatpush1.bf16.msra.mxu1 %v9466_v46 }
  0x49   : > { %9264 = vmatprep.subr.bf16.mxu1 %v9467_v47 }
  0x4a   : > { %1785 = vperm.xlu1 %9302, %v9901_v48   ;;  %3416 = vmatpush1.bf16.msra.mxu0 %v9466_v46 }
  0x4b   : > { %1549 = vperm.xlu0 %9297, %v9904_v49   ;;  %3417 = vmatprep.subr.bf16.mxu0 %v9467_v47 }
  0x4c   : > { %9280 = vmatpush1.bf16.msra.mxu1 %v9469_v50 }
  0x4d   : > { %9265 = vmatprep.subr.bf16.mxu1 %v9470_v51 }
  0x4e   : > { %9303 = vset.pattern.permute.xlu1 %v14114_v2  ;;  %3418 = vmatpush1.bf16.msra.mxu0 %v9469_v50 }
  0x4f   : > { %584 = vperm.xlu1 %9303, %v450_v52   ;;  %1557 = vperm.xlu0 %9297, %v9916_v53  }
  0x50   : > { %9281 = vmatpush1.bf16.msra.mxu1 %v9472_v54  ;;  %3419 = vmatprep.subr.bf16.mxu0 %v9470_v51 }
  0x52   : > { %3420 = vmatpush1.bf16.msra.mxu0 %v9472_v54  ;;  %v503_v54 = vld [vmem:[%s9775_s23 + $0x1b0] sm:$0xff] }
  0x53   : > { %9304 = vset.pattern.permute.xlu1 %v14120_v1  ;;  %1565 = vperm.xlu0 %9297, %v9925_v55  }
  0x54   : > { %1497 = vperm.xlu1 %9304, %v450_v52  }
  0x57   : > { %1573 = vperm.xlu0 %9297, %v9928_v56  }
  0x58   : > { %9305 = vset.pattern.permute.xlu1 %v14114_v2 }
  0x59   : > { %949 = vperm.xlu1 %9305, %v523_v57  }
  0x5b   : > { %1581 = vperm.xlu0 %9297, %v9934_v58  }
  0x5d   : > { %9306 = vset.pattern.permute.xlu1 %v14120_v1 }
  0x5e   : > { %1789 = vperm.xlu1 %9306, %v523_v57  }
  0x5f   : > { %1589 = vperm.xlu0 %9297, %v9939_v59  }
  0x62   : > { %1793 = vperm.xlu1 %9306, %v9944_v60  }
  0x63   : > { %1597 = vperm.xlu0 %9297, %v9948_v61  }
  0x66   : > { %9307 = vset.pattern.permute.xlu1 %v14114_v2 }
  0x67   : > { %594 = vperm.xlu1 %9307, %v452_v62   ;;  %1605 = vperm.xlu0 %9297, %v9954_v63  }
  0x6b   : > { %9308 = vset.pattern.permute.xlu1 %v14120_v1  ;;  %1613 = vperm.xlu0 %9297, %v9959_v0  }
  0x6c   : > { %1505 = vperm.xlu1 %9308, %v452_v62   ;;  %v10029_v62 = vrot.slane %v448_v44, %v9991_v19 }
  0x6f   : > { %1621 = vperm.xlu0 %9297, %v9964_v3  }
  0x70   : > { %9309 = vset.pattern.permute.xlu1 %v14114_v2 }
  0x71   : > { %959 = vperm.xlu1 %9309, %v525_v4  }
  0x73   : > { %1629 = vperm.xlu0 %9297, %v9970_v5  }
  0x75   : > { %9310 = vset.pattern.permute.xlu1 %v14120_v1 }
  0x76   : > { %1797 = vperm.xlu1 %9310, %v525_v4   ;;  %v10032_v4 = vrot.slane %v448_v44, %v9989_v17 }
  0x77   : > { %1637 = vperm.xlu0 %9297, %v485_v6  }
  0x7a   : > { %1801 = vperm.xlu1 %9310, %v9976_v7  }
  0x7b   : > { %1645 = vperm.xlu0 %9297, %v487_v8  }
  0x7e   : > { %9311 = vset.pattern.permute.xlu1 %v14114_v2 }
  0x7f   : > { %604 = vperm.xlu1 %9311, %v454_v9   ;;  %1653 = vperm.xlu0 %9297, %v489_v10  }
  0x83   : > { %9312 = vset.pattern.permute.xlu1 %v14120_v1  ;;  %1661 = vperm.xlu0 %9297, %v491_v11  }
  0x84   : > { %1513 = vperm.xlu1 %9312, %v454_v9  }
  0x87   : > { %1669 = vperm.xlu0 %9297, %v493_v13  }
  0x88   : > { %9313 = vset.pattern.permute.xlu1 %v14114_v2 }
  0x89   : > { %969 = vperm.xlu1 %9313, %v527_v14  }
  0x8b   : > { %1677 = vperm.xlu0 %9297, %v495_v16  }
  0x8d   : > { %9314 = vset.pattern.permute.xlu1 %v14120_v1 }
  0x8e   : > { %1805 = vperm.xlu1 %9314, %v527_v14  }
  0x8f   : > { %1685 = vperm.xlu0 %9297, %v497_v22  }
  0x92   : > { %1809 = vperm.xlu1 %9314, %v10001_v30  }
  0x93   : > { %1693 = vperm.xlu0 %9297, %v499_v31  }
  0x95   : > { %v1750_v41 = vpop.permute.xlu1 %1749  ;;  %v900_v43 = vpop.permute.xlu0 %899 }
  0x96   : > { %v2150_v46 = vmul.f32 %v10006_v33, %v1750_v41  ;;  %v2151_v47 = vmul.f32 %v10009_v34, %v1750_v41  ;;  %v1364_v50 = vmul.f32 %v10012_v36, %v900_v43  ;;  %v1365_v51 = vmul.f32 %v10015_v37, %v900_v43  ;;  %9315 = vset.pattern.permute.xlu1 %v14114_v2 }
  0x97   : > { %614 = vperm.xlu1 %9315, %v456_v39   ;;  %1701 = vperm.xlu0 %9297, %v501_v40  }
  0x98   : > { %v2406_v52 = vadd.f32 %v2150_v46, %v1364_v50  ;;  %v2407_v57 = vadd.f32 %v2151_v47, %v1365_v51 }
  0x99   : > { %v1754_v6 = vpop.permute.xlu1 %1753  ;;  %v905_v8 = vpop.permute.xlu0 %904 }
  0x9a   : > { %v2152_v9 = vmul.f32 %v10006_v33, %v1754_v6  ;;  %v2153_v10 = vmul.f32 %v10009_v34, %v1754_v6  ;;  %v1366_v11 = vmul.f32 %v10012_v36, %v905_v8  ;;  %v1367_v12 = vmul.f32 %v10015_v37, %v905_v8 }
  0x9b   : > { %9316 = vset.pattern.permute.xlu1 %v14120_v1  ;;  %1709 = vperm.xlu0 %9297, %v503_v54   ;;  %v2674_v15 = vadd.f32 %v10032_v4, %v2407_v57  ;;  %v2673_v16 = vadd.f32 %v10029_v62, %v2406_v52 }
  0x9c   : > { %v2408_v13 = vadd.f32 %v2152_v9, %v1366_v11  ;;  %1521 = vperm.xlu1 %9316, %v456_v39   ;;  %v2409_v14 = vadd.f32 %v2153_v10, %v1367_v12  ;;  %v10058_v9 = vld [vmem:[%s9775_s23 + $0x288] sm:$0xff] }
  0x9d   : > { %v910_v18 = vpop.permute.xlu0 %909  ;;  %v2930_v25 = vmax.f32 %v2674_v15, 0.0  ;;  %v2929_v28 = vmax.f32 %v2673_v16, 0.0 }
  0x9e   : > { %v915_v20 = vpop.permute.xlu1 %914  ;;  %v2676_v22 = vadd.f32 %v10032_v4, %v2409_v14  ;;  %v2675_v24 = vadd.f32 %v10029_v62, %v2408_v13  ;;  %v1369_v51 = vmul.f32 %v10015_v37, %v910_v18 }
  0x9f   : > { %9412 = vset.pattern.permute.xlu0 %v14114_v2  ;;  %v1370_v43 = vmul.f32 %v10012_v36, %v915_v20  ;;  %v1371_v46 = vmul.f32 %v10015_v37, %v915_v20 }
  0xa0   : > { %9317 = vset.pattern.permute.xlu1 %v14114_v2  ;;  %929 = vperm.xlu0 %9412, %v9818_v23   ;;  %v2932_v27 = vmax.f32 %v2676_v22, 0.0  ;;  %v2931_v31 = vmax.f32 %v2675_v24, 0.0  ;;  %v1368_v23 = vmul.f32 %v10012_v36, %v910_v18  ;;  %v458_v18 = vld [vmem:[%s9775_s23 + $0x48] sm:$0xff] }
  0xa1   : > { %979 = vperm.xlu1 %9317, %v529_v21   ;;  %v925_v39 = vpop.permute.xlu0 %924 }
  0xa2   : > { %v3122_v40 = vpack.c.bf16 %v2932_v27, %v2930_v25  ;;  %v3121_v41 = vpack.c.bf16 %v2931_v31, %v2929_v28 }
  0xa3   : > { %v1762_v44 = vpop.permute.xlu1 %1761 }
  0xa4   : > { %v2156_v47 = vmul.f32 %v10006_v33, %v1762_v44  ;;  %v2157_v50 = vmul.f32 %v10009_v34, %v1762_v44  ;;  %3741 = vmatprep.mubr.bf16.mxu1 %v3122_v40  ;;  %944 = vperm.xlu0 %9412, %v9901_v48   ;;  %v1375_v44 = vmul.f32 %v10015_v37, %v925_v39 }
  0xa5   : > { %3742 = vmatmul.mubr.bf16.vlgmr.msra.gmra.mrb[0].mxu1 %v3121_v41  ;;  %9318 = vset.pattern.permute.xlu1 %v14120_v1 }
  0xa6   : > { %v2412_v52 = vadd.f32 %v2156_v47, %v1370_v43  ;;  %v2413_v54 = vadd.f32 %v2157_v50, %v1371_v46  ;;  %v1758_v57 = vpop.permute.xlu0 %1757  ;;  %1813 = vperm.xlu1 %9318, %v529_v21   ;;  %v1374_v43 = vmul.f32 %v10012_v36, %v925_v39 }
  0xa7   : > { %v2154_v6 = vmul.f32 %v10006_v33, %v1758_v57  ;;  %v2155_v8 = vmul.f32 %v10009_v34, %v1758_v57 }
  0xa8   : > { %v920_v10 = vpop.permute.xlu1 %919  ;;  %579 = vperm.xlu0 %9412, %v9828_v26   ;;  %v2680_v12 = vadd.f32 %v10032_v4, %v2413_v54  ;;  %v2679_v13 = vadd.f32 %v10029_v62, %v2412_v52 }
  0xa9   : > { %v2410_v48 = vadd.f32 %v2154_v6, %v1368_v23  ;;  %v2411_v11 = vadd.f32 %v2155_v8, %v1369_v51  ;;  %v1372_v25 = vmul.f32 %v10012_v36, %v920_v10  ;;  %v1373_v27 = vmul.f32 %v10015_v37, %v920_v10  ;;  %v531_v10 = vld [vmem:[%s9775_s23 + $0x290] sm:$0xff] }
  0xaa   : > { %1817 = vperm.xlu1 %9318, %v10058_v9   ;;  %v10064_v14 = vpop.permute.xlu0 %1773  ;;  %v2936_v26 = vmax.f32 %v2680_v12, 0.0  ;;  %v2935_v24 = vmax.f32 %v2679_v13, 0.0 }
  0xab   : > { %v2678_v15 = vadd.f32 %v10032_v4, %v2411_v11  ;;  %v2677_v16 = vadd.f32 %v10029_v62, %v2410_v48 }
  0xac   : > { %954 = vperm.xlu0 %9412, %v9944_v60  }
  0xad   : > { %v1766_v20 = vpop.permute.xlu1 %1765  ;;  %v2934_v21 = vmax.f32 %v2678_v15, 0.0  ;;  %v2933_v22 = vmax.f32 %v2677_v16, 0.0 }
  0xae   : > { %v2158_v28 = vmul.f32 %v10006_v33, %v1766_v20  ;;  %v2159_v31 = vmul.f32 %v10009_v34, %v1766_v20  ;;  %9319 = vset.pattern.permute.xlu1 %v14114_v2  ;;  %v10075_v40 = vpop.permute.xlu0 %1493 }
  0xaf   : > { %624 = vperm.xlu1 %9319, %v458_v18   ;;  %v3124_v60 = vpack.c.bf16 %v2936_v26, %v2934_v21  ;;  %v3123_v41 = vpack.c.bf16 %v2935_v24, %v2933_v22  ;;  %v532_v26 = vld [vmem:[%s9775_s23 + $0x298] sm:$0xff] }
  0xb0   : > { %v2414_v46 = vadd.f32 %v2158_v28, %v1372_v25  ;;  %v2415_v47 = vadd.f32 %v2159_v31, %v1373_v27  ;;  %589 = vperm.xlu0 %9412, %v9839_v29   ;;  %v460_v25 = vld [vmem:[%s9775_s23 + $0x58] sm:$0xff] }
  0xb1   : > { %v1770_v50 = vpop.permute.xlu1 %1769  ;;  %3751 = vmatprep.mubr.bf16.mxu1 %v3124_v60  ;;  %v533_v60 = vld [vmem:[%s9775_s23 + $0x2a0] sm:$0xff] }
  0xb2   : > { %v2160_v23 = vmul.f32 %v10006_v33, %v1770_v50  ;;  %v2161_v51 = vmul.f32 %v10009_v34, %v1770_v50  ;;  %3752 = vmatmul.mubr.bf16.gmra.mrb[4].mxu1 %v3123_v41  ;;  %v10082_v52 = vpop.permute.xlu0 %1501  ;;  %v2682_v54 = vadd.f32 %v10032_v4, %v2415_v47  ;;  %v2681_v29 = vadd.f32 %v10029_v62, %v2414_v46  ;;  %v536_v47 = vld [vmem:[%s9775_s23 + $0x2b8] sm:$0xff]  ;;  %v462_v50 = vld [vmem:[%s9775_s23 + $0x68] sm:$0xff] }
  0xb3   : > { %9320 = vset.pattern.permute.xlu1 %v14120_v1 }
  0xb4   : > { %v2416_v57 = vadd.f32 %v2160_v23, %v1374_v43  ;;  %v2417_v39 = vadd.f32 %v2161_v51, %v1375_v44  ;;  %1529 = vperm.xlu1 %9320, %v458_v18   ;;  %964 = vperm.xlu0 %9412, %v9976_v7   ;;  %v2938_v12 = vmax.f32 %v2682_v54, 0.0  ;;  %v2937_v15 = vmax.f32 %v2681_v29, 0.0 }
  0xb6   : > { %v10088_v6 = vpop.permute.xlu1 %934  ;;  %v10090_v8 = vpop.permute.xlu0 %1509  ;;  %v2684_v48 = vadd.f32 %v10032_v4, %v2417_v39  ;;  %v2683_v11 = vadd.f32 %v10029_v62, %v2416_v57 }
  0xb8   : > { %9321 = vset.pattern.permute.xlu1 %v14114_v2  ;;  %599 = vperm.xlu0 %9412, %v9847_v32   ;;  %v2940_v13 = vmax.f32 %v2684_v48, 0.0  ;;  %v2939_v7 = vmax.f32 %v2683_v11, 0.0 }
  0xb9   : > { %989 = vperm.xlu1 %9321, %v531_v10  }
  0xba   : > { %v10097_v16 = vpop.permute.xlu0 %1517  ;;  %v3126_v18 = vpack.c.bf16 %v2940_v13, %v2938_v12  ;;  %v3125_v20 = vpack.c.bf16 %v2939_v7, %v2937_v15  ;;  %v464_v7 = vld [vmem:[%s9775_s23 + $0x78] sm:$0xff] }
  0xbb   : > { %v10099_v21 = vpop.permute.xlu1 %1777 }
  0xbc   : > { %3761 = vmatprep.mubr.bf16.mxu1 %v3126_v18  ;;  %974 = vperm.xlu0 %9412, %v10001_v30  }
  0xbd   : > { %3762 = vmatmul.mubr.bf16.gmra.mrb[8].mxu1 %v3125_v20  ;;  %9322 = vset.pattern.permute.xlu1 %v14120_v1 }
  0xbe   : > { %1821 = vperm.xlu1 %9322, %v531_v10   ;;  %v10103_v32 = vpop.permute.xlu0 %1525  ;;  %v535_v10 = vld [vmem:[%s9775_s23 + $0x2b0] sm:$0xff] }
  0xc0   : > { %v10106_v22 = vpop.permute.xlu1 %939  ;;  %609 = vperm.xlu0 %9412, %v9857_v35  }
  0xc2   : > { %1825 = vperm.xlu1 %9322, %v532_v26   ;;  %v10109_v24 = vpop.permute.xlu0 %1533 }
  0xc4   : > { %984 = vperm.xlu0 %9412, %v10058_v9  }
  0xc5   : > { %v10113_v27 = vpop.permute.xlu1 %1781 }
  0xc6   : > { %9323 = vset.pattern.permute.xlu1 %v14114_v2  ;;  %v10116_v30 = vpop.permute.xlu0 %1541 }
  0xc7   : > { %14147 = vst [vmem:[#allocation5_spill] sm:$0xff] %v10116_v30  ;;  %634 = vperm.xlu1 %9323, %v460_v25  }
  0xc8   : > { %619 = vperm.xlu0 %9412, %v9867_v38   ;;  %v534_v38 = vld [vmem:[%s9775_s23 + $0x2a8] sm:$0xff] }
  0xc9   : > { %v10119_v28 = vpop.permute.xlu1 %1785 }
  0xca   : > { %v10121_v35 = vpop.permute.xlu0 %1549 }
  0xcb   : > { %14148 = vst [vmem:[#allocation6_spill] sm:$0xff] %v10121_v35  ;;  %9324 = vset.pattern.permute.xlu1 %v14120_v1 }
  0xcc   : > { %1537 = vperm.xlu1 %9324, %v460_v25   ;;  %994 = vperm.xlu0 %9412, %v532_v26   ;;  %v10195_v26 = vld [vmem:[%s9775_s23 + $0x2f8] sm:$0xff] }
  0xcd   : > { %14160 = vst [vmem:[#allocation18_spill] sm:$0xff] %v10195_v26 }
  0xce   : > { %v10124_v9 = vpop.permute.xlu1 %584  ;;  %v10126_v31 = vpop.permute.xlu0 %1557 }
  0xcf   : > { %14149 = vst [vmem:[#allocation7_spill] sm:$0xff] %v10126_v31 }
  0xd0   : > { %9325 = vset.pattern.permute.xlu1 %v14114_v2  ;;  %629 = vperm.xlu0 %9412, %v9879_v42  }
  0xd1   : > { %999 = vperm.xlu1 %9325, %v533_v60  }
  0xd2   : > { %v10132_v41 = vpop.permute.xlu0 %1565 }
  0xd3   : > { %14150 = vst [vmem:[#allocation8_spill] sm:$0xff] %v10132_v41  ;;  %v10134_v43 = vpop.permute.xlu1 %1497  ;;  %v1381_v41 = vmul.f32 %v10015_v37, %v10106_v22 }
  0xd4   : > { %1004 = vperm.xlu0 %9412, %v534_v38  }
  0xd5   : > { %9326 = vset.pattern.permute.xlu1 %v14120_v1 }
  0xd6   : > { %1829 = vperm.xlu1 %9326, %v533_v60   ;;  %v10137_v44 = vpop.permute.xlu0 %1573 }
  0xd7   : > { %14151 = vst [vmem:[#allocation9_spill] sm:$0xff] %v10137_v44  ;;  %v1380_v44 = vmul.f32 %v10012_v36, %v10106_v22 }
  0xd8   : > { %v10139_v46 = vpop.permute.xlu1 %949  ;;  %639 = vperm.xlu0 %9412, %v9890_v45   ;;  %v538_v45 = vld [vmem:[%s9775_s23 + $0x2c8] sm:$0xff] }
  0xd9   : > { %v1385_v22 = vmul.f32 %v10015_v37, %v10139_v46 }
  0xda   : > { %1833 = vperm.xlu1 %9326, %v534_v38   ;;  %v10143_v42 = vpop.permute.xlu0 %1581 }
  0xdb   : > { %14152 = vst [vmem:[#allocation10_spill] sm:$0xff] %v10143_v42 }
  0xdc   : > { %1014 = vperm.xlu0 %9412, %v536_v47  }
  0xdd   : > { %v10146_v23 = vpop.permute.xlu1 %1789 }
  0xde   : > { %9327 = vset.pattern.permute.xlu1 %v14114_v2  ;;  %v10149_v51 = vpop.permute.xlu0 %1589 }
  0xdf   : > { %14153 = vst [vmem:[#allocation11_spill] sm:$0xff] %v10149_v51  ;;  %644 = vperm.xlu1 %9327, %v462_v50  }
  0xe0   : > { %649 = vperm.xlu0 %9412, %v9904_v49   ;;  %v10166_v49 = vld [vmem:[%s9775_s23 + $0x2d8] sm:$0xff] }
  0xe1   : > { %v10152_v54 = vpop.permute.xlu1 %1793 }
  0xe2   : > { %v10155_v57 = vpop.permute.xlu0 %1597 }
  0xe3   : > { %14154 = vst [vmem:[#allocation12_spill] sm:$0xff] %v10155_v57  ;;  %9328 = vset.pattern.permute.xlu1 %v14120_v1 }
  0xe4   : > { %1545 = vperm.xlu1 %9328, %v462_v50   ;;  %1024 = vperm.xlu0 %9412, %v538_v45  }
  0xe6   : > { %v10158_v39 = vpop.permute.xlu1 %594  ;;  %v10160_v29 = vpop.permute.xlu0 %1605 }
  0xe7   : > { %14155 = vst [vmem:[#allocation13_spill] sm:$0xff] %v10160_v29  ;;  %v550_v29 = vld [vmem:[%s9775_s23 + $0x328] sm:$0xff] }
  0xe8   : > { %9329 = vset.pattern.permute.xlu1 %v14114_v2  ;;  %659 = vperm.xlu0 %9412, %v9916_v53   ;;  %v10180_v53 = vld [vmem:[%s9775_s23 + $0x2e8] sm:$0xff] }
  0xe9   : > { %1009 = vperm.xlu1 %9329, %v535_v10  }
  0xea   : > { %v10168_v48 = vpop.permute.xlu0 %1613 }
  0xeb   : > { %14156 = vst [vmem:[#allocation14_spill] sm:$0xff] %v10168_v48  ;;  %v10170_v11 = vpop.permute.xlu1 %1505 }
  0xec   : > { %1034 = vperm.xlu0 %9412, %v10166_v49   ;;  %v2029_v31 = vmul.f32 %v10009_v34, %v10170_v11 }
  0xed   : > { %9330 = vset.pattern.permute.xlu1 %v14120_v1 }
  0xee   : > { %1837 = vperm.xlu1 %9330, %v535_v10   ;;  %v10174_v12 = vpop.permute.xlu0 %1621 }
  0xef   : > { %14157 = vst [vmem:[#allocation15_spill] sm:$0xff] %v10174_v12  ;;  %v2166_v12 = vmul.f32 %v10006_v33, %v10113_v27 }
  0xf0   : > { %v10176_v13 = vpop.permute.xlu1 %959  ;;  %669 = vperm.xlu0 %9412, %v9925_v55  }
  0xf2   : > { %1841 = vperm.xlu1 %9330, %v536_v47   ;;  %v10182_v15 = vpop.permute.xlu0 %1629  ;;  %v537_v47 = vld [vmem:[%s9775_s23 + $0x2c0] sm:$0xff] }
  0xf3   : > { %14158 = vst [vmem:[#allocation16_spill] sm:$0xff] %v10182_v15  ;;  %v14167_v15 = vmov 0  }
  0xf4   : > { %1044 = vperm.xlu0 %9412, %v10180_v53  }
  0xf5   : > { %v10186_v18 = vpop.permute.xlu1 %1797 }
  0xf6   : > { %9331 = vset.pattern.permute.xlu1 %v14114_v2  ;;  %v10189_v20 = vpop.permute.xlu0 %1637 }
  0xf7   : > { %14159 = vst [vmem:[#allocation17_spill] sm:$0xff] %v10189_v20  ;;  %654 = vperm.xlu1 %9331, %v464_v7   ;;  %v2164_v20 = vmul.f32 %v10006_v33, %v10099_v21 }
  0xf8   : > { %679 = vperm.xlu0 %9412, %v9928_v56   ;;  %v10209_v56 = vld [vmem:[%s9775_s23 + $0x308] sm:$0xff] }
  0xf9   : > { %v10192_v55 = vpop.permute.xlu1 %1801  ;;  %14163 = vst [vmem:[#allocation21_spill] sm:$0xff] %v10209_v56 }
  0xfa   : > { %v10197_v25 = vpop.permute.xlu0 %1645 }
  0xfb   : > { %14161 = vst [vmem:[#allocation19_spill] sm:$0xff] %v10197_v25  ;;  %9332 = vset.pattern.permute.xlu1 %v14120_v1  ;;  %v466_v25 = vld [vmem:[%s9775_s23 + $0x88] sm:$0xff] }
  0xfc   : > { %1553 = vperm.xlu1 %9332, %v464_v7   ;;  %1054 = vperm.xlu0 %9412, %v10195_v26  }
  0xfe   : > { %v10201_v60 = vpop.permute.xlu1 %604  ;;  %v10203_v38 = vpop.permute.xlu0 %1653 }
  0xff   : > { %14162 = vst [vmem:[#allocation20_spill] sm:$0xff] %v10203_v38 }
 0x100   : > { %9333 = vset.pattern.permute.xlu1 %v14114_v2  ;;  %689 = vperm.xlu0 %9412, %v9934_v58   ;;  %v548_v2 = vld [vmem:[%s9775_s23 + $0x318] sm:$0xff] }
 0x101   : > { %1019 = vperm.xlu1 %9333, %v537_v47  }
 0x102   : > { %v10211_v50 = vpop.permute.xlu0 %1661 }
 0x103   : > { %14164 = vst [vmem:[#allocation22_spill] sm:$0xff] %v10211_v50  ;;  %v10213_v10 = vpop.permute.xlu1 %1513 }
 0x104   : > { %1064 = vperm.xlu0 %9412, %v10209_v56   ;;  %v1243_v56 = vmul.f32 %v10015_v37, %v10158_v39 }
 0x105   : > { %9334 = vset.pattern.permute.xlu1 %v14120_v1  ;;  %v10235_v1 = vmul.f32 %v10006_v33, %v10064_v14 }
 0x106   : > { %1845 = vperm.xlu1 %9334, %v537_v47   ;;  %v10217_v7 = vpop.permute.xlu0 %1669 }
 0x107   : > { %14165 = vst [vmem:[#allocation23_spill] sm:$0xff] %v10217_v7  ;;  %v1379_v7 = vmul.f32 %v10015_v37, %v10088_v6 }
 0x108   : > { %v10219_v38 = vpop.permute.xlu1 %969  ;;  %699 = vperm.xlu0 %9412, %v9939_v59   ;;  %v10239_v59 = vmul.f32 %v10009_v34, %v10064_v14  ;;  %v1378_v14 = vmul.f32 %v10012_v36, %v10088_v6  ;;  %v2025_v6 = vmul.f32 %v10009_v34, %v10134_v43 }
 0x10a   : > { %1849 = vperm.xlu1 %9334, %v538_v45   ;;  %v10223_v58 = vpop.permute.xlu0 %1677  ;;  %v10245_v45 = vmul.f32 %v10006_v33, %v10075_v40  ;;  %v2420_v57 = vadd.f32 %v2164_v20, %v1378_v14  ;;  %v2171_v20 = vmul.f32 %v10009_v34, %v10146_v23  ;;  %v14170_v14 = vmov 1  }
 0x10b   : > { %14166 = vst [vmem:[#allocation24_spill] sm:$0xff] %v10223_v58  ;;  %v10249_v58 = vmul.f32 %v10009_v34, %v10075_v40  ;;  %v10266_v40 = vmul.f32 %v10006_v33, %v10090_v8 }
 0x10c   : > { %1074 = vperm.xlu0 %9412, %v548_v2   ;;  %v2165_v2 = vmul.f32 %v10009_v34, %v10099_v21  ;;  %v10260_v21 = vmul.f32 %v10009_v34, %v10082_v52 }
 0x10d   : > { %v10226_v50 = vpop.permute.xlu1 %1805 }
 0x10e   : > { %9335 = vset.pattern.permute.xlu1 %v14167_v15  ;;  %v10231_v47 = vpop.permute.xlu0 %1685  ;;  %v2421_v42 = vadd.f32 %v2165_v2, %v1379_v7  ;;  %v2170_v7 = vmul.f32 %v10006_v33, %v10146_v23  ;;  %v2422_v2 = vadd.f32 %v2166_v12, %v1380_v44  ;;  %v2427_v12 = vadd.f32 %v2171_v20, %v1385_v22 }
 0x10f   : > { %14168 = vst [vmem:[#allocation25_spill] sm:$0xff] %v10231_v47  ;;  %664 = vperm.xlu1 %9335, %v466_v25   ;;  %v10253_v47 = vmul.f32 %v10006_v33, %v10082_v52  ;;  %v2024_v52 = vmul.f32 %v10006_v33, %v10134_v43  ;;  %v1239_v43 = vmul.f32 %v10015_v37, %v10124_v9 }
 0x110   : > { %709 = vperm.xlu0 %9412, %v9948_v61   ;;  %v2167_v61 = vmul.f32 %v10009_v34, %v10113_v27  ;;  %v1238_v27 = vmul.f32 %v10012_v36, %v10124_v9  ;;  %v1384_v9 = vmul.f32 %v10012_v36, %v10139_v46  ;;  %v10316_v46 = vmul.f32 %v10009_v34, %v10090_v8  ;;  %v552_v8 = vld [vmem:[%s9775_s23 + $0x338] sm:$0xff] }
 0x111   : > { %v10270_v48 = vpop.permute.xlu1 %1809  ;;  %v2281_v44 = vadd.f32 %v2025_v6, %v1239_v43  ;;  %v2285_v6 = vadd.f32 %v2029_v31, %v1243_v56  ;;  %v10344_v43 = vadd.f32 %v10029_v62, %v2422_v2  ;;  %v10352_v31 = vmul.f32 %v10009_v34, %v10103_v32 }
 0x112   : > { %v10279_v51 = vpop.permute.xlu0 %1693  ;;  %v2423_v17 = vadd.f32 %v2167_v61, %v1381_v41  ;;  %v2280_v19 = vadd.f32 %v2024_v52, %v1238_v27  ;;  %v10312_v41 = vadd.f32 %v10032_v4, %v2421_v42  ;;  %v10321_v61 = vadd.f32 %v10029_v62, %v2420_v57 }
 0x113   : > { %14169 = vst [vmem:[#allocation26_spill] sm:$0xff] %v10279_v51  ;;  %9336 = vset.pattern.permute.xlu1 %v14170_v14  ;;  %v2028_v51 = vmul.f32 %v10006_v33, %v10170_v11  ;;  %v2426_v11 = vadd.f32 %v2170_v7, %v1384_v9  ;;  %v10325_v52 = vmul.f32 %v10006_v33, %v10097_v16  ;;  %14175 = vst [vmem:[#allocation31_spill] sm:$0xff] %v10352_v31 }
 0x114   : > { %1561 = vperm.xlu1 %9336, %v466_v25   ;;  %1084 = vperm.xlu0 %9412, %v550_v29   ;;  %v539_v29 = vld [vmem:[%s9775_s23 + $0x2d0] sm:$0xff]  ;;  %v1242_v25 = vmul.f32 %v10012_v36, %v10158_v39  ;;  %v10329_v42 = vmul.f32 %v10009_v34, %v10097_v16  ;;  %v10335_v27 = vadd.f32 %v10032_v4, %v2423_v17 }
 0x115   : > { %v10341_v57 = vadd.f32 %v10029_v62, %v2280_v19  ;;  %v10348_v16 = vmul.f32 %v10006_v33, %v10103_v32  ;;  %v10358_v56 = vadd.f32 %v10032_v4, %v2427_v12  ;;  %v10362_v19 = vmul.f32 %v10006_v33, %v10109_v24  ;;  %v554_v12 = vld [vmem:[%s9775_s23 + $0x348] sm:$0xff] }
 0x116   : > { %v10302_v35 = vpop.permute.xlu1 %614  ;;  %v10304_v23 = vpop.permute.xlu0 %1701  ;;  %14172 = vst [vmem:[#allocation28_spill] sm:$0xff] %v10329_v42  ;;  %v2284_v39 = vadd.f32 %v2028_v51, %v1242_v25  ;;  %v10366_v7 = vmul.f32 %v10009_v34, %v10109_v24  ;;  %v10370_v32 = vadd.f32 %v10029_v62, %v2426_v11  ;;  %v2168_v22 = vmul.f32 %v10006_v33, %v10119_v28 }
 0x117   : > { %14171 = vst [vmem:[#allocation27_spill] sm:$0xff] %v10304_v23  ;;  %14174 = vst [vmem:[#allocation30_spill] sm:$0xff] %v10348_v16  ;;  %v2169_v9 = vmul.f32 %v10009_v34, %v10119_v28  ;;  %v10389_v28 = vmul.f32 %v10006_v33, %v10152_v54  ;;  %v1388_v25 = vmul.f32 %v10012_v36, %v10176_v13 }
 0x118   : > { %9337 = vset.pattern.permute.xlu1 %v14167_v15  ;;  %719 = vperm.xlu0 %9412, %v9954_v63   ;;  %v10338_v63 = vadd.f32 %v10032_v4, %v2281_v44  ;;  %14176 = vst [vmem:[#allocation32_spill] sm:$0xff] %v10362_v19  ;;  %14177 = vst [vmem:[#allocation33_spill] sm:$0xff] %v10366_v7  ;;  %v10378_v44 = vadd.f32 %v10032_v4, %v2285_v6 }
 0x119   : > { %1029 = vperm.xlu1 %9337, %v539_v29   ;;  %v10381_v24 = vadd.f32 %v10029_v62, %v2284_v39  ;;  %v10393_v6 = vmul.f32 %v10009_v34, %v10152_v54  ;;  %v1389_v17 = vmul.f32 %v10015_v37, %v10176_v13  ;;  %v1247_v23 = vmul.f32 %v10015_v37, %v10201_v60 }
 0x11a   : > { %v10332_v20 = vpop.permute.xlu0 %1709  ;;  %v2179_v30 = vmul.f32 %v10009_v34, %v10226_v50 }
 0x11b   : > { %14173 = vst [vmem:[#allocation29_spill] sm:$0xff] %v10332_v20  ;;  %v10354_v51 = vpop.permute.xlu1 %1521  ;;  %v2174_v20 = vmul.f32 %v10006_v33, %v10186_v18 }
 0x11c   : > { %1094 = vperm.xlu0 %9412, %v552_v8  }
 0x11d   : > { %9338 = vset.pattern.permute.xlu1 %v14170_v14 }
 0x11e   : > { %1853 = vperm.xlu1 %9338, %v539_v29   ;;  %v2175_v29 = vmul.f32 %v10009_v34, %v10186_v18  ;;  %v1246_v18 = vmul.f32 %v10012_v36, %v10201_v60  ;;  %v1393_v60 = vmul.f32 %v10015_v37, %v10219_v38 }
 0x11f   : > { %v930_v39 = vpop.permute.xlu0 %929 }
 0x120   : > { %v1376_v11 = vmul.f32 %v10012_v36, %v930_v39  ;;  %v1377_v8 = vmul.f32 %v10015_v37, %v930_v39  ;;  %v10402_v2 = vpop.permute.xlu1 %979  ;;  %729 = vperm.xlu0 %9412, %v9959_v0   ;;  %v2032_v39 = vmul.f32 %v10006_v33, %v10213_v10  ;;  %v2033_v0 = vmul.f32 %v10009_v34, %v10213_v10 }
 0x121   : > { %v2431_v13 = vadd.f32 %v2175_v29, %v1389_v17  ;;  %v2430_v17 = vadd.f32 %v2174_v20, %v1388_v25  ;;  %v1392_v20 = vmul.f32 %v10012_v36, %v10219_v38 }
 0x122   : > { %v2418_v54 = vadd.f32 %v10235_v1, %v1376_v11  ;;  %v2419_v26 = vadd.f32 %v10239_v59, %v1377_v8  ;;  %1857 = vperm.xlu1 %9338, %v10166_v49   ;;  %v468_v1 = vld [vmem:[%s9775_s23 + $0x98] sm:$0xff]  ;;  %v10433_v11 = vmul.f32 %v10006_v33, %v10192_v55  ;;  %v2178_v8 = vmul.f32 %v10006_v33, %v10226_v50 }
 0x123   : > { %v945_v7 = vpop.permute.xlu0 %944  ;;  %v2289_v31 = vadd.f32 %v2033_v0, %v1247_v23  ;;  %v10446_v50 = vmul.f32 %v10009_v34, %v10192_v55  ;;  %v14179_v0 = vmax.f32 %v10321_v61, 0.0 }
 0x124   : > { %v1382_v19 = vmul.f32 %v10012_v36, %v945_v7  ;;  %v1383_v10 = vmul.f32 %v10015_v37, %v945_v7  ;;  %v2686_v59 = vadd.f32 %v10032_v4, %v2419_v26  ;;  %v2685_v49 = vadd.f32 %v10029_v62, %v2418_v54  ;;  %1104 = vperm.xlu0 %9412, %v554_v12  }
 0x125   : > { %v10439_v29 = vpop.permute.xlu1 %1813  ;;  %v2288_v7 = vadd.f32 %v2032_v39, %v1246_v18  ;;  %v2435_v12 = vadd.f32 %v2179_v30, %v1393_v60  ;;  %v2434_v38 = vadd.f32 %v2178_v8, %v1392_v20  ;;  %v10470_v61 = vadd.f32 %v10032_v4, %v2289_v31 }
 0x126   : > { %v2424_v16 = vadd.f32 %v2168_v22, %v1382_v19  ;;  %v2425_v26 = vadd.f32 %v2169_v9, %v1383_v10  ;;  %9339 = vset.pattern.permute.xlu1 %v14167_v15  ;;  %v2942_v54 = vmax.f32 %v2686_v59, 0.0  ;;  %v2941_v42 = vmax.f32 %v2685_v49, 0.0  ;;  %v556_v49 = vld [vmem:[%s9775_s23 + $0x358] sm:$0xff] }
 0x127   : > { %674 = vperm.xlu1 %9339, %v468_v1   ;;  %v580_v25 = vpop.permute.xlu0 %579  ;;  %v10452_v19 = vadd.f32 %v10032_v4, %v2431_v13  ;;  %v14178_v22 = vmax.f32 %v10312_v41, 0.0  ;;  %v10466_v13 = vadd.f32 %v10029_v62, %v2430_v17  ;;  %v2037_v31 = vmul.f32 %v10009_v34, %v10354_v51 }
 0x128   : > { %v1236_v39 = vmul.f32 %v10012_v36, %v580_v25  ;;  %v1237_v23 = vmul.f32 %v10015_v37, %v580_v25  ;;  %739 = vperm.xlu0 %9412, %v9964_v3   ;;  %v3127_v18 = vpack.c.bf16 %v14179_v0, %v2941_v42  ;;  %v2692_v55 = vadd.f32 %v10032_v4, %v2425_v26 }
 0x129   : > { %v10454_v30 = vpop.permute.xlu1 %1817  ;;  %v3128_v9 = vpack.c.bf16 %v14178_v22, %v2942_v54  ;;  %v2691_v3 = vadd.f32 %v10029_v62, %v2424_v16  ;;  %v10473_v42 = vadd.f32 %v10029_v62, %v2288_v7  ;;  %v2954_v8 = vmax.f32 %v10452_v19, 0.0 }
 0x12a   : > { %v2278_v10 = vadd.f32 %v10245_v45, %v1236_v39  ;;  %v2279_v59 = vadd.f32 %v10249_v58, %v1237_v23  ;;  %v2948_v60 = vmax.f32 %v2692_v55, 0.0  ;;  %v10476_v58 = vadd.f32 %v10032_v4, %v2435_v12  ;;  %v541_v39 = vld [vmem:[%s9775_s23 + $0x2e0] sm:$0xff] }
 0x12b   : > { %3771 = vmatprep.mubr.bf16.mxu1 %v3128_v9  ;;  %9340 = vset.pattern.permute.xlu1 %v14170_v14  ;;  %v955_v41 = vpop.permute.xlu0 %954  ;;  %v14180_v7 = vmax.f32 %v10335_v27, 0.0  ;;  %v10488_v12 = vadd.f32 %v10029_v62, %v2434_v38  ;;  %v2947_v22 = vmax.f32 %v2691_v3, 0.0  ;;  %v1250_v9 = vmul.f32 %v10012_v36, %v10302_v35 }
 0x12c   : > { %3772 = vmatmul.mubr.bf16.gmra.mrb[12].mxu1 %v3127_v18  ;;  %v1386_v45 = vmul.f32 %v10012_v36, %v955_v41  ;;  %v1387_v16 = vmul.f32 %v10015_v37, %v955_v41  ;;  %1569 = vperm.xlu1 %9340, %v468_v1   ;;  %v2546_v17 = vadd.f32 %v10032_v4, %v2279_v59  ;;  %v14181_v55 = vmax.f32 %v10338_v63, 0.0 }
 0x12d   : > { %v3130_v26 = vpack.c.bf16 %v2948_v60, %v14180_v7  ;;  %v2545_v20 = vadd.f32 %v10029_v62, %v2278_v10  ;;  %1114 = vperm.xlu0 %9412, %v556_v49   ;;  %v1251_v27 = vmul.f32 %v10015_v37, %v10302_v35  ;;  %v2036_v0 = vmul.f32 %v10006_v33, %v10354_v51 }
 0x12e   : > { %v2428_v25 = vadd.f32 %v10389_v28, %v1386_v45  ;;  %v2429_v1 = vadd.f32 %v10393_v6, %v1387_v16  ;;  %v10492_v54 = vpop.permute.xlu1 %624  ;;  %v2802_v23 = vmax.f32 %v2546_v17, 0.0  ;;  %v14182_v35 = vmax.f32 %v10341_v57, 0.0 }
 0x12f   : > { %3781 = vmatprep.mubr.bf16.mxu1 %v3130_v26  ;;  %v590_v38 = vpop.permute.xlu0 %589  ;;  %v2801_v18 = vmax.f32 %v2545_v20, 0.0  ;;  %v2293_v3 = vadd.f32 %v2037_v31, %v1251_v27  ;;  %v2953_v41 = vmax.f32 %v10466_v13, 0.0  ;;  %v14183_v63 = vmax.f32 %v10344_v43, 0.0 }
 0x130   : > { %v1240_v28 = vmul.f32 %v10012_v36, %v590_v38  ;;  %v1241_v6 = vmul.f32 %v10015_v37, %v590_v38  ;;  %9341 = vset.pattern.permute.xlu1 %v14167_v15  ;;  %v3058_v10 = vpack.c.bf16 %v14181_v55, %v2802_v23  ;;  %v2696_v59 = vadd.f32 %v10032_v4, %v2429_v1 }
 0x131   : > { %1039 = vperm.xlu1 %9341, %v541_v39   ;;  %v3057_v49 = vpack.c.bf16 %v14182_v35, %v2801_v18  ;;  %v2695_v51 = vadd.f32 %v10029_v62, %v2428_v25  ;;  %749 = vperm.xlu0 %9412, %v9970_v5   ;;  %v3129_v16 = vpack.c.bf16 %v2947_v22, %v14183_v63  ;;  %v2812_v26 = vmax.f32 %v10470_v61, 0.0  ;;  %v558_v25 = vld [vmem:[%s9775_s23 + $0x368] sm:$0xff] }
 0x132   : > { %v2282_v60 = vadd.f32 %v10253_v47, %v1240_v28  ;;  %v2283_v45 = vadd.f32 %v10260_v21, %v1241_v6  ;;  %3421 = vmatprep.mubr.bf16.mxu0 %v3058_v10  ;;  %v2952_v17 = vmax.f32 %v2696_v59, 0.0  ;;  %v10518_v57 = vmul.f32 %v10006_v33, %v10270_v48 }
 0x133   : > { %v2292_v31 = vadd.f32 %v2036_v0, %v1250_v9  ;;  %v10520_v7 = vpop.permute.xlu1 %1529  ;;  %3422 = vmatmul.mubr.bf16.vlgmr.msra.gmra.mrb[0].mxu0 %v3057_v49  ;;  %v965_v5 = vpop.permute.xlu0 %964  ;;  %v2811_v47 = vmax.f32 %v10473_v42, 0.0  ;;  %v2181_v21 = vmul.f32 %v10009_v34, %v10270_v48  ;;  %v2958_v1 = vmax.f32 %v10476_v58, 0.0 }
 0x134   : > { %3782 = vmatmul.mubr.bf16.gmra.mrb[16].mxu1 %v3129_v16  ;;  %v1390_v43 = vmul.f32 %v10012_v36, %v965_v5  ;;  %v1391_v20 = vmul.f32 %v10015_v37, %v965_v5  ;;  %v14184_v23 = vmax.f32 %v10358_v56, 0.0  ;;  %v2550_v9 = vadd.f32 %v10032_v4, %v2283_v45 }
 0x135   : > { %9342 = vset.pattern.permute.xlu1 %v14170_v14  ;;  %v2549_v27 = vadd.f32 %v10029_v62, %v2282_v60  ;;  %v2951_v0 = vmax.f32 %v2695_v51, 0.0  ;;  %v10538_v18 = vadd.f32 %v10032_v4, %v2293_v3  ;;  %v2957_v28 = vmax.f32 %v10488_v12, 0.0  ;;  %1124 = vperm.xlu0 %9412, %v558_v25   ;;  %v9633_v25 = vld [vmem:[%s9775_s23 + $0x120] sm:$0xff] }
 0x136   : > { %v3132_v22 = vpack.c.bf16 %v2952_v17, %v14184_v23  ;;  %v2432_v48 = vadd.f32 %v10433_v11, %v1390_v43  ;;  %v2433_v38 = vadd.f32 %v10446_v50, %v1391_v20  ;;  %1861 = vperm.xlu1 %9342, %v541_v39   ;;  %v2183_v6 = vmul.f32 %v10009_v34, %v10439_v29  ;;  %v470_v23 = vld [vmem:[%s9775_s23 + $0xa8] sm:$0xff] }
 0x137   : > { %v600_v56 = vpop.permute.xlu0 %599  ;;  %v2806_v55 = vmax.f32 %v2550_v9, 0.0  ;;  %v2805_v10 = vmax.f32 %v2549_v27, 0.0  ;;  %v10544_v59 = vadd.f32 %v10029_v62, %v2292_v31  ;;  %v1397_v11 = vmul.f32 %v10015_v37, %v10402_v2 }
 0x138   : > { %3791 = vmatprep.mubr.bf16.mxu1 %v3132_v22  ;;  %v1244_v50 = vmul.f32 %v10012_v36, %v600_v56  ;;  %v1245_v39 = vmul.f32 %v10015_v37, %v600_v56  ;;  %v10550_v3 = vpop.permute.xlu1 %989  ;;  %v2700_v35 = vadd.f32 %v10032_v4, %v2433_v38  ;;  %v2182_v49 = vmul.f32 %v10006_v33, %v10439_v29 }
 0x139   : > { %v14185_v51 = vmax.f32 %v10378_v44, 0.0  ;;  %v14186_v45 = vmax.f32 %v10381_v24, 0.0  ;;  %v14187_v16 = vmax.f32 %v10370_v32, 0.0  ;;  %v2699_v20 = vadd.f32 %v10029_v62, %v2432_v48  ;;  %759 = vperm.xlu0 %9412, %v9633_v25   ;;  %v9634_v25 = vld [vmem:[%s9775_s23 + $0x130] sm:$0xff] }
 0x13a   : > { %v2286_v31 = vadd.f32 %v10266_v40, %v1244_v50  ;;  %v2287_v5 = vadd.f32 %v10316_v46, %v1245_v39  ;;  %1865 = vperm.xlu1 %9342, %v10180_v53   ;;  %v2956_v43 = vmax.f32 %v2700_v35, 0.0  ;;  %v1396_v44 = vmul.f32 %v10012_v36, %v10402_v2 }
 0x13b   : > { %v3060_v60 = vpack.c.bf16 %v14185_v51, %v2806_v55  ;;  %v3059_v63 = vpack.c.bf16 %v14186_v45, %v2805_v10  ;;  %v3131_v17 = vpack.c.bf16 %v2951_v0, %v14187_v16  ;;  %v2439_v29 = vadd.f32 %v2183_v6, %v1397_v11  ;;  %v975_v32 = vpop.permute.xlu0 %974  ;;  %v560_v6 = vld [vmem:[%s9775_s23 + $0x378] sm:$0xff] }
 0x13c   : > { %v2041_v24 = vmul.f32 %v10009_v34, %v10520_v7  ;;  %v2816_v40 = vmax.f32 %v10538_v18, 0.0  ;;  %v1394_v53 = vmul.f32 %v10012_v36, %v975_v32  ;;  %v1395_v46 = vmul.f32 %v10015_v37, %v975_v32 }
 0x13d   : > { %3431 = vmatprep.mubr.bf16.mxu0 %v3060_v60  ;;  %3792 = vmatmul.mubr.bf16.gmra.mrb[20].mxu1 %v3131_v17  ;;  %v3134_v2 = vpack.c.bf16 %v2956_v43, %v2954_v8  ;;  %v2815_v22 = vmax.f32 %v10544_v59, 0.0  ;;  %v2438_v9 = vadd.f32 %v2182_v49, %v1396_v44  ;;  %v1255_v27 = vmul.f32 %v10015_v37, %v10492_v54  ;;  %v1822_v0 = vpop.permute.xlu1 %1821 }
 0x13e   : > { %3432 = vmatmul.mubr.bf16.gmra.mrb[4].mxu0 %v3059_v63  ;;  %v2554_v48 = vadd.f32 %v10032_v4, %v2287_v5  ;;  %v2553_v38 = vadd.f32 %v10029_v62, %v2286_v31  ;;  %v2184_v56 = vmul.f32 %v10006_v33, %v10454_v30  ;;  %v2436_v55 = vadd.f32 %v10518_v57, %v1394_v53  ;;  %v14188_v31 = vld [vmem:[#allocation28_spill] sm:$0xff] }
 0x13f   : > { %v2437_v19 = vadd.f32 %v2181_v21, %v1395_v46  ;;  %9343 = vset.pattern.permute.xlu1 %v14167_v15  ;;  %v2955_v8 = vmax.f32 %v2699_v20, 0.0  ;;  %v2040_v10 = vmul.f32 %v10006_v33, %v10520_v7  ;;  %v2297_v11 = vadd.f32 %v2041_v24, %v1255_v27  ;;  %3801 = vmatprep.mubr.bf16.mxu1 %v3134_v2  ;;  %v610_v50 = vpop.permute.xlu0 %609 }
 0x140   : > { %684 = vperm.xlu1 %9343, %v470_v23   ;;  %v2810_v39 = vmax.f32 %v2554_v48, 0.0  ;;  %v2809_v35 = vmax.f32 %v2553_v38, 0.0  ;;  %v1254_v49 = vmul.f32 %v10012_v36, %v10492_v54  ;;  %v1248_v51 = vmul.f32 %v10012_v36, %v610_v50  ;;  %1134 = vperm.xlu0 %9412, %v560_v6   ;;  %v562_v48 = vld [vmem:[%s9775_s23 + $0x388] sm:$0xff]  ;;  %v543_v38 = vld [vmem:[%s9775_s23 + $0x2f0] sm:$0xff] }
 0x141   : > { %v1249_v57 = vmul.f32 %v10015_v37, %v610_v50  ;;  %v10593_v21 = vadd.f32 %v10032_v4, %v2439_v29  ;;  %v1826_v60 = vpop.permute.xlu1 %1825  ;;  %v2704_v63 = vadd.f32 %v10032_v4, %v2437_v19  ;;  %v2703_v16 = vadd.f32 %v10029_v62, %v2436_v55 }
 0x142   : > { %v3062_v7 = vpack.c.bf16 %v2812_v26, %v2810_v39  ;;  %v3061_v45 = vpack.c.bf16 %v2811_v47, %v2809_v35  ;;  %v2185_v54 = vmul.f32 %v10009_v34, %v10454_v30  ;;  %v2290_v17 = vadd.f32 %v10325_v52, %v1248_v51  ;;  %v14189_v39 = vld [vmem:[#allocation30_spill] sm:$0xff] }
 0x143   : > { %v2291_v5 = vadd.f32 %v14188_v31, %v1249_v57  ;;  %v3133_v43 = vpack.c.bf16 %v2955_v8, %v2953_v41  ;;  %v2296_v20 = vadd.f32 %v2040_v10, %v1254_v49  ;;  %v985_v61 = vpop.permute.xlu0 %984  ;;  %v2960_v42 = vmax.f32 %v2704_v63, 0.0  ;;  %v14190_v49 = vld [vmem:[#allocation31_spill] sm:$0xff] }
 0x144   : > { %3441 = vmatprep.mubr.bf16.mxu0 %v3062_v7  ;;  %9344 = vset.pattern.permute.xlu1 %v14170_v14  ;;  %v10609_v26 = vadd.f32 %v10032_v4, %v2297_v11  ;;  %v10612_v47 = vadd.f32 %v10029_v62, %v2438_v9  ;;  %v1398_v52 = vmul.f32 %v10012_v36, %v985_v61  ;;  %v2962_v41 = vmax.f32 %v10593_v21, 0.0 }
 0x145   : > { %3802 = vmatmul.mubr.bf16.gmra.mrb[24].mxu1 %v3133_v43  ;;  %v1399_v30 = vmul.f32 %v10015_v37, %v985_v61  ;;  %v2558_v13 = vadd.f32 %v10032_v4, %v2291_v5  ;;  %v2187_v44 = vmul.f32 %v10009_v34, %v1822_v0  ;;  %1577 = vperm.xlu1 %9344, %v470_v23   ;;  %v2959_v32 = vmax.f32 %v2703_v16, 0.0  ;;  %v9635_v5 = vld [vmem:[%s9775_s23 + $0x140] sm:$0xff] }
 0x146   : > { %3442 = vmatmul.mubr.bf16.gmra.mrb[8].mxu0 %v3061_v45  ;;  %v3136_v29 = vpack.c.bf16 %v2960_v42, %v2958_v1  ;;  %v2557_v24 = vadd.f32 %v10029_v62, %v2290_v17  ;;  %769 = vperm.xlu0 %9412, %v9634_v25   ;;  %v1400_v53 = vmul.f32 %v10012_v36, %v10550_v3  ;;  %v635_v9 = vpop.permute.xlu1 %634  ;;  %v2820_v50 = vmax.f32 %v10609_v26, 0.0  ;;  %v564_v26 = vld [vmem:[%s9775_s23 + $0x398] sm:$0xff] }
 0x147   : > { %v2440_v46 = vadd.f32 %v2184_v56, %v1398_v52  ;;  %v2441_v2 = vadd.f32 %v2185_v54, %v1399_v30  ;;  %v2814_v27 = vmax.f32 %v2558_v13, 0.0  ;;  %v1401_v23 = vmul.f32 %v10015_v37, %v10550_v3  ;;  %v620_v1 = vpop.permute.xlu0 %619 }
 0x148   : > { %v2186_v58 = vmul.f32 %v10006_v33, %v1822_v0  ;;  %3811 = vmatprep.mubr.bf16.mxu1 %v3136_v29  ;;  %v2813_v6 = vmax.f32 %v2557_v24, 0.0  ;;  %v2563_v55 = vadd.f32 %v10029_v62, %v2296_v20  ;;  %v1252_v19 = vmul.f32 %v10012_v36, %v620_v1 }
 0x149   : > { %v1253_v8 = vmul.f32 %v10015_v37, %v620_v1  ;;  %v3064_v56 = vpack.c.bf16 %v2816_v40, %v2814_v27  ;;  %v2708_v10 = vadd.f32 %v10032_v4, %v2441_v2  ;;  %v2443_v11 = vadd.f32 %v2187_v44, %v1401_v23  ;;  %9345 = vset.pattern.permute.xlu1 %v14167_v15 }
 0x14a   : > { %v3063_v3 = vpack.c.bf16 %v2815_v22, %v2813_v6  ;;  %v3135_v0 = vpack.c.bf16 %v2959_v32, %v2957_v28  ;;  %1144 = vperm.xlu0 %9412, %v562_v48   ;;  %v2294_v35 = vadd.f32 %v14189_v39, %v1252_v19  ;;  %1049 = vperm.xlu1 %9345, %v543_v38   ;;  %v2819_v16 = vmax.f32 %v2563_v55, 0.0  ;;  %v14191_v48 = vld [vmem:[#allocation32_spill] sm:$0xff]  ;;  %v14193_v55 = vld [vmem:[#allocation18_spill] sm:$0xff] }
 0x14b   : > { %v2295_v51 = vadd.f32 %v14190_v49, %v1253_v8  ;;  %3451 = vmatprep.mubr.bf16.mxu0 %v3064_v56  ;;  %v2964_v18 = vmax.f32 %v2708_v10, 0.0  ;;  %v2707_v40 = vadd.f32 %v10029_v62, %v2440_v46  ;;  %v2188_v57 = vmul.f32 %v10006_v33, %v1826_v60  ;;  %v1538_v22 = vpop.permute.xlu1 %1537  ;;  %v995_v21 = vpop.permute.xlu0 %994  ;;  %v472_v39 = vld [vmem:[%s9775_s23 + $0xb8] sm:$0xff] }
 0x14c   : > { %v2189_v59 = vmul.f32 %v10009_v34, %v1826_v60  ;;  %v1258_v12 = vmul.f32 %v10012_v36, %v635_v9  ;;  %v1259_v28 = vmul.f32 %v10015_v37, %v635_v9  ;;  %v2044_v7 = vmul.f32 %v10006_v33, %v1538_v22 }
 0x14d   : > { %v2045_v45 = vmul.f32 %v10009_v34, %v1538_v22  ;;  %3812 = vmatmul.mubr.bf16.gmra.mrb[28].mxu1 %v3135_v0  ;;  %v1402_v63 = vmul.f32 %v10012_v36, %v995_v21  ;;  %v1403_v54 = vmul.f32 %v10015_v37, %v995_v21  ;;  %v3138_v17 = vpack.c.bf16 %v2964_v18, %v2962_v41  ;;  %v9636_v18 = vld [vmem:[%s9775_s23 + $0x150] sm:$0xff] }
 0x14e   : > { %3452 = vmatmul.mubr.bf16.gmra.mrb[12].mxu0 %v3063_v3  ;;  %v2562_v60 = vadd.f32 %v10032_v4, %v2295_v51  ;;  %v2561_v31 = vadd.f32 %v10029_v62, %v2294_v35  ;;  %779 = vperm.xlu0 %9412, %v9635_v5   ;;  %v2442_v43 = vadd.f32 %v2186_v58, %v1400_v53  ;;  %v2963_v42 = vmax.f32 %v2707_v40, 0.0  ;;  %v14192_v58 = vld [vmem:[#allocation33_spill] sm:$0xff] }
 0x14f   : > { %v2300_v20 = vadd.f32 %v2044_v7, %v1258_v12  ;;  %v2301_v61 = vadd.f32 %v2045_v45, %v1259_v28  ;;  %9346 = vset.pattern.permute.xlu1 %v14170_v14  ;;  %v2444_v52 = vadd.f32 %v2188_v57, %v1402_v63  ;;  %v2445_v30 = vadd.f32 %v2189_v59, %v1403_v54  ;;  %v630_v13 = vpop.permute.xlu0 %629  ;;  %v566_v28 = vld [vmem:[%s9775_s23 + $0x3a8] sm:$0xff] }
 0x150   : > { %1869 = vperm.xlu1 %9346, %v543_v38   ;;  %3821 = vmatprep.mubr.bf16.mxu1 %v3138_v17  ;;  %v2818_v44 = vmax.f32 %v2562_v60, 0.0  ;;  %v2817_v41 = vmax.f32 %v2561_v31, 0.0  ;;  %v1256_v29 = vmul.f32 %v10012_v36, %v630_v13  ;;  %v1257_v24 = vmul.f32 %v10015_v37, %v630_v13  ;;  %v1000_v32 = vpop.permute.xlu1 %999 }
 0x151   : > { %v2961_v25 = vmax.f32 %v10612_v47, 0.0  ;;  %v2710_v53 = vadd.f32 %v10032_v4, %v2443_v11  ;;  %v2568_v9 = vadd.f32 %v10032_v4, %v2301_v61  ;;  %v2567_v27 = vadd.f32 %v10029_v62, %v2300_v20 }
 0x152   : > { %v3066_v46 = vpack.c.bf16 %v2820_v50, %v2818_v44  ;;  %v3065_v2 = vpack.c.bf16 %v2819_v16, %v2817_v41  ;;  %1154 = vperm.xlu0 %9412, %v564_v26   ;;  %v2298_v23 = vadd.f32 %v14191_v48, %v1256_v29  ;;  %v2299_v1 = vadd.f32 %v14192_v58, %v1257_v24  ;;  %v568_v48 = vld [vmem:[%s9775_s23 + $0x3b8] sm:$0xff] }
 0x153   : > { %v3137_v38 = vpack.c.bf16 %v2963_v42, %v2961_v25  ;;  %v2712_v6 = vadd.f32 %v10032_v4, %v2445_v30  ;;  %v2709_v47 = vadd.f32 %v10029_v62, %v2442_v43  ;;  %v2711_v19 = vadd.f32 %v10029_v62, %v2444_v52  ;;  %v1005_v11 = vpop.permute.xlu0 %1004  ;;  %v14194_v43 = vld [vmem:[#allocation5_spill] sm:$0xff] }
 0x154   : > { %1873 = vperm.xlu1 %9346, %v14193_v55   ;;  %3461 = vmatprep.mubr.bf16.mxu0 %v3066_v46  ;;  %v1404_v8 = vmul.f32 %v10012_v36, %v1000_v32  ;;  %v2966_v56 = vmax.f32 %v2710_v53, 0.0  ;;  %v2566_v3 = vadd.f32 %v10032_v4, %v2299_v1  ;;  %v1405_v0 = vmul.f32 %v10015_v37, %v1000_v32  ;;  %v9637_v46 = vld [vmem:[%s9775_s23 + $0x160] sm:$0xff] }
 0x155   : > { %3822 = vmatmul.mubr.bf16.gmra.mrb[32].mxu1 %v3137_v38  ;;  %v2968_v10 = vmax.f32 %v2712_v6, 0.0  ;;  %v1830_v50 = vpop.permute.xlu1 %1829  ;;  %v2824_v35 = vmax.f32 %v2568_v9, 0.0  ;;  %v2565_v49 = vadd.f32 %v10029_v62, %v2298_v23  ;;  %v2823_v51 = vmax.f32 %v2567_v27, 0.0 }
 0x156   : > { %3462 = vmatmul.mubr.bf16.gmra.mrb[16].mxu0 %v3065_v2  ;;  %789 = vperm.xlu0 %9412, %v9636_v18   ;;  %v2190_v40 = vmul.f32 %v10006_v33, %v1830_v50  ;;  %v2191_v57 = vmul.f32 %v10009_v34, %v1830_v50  ;;  %v2822_v12 = vmax.f32 %v2566_v3, 0.0  ;;  %v1406_v22 = vmul.f32 %v10012_v36, %v1005_v11  ;;  %v545_v2 = vld [vmem:[%s9775_s23 + $0x300] sm:$0xff] }
 0x157   : > { %v3140_v59 = vpack.c.bf16 %v2968_v10, %v2966_v56  ;;  %v1407_v21 = vmul.f32 %v10015_v37, %v1005_v11  ;;  %v2821_v7 = vmax.f32 %v2565_v49, 0.0  ;;  %v2967_v45 = vmax.f32 %v2711_v19, 0.0  ;;  %v640_v17 = vpop.permute.xlu0 %639 }
 0x158   : > { %9347 = vset.pattern.permute.xlu1 %v14167_v15  ;;  %v2446_v63 = vadd.f32 %v2190_v40, %v1404_v8  ;;  %v2447_v16 = vadd.f32 %v2191_v57, %v1405_v0  ;;  %v3068_v54 = vpack.c.bf16 %v2824_v35, %v2822_v12  ;;  %v2965_v5 = vmax.f32 %v2709_v47, 0.0  ;;  %v570_v35 = vld [vmem:[%s9775_s23 + $0x3c8] sm:$0xff] }
 0x159   : > { %3831 = vmatprep.mubr.bf16.mxu1 %v3140_v59  ;;  %694 = vperm.xlu1 %9347, %v472_v39   ;;  %v1834_v60 = vpop.permute.xlu1 %1833  ;;  %v3067_v31 = vpack.c.bf16 %v2823_v51, %v2821_v7  ;;  %v2046_v20 = vmul.f32 %v10006_v33, %v14194_v43  ;;  %v2047_v61 = vmul.f32 %v10009_v34, %v14194_v43 }
 0x15a   : > { %1164 = vperm.xlu0 %9412, %v566_v28   ;;  %v2192_v42 = vmul.f32 %v10006_v33, %v1834_v60  ;;  %v2193_v26 = vmul.f32 %v10009_v34, %v1834_v60  ;;  %3471 = vmatprep.mubr.bf16.mxu0 %v3068_v54  ;;  %v3139_v52 = vpack.c.bf16 %v2967_v45, %v2965_v5  ;;  %v14195_v28 = vld [vmem:[#allocation21_spill] sm:$0xff] }
 0x15b   : > { %v1260_v30 = vmul.f32 %v10012_v36, %v640_v17  ;;  %v1261_v13 = vmul.f32 %v10015_v37, %v640_v17  ;;  %v2714_v44 = vadd.f32 %v10032_v4, %v2447_v16  ;;  %v2713_v24 = vadd.f32 %v10029_v62, %v2446_v63  ;;  %v474_v16 = vld [vmem:[%s9775_s23 + $0xc8] sm:$0xff]  ;;  %v572_v5 = vld [vmem:[%s9775_s23 + $0x3d8] sm:$0xff] }
 0x15c   : > { %v2448_v41 = vadd.f32 %v2192_v42, %v1406_v22  ;;  %v2449_v29 = vadd.f32 %v2193_v26, %v1407_v21  ;;  %v1015_v22 = vpop.permute.xlu0 %1014 }
 0x15d   : > { %9348 = vset.pattern.permute.xlu1 %v14170_v14  ;;  %3832 = vmatmul.mubr.bf16.gmra.mrb[36].mxu1 %v3139_v52  ;;  %v2302_v9 = vadd.f32 %v2046_v20, %v1260_v30  ;;  %v2303_v27 = vadd.f32 %v2047_v61, %v1261_v13  ;;  %v2970_v23 = vmax.f32 %v2714_v44, 0.0  ;;  %v2969_v1 = vmax.f32 %v2713_v24, 0.0  ;;  %v3217_v44 = vld [vmem:[%s14103_s4] sm:$0x3] }
 0x15e   : > { %3472 = vmatmul.mubr.bf16.gmra.mrb[20].mxu0 %v3067_v31  ;;  %1585 = vperm.xlu1 %9348, %v472_v39   ;;  %v645_v32 = vpop.permute.xlu1 %644  ;;  %v2716_v25 = vadd.f32 %v10032_v4, %v2449_v29  ;;  %v2715_v53 = vadd.f32 %v10029_v62, %v2448_v41  ;;  %v9638_v39 = vld [vmem:[%s9775_s23 + $0x170] sm:$0xff]  ;;  %v9639_v31 = vld [vmem:[%s9775_s23 + $0x180] sm:$0xff]  ;;  %v1410_v43 = vmul.f32 %v10012_v36, %v1015_v22 }
 0x15f   : > { %799 = vperm.xlu0 %9412, %v9637_v46   ;;  %v2569_v19 = vadd.f32 %v10029_v62, %v2302_v9  ;;  %v2570_v8 = vadd.f32 %v10032_v4, %v2303_v27  ;;  %v1262_v56 = vmul.f32 %v10012_v36, %v645_v32  ;;  %v1263_v10 = vmul.f32 %v10015_v37, %v645_v32  ;;  %v14196_v41 = vld [vmem:[#allocation6_spill] sm:$0xff]  ;;  %v14197_v27 = vld [vmem:[#allocation4_spill] sm:$0xff] }
 0x160   : > { %v2972_v58 = vmax.f32 %v2716_v25, 0.0  ;;  %v2971_v38 = vmax.f32 %v2715_v53, 0.0  ;;  %v1411_v20 = vmul.f32 %v10015_v37, %v1015_v22  ;;  %v650_v52 = vpop.permute.xlu0 %649  ;;  %v2050_v29 = vmul.f32 %v10006_v33, %v14196_v41 }
 0x161   : > { %v2826_v18 = vmax.f32 %v2570_v8, 0.0  ;;  %v2825_v57 = vmax.f32 %v2569_v19, 0.0  ;;  %v2051_v24 = vmul.f32 %v10009_v34, %v14196_v41  ;;  %v1264_v32 = vmul.f32 %v10012_v36, %v650_v52  ;;  %v547_v8 = vld [vmem:[%s9775_s23 + $0x310] sm:$0xff] }
 0x162   : > { %9349 = vset.pattern.permute.xlu1 %v14167_v15  ;;  %v3142_v6 = vpack.c.bf16 %v2972_v58, %v2970_v23  ;;  %v3141_v55 = vpack.c.bf16 %v2971_v38, %v2969_v1  ;;  %v1265_v25 = vmul.f32 %v10015_v37, %v650_v52  ;;  %v14198_v58 = vld [vmem:[#allocation3_spill] sm:$0xff] }
 0x163   : > { %1059 = vperm.xlu1 %9349, %v545_v2   ;;  %1174 = vperm.xlu0 %9412, %v568_v48   ;;  %v1546_v47 = vpop.permute.xlu1 %1545  ;;  %v10736_v48 = vrot.slane %v3217_v44, %v14197_v27  ;;  %v10739_v1 = vrot.slane %v3217_v44, %v14198_v58 }
 0x164   : > { %v2048_v11 = vmul.f32 %v10006_v33, %v1546_v47  ;;  %v2049_v3 = vmul.f32 %v10009_v34, %v1546_v47  ;;  %3841 = vmatprep.mubr.bf16.mxu1 %v3142_v6  ;;  %v2306_v47 = vadd.f32 %v2050_v29, %v1264_v32  ;;  %v2307_v19 = vadd.f32 %v2051_v24, %v1265_v25  ;;  %v1025_v29 = vpop.permute.xlu0 %1024  ;;  %v9642_v25 = vld [vmem:[%s9775_s23 + $0x318] sm:$0xff] }
 0x165   : > { %3842 = vmatmul.mubr.bf16.gmra.mrb[40].mxu1 %v3141_v55  ;;  %v9640_v55 = vld [vmem:[%s9775_s23 + $0x190] sm:$0xff] }
 0x166   : > { %v2304_v0 = vadd.f32 %v2048_v11, %v1262_v56  ;;  %v2305_v50 = vadd.f32 %v2049_v3, %v1263_v10  ;;  %v574_v56 = vld [vmem:[%s9775_s23 + $0x3e8] sm:$0xff] }
 0x167   : > { %9350 = vset.pattern.permute.xlu1 %v14170_v14  ;;  %809 = vperm.xlu0 %9412, %v9638_v39  }
 0x168   : > { %1877 = vperm.xlu1 %9350, %v545_v2   ;;  %v1010_v49 = vpop.permute.xlu1 %1009  ;;  %v2572_v51 = vadd.f32 %v10032_v4, %v2305_v50  ;;  %v2571_v40 = vadd.f32 %v10029_v62, %v2304_v0 }
 0x169   : > { %v1408_v45 = vmul.f32 %v10012_v36, %v1010_v49  ;;  %v1409_v54 = vmul.f32 %v10015_v37, %v1010_v49 }
 0x16a   : > { %v2828_v59 = vmax.f32 %v2572_v51, 0.0  ;;  %v2827_v12 = vmax.f32 %v2571_v40, 0.0 }
 0x16b   : > { %1184 = vperm.xlu0 %9412, %v570_v35  }
 0x16c   : > { %1881 = vperm.xlu1 %9350, %v14195_v28   ;;  %v3070_v21 = vpack.c.bf16 %v2828_v59, %v2826_v18  ;;  %v3069_v7 = vpack.c.bf16 %v2827_v12, %v2825_v57  ;;  %v2573_v57 = vadd.f32 %v10029_v62, %v2306_v47  ;;  %v2574_v59 = vadd.f32 %v10032_v4, %v2307_v19 }
 0x16d   : > { %v1838_v63 = vpop.permute.xlu1 %1837 }
 0x16e   : > { %v2194_v17 = vmul.f32 %v10006_v33, %v1838_v63  ;;  %v2195_v60 = vmul.f32 %v10009_v34, %v1838_v63  ;;  %3481 = vmatprep.mubr.bf16.mxu0 %v3070_v21 }
 0x16f   : > { %819 = vperm.xlu0 %9412, %v9639_v31   ;;  %3482 = vmatmul.mubr.bf16.gmra.mrb[24].mxu0 %v3069_v7 }
 0x170   : > { %9351 = vset.pattern.permute.xlu1 %v14167_v15  ;;  %v2450_v61 = vadd.f32 %v2194_v17, %v1408_v45  ;;  %v2451_v42 = vadd.f32 %v2195_v60, %v1409_v54 }
 0x171   : > { %704 = vperm.xlu1 %9351, %v474_v16   ;;  %v1842_v26 = vpop.permute.xlu1 %1841 }
 0x172   : > { %v2196_v30 = vmul.f32 %v10006_v33, %v1842_v26  ;;  %v2197_v13 = vmul.f32 %v10009_v34, %v1842_v26  ;;  %v2718_v2 = vadd.f32 %v10032_v4, %v2451_v42  ;;  %v2717_v9 = vadd.f32 %v10029_v62, %v2450_v61  ;;  %v576_v26 = vld [vmem:[%s9775_s23 + $0x3f8] sm:$0xff] }
 0x173   : > { %1194 = vperm.xlu0 %9412, %v572_v5   ;;  %v2829_v42 = vmax.f32 %v2573_v57, 0.0 }
 0x174   : > { %v2452_v53 = vadd.f32 %v2196_v30, %v1410_v43  ;;  %v2453_v46 = vadd.f32 %v2197_v13, %v1411_v20  ;;  %v2974_v11 = vmax.f32 %v2718_v2, 0.0  ;;  %v2973_v0 = vmax.f32 %v2717_v9, 0.0  ;;  %v9641_v20 = vld [vmem:[%s9775_s23 + $0x1a0] sm:$0xff] }
 0x175   : > { %9352 = vset.pattern.permute.xlu1 %v14170_v14  ;;  %v2830_v13 = vmax.f32 %v2574_v59, 0.0 }
 0x176   : > { %1593 = vperm.xlu1 %9352, %v474_v16   ;;  %v655_v23 = vpop.permute.xlu1 %654  ;;  %v2720_v38 = vadd.f32 %v10032_v4, %v2453_v46  ;;  %v2719_v6 = vadd.f32 %v10029_v62, %v2452_v53 }
 0x177   : > { %829 = vperm.xlu0 %9412, %v9640_v55   ;;  %v1266_v12 = vmul.f32 %v10012_v36, %v655_v23  ;;  %v1267_v7 = vmul.f32 %v10015_v37, %v655_v23 }
 0x178   : > { %v3743_v10 = vpop.f32.mrb[0].mxu1  ;;  %v2976_v3 = vmax.f32 %v2720_v38, 0.0  ;;  %v2975_v50 = vmax.f32 %v2719_v6, 0.0  ;;  %v476_v6 = vld [vmem:[%s9775_s23 + $0xd8] sm:$0xff] }
 0x179   : > { %v3744_v39 = vadd.f32 %v3743_v10, %v10736_v48  ;;  %v3745_v35 = vpop.f32.mrb[1].mxu1  ;;  %v1414_v10 = vmul.f32 %v10012_v36, %v1025_v29 }
 0x17a   : > { %9353 = vset.pattern.permute.xlu1 %v14167_v15  ;;  %v3746_v49 = vadd.f32 %v3745_v35, %v10739_v1  ;;  %v3747_v51 = vpop.f32.mrb[2].mxu1  ;;  %v3144_v18 = vpack.c.bf16 %v2976_v3, %v2974_v11  ;;  %v3143_v40 = vpack.c.bf16 %v2975_v50, %v2973_v0  ;;  %v1415_v0 = vmul.f32 %v10015_v37, %v1025_v29  ;;  %v660_v50 = vpop.permute.xlu0 %659  ;;  %v549_v29 = vld [vmem:[%s9775_s23 + $0x320] sm:$0xff] }
 0x17b   : > { %1069 = vperm.xlu1 %9353, %v547_v8   ;;  %1204 = vperm.xlu0 %9412, %v574_v56   ;;  %v3748_v28 = vadd.f32 %v3747_v51, %v10736_v48  ;;  %v3749_v22 = vpop.f32.mrb[3].mxu1  ;;  %v1554_v21 = vpop.permute.xlu1 %1553  ;;  %v4190_v54 = vmax.f32 %v3744_v39, 0.0  ;;  %v9643_v56 = vld [vmem:[%s9775_s23 + $0x1b0] sm:$0xff]  ;;  %v1268_v59 = vmul.f32 %v10012_v36, %v660_v50 }
 0x17c   : > { %v3750_v45 = vadd.f32 %v3749_v22, %v10739_v1  ;;  %v2052_v63 = vmul.f32 %v10006_v33, %v1554_v21  ;;  %v2053_v16 = vmul.f32 %v10009_v34, %v1554_v21  ;;  %3851 = vmatprep.mubr.bf16.mxu1 %v3144_v18  ;;  %v4191_v60 = vmax.f32 %v3746_v49, 0.0  ;;  %v14201_v18 = vld [vmem:[#allocation7_spill] sm:$0xff] }
 0x17d   : > { %v4192_v17 = vmax.f32 %v3748_v28, 0.0  ;;  %3852 = vmatmul.mubr.bf16.gmra.mrb[44].mxu1 %v3143_v40  ;;  %v2054_v40 = vmul.f32 %v10006_v33, %v14201_v18  ;;  %v2055_v57 = vmul.f32 %v10009_v34, %v14201_v18 }
 0x17e   : > { %v4193_v31 = vmax.f32 %v3750_v45, 0.0  ;;  %v2308_v5 = vadd.f32 %v2052_v63, %v1266_v12  ;;  %v2309_v43 = vadd.f32 %v2053_v16, %v1267_v7  ;;  %v1269_v63 = vmul.f32 %v10015_v37, %v660_v50 }
 0x17f   : > { %9354 = vset.pattern.permute.xlu1 %v14170_v14  ;;  %839 = vperm.xlu0 %9412, %v9641_v20   ;;  %v10759_v61 = vpack.c.bf16 %v4192_v17, %v4190_v54 }
 0x180   : > { %1885 = vperm.xlu1 %9354, %v547_v8   ;;  %v1020_v52 = vpop.permute.xlu1 %1019  ;;  %v2576_v30 = vadd.f32 %v10032_v4, %v2309_v43  ;;  %v2575_v44 = vadd.f32 %v10029_v62, %v2308_v5  ;;  %v10764_v41 = vpack.c.bf16 %v4193_v31, %v4191_v60 }
 0x181   : > { %14199 = vst [vmem:[#allocation28_spill] sm:$0xff] %v10759_v61  ;;  %v1412_v2 = vmul.f32 %v10012_v36, %v1020_v52  ;;  %v1413_v9 = vmul.f32 %v10015_v37, %v1020_v52  ;;  %v506_v52 = vld [vmem:[%s9775_s23 + $0x1c8] sm:$0xff] }
 0x182   : > { %14200 = vst [vmem:[#allocation30_spill] sm:$0xff] %v10764_v41  ;;  %v2832_v24 = vmax.f32 %v2576_v30, 0.0  ;;  %v2831_v32 = vmax.f32 %v2575_v44, 0.0  ;;  %v2311_v44 = vadd.f32 %v2055_v57, %v1269_v63 }
 0x183   : > { %1214 = vperm.xlu0 %9412, %v576_v26  }
 0x184   : > { %1889 = vperm.xlu1 %9354, %v9642_v25   ;;  %v3072_v53 = vpack.c.bf16 %v2832_v24, %v2830_v13  ;;  %v3071_v46 = vpack.c.bf16 %v2831_v32, %v2829_v42  ;;  %v2310_v13 = vadd.f32 %v2054_v40, %v1268_v59 }
 0x185   : > { %v3753_v23 = vpop.f32.mrb[4].mxu1  ;;  %v1846_v38 = vpop.permute.xlu1 %1845 }
 0x186   : > { %v3754_v55 = vadd.f32 %v3753_v23, %v10736_v48  ;;  %v2198_v47 = vmul.f32 %v10006_v33, %v1846_v38  ;;  %v2199_v19 = vmul.f32 %v10009_v34, %v1846_v38  ;;  %v3755_v8 = vpop.f32.mrb[5].mxu1  ;;  %3491 = vmatprep.mubr.bf16.mxu0 %v3072_v53 }
 0x187   : > { %849 = vperm.xlu0 %9412, %v9643_v56   ;;  %v3756_v11 = vadd.f32 %v3755_v8, %v10739_v1  ;;  %v3757_v3 = vpop.f32.mrb[6].mxu1  ;;  %3492 = vmatmul.mubr.bf16.gmra.mrb[28].mxu0 %v3071_v46 }
 0x188   : > { %9355 = vset.pattern.permute.xlu1 %v14167_v15  ;;  %v2454_v39 = vadd.f32 %v2198_v47, %v1412_v2  ;;  %v2455_v35 = vadd.f32 %v2199_v19, %v1413_v9  ;;  %v3758_v49 = vadd.f32 %v3757_v3, %v10736_v48  ;;  %v3759_v51 = vpop.f32.mrb[7].mxu1  ;;  %v4194_v22 = vmax.f32 %v3754_v55, 0.0 }
 0x189   : > { %714 = vperm.xlu1 %9355, %v476_v6   ;;  %v3760_v12 = vadd.f32 %v3759_v51, %v10739_v1  ;;  %v1850_v28 = vpop.permute.xlu1 %1849  ;;  %v4195_v16 = vmax.f32 %v3756_v11, 0.0  ;;  %v2577_v47 = vadd.f32 %v10029_v62, %v2310_v13  ;;  %v2578_v19 = vadd.f32 %v10032_v4, %v2311_v44 }
 0x18a   : > { %v4196_v21 = vmax.f32 %v3758_v49, 0.0  ;;  %v2200_v7 = vmul.f32 %v10006_v33, %v1850_v28  ;;  %v2201_v45 = vmul.f32 %v10009_v34, %v1850_v28  ;;  %v2722_v17 = vadd.f32 %v10032_v4, %v2455_v35 }
 0x18b   : > { %v4197_v54 = vmax.f32 %v3760_v12, 0.0  ;;  %v2721_v43 = vadd.f32 %v10029_v62, %v2454_v39  ;;  %864 = vperm.xlu0 %9412, %v506_v52   ;;  %v2834_v12 = vmax.f32 %v2578_v19, 0.0 }
 0x18c   : > { %v10789_v60 = vpack.c.bf16 %v4196_v21, %v4194_v22  ;;  %v2456_v31 = vadd.f32 %v2200_v7, %v1414_v10  ;;  %v2457_v5 = vadd.f32 %v2201_v45, %v1415_v0  ;;  %v2978_v32 = vmax.f32 %v2722_v17, 0.0  ;;  %v1035_v17 = vpop.permute.xlu0 %1034 }
 0x18d   : > { %9356 = vset.pattern.permute.xlu1 %v14170_v14  ;;  %v10796_v30 = vpack.c.bf16 %v4197_v54, %v4195_v16  ;;  %v2977_v53 = vmax.f32 %v2721_v43, 0.0  ;;  %v2833_v7 = vmax.f32 %v2577_v47, 0.0  ;;  %v9644_v54 = vld [vmem:[%s9775_s23 + $0x328] sm:$0xff]  ;;  %v1418_v44 = vmul.f32 %v10012_v36, %v1035_v17 }
 0x18e   : > { %14202 = vst [vmem:[#allocation31_spill] sm:$0xff] %v10789_v60  ;;  %1601 = vperm.xlu1 %9356, %v476_v6   ;;  %v665_v20 = vpop.permute.xlu1 %664  ;;  %v2724_v42 = vadd.f32 %v10032_v4, %v2457_v5  ;;  %v2723_v26 = vadd.f32 %v10029_v62, %v2456_v31 }
 0x18f   : > { %14203 = vst [vmem:[#allocation32_spill] sm:$0xff] %v10796_v30  ;;  %v1270_v8 = vmul.f32 %v10012_v36, %v665_v20  ;;  %9417 = vset.pattern.permute.xlu0 %v14170_v14  ;;  %v1271_v3 = vmul.f32 %v10015_v37, %v665_v20  ;;  %v478_v20 = vld [vmem:[%s9775_s23 + $0xe8] sm:$0xff] }
 0x190   : > { %v3763_v24 = vpop.f32.mrb[8].mxu1  ;;  %v2980_v25 = vmax.f32 %v2724_v42, 0.0  ;;  %v2979_v46 = vmax.f32 %v2723_v26, 0.0 }
 0x191   : > { %v3764_v2 = vadd.f32 %v3763_v24, %v10736_v48  ;;  %v3765_v9 = vpop.f32.mrb[9].mxu1 }
 0x192   : > { %9357 = vset.pattern.permute.xlu1 %v14167_v15  ;;  %v3766_v23 = vadd.f32 %v3765_v9, %v10739_v1  ;;  %v3767_v38 = vpop.f32.mrb[10].mxu1  ;;  %v3146_v6 = vpack.c.bf16 %v2980_v25, %v2978_v32  ;;  %v3145_v55 = vpack.c.bf16 %v2979_v46, %v2977_v53  ;;  %v670_v53 = vpop.permute.xlu0 %669  ;;  %v14206_v9 = vld [vmem:[#allocation8_spill] sm:$0xff] }
 0x193   : > { %1079 = vperm.xlu1 %9357, %v549_v29   ;;  %v3768_v56 = vadd.f32 %v3767_v38, %v10736_v48  ;;  %v3769_v10 = vpop.f32.mrb[11].mxu1  ;;  %v1562_v11 = vpop.permute.xlu1 %1561  ;;  %v4198_v35 = vmax.f32 %v3764_v2, 0.0  ;;  %v2059_v38 = vmul.f32 %v10009_v34, %v14206_v9 }
 0x194   : > { %v3770_v0 = vadd.f32 %v3769_v10, %v10739_v1  ;;  %v2056_v50 = vmul.f32 %v10006_v33, %v1562_v11  ;;  %v2057_v39 = vmul.f32 %v10009_v34, %v1562_v11  ;;  %3861 = vmatprep.mubr.bf16.mxu1 %v3146_v6  ;;  %v4199_v51 = vmax.f32 %v3766_v23, 0.0 }
 0x195   : > { %v4200_v49 = vmax.f32 %v3768_v56, 0.0  ;;  %3862 = vmatmul.mubr.bf16.gmra.mrb[48].mxu1 %v3145_v55  ;;  %v2058_v23 = vmul.f32 %v10006_v33, %v14206_v9  ;;  %v1272_v6 = vmul.f32 %v10012_v36, %v670_v53  ;;  %v1273_v55 = vmul.f32 %v10015_v37, %v670_v53 }
 0x196   : > { %v4201_v18 = vmax.f32 %v3770_v0, 0.0  ;;  %v2312_v40 = vadd.f32 %v2056_v50, %v1270_v8  ;;  %v2313_v57 = vadd.f32 %v2057_v39, %v1271_v3  ;;  %v551_v39 = vld [vmem:[%s9775_s23 + $0x330] sm:$0xff] }
 0x197   : > { %9358 = vset.pattern.permute.xlu1 %v14170_v14  ;;  %v10812_v59 = vpack.c.bf16 %v4200_v49, %v4198_v35  ;;  %v2314_v0 = vadd.f32 %v2058_v23, %v1272_v6  ;;  %v2315_v50 = vadd.f32 %v2059_v38, %v1273_v55 }
 0x198   : > { %1893 = vperm.xlu1 %9358, %v549_v29   ;;  %v1030_v28 = vpop.permute.xlu1 %1029  ;;  %v2580_v22 = vadd.f32 %v10032_v4, %v2313_v57  ;;  %v2579_v21 = vadd.f32 %v10029_v62, %v2312_v40  ;;  %v10816_v45 = vpack.c.bf16 %v4201_v18, %v4199_v51  ;;  %v1419_v29 = vmul.f32 %v10015_v37, %v1035_v17 }
 0x199   : > { %14204 = vst [vmem:[#allocation33_spill] sm:$0xff] %v10812_v59  ;;  %v1416_v42 = vmul.f32 %v10012_v36, %v1030_v28  ;;  %v1417_v26 = vmul.f32 %v10015_v37, %v1030_v28  ;;  %v2582_v28 = vadd.f32 %v10032_v4, %v2315_v50 }
 0x19a   : > { %14205 = vst [vmem:[#allocation18_spill] sm:$0xff] %v10816_v45  ;;  %v2836_v63 = vmax.f32 %v2580_v22, 0.0  ;;  %v2835_v16 = vmax.f32 %v2579_v21, 0.0 }
 0x19c   : > { %1897 = vperm.xlu1 %9358, %v9644_v54   ;;  %v3074_v31 = vpack.c.bf16 %v2836_v63, %v2834_v12  ;;  %v3073_v5 = vpack.c.bf16 %v2835_v16, %v2833_v7  ;;  %v2581_v12 = vadd.f32 %v10029_v62, %v2314_v0 }
 0x19d   : > { %v1854_v43 = vpop.permute.xlu1 %1853 }
 0x19e   : > { %v2202_v52 = vmul.f32 %v10006_v33, %v1854_v43  ;;  %v2203_v13 = vmul.f32 %v10009_v34, %v1854_v43  ;;  %3501 = vmatprep.mubr.bf16.mxu0 %v3074_v31  ;;  %v2838_v43 = vmax.f32 %v2582_v28, 0.0 }
 0x19f   : > { %3502 = vmatmul.mubr.bf16.gmra.mrb[32].mxu0 %v3073_v5 }
 0x1a0   : > { %9359 = vset.pattern.permute.xlu1 %v14167_v15  ;;  %v2458_v24 = vadd.f32 %v2202_v52, %v1416_v42  ;;  %v2459_v32 = vadd.f32 %v2203_v13, %v1417_v26  ;;  %v2837_v42 = vmax.f32 %v2581_v12, 0.0  ;;  %v9645_v13 = vld [vmem:[%s9775_s23 + $0x338] sm:$0xff] }
 0x1a1   : > { %724 = vperm.xlu1 %9359, %v478_v20   ;;  %v1858_v25 = vpop.permute.xlu1 %1857 }
 0x1a2   : > { %v2204_v46 = vmul.f32 %v10006_v33, %v1858_v25  ;;  %v2205_v2 = vmul.f32 %v10009_v34, %v1858_v25  ;;  %v2726_v8 = vadd.f32 %v10032_v4, %v2459_v32  ;;  %v2725_v56 = vadd.f32 %v10029_v62, %v2458_v24  ;;  %v480_v25 = vld [vmem:[%s9775_s23 + $0xf8] sm:$0xff] }
 0x1a4   : > { %v2460_v47 = vadd.f32 %v2204_v46, %v1418_v44  ;;  %v2461_v19 = vadd.f32 %v2205_v2, %v1419_v29  ;;  %v2982_v35 = vmax.f32 %v2726_v8, 0.0  ;;  %v2981_v51 = vmax.f32 %v2725_v56, 0.0  ;;  %v1045_v44 = vpop.permute.xlu0 %1044 }
 0x1a5   : > { %9360 = vset.pattern.permute.xlu1 %v14170_v14  ;;  %v1422_v23 = vmul.f32 %v10012_v36, %v1045_v44  ;;  %v1423_v38 = vmul.f32 %v10015_v37, %v1045_v44 }
 0x1a6   : > { %1609 = vperm.xlu1 %9360, %v478_v20   ;;  %v675_v10 = vpop.permute.xlu1 %674  ;;  %v2728_v11 = vadd.f32 %v10032_v4, %v2461_v19  ;;  %v2727_v3 = vadd.f32 %v10029_v62, %v2460_v47 }
 0x1a7   : > { %v1274_v21 = vmul.f32 %v10012_v36, %v675_v10  ;;  %v1275_v7 = vmul.f32 %v10015_v37, %v675_v10  ;;  %v14207_v10 = vld [vmem:[#allocation9_spill] sm:$0xff] }
 0x1a8   : > { %v2984_v49 = vmax.f32 %v2728_v11, 0.0  ;;  %v2983_v18 = vmax.f32 %v2727_v3, 0.0  ;;  %v680_v19 = vpop.permute.xlu0 %679  ;;  %v2062_v11 = vmul.f32 %v10006_v33, %v14207_v10  ;;  %v2063_v3 = vmul.f32 %v10009_v34, %v14207_v10 }
 0x1a9   : > { %v1276_v0 = vmul.f32 %v10012_v36, %v680_v19  ;;  %v1277_v50 = vmul.f32 %v10015_v37, %v680_v19 }
 0x1aa   : > { %9361 = vset.pattern.permute.xlu1 %v14167_v15  ;;  %v3148_v40 = vpack.c.bf16 %v2984_v49, %v2982_v35  ;;  %v3147_v57 = vpack.c.bf16 %v2983_v18, %v2981_v51 }
 0x1ab   : > { %1089 = vperm.xlu1 %9361, %v551_v39   ;;  %v1570_v22 = vpop.permute.xlu1 %1569  ;;  %v2318_v12 = vadd.f32 %v2062_v11, %v1276_v0  ;;  %v2319_v28 = vadd.f32 %v2063_v3, %v1277_v50 }
 0x1ac   : > { %v2060_v63 = vmul.f32 %v10006_v33, %v1570_v22  ;;  %v2061_v16 = vmul.f32 %v10009_v34, %v1570_v22  ;;  %3871 = vmatprep.mubr.bf16.mxu1 %v3148_v40  ;;  %v553_v22 = vld [vmem:[%s9775_s23 + $0x340] sm:$0xff] }
 0x1ad   : > { %3872 = vmatmul.mubr.bf16.gmra.mrb[52].mxu1 %v3147_v57 }
 0x1ae   : > { %v2316_v54 = vadd.f32 %v2060_v63, %v1274_v21  ;;  %v2317_v17 = vadd.f32 %v2061_v16, %v1275_v7 }
 0x1af   : > { %9362 = vset.pattern.permute.xlu1 %v14170_v14 }
 0x1b0   : > { %1901 = vperm.xlu1 %9362, %v551_v39   ;;  %v1040_v31 = vpop.permute.xlu1 %1039  ;;  %v2584_v5 = vadd.f32 %v10032_v4, %v2317_v17  ;;  %v2583_v20 = vadd.f32 %v10029_v62, %v2316_v54 }
 0x1b1   : > { %v1420_v53 = vmul.f32 %v10012_v36, %v1040_v31  ;;  %v1421_v46 = vmul.f32 %v10015_v37, %v1040_v31  ;;  %v2585_v31 = vadd.f32 %v10029_v62, %v2318_v12 }
 0x1b2   : > { %v2840_v26 = vmax.f32 %v2584_v5, 0.0  ;;  %v2839_v52 = vmax.f32 %v2583_v20, 0.0  ;;  %v2586_v5 = vadd.f32 %v10032_v4, %v2319_v28 }
 0x1b4   : > { %1905 = vperm.xlu1 %9362, %v9645_v13   ;;  %v3076_v29 = vpack.c.bf16 %v2840_v26, %v2838_v43  ;;  %v3075_v24 = vpack.c.bf16 %v2839_v52, %v2837_v42 }
 0x1b5   : > { %v1862_v32 = vpop.permute.xlu1 %1861 }
 0x1b6   : > { %v2206_v2 = vmul.f32 %v10006_v33, %v1862_v32  ;;  %v2207_v9 = vmul.f32 %v10009_v34, %v1862_v32  ;;  %3511 = vmatprep.mubr.bf16.mxu0 %v3076_v29  ;;  %v2842_v32 = vmax.f32 %v2586_v5, 0.0 }
 0x1b7   : > { %3512 = vmatmul.mubr.bf16.gmra.mrb[36].mxu0 %v3075_v24 }
 0x1b8   : > { %9363 = vset.pattern.permute.xlu1 %v14167_v15  ;;  %v2462_v6 = vadd.f32 %v2206_v2, %v1420_v53  ;;  %v2463_v55 = vadd.f32 %v2207_v9, %v1421_v46  ;;  %v2841_v53 = vmax.f32 %v2585_v31, 0.0  ;;  %v9646_v46 = vld [vmem:[%s9775_s23 + $0x348] sm:$0xff] }
 0x1b9   : > { %734 = vperm.xlu1 %9363, %v480_v25   ;;  %v1866_v47 = vpop.permute.xlu1 %1865 }
 0x1ba   : > { %v2208_v8 = vmul.f32 %v10006_v33, %v1866_v47  ;;  %v2209_v56 = vmul.f32 %v10009_v34, %v1866_v47  ;;  %v2730_v49 = vadd.f32 %v10032_v4, %v2463_v55  ;;  %v2729_v51 = vadd.f32 %v10029_v62, %v2462_v6  ;;  %v482_v6 = vld [vmem:[%s9775_s23 + $0x108] sm:$0xff] }
 0x1bc   : > { %v2464_v39 = vadd.f32 %v2208_v8, %v1422_v23  ;;  %v2465_v35 = vadd.f32 %v2209_v56, %v1423_v38  ;;  %v2986_v21 = vmax.f32 %v2730_v49, 0.0  ;;  %v2985_v63 = vmax.f32 %v2729_v51, 0.0  ;;  %v1055_v23 = vpop.permute.xlu0 %1054 }
 0x1bd   : > { %9364 = vset.pattern.permute.xlu1 %v14170_v14  ;;  %v1426_v11 = vmul.f32 %v10012_v36, %v1055_v23  ;;  %v1427_v3 = vmul.f32 %v10015_v37, %v1055_v23 }
 0x1be   : > { %1617 = vperm.xlu1 %9364, %v480_v25   ;;  %v2732_v40 = vadd.f32 %v10032_v4, %v2465_v35  ;;  %v2731_v57 = vadd.f32 %v10029_v62, %v2464_v39 }
 0x1bf   : > { %v685_v18 = vpop.permute.xlu1 %684 }
 0x1c0   : > { %v2988_v7 = vmax.f32 %v2732_v40, 0.0  ;;  %v2987_v16 = vmax.f32 %v2731_v57, 0.0  ;;  %v1278_v20 = vmul.f32 %v10012_v36, %v685_v18  ;;  %v1279_v42 = vmul.f32 %v10015_v37, %v685_v18  ;;  %v690_v35 = vpop.permute.xlu0 %689  ;;  %v14208_v18 = vld [vmem:[#allocation10_spill] sm:$0xff] }
 0x1c1   : > { %v2066_v40 = vmul.f32 %v10006_v33, %v14208_v18  ;;  %v2067_v57 = vmul.f32 %v10009_v34, %v14208_v18  ;;  %v1280_v12 = vmul.f32 %v10012_v36, %v690_v35  ;;  %v1281_v28 = vmul.f32 %v10015_v37, %v690_v35 }
 0x1c2   : > { %9365 = vset.pattern.permute.xlu1 %v14167_v15  ;;  %v3150_v54 = vpack.c.bf16 %v2988_v7, %v2986_v21  ;;  %v3149_v17 = vpack.c.bf16 %v2987_v16, %v2985_v63 }
 0x1c3   : > { %1099 = vperm.xlu1 %9365, %v553_v22   ;;  %v2322_v5 = vadd.f32 %v2066_v40, %v1280_v12 }
 0x1c4   : > { %v1578_v43 = vpop.permute.xlu1 %1577  ;;  %3881 = vmatprep.mubr.bf16.mxu1 %v3150_v54  ;;  %v555_v54 = vld [vmem:[%s9775_s23 + $0x350] sm:$0xff] }
 0x1c5   : > { %v2064_v26 = vmul.f32 %v10006_v33, %v1578_v43  ;;  %v2065_v52 = vmul.f32 %v10009_v34, %v1578_v43  ;;  %3882 = vmatmul.mubr.bf16.gmra.mrb[56].mxu1 %v3149_v17  ;;  %v2323_v43 = vadd.f32 %v2067_v57, %v1281_v28 }
 0x1c7   : > { %9366 = vset.pattern.permute.xlu1 %v14170_v14  ;;  %v2320_v13 = vadd.f32 %v2064_v26, %v1278_v20  ;;  %v2321_v44 = vadd.f32 %v2065_v52, %v1279_v42 }
 0x1c8   : > { %1909 = vperm.xlu1 %9366, %v553_v22  }
 0x1c9   : > { %v1050_v29 = vpop.permute.xlu1 %1049  ;;  %v2588_v24 = vadd.f32 %v10032_v4, %v2321_v44  ;;  %v2587_v25 = vadd.f32 %v10029_v62, %v2320_v13 }
 0x1ca   : > { %v1424_v47 = vmul.f32 %v10012_v36, %v1050_v29  ;;  %v1425_v8 = vmul.f32 %v10015_v37, %v1050_v29  ;;  %v2589_v29 = vadd.f32 %v10029_v62, %v2322_v5 }
 0x1cb   : > { %v2844_v2 = vmax.f32 %v2588_v24, 0.0  ;;  %v2843_v9 = vmax.f32 %v2587_v25, 0.0  ;;  %v2590_v24 = vadd.f32 %v10032_v4, %v2323_v43  ;;  %v1065_v25 = vpop.permute.xlu0 %1064 }
 0x1cc   : > { %1913 = vperm.xlu1 %9366, %v9646_v46   ;;  %v1430_v57 = vmul.f32 %v10012_v36, %v1065_v25  ;;  %v1431_v12 = vmul.f32 %v10015_v37, %v1065_v25 }
 0x1cd   : > { %v3078_v38 = vpack.c.bf16 %v2844_v2, %v2842_v32  ;;  %v3077_v55 = vpack.c.bf16 %v2843_v9, %v2841_v53 }
 0x1cf   : > { %v1870_v19 = vpop.permute.xlu1 %1869  ;;  %3521 = vmatprep.mubr.bf16.mxu0 %v3078_v38 }
 0x1d0   : > { %v2210_v56 = vmul.f32 %v10006_v33, %v1870_v19  ;;  %v2211_v10 = vmul.f32 %v10009_v34, %v1870_v19  ;;  %9367 = vset.pattern.permute.xlu1 %v14167_v15  ;;  %3522 = vmatmul.mubr.bf16.gmra.mrb[40].mxu0 %v3077_v55 }
 0x1d1   : > { %744 = vperm.xlu1 %9367, %v482_v6  }
 0x1d2   : > { %v2466_v0 = vadd.f32 %v2210_v56, %v1424_v47  ;;  %v2467_v50 = vadd.f32 %v2211_v10, %v1425_v8  ;;  %v2846_v47 = vmax.f32 %v2590_v24, 0.0  ;;  %v2845_v8 = vmax.f32 %v2589_v29, 0.0  ;;  %v700_v56 = vpop.permute.xlu0 %699  ;;  %v9647_v10 = vld [vmem:[%s9775_s23 + $0x358] sm:$0xff]  ;;  %v557_v29 = vld [vmem:[%s9775_s23 + $0x360] sm:$0xff] }
 0x1d3   : > { %v1874_v39 = vpop.permute.xlu1 %1873  ;;  %v1284_v5 = vmul.f32 %v10012_v36, %v700_v56  ;;  %v1285_v43 = vmul.f32 %v10015_v37, %v700_v56 }
 0x1d4   : > { %v2212_v49 = vmul.f32 %v10006_v33, %v1874_v39  ;;  %v2213_v51 = vmul.f32 %v10009_v34, %v1874_v39  ;;  %v2734_v7 = vadd.f32 %v10032_v4, %v2467_v50  ;;  %v2733_v63 = vadd.f32 %v10029_v62, %v2466_v0  ;;  %v484_v50 = vld [vmem:[%s9775_s23 + $0x118] sm:$0xff] }
 0x1d5   : > { %9368 = vset.pattern.permute.xlu1 %v14170_v14 }
 0x1d6   : > { %v2468_v22 = vadd.f32 %v2212_v49, %v1426_v11  ;;  %v2469_v21 = vadd.f32 %v2213_v51, %v1427_v3  ;;  %1625 = vperm.xlu1 %9368, %v482_v6   ;;  %v2990_v20 = vmax.f32 %v2734_v7, 0.0  ;;  %v2989_v26 = vmax.f32 %v2733_v63, 0.0  ;;  %v10926_v28 = vpop.permute.xlu0 %1074 }
 0x1d8   : > { %v695_v16 = vpop.permute.xlu1 %694  ;;  %v2736_v17 = vadd.f32 %v10032_v4, %v2469_v21  ;;  %v2735_v31 = vadd.f32 %v10029_v62, %v2468_v22 }
 0x1d9   : > { %v1282_v53 = vmul.f32 %v10012_v36, %v695_v16  ;;  %v1283_v46 = vmul.f32 %v10015_v37, %v695_v16 }
 0x1da   : > { %9369 = vset.pattern.permute.xlu1 %v14167_v15  ;;  %v2992_v42 = vmax.f32 %v2736_v17, 0.0  ;;  %v2991_v52 = vmax.f32 %v2735_v31, 0.0 }
 0x1db   : > { %1109 = vperm.xlu1 %9369, %v555_v54  }
 0x1dc   : > { %v3152_v13 = vpack.c.bf16 %v2992_v42, %v2990_v20  ;;  %v3151_v44 = vpack.c.bf16 %v2991_v52, %v2989_v26 }
 0x1dd   : > { %v1586_v32 = vpop.permute.xlu1 %1585 }
 0x1de   : > { %v2068_v2 = vmul.f32 %v10006_v33, %v1586_v32  ;;  %v2069_v9 = vmul.f32 %v10009_v34, %v1586_v32  ;;  %3891 = vmatprep.mubr.bf16.mxu1 %v3152_v13  ;;  %v710_v13 = vpop.permute.xlu0 %709 }
 0x1df   : > { %9370 = vset.pattern.permute.xlu1 %v14170_v14  ;;  %3892 = vmatmul.mubr.bf16.gmra.mrb[60].mxu1 %v3151_v44 }
 0x1e0   : > { %v2324_v23 = vadd.f32 %v2068_v2, %v1282_v53  ;;  %v2325_v38 = vadd.f32 %v2069_v9, %v1283_v46  ;;  %1917 = vperm.xlu1 %9370, %v555_v54   ;;  %v14209_v54 = vld [vmem:[#allocation11_spill] sm:$0xff] }
 0x1e1   : > { %v2070_v17 = vmul.f32 %v10006_v33, %v14209_v54  ;;  %v2071_v31 = vmul.f32 %v10009_v34, %v14209_v54 }
 0x1e2   : > { %v1060_v6 = vpop.permute.xlu1 %1059  ;;  %v2592_v55 = vadd.f32 %v10032_v4, %v2325_v38  ;;  %v2591_v19 = vadd.f32 %v10029_v62, %v2324_v23 }
 0x1e3   : > { %v1428_v35 = vmul.f32 %v10012_v36, %v1060_v6  ;;  %v1429_v51 = vmul.f32 %v10015_v37, %v1060_v6  ;;  %v2326_v25 = vadd.f32 %v2070_v17, %v1284_v5  ;;  %v2327_v53 = vadd.f32 %v2071_v31, %v1285_v43  ;;  %v14211_v17 = vld [vmem:[#allocation13_spill] sm:$0xff] }
 0x1e4   : > { %1921 = vperm.xlu1 %9370, %v9647_v10   ;;  %v2848_v11 = vmax.f32 %v2592_v55, 0.0  ;;  %v2847_v3 = vmax.f32 %v2591_v19, 0.0  ;;  %v2079_v31 = vmul.f32 %v10009_v34, %v14211_v17  ;;  %v2078_v43 = vmul.f32 %v10006_v33, %v14211_v17 }
 0x1e5   : > { %v2593_v55 = vadd.f32 %v10029_v62, %v2326_v25  ;;  %v9473_v25 = vld [vmem:[%s14104_s5] ss:$8 sps:$4 sm:$0xff]  }
 0x1e6   : > { %v3080_v0 = vpack.c.bf16 %v2848_v11, %v2846_v47  ;;  %v3079_v39 = vpack.c.bf16 %v2847_v3, %v2845_v8  ;;  %v2594_v47 = vadd.f32 %v10032_v4, %v2327_v53  ;;  %v10945_v8 = vpop.permute.xlu0 %1084 }
 0x1e7   : > { %v1878_v49 = vpop.permute.xlu1 %1877  ;;  %v11013_v17 = vmul.f32 %v10015_v37, %v10945_v8 }
 0x1e8   : > { %v2214_v18 = vmul.f32 %v10006_v33, %v1878_v49  ;;  %v2215_v40 = vmul.f32 %v10009_v34, %v1878_v49  ;;  %9371 = vset.pattern.permute.xlu1 %v14167_v15  ;;  %3531 = vmatprep.mubr.bf16.mxu0 %v3080_v0  ;;  %v2850_v49 = vmax.f32 %v2594_v47, 0.0  ;;  %v1435_v47 = vmul.f32 %v10015_v37, %v10926_v28 }
 0x1e9   : > { %754 = vperm.xlu1 %9371, %v484_v50   ;;  %3532 = vmatmul.mubr.bf16.gmra.mrb[44].mxu0 %v3079_v39 }
 0x1ea   : > { %v2470_v22 = vadd.f32 %v2214_v18, %v1428_v35  ;;  %v2471_v21 = vadd.f32 %v2215_v40, %v1429_v51  ;;  %v2849_v18 = vmax.f32 %v2593_v55, 0.0  ;;  %v14210_v40 = vld [vmem:[#allocation12_spill] sm:$0xff]  ;;  %v1434_v55 = vmul.f32 %v10012_v36, %v10926_v28 }
 0x1eb   : > { %v1882_v7 = vpop.permute.xlu1 %1881 }
 0x1ec   : > { %v2216_v63 = vmul.f32 %v10006_v33, %v1882_v7  ;;  %v2217_v16 = vmul.f32 %v10009_v34, %v1882_v7  ;;  %v2738_v26 = vadd.f32 %v10032_v4, %v2471_v21  ;;  %v2737_v52 = vadd.f32 %v10029_v62, %v2470_v22  ;;  %v720_v7 = vpop.permute.xlu0 %719 }
 0x1ed   : > { %9372 = vset.pattern.permute.xlu1 %v14170_v14  ;;  %v1288_v22 = vmul.f32 %v10012_v36, %v710_v13  ;;  %v1289_v21 = vmul.f32 %v10015_v37, %v710_v13  ;;  %v1293_v5 = vmul.f32 %v10015_v37, %v720_v7 }
 0x1ee   : > { %v2472_v20 = vadd.f32 %v2216_v63, %v1430_v57  ;;  %v2473_v42 = vadd.f32 %v2217_v16, %v1431_v12  ;;  %1633 = vperm.xlu1 %9372, %v484_v50   ;;  %v2994_v46 = vmax.f32 %v2738_v26, 0.0  ;;  %v2993_v9 = vmax.f32 %v2737_v52, 0.0  ;;  %v9648_v63 = vld [vmem:[%s9775_s23 + $0x368] sm:$0xff] }
 0x1ef   : > { %v2074_v57 = vmul.f32 %v10006_v33, %v14210_v40  ;;  %v2075_v12 = vmul.f32 %v10009_v34, %v14210_v40  ;;  %v9475_v52 = vld [vmem:[%s14104_s5 + $0x4] ss:$8 sps:$4 sm:$0xff]  }
 0x1f0   : > { %v705_v44 = vpop.permute.xlu1 %704  ;;  %v2740_v24 = vadd.f32 %v10032_v4, %v2473_v42  ;;  %v2739_v32 = vadd.f32 %v10029_v62, %v2472_v20  ;;  %v486_v42 = vld [vmem:[%s9775_s23 + $0x128] sm:$0xff]  ;;  %4650 = vmatprep.subr.bf16.mxu1 %v9475_v52 }
 0x1f1   : > { %v1286_v56 = vmul.f32 %v10012_v36, %v705_v44  ;;  %v1287_v10 = vmul.f32 %v10015_v37, %v705_v44  ;;  %v2330_v13 = vadd.f32 %v2074_v57, %v1288_v22  ;;  %v2331_v44 = vadd.f32 %v2075_v12, %v1289_v21  ;;  %4651 = vmatpush1.bf16.msra.mxu1 %v9473_v25 }
 0x1f2   : > { %9373 = vset.pattern.permute.xlu1 %v14167_v15  ;;  %v2996_v2 = vmax.f32 %v2740_v24, 0.0  ;;  %v2995_v23 = vmax.f32 %v2739_v32, 0.0  ;;  %v11003_v57 = vmul.f32 %v10012_v36, %v10945_v8 }
 0x1f3   : > { %1119 = vperm.xlu1 %9373, %v557_v29  }
 0x1f4   : > { %v3154_v38 = vpack.c.bf16 %v2996_v2, %v2994_v46  ;;  %v3153_v6 = vpack.c.bf16 %v2995_v23, %v2993_v9  ;;  %v2335_v23 = vadd.f32 %v2079_v31, %v1293_v5  ;;  %v1095_v31 = vpop.permute.xlu0 %1094 }
 0x1f5   : > { %v1594_v19 = vpop.permute.xlu1 %1593 }
 0x1f6   : > { %v2072_v11 = vmul.f32 %v10006_v33, %v1594_v19  ;;  %v2073_v3 = vmul.f32 %v10009_v34, %v1594_v19  ;;  %3901 = vmatprep.mubr.bf16.mxu1 %v3154_v38  ;;  %v11006_v12 = vadd.f32 %v10032_v4, %v2335_v23 }
 0x1f7   : > { %9374 = vset.pattern.permute.xlu1 %v14170_v14  ;;  %3902 = vmatmul.mubr.bf16.gmra.mrb[64].mxu1 %v3153_v6 }
 0x1f8   : > { %v2328_v0 = vadd.f32 %v2072_v11, %v1286_v56  ;;  %v2329_v50 = vadd.f32 %v2073_v3, %v1287_v10  ;;  %1925 = vperm.xlu1 %9374, %v557_v29   ;;  %v1292_v29 = vmul.f32 %v10012_v36, %v720_v7  ;;  %v14212_v11 = vld [vmem:[#allocation14_spill] sm:$0xff] }
 0x1f9   : > { %v10986_v3 = vmul.f32 %v10006_v33, %v14212_v11  ;;  %v10997_v28 = vmul.f32 %v10009_v34, %v14212_v11 }
 0x1fa   : > { %v1070_v39 = vpop.permute.xlu1 %1069  ;;  %v2596_v35 = vadd.f32 %v10032_v4, %v2329_v50  ;;  %v2595_v51 = vadd.f32 %v10029_v62, %v2328_v0  ;;  %v10989_v0 = vadd.f32 %v10029_v62, %v2330_v13  ;;  %v10992_v50 = vadd.f32 %v10032_v4, %v2331_v44 }
 0x1fb   : > { %v1432_v24 = vmul.f32 %v10012_v36, %v1070_v39  ;;  %v1433_v53 = vmul.f32 %v10015_v37, %v1070_v39 }
 0x1fc   : > { %1929 = vperm.xlu1 %9374, %v9648_v63   ;;  %v2852_v16 = vmax.f32 %v2596_v35, 0.0  ;;  %v2851_v54 = vmax.f32 %v2595_v51, 0.0  ;;  %v2334_v51 = vadd.f32 %v2078_v43, %v1292_v29  ;;  %v559_v29 = vld [vmem:[%s9775_s23 + $0x370] sm:$0xff] }
 0x1fe   : > { %v3082_v20 = vpack.c.bf16 %v2852_v16, %v2850_v49  ;;  %v3081_v26 = vpack.c.bf16 %v2851_v54, %v2849_v18  ;;  %v11020_v52 = vadd.f32 %v10029_v62, %v2334_v51 }
 0x1ff   : > { %v1886_v32 = vpop.permute.xlu1 %1885  ;;  %v3773_v9 = vpop.f32.mrb[12].mxu1 }
 0x200   : > { %v2218_v46 = vmul.f32 %v10006_v33, %v1886_v32  ;;  %v2219_v2 = vmul.f32 %v10009_v34, %v1886_v32  ;;  %9375 = vset.pattern.permute.xlu1 %v14167_v15  ;;  %3541 = vmatprep.mubr.bf16.mxu0 %v3082_v20  ;;  %v3774_v38 = vadd.f32 %v3773_v9, %v10736_v48  ;;  %v3775_v6 = vpop.f32.mrb[13].mxu1  ;;  %v2854_v20 = vmax.f32 %v10992_v50, 0.0 }
 0x201   : > { %764 = vperm.xlu1 %9375, %v486_v42   ;;  %3542 = vmatmul.mubr.bf16.gmra.mrb[48].mxu0 %v3081_v26  ;;  %v3777_v10 = vpop.f32.mrb[14].mxu1  ;;  %v11027_v32 = vmul.f32 %v10012_v36, %v1095_v31  ;;  %v11030_v25 = vadd.f32 %v3775_v6, %v10739_v1 }
 0x202   : > { %v2474_v19 = vadd.f32 %v2218_v46, %v1432_v24  ;;  %v2475_v56 = vadd.f32 %v2219_v2, %v1433_v53  ;;  %v3778_v39 = vadd.f32 %v3777_v10, %v10736_v48  ;;  %v3779_v49 = vpop.f32.mrb[15].mxu1  ;;  %v4202_v22 = vmax.f32 %v3774_v38, 0.0 }
 0x203   : > { %v1890_v35 = vpop.permute.xlu1 %1889  ;;  %v11035_v23 = vadd.f32 %v3779_v49, %v10739_v1 }
 0x204   : > { %v2220_v18 = vmul.f32 %v10006_v33, %v1890_v35  ;;  %v2221_v40 = vmul.f32 %v10009_v34, %v1890_v35  ;;  %v4204_v21 = vmax.f32 %v3778_v39, 0.0  ;;  %v2742_v16 = vadd.f32 %v10032_v4, %v2475_v56 }
 0x205   : > { %9376 = vset.pattern.permute.xlu1 %v14170_v14  ;;  %v2741_v54 = vadd.f32 %v10029_v62, %v2474_v19 }
 0x206   : > { %v2476_v7 = vadd.f32 %v2220_v18, %v1434_v55  ;;  %v2477_v63 = vadd.f32 %v2221_v40, %v1435_v47  ;;  %1641 = vperm.xlu1 %9376, %v486_v42   ;;  %v11015_v5 = vpack.c.bf16 %v4204_v21, %v4202_v22  ;;  %v3423_v43 = vpop.f32.mrb[0].mxu0  ;;  %v2998_v47 = vmax.f32 %v2742_v16, 0.0 }
 0x207   : > { %v3424_v13 = vadd.f32 %v3423_v43, %v10736_v48  ;;  %v3783_v44 = vpop.f32.mrb[16].mxu1  ;;  %v3425_v46 = vpop.f32.mrb[1].mxu0  ;;  %v2997_v56 = vmax.f32 %v2741_v54, 0.0 }
 0x208   : > { %14213 = vst [vmem:[#allocation5_spill] sm:$0xff] %v11015_v5  ;;  %v715_v42 = vpop.permute.xlu1 %714  ;;  %v2744_v24 = vadd.f32 %v10032_v4, %v2477_v63  ;;  %v2743_v8 = vadd.f32 %v10029_v62, %v2476_v7  ;;  %v3784_v53 = vadd.f32 %v3783_v44, %v10736_v48  ;;  %v3785_v2 = vpop.f32.mrb[17].mxu1  ;;  %v11043_v22 = vadd.f32 %v3425_v46, %v10739_v1  ;;  %v561_v5 = vld [vmem:[%s9775_s23 + $0x380] sm:$0xff] }
 0x209   : > { %v3427_v38 = vpop.f32.mrb[2].mxu0  ;;  %v3787_v55 = vpop.f32.mrb[18].mxu1  ;;  %v1290_v10 = vmul.f32 %v10012_v36, %v715_v42  ;;  %v1291_v49 = vmul.f32 %v10015_v37, %v715_v42  ;;  %v4062_v18 = vmax.f32 %v3424_v13, 0.0  ;;  %v11046_v43 = vadd.f32 %v3785_v2, %v10739_v1 }
 0x20a   : > { %9377 = vset.pattern.permute.xlu1 %v14167_v15  ;;  %v3000_v19 = vmax.f32 %v2744_v24, 0.0  ;;  %v3428_v6 = vadd.f32 %v3427_v38, %v10736_v48  ;;  %v3788_v11 = vadd.f32 %v3787_v55, %v10736_v48  ;;  %v3429_v39 = vpop.f32.mrb[3].mxu0  ;;  %v3789_v35 = vpop.f32.mrb[19].mxu1  ;;  %v2999_v51 = vmax.f32 %v2743_v8, 0.0 }
 0x20b   : > { %1129 = vperm.xlu1 %9377, %v559_v29   ;;  %v4206_v40 = vmax.f32 %v3784_v53, 0.0  ;;  %v11049_v44 = vadd.f32 %v3429_v39, %v10739_v1  ;;  %v11053_v13 = vpop.permute.xlu0 %729  ;;  %v11060_v46 = vadd.f32 %v3789_v35, %v10739_v1  ;;  %v11065_v38 = vmul.f32 %v10015_v37, %v1095_v31 }
 0x20c   : > { %v4064_v21 = vmax.f32 %v3428_v6, 0.0  ;;  %v4208_v7 = vmax.f32 %v3788_v11, 0.0  ;;  %v3156_v16 = vpack.c.bf16 %v3000_v19, %v2998_v47  ;;  %v3155_v54 = vpack.c.bf16 %v2999_v51, %v2997_v56  ;;  %v9476_v6 = vld [vmem:[%s14104_s5 + $0x10] ss:$8 sps:$4 sm:$0xff]   ;;  %v9478_v11 = vld [vmem:[%s14104_s5 + $0x14] ss:$8 sps:$4 sm:$0xff]  }
 0x20d   : > { %v1602_v63 = vpop.permute.xlu1 %1601  ;;  %v11075_v39 = vmul.f32 %v10012_v36, %v11053_v13  ;;  %4652 = vmatprep.subr.bf16.mxu1 %v9478_v11 }
 0x20e   : > { %v2076_v24 = vmul.f32 %v10006_v33, %v1602_v63  ;;  %v2077_v42 = vmul.f32 %v10009_v34, %v1602_v63  ;;  %v11055_v8 = vpack.c.bf16 %v4064_v21, %v4062_v18  ;;  %v11057_v53 = vpack.c.bf16 %v4208_v7, %v4206_v40  ;;  %3911 = vmatprep.mubr.bf16.mxu1 %v3156_v16 }
 0x20f   : > { %9378 = vset.pattern.permute.xlu1 %v14170_v14  ;;  %3912 = vmatmul.mubr.bf16.gmra.mrb[68].mxu1 %v3155_v54  ;;  %v4063_v16 = vmax.f32 %v11043_v22, 0.0  ;;  %v9649_v22 = vld [vmem:[%s9775_s23 + $0x378] sm:$0xff] }
 0x210   : > { %14214 = vst [vmem:[#allocation21_spill] sm:$0xff] %v11057_v53  ;;  %v2332_v55 = vadd.f32 %v2076_v24, %v1290_v10  ;;  %v2333_v47 = vadd.f32 %v2077_v42, %v1291_v49  ;;  %1933 = vperm.xlu1 %9378, %v559_v29   ;;  %v3793_v56 = vpop.f32.mrb[20].mxu1  ;;  %v4065_v24 = vmax.f32 %v11049_v44, 0.0  ;;  %4653 = vmatpush1.bf16.msra.mxu1 %v9476_v6 }
 0x211   : > { %v3433_v19 = vpop.f32.mrb[4].mxu0  ;;  %v3794_v29 = vadd.f32 %v3793_v56, %v10736_v48  ;;  %v3795_v51 = vpop.f32.mrb[21].mxu1 }
 0x212   : > { %v11079_v10 = vadd.f32 %v3433_v19, %v10736_v48  ;;  %v3435_v35 = vpop.f32.mrb[5].mxu0  ;;  %v1080_v40 = vpop.permute.xlu1 %1079  ;;  %v2600_v7 = vadd.f32 %v10032_v4, %v2333_v47  ;;  %v2599_v63 = vadd.f32 %v10029_v62, %v2332_v55  ;;  %v11092_v47 = vadd.f32 %v3795_v51, %v10739_v1  ;;  %v488_v51 = vld [vmem:[%s9775_s23 + $0x138] sm:$0xff] }
 0x213   : > { %v3436_v18 = vadd.f32 %v3435_v35, %v10739_v1  ;;  %v3437_v21 = vpop.f32.mrb[6].mxu0  ;;  %v3797_v19 = vpop.f32.mrb[22].mxu1  ;;  %v4210_v2 = vmax.f32 %v3794_v29, 0.0  ;;  %v1436_v9 = vmul.f32 %v10012_v36, %v1080_v40  ;;  %v1437_v6 = vmul.f32 %v10015_v37, %v1080_v40 }
 0x214   : > { %v3439_v56 = vpop.f32.mrb[7].mxu0  ;;  %v3798_v55 = vadd.f32 %v3797_v19, %v10736_v48  ;;  %v3799_v11 = vpop.f32.mrb[23].mxu1  ;;  %1937 = vperm.xlu1 %9378, %v9649_v22   ;;  %v2856_v42 = vmax.f32 %v2600_v7, 0.0  ;;  %v2855_v54 = vmax.f32 %v2599_v63, 0.0  ;;  %v11100_v31 = vadd.f32 %v3437_v21, %v10736_v48 }
 0x215   : > { %v3440_v44 = vadd.f32 %v3439_v56, %v10739_v1  ;;  %v4067_v49 = vmax.f32 %v3436_v18, 0.0  ;;  %v11104_v19 = vadd.f32 %v3799_v11, %v10739_v1  ;;  %v14215_v56 = vmax.f32 %v10989_v0, 0.0 }
 0x216   : > { %v4212_v29 = vmax.f32 %v3798_v55, 0.0  ;;  %v3084_v22 = vpack.c.bf16 %v2856_v42, %v2854_v20 }
 0x217   : > { %v4069_v35 = vmax.f32 %v3440_v44, 0.0  ;;  %v1894_v26 = vpop.permute.xlu1 %1893  ;;  %v3083_v7 = vpack.c.bf16 %v2855_v54, %v14215_v56  ;;  %v11115_v44 = vpack.c.bf16 %v4065_v24, %v4063_v16 }
 0x218   : > { %v11110_v63 = vpack.c.bf16 %v4212_v29, %v4210_v2  ;;  %v2222_v18 = vmul.f32 %v10006_v33, %v1894_v26  ;;  %v2223_v40 = vmul.f32 %v10009_v34, %v1894_v26  ;;  %9379 = vset.pattern.permute.xlu1 %v14167_v15  ;;  %v3803_v55 = vpop.f32.mrb[24].mxu1  ;;  %3551 = vmatprep.mubr.bf16.mxu0 %v3084_v22  ;;  %v4068_v26 = vmax.f32 %v11100_v31, 0.0 }
 0x219   : > { %v3443_v21 = vpop.f32.mrb[8].mxu0  ;;  %v3804_v0 = vadd.f32 %v3803_v55, %v10736_v48  ;;  %774 = vperm.xlu1 %9379, %v488_v51   ;;  %v3805_v2 = vpop.f32.mrb[25].mxu1  ;;  %v11122_v54 = vpack.c.bf16 %v4069_v35, %v4067_v49  ;;  %3552 = vmatmul.mubr.bf16.gmra.mrb[52].mxu0 %v3083_v7 }
 0x21a   : > { %14216 = vst [vmem:[#allocation6_spill] sm:$0xff] %v11110_v63  ;;  %v11119_v50 = vadd.f32 %v3443_v21, %v10736_v48  ;;  %v3445_v20 = vpop.f32.mrb[9].mxu0  ;;  %v2478_v42 = vadd.f32 %v2222_v18, %v1436_v9  ;;  %v2479_v29 = vadd.f32 %v2223_v40, %v1437_v6  ;;  %v3807_v56 = vpop.f32.mrb[26].mxu1  ;;  %v11128_v22 = vadd.f32 %v3805_v2, %v10739_v1 }
 0x21b   : > { %v3446_v16 = vadd.f32 %v3445_v20, %v10739_v1  ;;  %v3447_v24 = vpop.f32.mrb[10].mxu0  ;;  %v3808_v49 = vadd.f32 %v3807_v56, %v10736_v48  ;;  %v1898_v35 = vpop.permute.xlu1 %1897  ;;  %v4214_v31 = vmax.f32 %v3804_v0, 0.0 }
 0x21c   : > { %v11131_v55 = vadd.f32 %v3447_v24, %v10736_v48  ;;  %v3449_v11 = vpop.f32.mrb[11].mxu0  ;;  %v2224_v6 = vmul.f32 %v10006_v33, %v1898_v35  ;;  %v2225_v7 = vmul.f32 %v10009_v34, %v1898_v35  ;;  %v3809_v18 = vpop.f32.mrb[27].mxu1  ;;  %v2746_v0 = vadd.f32 %v10032_v4, %v2479_v29 }
 0x21d   : > { %v4071_v40 = vmax.f32 %v3446_v16, 0.0  ;;  %v4216_v20 = vmax.f32 %v3808_v49, 0.0  ;;  %v3450_v2 = vadd.f32 %v3449_v11, %v10739_v1  ;;  %v11139_v24 = vadd.f32 %v3809_v18, %v10739_v1  ;;  %9380 = vset.pattern.permute.xlu1 %v14170_v14 }
 0x21e   : > { %v2480_v56 = vadd.f32 %v2224_v6, %v11003_v57  ;;  %v2481_v21 = vadd.f32 %v2225_v7, %v11013_v17  ;;  %1649 = vperm.xlu1 %9380, %v488_v51   ;;  %v2745_v35 = vadd.f32 %v10029_v62, %v2478_v42  ;;  %v4072_v49 = vmax.f32 %v11131_v55, 0.0  ;;  %v9479_v42 = vld [vmem:[%s14104_s5 + $0x20] ss:$8 sps:$4 sm:$0xff]  }
 0x21f   : > { %v11148_v9 = vpack.c.bf16 %v4216_v20, %v4214_v31  ;;  %v4073_v11 = vmax.f32 %v3450_v2, 0.0  ;;  %v3002_v17 = vmax.f32 %v2746_v0, 0.0  ;;  %v9481_v20 = vld [vmem:[%s14104_s5 + $0x24] ss:$8 sps:$4 sm:$0xff]  }
 0x220   : > { %v725_v63 = vpop.permute.xlu1 %724  ;;  %v2748_v57 = vadd.f32 %v10032_v4, %v2481_v21  ;;  %v2747_v51 = vadd.f32 %v10029_v62, %v2480_v56  ;;  %v3813_v31 = vpop.f32.mrb[28].mxu1  ;;  %v3001_v7 = vmax.f32 %v2745_v35, 0.0  ;;  %v14218_v21 = vmax.f32 %v11079_v10, 0.0  ;;  %4654 = vmatprep.subr.bf16.mxu1 %v9481_v20 }
 0x221   : > { %14217 = vst [vmem:[#allocation7_spill] sm:$0xff] %v11148_v9  ;;  %v3453_v53 = vpop.f32.mrb[12].mxu0  ;;  %v1294_v29 = vmul.f32 %v10012_v36, %v725_v63  ;;  %v1295_v56 = vmul.f32 %v10015_v37, %v725_v63  ;;  %v3814_v0 = vadd.f32 %v3813_v31, %v10736_v48  ;;  %v3815_v16 = vpop.f32.mrb[29].mxu1  ;;  %v11174_v63 = vpack.c.bf16 %v4073_v11, %v4071_v40 }
 0x222   : > { %v3454_v55 = vadd.f32 %v3453_v53, %v10736_v48  ;;  %v3455_v6 = vpop.f32.mrb[13].mxu0  ;;  %v11164_v2 = vpack.c.bf16 %v4068_v26, %v14218_v21  ;;  %9381 = vset.pattern.permute.xlu1 %v14167_v15  ;;  %v3004_v9 = vmax.f32 %v2748_v57, 0.0  ;;  %v11171_v35 = vadd.f32 %v3815_v16, %v10739_v1  ;;  %v3817_v45 = vpop.f32.mrb[30].mxu1  ;;  %4655 = vmatpush1.bf16.msra.mxu1 %v9479_v42 }
 0x223   : > { %v3456_v18 = vadd.f32 %v3455_v6, %v10739_v1  ;;  %v3457_v53 = vpop.f32.mrb[14].mxu0  ;;  %1139 = vperm.xlu1 %9381, %v561_v5   ;;  %v3003_v26 = vmax.f32 %v2747_v51, 0.0  ;;  %v4218_v21 = vmax.f32 %v3814_v0, 0.0  ;;  %v3818_v6 = vadd.f32 %v3817_v45, %v10736_v48  ;;  %v3819_v30 = vpop.f32.mrb[31].mxu1 }
 0x224   : > { %v3458_v59 = vadd.f32 %v3457_v53, %v10736_v48  ;;  %v3459_v10 = vpop.f32.mrb[15].mxu0  ;;  %v4074_v31 = vmax.f32 %v3454_v55, 0.0  ;;  %v11179_v61 = vadd.f32 %v3819_v30, %v10739_v1  ;;  %v3158_v41 = vpack.c.bf16 %v3004_v9, %v3002_v17 }
 0x225   : > { %v3460_v60 = vadd.f32 %v3459_v10, %v10739_v1  ;;  %v4075_v57 = vmax.f32 %v3456_v18, 0.0  ;;  %v1610_v53 = vpop.permute.xlu1 %1609  ;;  %v4220_v58 = vmax.f32 %v3818_v6, 0.0  ;;  %v4219_v55 = vmax.f32 %v11171_v35, 0.0 }
 0x226   : > { %v4076_v16 = vmax.f32 %v3458_v59, 0.0  ;;  %v2080_v40 = vmul.f32 %v10006_v33, %v1610_v53  ;;  %v2081_v11 = vmul.f32 %v10009_v34, %v1610_v53  ;;  %3921 = vmatprep.mubr.bf16.mxu1 %v3158_v41  ;;  %v3157_v45 = vpack.c.bf16 %v3003_v26, %v3001_v7 }
 0x227   : > { %v4077_v51 = vmax.f32 %v3460_v60, 0.0  ;;  %9382 = vset.pattern.permute.xlu1 %v14170_v14  ;;  %v14219_v18 = vmax.f32 %v11119_v50, 0.0  ;;  %v11191_v42 = vpack.c.bf16 %v4220_v58, %v4218_v21  ;;  %v14222_v26 = vmax.f32 %v11035_v23, 0.0 }
 0x228   : > { %v11189_v30 = vpack.c.bf16 %v4076_v16, %v4074_v31  ;;  %v2336_v9 = vadd.f32 %v2080_v40, %v1294_v29  ;;  %v2337_v60 = vadd.f32 %v2081_v11, %v1295_v56  ;;  %1941 = vperm.xlu1 %9382, %v561_v5   ;;  %v3823_v20 = vpop.f32.mrb[32].mxu1  ;;  %3922 = vmatmul.mubr.bf16.gmra.mrb[72].mxu1 %v3157_v45  ;;  %v14224_v29 = vmax.f32 %v11046_v43, 0.0 }
 0x229   : > { %v11187_v59 = vpack.c.bf16 %v4072_v49, %v14219_v18  ;;  %14220 = vst [vmem:[#allocation8_spill] sm:$0xff] %v11191_v42  ;;  %v3463_v17 = vpop.f32.mrb[16].mxu0  ;;  %v11193_v0 = vpack.c.bf16 %v4077_v51, %v4075_v57  ;;  %v3824_v7 = vadd.f32 %v3823_v20, %v10736_v48  ;;  %v3825_v50 = vpop.f32.mrb[33].mxu1  ;;  %v14221_v49 = vmax.f32 %v11030_v25, 0.0 }
 0x22a   : > { %v3464_v41 = vadd.f32 %v3463_v17, %v10736_v48  ;;  %v3465_v10 = vpop.f32.mrb[17].mxu0  ;;  %v14225_v5 = vmax.f32 %v11060_v46, 0.0  ;;  %v4221_v31 = vmax.f32 %v11179_v61, 0.0  ;;  %v1090_v6 = vpop.permute.xlu1 %1089  ;;  %v2604_v16 = vadd.f32 %v10032_v4, %v2337_v60  ;;  %v9650_v60 = vld [vmem:[%s9775_s23 + $0x388] sm:$0xff] }
 0x22b   : > { %v11201_v58 = vpack.c.bf16 %v14222_v26, %v14221_v49  ;;  %v3466_v21 = vadd.f32 %v3465_v10, %v10739_v1  ;;  %v3467_v57 = vpop.f32.mrb[18].mxu0  ;;  %v2603_v25 = vadd.f32 %v10029_v62, %v2336_v9  ;;  %v4222_v53 = vmax.f32 %v3824_v7, 0.0  ;;  %v3827_v46 = vpop.f32.mrb[34].mxu1  ;;  %v490_v49 = vld [vmem:[%s9775_s23 + $0x148] sm:$0xff] }
 0x22c   : > { %v11207_v56 = vpack.c.bf16 %v14225_v5, %v14224_v29  ;;  %v4078_v23 = vmax.f32 %v3464_v41, 0.0  ;;  %v3826_v51 = vadd.f32 %v3825_v50, %v10739_v1  ;;  %v1440_v43 = vmul.f32 %v10012_v36, %v1090_v6  ;;  %v3469_v40 = vpop.f32.mrb[19].mxu0  ;;  %v3829_v17 = vpop.f32.mrb[35].mxu1  ;;  %1945 = vperm.xlu1 %9382, %v9650_v60  }
 0x22d   : > { %14223 = vst [vmem:[#allocation9_spill] sm:$0xff] %v11201_v58  ;;  %v4079_v11 = vmax.f32 %v3466_v21, 0.0  ;;  %v1441_v61 = vmul.f32 %v10015_v37, %v1090_v6  ;;  %v3468_v45 = vadd.f32 %v3467_v57, %v10736_v48  ;;  %v3828_v18 = vadd.f32 %v3827_v46, %v10736_v48 }
 0x22e   : > { %14226 = vst [vmem:[#allocation10_spill] sm:$0xff] %v11207_v56  ;;  %v3470_v9 = vadd.f32 %v3469_v40, %v10739_v1  ;;  %v3830_v20 = vadd.f32 %v3829_v17, %v10739_v1  ;;  %v2860_v41 = vmax.f32 %v2604_v16, 0.0  ;;  %v2859_v7 = vmax.f32 %v2603_v25, 0.0 }
 0x22f   : > { %v4080_v10 = vmax.f32 %v3468_v45, 0.0  ;;  %v4224_v50 = vmax.f32 %v3828_v18, 0.0  ;;  %v14227_v26 = vmax.f32 %v11092_v47, 0.0  ;;  %v14228_v29 = vmax.f32 %v11104_v19, 0.0  ;;  %v1902_v17 = vpop.permute.xlu1 %1901 }
 0x230   : > { %v14230_v21 = vmax.f32 %v11128_v22, 0.0  ;;  %v14231_v6 = vmax.f32 %v11139_v24, 0.0  ;;  %v4081_v46 = vmax.f32 %v3470_v9, 0.0  ;;  %v4225_v40 = vmax.f32 %v3830_v20, 0.0  ;;  %9383 = vset.pattern.permute.xlu1 %v14167_v15  ;;  %v9482_v24 = vld [vmem:[%s14104_s5 + $0x30] ss:$8 sps:$4 sm:$0xff]  }
 0x231   : > { %v11226_v5 = vpack.c.bf16 %v14228_v29, %v14227_v26  ;;  %v14233_v16 = vmax.f32 %v11006_v12, 0.0  ;;  %v14234_v45 = vmax.f32 %v11020_v52, 0.0  ;;  %v11238_v47 = vpack.c.bf16 %v4224_v50, %v4222_v53  ;;  %v3473_v22 = vpop.f32.mrb[20].mxu0  ;;  %v9484_v12 = vld [vmem:[%s14104_s5 + $0x34] ss:$8 sps:$4 sm:$0xff]   ;;  %v3833_v20 = vpop.f32.mrb[36].mxu1  ;;  %784 = vperm.xlu1 %9383, %v490_v49  }
 0x232   : > { %v11232_v57 = vpack.c.bf16 %v14231_v6, %v14230_v21  ;;  %v2226_v19 = vmul.f32 %v10006_v33, %v1902_v17  ;;  %v2227_v60 = vmul.f32 %v10009_v34, %v1902_v17  ;;  %v11249_v9 = vpack.c.bf16 %v4080_v10, %v4078_v23  ;;  %v3835_v10 = vpop.f32.mrb[37].mxu1  ;;  %4656 = vmatprep.subr.bf16.mxu1 %v9484_v12 }
 0x233   : > { %14229 = vst [vmem:[#allocation11_spill] sm:$0xff] %v11226_v5  ;;  %v3086_v25 = vpack.c.bf16 %v2860_v41, %v14233_v16  ;;  %v3085_v18 = vpack.c.bf16 %v2859_v7, %v14234_v45  ;;  %14235 = vst [vmem:[#allocation13_spill] sm:$0xff] %v11238_v47  ;;  %v4223_v52 = vmax.f32 %v3826_v51, 0.0  ;;  %v3474_v53 = vadd.f32 %v3473_v22, %v10736_v48  ;;  %v3475_v41 = vpop.f32.mrb[21].mxu0  ;;  %v1906_v16 = vpop.permute.xlu1 %1905  ;;  %v9658_v5 = vld [vmem:[%s9775_s23 + $0x1c8] sm:$0xff] }
 0x234   : > { %14232 = vst [vmem:[#allocation12_spill] sm:$0xff] %v11232_v57  ;;  %v11252_v7 = vpack.c.bf16 %v4081_v46, %v4079_v11  ;;  %v11256_v50 = vpack.c.bf16 %v4221_v31, %v4219_v55  ;;  %v1297_v26 = vmul.f32 %v10015_v37, %v11053_v13  ;;  %v2483_v29 = vadd.f32 %v2227_v60, %v1441_v61  ;;  %v3477_v21 = vpop.f32.mrb[22].mxu0  ;;  %v3837_v46 = vpop.f32.mrb[38].mxu1 }
 0x235   : > { %3561 = vmatprep.mubr.bf16.mxu0 %v3086_v25  ;;  %v3834_v23 = vadd.f32 %v3833_v20, %v10736_v48  ;;  %v3476_v51 = vadd.f32 %v3475_v41, %v10739_v1  ;;  %v2482_v6 = vadd.f32 %v2226_v19, %v1440_v43  ;;  %v4082_v17 = vmax.f32 %v3474_v53, 0.0  ;;  %v3479_v25 = vpop.f32.mrb[23].mxu0  ;;  %v3839_v45 = vpop.f32.mrb[39].mxu1  ;;  %4657 = vmatpush1.bf16.msra.mxu1 %v9482_v24 }
 0x236   : > { %14236 = vst [vmem:[#allocation14_spill] sm:$0xff] %v11256_v50  ;;  %3562 = vmatmul.mubr.bf16.gmra.mrb[56].mxu0 %v3085_v18  ;;  %v3478_v11 = vadd.f32 %v3477_v21, %v10736_v48  ;;  %v11263_v35 = vpack.c.bf16 %v4225_v40, %v4223_v52  ;;  %v3836_v13 = vadd.f32 %v3835_v10, %v10739_v1 }
 0x237   : > { %v4226_v55 = vmax.f32 %v3834_v23, 0.0  ;;  %v3838_v31 = vadd.f32 %v3837_v46, %v10736_v48  ;;  %v2228_v61 = vmul.f32 %v10006_v33, %v1906_v16  ;;  %v4083_v18 = vmax.f32 %v3476_v51, 0.0  ;;  %9384 = vset.pattern.permute.xlu1 %v14170_v14 }
 0x238   : > { %14237 = vst [vmem:[#allocation34_spill] sm:$0xff] %v11263_v35  ;;  %v4084_v43 = vmax.f32 %v3478_v11, 0.0  ;;  %v2229_v19 = vmul.f32 %v10009_v34, %v1906_v16  ;;  %v3480_v60 = vadd.f32 %v3479_v25, %v10739_v1  ;;  %v3840_v12 = vadd.f32 %v3839_v45, %v10739_v1  ;;  %1657 = vperm.xlu1 %9384, %v490_v49   ;;  %v735_v21 = vpop.permute.xlu1 %734  ;;  %v563_v11 = vld [vmem:[%s9775_s23 + $0x390] sm:$0xff]  ;;  %v3843_v46 = vpop.f32.mrb[40].mxu1 }
 0x239   : > { %v4228_v40 = vmax.f32 %v3838_v31, 0.0  ;;  %v2484_v22 = vadd.f32 %v2228_v61, %v11027_v32  ;;  %v2750_v52 = vadd.f32 %v10032_v4, %v2483_v29  ;;  %v2749_v20 = vadd.f32 %v10029_v62, %v2482_v6 }
 0x23a   : > { %v2485_v53 = vadd.f32 %v2229_v19, %v11065_v38  ;;  %v4085_v24 = vmax.f32 %v3480_v60, 0.0  ;;  %v11276_v41 = vpack.c.bf16 %v4084_v43, %v4082_v17  ;;  %v4227_v23 = vmax.f32 %v3836_v13, 0.0  ;;  %v3845_v17 = vpop.f32.mrb[41].mxu1 }
 0x23b   : > { %v11278_v51 = vpack.c.bf16 %v4228_v40, %v4226_v55  ;;  %v4229_v10 = vmax.f32 %v3840_v12, 0.0  ;;  %v2751_v32 = vadd.f32 %v10029_v62, %v2484_v22  ;;  %v2338_v49 = vadd.f32 %v10986_v3, %v11075_v39  ;;  %v3847_v3 = vpop.f32.mrb[42].mxu1 }
 0x23c   : > { %v2752_v29 = vadd.f32 %v10032_v4, %v2485_v53  ;;  %v3005_v38 = vmax.f32 %v2749_v20, 0.0  ;;  %9385 = vset.pattern.permute.xlu1 %v14167_v15  ;;  %v3844_v6 = vadd.f32 %v3843_v46, %v10736_v48  ;;  %v11287_v55 = vpack.c.bf16 %v4085_v24, %v4083_v18  ;;  %v3849_v43 = vpop.f32.mrb[43].mxu1 }
 0x23d   : > { %14238 = vst [vmem:[#allocation35_spill] sm:$0xff] %v11278_v51  ;;  %v3007_v16 = vmax.f32 %v2751_v32, 0.0  ;;  %v11289_v13 = vpack.c.bf16 %v4229_v10, %v4227_v23  ;;  %v2339_v31 = vadd.f32 %v10997_v28, %v1297_v26  ;;  %1149 = vperm.xlu1 %9385, %v563_v11   ;;  %v3846_v61 = vadd.f32 %v3845_v17, %v10739_v1  ;;  %v1618_v18 = vpop.permute.xlu1 %1617 }
 0x23e   : > { %v3006_v39 = vmax.f32 %v2750_v52, 0.0  ;;  %v3008_v25 = vmax.f32 %v2752_v29, 0.0  ;;  %v3848_v45 = vadd.f32 %v3847_v3, %v10736_v48  ;;  %v1298_v60 = vmul.f32 %v10012_v36, %v735_v21  ;;  %v9485_v29 = vld [vmem:[%s14104_s5 + $0x40] ss:$8 sps:$4 sm:$0xff]  }
 0x23f   : > { %14239 = vst [vmem:[#allocation36_spill] sm:$0xff] %v11289_v13  ;;  %v3159_v19 = vpack.c.bf16 %v3007_v16, %v3005_v38  ;;  %v1299_v40 = vmul.f32 %v10015_v37, %v735_v21  ;;  %v3850_v22 = vadd.f32 %v3849_v43, %v10739_v1  ;;  %v4230_v53 = vmax.f32 %v3844_v6, 0.0 }
 0x240   : > { %v3160_v12 = vpack.c.bf16 %v3008_v25, %v3006_v39  ;;  %v4232_v28 = vmax.f32 %v3848_v45, 0.0  ;;  %v2084_v26 = vmul.f32 %v10006_v33, %v1618_v18  ;;  %v2085_v24 = vmul.f32 %v10009_v34, %v1618_v18 }
 0x241   : > { %v2605_v52 = vadd.f32 %v10029_v62, %v2338_v49  ;;  %v2606_v20 = vadd.f32 %v10032_v4, %v2339_v31  ;;  %v4231_v23 = vmax.f32 %v3846_v61, 0.0  ;;  %v4233_v10 = vmax.f32 %v3850_v22, 0.0  ;;  %9386 = vset.pattern.permute.xlu1 %v14170_v14  ;;  %v9487_v49 = vld [vmem:[%s14104_s5 + $0x44] ss:$8 sps:$4 sm:$0xff]  }
 0x242   : > { %3931 = vmatprep.mubr.bf16.mxu1 %v3160_v12  ;;  %v11302_v21 = vpack.c.bf16 %v4232_v28, %v4230_v53  ;;  %v2340_v32 = vadd.f32 %v2084_v26, %v1298_v60  ;;  %v2341_v46 = vadd.f32 %v2085_v24, %v1299_v40  ;;  %1949 = vperm.xlu1 %9386, %v563_v11   ;;  %v1100_v6 = vpop.permute.xlu1 %1099  ;;  %v3483_v31 = vpop.f32.mrb[24].mxu0  ;;  %v9651_v11 = vld [vmem:[%s9775_s23 + $0x398] sm:$0xff] }
 0x243   : > { %3932 = vmatmul.mubr.bf16.gmra.mrb[76].mxu1 %v3159_v19  ;;  %v11310_v38 = vpack.c.bf16 %v4233_v10, %v4231_v23  ;;  %v2862_v61 = vmax.f32 %v2606_v20, 0.0  ;;  %4658 = vmatprep.subr.bf16.mxu1 %v9487_v49  ;;  %v3484_v3 = vadd.f32 %v3483_v31, %v10736_v48  ;;  %v3485_v39 = vpop.f32.mrb[25].mxu0  ;;  %v2861_v45 = vmax.f32 %v2605_v52, 0.0  ;;  %v492_v12 = vld [vmem:[%s9775_s23 + $0x158] sm:$0xff]  ;;  %v1105_v23 = vpop.permute.xlu0 %1104 }
 0x244   : > { %14240 = vst [vmem:[#allocation37_spill] sm:$0xff] %v11302_v21  ;;  %v2608_v17 = vadd.f32 %v10032_v4, %v2341_v46  ;;  %v2607_v16 = vadd.f32 %v10029_v62, %v2340_v32  ;;  %4659 = vmatpush1.bf16.msra.mxu1 %v9485_v29  ;;  %v3486_v19 = vadd.f32 %v3485_v39, %v10739_v1  ;;  %v3487_v60 = vpop.f32.mrb[26].mxu0 }
 0x245   : > { %14241 = vst [vmem:[#allocation38_spill] sm:$0xff] %v11310_v38  ;;  %v3488_v40 = vadd.f32 %v3487_v60, %v10736_v48  ;;  %v3489_v18 = vpop.f32.mrb[27].mxu0  ;;  %v1444_v28 = vmul.f32 %v10012_v36, %v1100_v6  ;;  %v1445_v26 = vmul.f32 %v10015_v37, %v1100_v6  ;;  %v4086_v52 = vmax.f32 %v3484_v3, 0.0 }
 0x246   : > { %1953 = vperm.xlu1 %9386, %v9651_v11   ;;  %v2864_v25 = vmax.f32 %v2608_v17, 0.0  ;;  %v2863_v43 = vmax.f32 %v2607_v16, 0.0  ;;  %v3490_v20 = vadd.f32 %v3489_v18, %v10739_v1  ;;  %v1446_v29 = vmul.f32 %v10012_v36, %v1105_v23  ;;  %v14242_v18 = vld [vmem:[#allocation15_spill] sm:$0xff] }
 0x247   : > { %v1910_v24 = vpop.permute.xlu1 %1909  ;;  %v4088_v10 = vmax.f32 %v3488_v40, 0.0  ;;  %v4087_v49 = vmax.f32 %v3486_v19, 0.0  ;;  %v1447_v6 = vmul.f32 %v10015_v37, %v1105_v23 }
 0x248   : > { %v3088_v22 = vpack.c.bf16 %v2864_v25, %v2862_v61  ;;  %v3087_v53 = vpack.c.bf16 %v2863_v43, %v2861_v45  ;;  %v2230_v32 = vmul.f32 %v10006_v33, %v1910_v24  ;;  %v2231_v46 = vmul.f32 %v10009_v34, %v1910_v24  ;;  %v740_v43 = vpop.permute.xlu0 %739 }
 0x249   : > { %v4089_v17 = vmax.f32 %v3490_v20, 0.0  ;;  %v11327_v61 = vpack.c.bf16 %v4088_v10, %v4086_v52  ;;  %v565_v20 = vld [vmem:[%s9775_s23 + $0x3a0] sm:$0xff] }
 0x24a   : > { %9387 = vset.pattern.permute.xlu1 %v14167_v15  ;;  %3571 = vmatprep.mubr.bf16.mxu0 %v3088_v22  ;;  %v2486_v16 = vadd.f32 %v2230_v32, %v1444_v28  ;;  %v2487_v31 = vadd.f32 %v2231_v46, %v1445_v26  ;;  %v2087_v22 = vmul.f32 %v10009_v34, %v14242_v18 }
 0x24b   : > { %794 = vperm.xlu1 %9387, %v492_v12   ;;  %3572 = vmatmul.mubr.bf16.gmra.mrb[60].mxu0 %v3087_v53  ;;  %v1914_v11 = vpop.permute.xlu1 %1913  ;;  %v11329_v3 = vpack.c.bf16 %v4089_v17, %v4087_v49  ;;  %v1301_v53 = vmul.f32 %v10015_v37, %v740_v43  ;;  %v2086_v28 = vmul.f32 %v10006_v33, %v14242_v18 }
 0x24c   : > { %v2232_v39 = vmul.f32 %v10006_v33, %v1914_v11  ;;  %v2233_v25 = vmul.f32 %v10009_v34, %v1914_v11  ;;  %v2754_v45 = vadd.f32 %v10032_v4, %v2487_v31  ;;  %v2753_v40 = vadd.f32 %v10029_v62, %v2486_v16 }
 0x24d   : > { %v1300_v26 = vmul.f32 %v10012_v36, %v740_v43  ;;  %v2343_v16 = vadd.f32 %v2087_v22, %v1301_v53 }
 0x24e   : > { %v2488_v19 = vadd.f32 %v2232_v39, %v1446_v29  ;;  %v2489_v60 = vadd.f32 %v2233_v25, %v1447_v6  ;;  %v3009_v49 = vmax.f32 %v2753_v40, 0.0  ;;  %v9488_v6 = vld [vmem:[%s14104_s5 + $0x50] ss:$8 sps:$4 sm:$0xff]   ;;  %v9490_v39 = vld [vmem:[%s14104_s5 + $0x54] ss:$8 sps:$4 sm:$0xff]  }
 0x24f   : > { %9388 = vset.pattern.permute.xlu1 %v14170_v14  ;;  %v2342_v25 = vadd.f32 %v2086_v28, %v1300_v26  ;;  %4660 = vmatprep.subr.bf16.mxu1 %v9490_v39  ;;  %v2610_v28 = vadd.f32 %v10032_v4, %v2343_v16 }
 0x250   : > { %1665 = vperm.xlu1 %9388, %v492_v12   ;;  %v745_v24 = vpop.permute.xlu1 %744  ;;  %v2756_v23 = vadd.f32 %v10032_v4, %v2489_v60  ;;  %v2755_v52 = vadd.f32 %v10029_v62, %v2488_v19  ;;  %v3853_v10 = vpop.f32.mrb[44].mxu1  ;;  %v3010_v12 = vmax.f32 %v2754_v45, 0.0  ;;  %4661 = vmatpush1.bf16.msra.mxu1 %v9488_v6 }
 0x251   : > { %v3854_v32 = vadd.f32 %v3853_v10, %v10736_v48  ;;  %v3855_v46 = vpop.f32.mrb[45].mxu1  ;;  %v1302_v40 = vmul.f32 %v10012_v36, %v745_v24  ;;  %v1303_v18 = vmul.f32 %v10015_v37, %v745_v24  ;;  %v2609_v24 = vadd.f32 %v10029_v62, %v2342_v25 }
 0x252   : > { %v3012_v29 = vmax.f32 %v2756_v23, 0.0  ;;  %v3011_v17 = vmax.f32 %v2755_v52, 0.0  ;;  %v3856_v31 = vadd.f32 %v3855_v46, %v10739_v1  ;;  %v3857_v11 = vpop.f32.mrb[46].mxu1  ;;  %v2866_v39 = vmax.f32 %v2610_v28, 0.0 }
 0x253   : > { %v3858_v45 = vadd.f32 %v3857_v11, %v10736_v48  ;;  %v3859_v43 = vpop.f32.mrb[47].mxu1  ;;  %v4234_v53 = vmax.f32 %v3854_v32, 0.0 }
 0x254   : > { %9389 = vset.pattern.permute.xlu1 %v14167_v15  ;;  %v3162_v19 = vpack.c.bf16 %v3012_v29, %v3010_v12  ;;  %v3161_v60 = vpack.c.bf16 %v3011_v17, %v3009_v49  ;;  %v3860_v22 = vadd.f32 %v3859_v43, %v10739_v1  ;;  %v4235_v26 = vmax.f32 %v3856_v31, 0.0 }
 0x255   : > { %1159 = vperm.xlu1 %9389, %v565_v20   ;;  %v1626_v23 = vpop.permute.xlu1 %1625  ;;  %v4236_v52 = vmax.f32 %v3858_v45, 0.0  ;;  %v9652_v45 = vld [vmem:[%s9775_s23 + $0x3a8] sm:$0xff] }
 0x256   : > { %v2088_v10 = vmul.f32 %v10006_v33, %v1626_v23  ;;  %v2089_v46 = vmul.f32 %v10009_v34, %v1626_v23  ;;  %3941 = vmatprep.mubr.bf16.mxu1 %v3162_v19  ;;  %v4237_v12 = vmax.f32 %v3860_v22, 0.0 }
 0x257   : > { %3942 = vmatmul.mubr.bf16.gmra.mrb[80].mxu1 %v3161_v60  ;;  %v11363_v29 = vpack.c.bf16 %v4236_v52, %v4234_v53  ;;  %v2865_v60 = vmax.f32 %v2609_v24, 0.0  ;;  %v494_v52 = vld [vmem:[%s9775_s23 + $0x168] sm:$0xff] }
 0x258   : > { %v2344_v32 = vadd.f32 %v2088_v10, %v1302_v40  ;;  %v2345_v49 = vadd.f32 %v2089_v46, %v1303_v18  ;;  %v11365_v17 = vpack.c.bf16 %v4237_v12, %v4235_v26 }
 0x259   : > { %9390 = vset.pattern.permute.xlu1 %v14170_v14  ;;  %14243 = vst [vmem:[#allocation15_spill] sm:$0xff] %v11363_v29 }
 0x25a   : > { %1957 = vperm.xlu1 %9390, %v565_v20   ;;  %14244 = vst [vmem:[#allocation39_spill] sm:$0xff] %v11365_v17  ;;  %v1110_v11 = vpop.permute.xlu1 %1109  ;;  %v2612_v6 = vadd.f32 %v10032_v4, %v2345_v49  ;;  %v2611_v16 = vadd.f32 %v10029_v62, %v2344_v32  ;;  %v3493_v31 = vpop.f32.mrb[28].mxu0  ;;  %v507_v17 = vld [vmem:[%s9775_s23 + $0x1d0] sm:$0xff] }
 0x25b   : > { %v3494_v43 = vadd.f32 %v3493_v31, %v10736_v48  ;;  %v3495_v25 = vpop.f32.mrb[29].mxu0  ;;  %v1448_v46 = vmul.f32 %v10012_v36, %v1110_v11  ;;  %v1449_v28 = vmul.f32 %v10015_v37, %v1110_v11  ;;  %v1115_v32 = vpop.permute.xlu0 %1114  ;;  %v9491_v31 = vld [vmem:[%s14104_s5 + $0x60] ss:$8 sps:$4 sm:$0xff]   ;;  %v9493_v11 = vld [vmem:[%s14104_s5 + $0x64] ss:$8 sps:$4 sm:$0xff]   ;;  %1725 = vperm.xlu0 %9417, %v507_v17  }
 0x25c   : > { %v2868_v19 = vmax.f32 %v2612_v6, 0.0  ;;  %v2867_v40 = vmax.f32 %v2611_v16, 0.0  ;;  %v3496_v20 = vadd.f32 %v3495_v25, %v10739_v1  ;;  %v3497_v18 = vpop.f32.mrb[30].mxu0  ;;  %v1451_v25 = vmul.f32 %v10015_v37, %v1115_v32  ;;  %4662 = vmatprep.subr.bf16.mxu1 %v9493_v11 }
 0x25d   : > { %v3498_v23 = vadd.f32 %v3497_v18, %v10736_v48  ;;  %v3499_v22 = vpop.f32.mrb[31].mxu0  ;;  %v4090_v49 = vmax.f32 %v3494_v43, 0.0  ;;  %4663 = vmatpush1.bf16.msra.mxu1 %v9491_v31  ;;  %v567_v31 = vld [vmem:[%s9775_s23 + $0x3b0] sm:$0xff] }
 0x25e   : > { %1961 = vperm.xlu1 %9390, %v9652_v45   ;;  %v3090_v53 = vpack.c.bf16 %v2868_v19, %v2866_v39  ;;  %v3089_v10 = vpack.c.bf16 %v2867_v40, %v2865_v60  ;;  %v3500_v12 = vadd.f32 %v3499_v22, %v10739_v1  ;;  %v1450_v39 = vmul.f32 %v10012_v36, %v1115_v32 }
 0x25f   : > { %v1918_v26 = vpop.permute.xlu1 %1917  ;;  %v4092_v24 = vmax.f32 %v3498_v23, 0.0  ;;  %v4091_v45 = vmax.f32 %v3496_v20, 0.0  ;;  %9418 = vset.pattern.permute.xlu0 %v14167_v15 }
 0x260   : > { %v2234_v6 = vmul.f32 %v10006_v33, %v1918_v26  ;;  %v2235_v16 = vmul.f32 %v10009_v34, %v1918_v26  ;;  %3581 = vmatprep.mubr.bf16.mxu0 %v3090_v53  ;;  %v4093_v43 = vmax.f32 %v3500_v12, 0.0  ;;  %v14245_v12 = vld [vmem:[#allocation16_spill] sm:$0xff]  ;;  %869 = vperm.xlu0 %9418, %v507_v17  }
 0x261   : > { %3582 = vmatmul.mubr.bf16.gmra.mrb[64].mxu0 %v3089_v10  ;;  %v11388_v40 = vpack.c.bf16 %v4092_v24, %v4090_v49  ;;  %v750_v10 = vpop.permute.xlu0 %749  ;;  %v2091_v32 = vmul.f32 %v10009_v34, %v14245_v12  ;;  %v2090_v24 = vmul.f32 %v10006_v33, %v14245_v12 }
 0x262   : > { %9391 = vset.pattern.permute.xlu1 %v14167_v15  ;;  %v2490_v19 = vadd.f32 %v2234_v6, %v1448_v46  ;;  %v2491_v60 = vadd.f32 %v2235_v16, %v1449_v28  ;;  %v11390_v23 = vpack.c.bf16 %v4093_v43, %v4091_v45  ;;  %v1305_v49 = vmul.f32 %v10015_v37, %v750_v10 }
 0x263   : > { %804 = vperm.xlu1 %9391, %v494_v52   ;;  %v1922_v18 = vpop.permute.xlu1 %1921  ;;  %v1304_v6 = vmul.f32 %v10012_v36, %v750_v10 }
 0x264   : > { %v2236_v22 = vmul.f32 %v10006_v33, %v1922_v18  ;;  %v2237_v53 = vmul.f32 %v10009_v34, %v1922_v18  ;;  %v2758_v20 = vadd.f32 %v10032_v4, %v2491_v60  ;;  %v2757_v28 = vadd.f32 %v10029_v62, %v2490_v19 }
 0x265   : > { %v2346_v12 = vadd.f32 %v2090_v24, %v1304_v6 }
 0x266   : > { %v2492_v26 = vadd.f32 %v2236_v22, %v1450_v39  ;;  %v2493_v46 = vadd.f32 %v2237_v53, %v1451_v25  ;;  %v3013_v60 = vmax.f32 %v2757_v28, 0.0  ;;  %v2347_v22 = vadd.f32 %v2091_v32, %v1305_v49 }
 0x267   : > { %9392 = vset.pattern.permute.xlu1 %v14170_v14 }
 0x268   : > { %1673 = vperm.xlu1 %9392, %v494_v52   ;;  %v755_v16 = vpop.permute.xlu1 %754  ;;  %v2760_v11 = vadd.f32 %v10032_v4, %v2493_v46  ;;  %v2759_v39 = vadd.f32 %v10029_v62, %v2492_v26  ;;  %v3863_v45 = vpop.f32.mrb[48].mxu1  ;;  %v3014_v52 = vmax.f32 %v2758_v20, 0.0  ;;  %v2614_v6 = vadd.f32 %v10032_v4, %v2347_v22  ;;  %v9494_v22 = vld [vmem:[%s14104_s5 + $0x70] ss:$8 sps:$4 sm:$0xff]  }
 0x269   : > { %v3864_v43 = vadd.f32 %v3863_v45, %v10736_v48  ;;  %v3865_v25 = vpop.f32.mrb[49].mxu1  ;;  %v1306_v21 = vmul.f32 %v10012_v36, %v755_v16  ;;  %v1307_v45 = vmul.f32 %v10015_v37, %v755_v16  ;;  %v2613_v16 = vadd.f32 %v10029_v62, %v2346_v12 }
 0x26a   : > { %v3016_v19 = vmax.f32 %v2760_v11, 0.0  ;;  %v3015_v18 = vmax.f32 %v2759_v39, 0.0  ;;  %v3866_v53 = vadd.f32 %v3865_v25, %v10739_v1  ;;  %v3867_v10 = vpop.f32.mrb[50].mxu1 }
 0x26b   : > { %v3868_v46 = vadd.f32 %v3867_v10, %v10736_v48  ;;  %v3869_v26 = vpop.f32.mrb[51].mxu1  ;;  %v4238_v32 = vmax.f32 %v3864_v43, 0.0  ;;  %v9653_v10 = vld [vmem:[%s9775_s23 + $0x3b8] sm:$0xff] }
 0x26c   : > { %9393 = vset.pattern.permute.xlu1 %v14167_v15  ;;  %v3164_v29 = vpack.c.bf16 %v3016_v19, %v3014_v52  ;;  %v3163_v20 = vpack.c.bf16 %v3015_v18, %v3013_v60  ;;  %v3870_v28 = vadd.f32 %v3869_v26, %v10739_v1  ;;  %v4239_v39 = vmax.f32 %v3866_v53, 0.0  ;;  %v9496_v53 = vld [vmem:[%s14104_s5 + $0x74] ss:$8 sps:$4 sm:$0xff]  }
 0x26d   : > { %1169 = vperm.xlu1 %9393, %v567_v31   ;;  %v1634_v38 = vpop.permute.xlu1 %1633  ;;  %v4240_v49 = vmax.f32 %v3868_v46, 0.0  ;;  %4664 = vmatprep.subr.bf16.mxu1 %v9496_v53 }
 0x26e   : > { %v2092_v11 = vmul.f32 %v10006_v33, %v1634_v38  ;;  %v2093_v24 = vmul.f32 %v10009_v34, %v1634_v38  ;;  %3951 = vmatprep.mubr.bf16.mxu1 %v3164_v29  ;;  %v4241_v52 = vmax.f32 %v3870_v28, 0.0  ;;  %4665 = vmatpush1.bf16.msra.mxu1 %v9494_v22 }
 0x26f   : > { %3952 = vmatmul.mubr.bf16.gmra.mrb[84].mxu1 %v3163_v20  ;;  %v11419_v25 = vpack.c.bf16 %v4240_v49, %v4238_v32  ;;  %v2869_v20 = vmax.f32 %v2613_v16, 0.0 }
 0x270   : > { %v2348_v19 = vadd.f32 %v2092_v11, %v1306_v21  ;;  %v2349_v43 = vadd.f32 %v2093_v24, %v1307_v45  ;;  %v11422_v60 = vpack.c.bf16 %v4241_v52, %v4239_v39  ;;  %v496_v24 = vld [vmem:[%s9775_s23 + $0x178] sm:$0xff] }
 0x271   : > { %9394 = vset.pattern.permute.xlu1 %v14170_v14  ;;  %14246 = vst [vmem:[#allocation16_spill] sm:$0xff] %v11419_v25 }
 0x272   : > { %1965 = vperm.xlu1 %9394, %v567_v31   ;;  %14247 = vst [vmem:[#allocation40_spill] sm:$0xff] %v11422_v60  ;;  %v1120_v38 = vpop.permute.xlu1 %1119  ;;  %v2616_v29 = vadd.f32 %v10032_v4, %v2349_v43  ;;  %v2615_v18 = vadd.f32 %v10029_v62, %v2348_v19  ;;  %v3503_v21 = vpop.f32.mrb[32].mxu0  ;;  %v2870_v31 = vmax.f32 %v2614_v6, 0.0 }
 0x273   : > { %v3504_v12 = vadd.f32 %v3503_v21, %v10736_v48  ;;  %v3505_v46 = vpop.f32.mrb[33].mxu0  ;;  %v1452_v39 = vmul.f32 %v10012_v36, %v1120_v38  ;;  %v1453_v52 = vmul.f32 %v10015_v37, %v1120_v38  ;;  %v1125_v43 = vpop.permute.xlu0 %1124  ;;  %v510_v21 = vld [vmem:[%s9775_s23 + $0x1e8] sm:$0xff] }
 0x274   : > { %v2872_v26 = vmax.f32 %v2616_v29, 0.0  ;;  %v2871_v45 = vmax.f32 %v2615_v18, 0.0  ;;  %v3506_v28 = vadd.f32 %v3505_v46, %v10739_v1  ;;  %v3507_v32 = vpop.f32.mrb[34].mxu0  ;;  %v1455_v38 = vmul.f32 %v10015_v37, %v1125_v43  ;;  %884 = vperm.xlu0 %9418, %v510_v21   ;;  %v569_v21 = vld [vmem:[%s9775_s23 + $0x3c0] sm:$0xff] }
 0x275   : > { %v3508_v49 = vadd.f32 %v3507_v32, %v10736_v48  ;;  %v3509_v17 = vpop.f32.mrb[35].mxu0  ;;  %v4094_v29 = vmax.f32 %v3504_v12, 0.0  ;;  %v511_v32 = vld [vmem:[%s9775_s23 + $0x1f0] sm:$0xff] }
 0x276   : > { %1969 = vperm.xlu1 %9394, %v9653_v10   ;;  %v3092_v11 = vpack.c.bf16 %v2872_v26, %v2870_v31  ;;  %v3091_v6 = vpack.c.bf16 %v2871_v45, %v2869_v20  ;;  %v3510_v16 = vadd.f32 %v3509_v17, %v10739_v1  ;;  %v1454_v31 = vmul.f32 %v10012_v36, %v1125_v43 }
 0x277   : > { %v1926_v19 = vpop.permute.xlu1 %1925  ;;  %v4096_v18 = vmax.f32 %v3508_v49, 0.0  ;;  %v4095_v10 = vmax.f32 %v3506_v28, 0.0 }
 0x278   : > { %v2238_v53 = vmul.f32 %v10006_v33, %v1926_v19  ;;  %v2239_v22 = vmul.f32 %v10009_v34, %v1926_v19  ;;  %3591 = vmatprep.mubr.bf16.mxu0 %v3092_v11  ;;  %v4097_v46 = vmax.f32 %v3510_v16, 0.0  ;;  %889 = vperm.xlu0 %9418, %v511_v32   ;;  %v14248_v16 = vld [vmem:[#allocation17_spill] sm:$0xff] }
 0x279   : > { %3592 = vmatmul.mubr.bf16.gmra.mrb[68].mxu0 %v3091_v6  ;;  %v11446_v20 = vpack.c.bf16 %v4096_v18, %v4094_v29  ;;  %v760_v6 = vpop.permute.xlu0 %759  ;;  %v2095_v43 = vmul.f32 %v10009_v34, %v14248_v16  ;;  %v2094_v18 = vmul.f32 %v10006_v33, %v14248_v16 }
 0x27a   : > { %9395 = vset.pattern.permute.xlu1 %v14167_v15  ;;  %v2494_v26 = vadd.f32 %v2238_v53, %v1452_v39  ;;  %v2495_v12 = vadd.f32 %v2239_v22, %v1453_v52  ;;  %v11449_v49 = vpack.c.bf16 %v4097_v46, %v4095_v10  ;;  %v1309_v29 = vmul.f32 %v10015_v37, %v760_v6 }
 0x27b   : > { %814 = vperm.xlu1 %9395, %v496_v24   ;;  %v1930_v45 = vpop.permute.xlu1 %1929  ;;  %v1308_v53 = vmul.f32 %v10012_v36, %v760_v6 }
 0x27c   : > { %v2240_v17 = vmul.f32 %v10006_v33, %v1930_v45  ;;  %v2241_v11 = vmul.f32 %v10009_v34, %v1930_v45  ;;  %v2762_v28 = vadd.f32 %v10032_v4, %v2495_v12  ;;  %v2761_v52 = vadd.f32 %v10029_v62, %v2494_v26  ;;  %9423 = vset.pattern.permute.xlu0 %v14170_v14 }
 0x27d   : > { %1741 = vperm.xlu0 %9423, %v511_v32  }
 0x27e   : > { %v2496_v19 = vadd.f32 %v2240_v17, %v1454_v31  ;;  %v2497_v39 = vadd.f32 %v2241_v11, %v1455_v38  ;;  %v3018_v46 = vmax.f32 %v2762_v28, 0.0  ;;  %v3017_v45 = vmax.f32 %v2761_v52, 0.0  ;;  %v9499_v28 = vld [vmem:[%s14104_s5 + $0x84] ss:$8 sps:$4 sm:$0xff]  }
 0x27f   : > { %9396 = vset.pattern.permute.xlu1 %v14170_v14  ;;  %v2351_v11 = vadd.f32 %v2095_v43, %v1309_v29  ;;  %4666 = vmatprep.subr.bf16.mxu1 %v9499_v28  ;;  %v9654_v28 = vld [vmem:[%s9775_s23 + $0x3c8] sm:$0xff] }
 0x280   : > { %1681 = vperm.xlu1 %9396, %v496_v24   ;;  %v765_v22 = vpop.permute.xlu1 %764  ;;  %v2764_v10 = vadd.f32 %v10032_v4, %v2497_v39  ;;  %v2763_v31 = vadd.f32 %v10029_v62, %v2496_v19  ;;  %v3873_v24 = vpop.f32.mrb[52].mxu1  ;;  %v9497_v19 = vld [vmem:[%s14104_s5 + $0x80] ss:$8 sps:$4 sm:$0xff]   ;;  %v2350_v39 = vadd.f32 %v2094_v18, %v1308_v53 }
 0x281   : > { %v3874_v38 = vadd.f32 %v3873_v24, %v10736_v48  ;;  %v3875_v26 = vpop.f32.mrb[53].mxu1  ;;  %v1310_v43 = vmul.f32 %v10012_v36, %v765_v22  ;;  %v1311_v29 = vmul.f32 %v10015_v37, %v765_v22  ;;  %4667 = vmatpush1.bf16.msra.mxu1 %v9497_v19  ;;  %v2618_v18 = vadd.f32 %v10032_v4, %v2351_v11 }
 0x282   : > { %v3020_v12 = vmax.f32 %v2764_v10, 0.0  ;;  %v3019_v17 = vmax.f32 %v2763_v31, 0.0  ;;  %v3876_v6 = vadd.f32 %v3875_v26, %v10739_v1  ;;  %v3877_v16 = vpop.f32.mrb[54].mxu1  ;;  %v2617_v22 = vadd.f32 %v10029_v62, %v2350_v39 }
 0x283   : > { %v3878_v52 = vadd.f32 %v3877_v16, %v10736_v48  ;;  %v3879_v10 = vpop.f32.mrb[55].mxu1  ;;  %v4242_v60 = vmax.f32 %v3874_v38, 0.0 }
 0x284   : > { %9397 = vset.pattern.permute.xlu1 %v14167_v15  ;;  %v3166_v31 = vpack.c.bf16 %v3020_v12, %v3018_v46  ;;  %v3165_v24 = vpack.c.bf16 %v3019_v17, %v3017_v45  ;;  %v3880_v25 = vadd.f32 %v3879_v10, %v10739_v1  ;;  %v4243_v53 = vmax.f32 %v3876_v6, 0.0 }
 0x285   : > { %1179 = vperm.xlu1 %9397, %v569_v21   ;;  %v1642_v26 = vpop.permute.xlu1 %1641  ;;  %v4244_v51 = vmax.f32 %v3878_v52, 0.0 }
 0x286   : > { %v2096_v13 = vmul.f32 %v10006_v33, %v1642_v26  ;;  %v2097_v32 = vmul.f32 %v10009_v34, %v1642_v26  ;;  %3961 = vmatprep.mubr.bf16.mxu1 %v3166_v31  ;;  %v4245_v46 = vmax.f32 %v3880_v25, 0.0  ;;  %v2874_v25 = vmax.f32 %v2618_v18, 0.0 }
 0x287   : > { %3962 = vmatmul.mubr.bf16.gmra.mrb[88].mxu1 %v3165_v24  ;;  %v11484_v12 = vpack.c.bf16 %v4244_v51, %v4242_v60  ;;  %v2873_v60 = vmax.f32 %v2617_v22, 0.0 }
 0x288   : > { %v2352_v38 = vadd.f32 %v2096_v13, %v1310_v43  ;;  %v2353_v45 = vadd.f32 %v2097_v32, %v1311_v29  ;;  %v11486_v17 = vpack.c.bf16 %v4245_v46, %v4243_v53  ;;  %v498_v29 = vld [vmem:[%s9775_s23 + $0x188] sm:$0xff] }
 0x289   : > { %9398 = vset.pattern.permute.xlu1 %v14170_v14  ;;  %14249 = vst [vmem:[#allocation17_spill] sm:$0xff] %v11484_v12 }
 0x28a   : > { %1973 = vperm.xlu1 %9398, %v569_v21   ;;  %14250 = vst [vmem:[#allocation41_spill] sm:$0xff] %v11486_v17  ;;  %v1130_v16 = vpop.permute.xlu1 %1129  ;;  %v2620_v19 = vadd.f32 %v10032_v4, %v2353_v45  ;;  %v2619_v11 = vadd.f32 %v10029_v62, %v2352_v38  ;;  %v3513_v6 = vpop.f32.mrb[36].mxu0 }
 0x28b   : > { %v3514_v52 = vadd.f32 %v3513_v6, %v10736_v48  ;;  %v3515_v39 = vpop.f32.mrb[37].mxu0  ;;  %v1456_v32 = vmul.f32 %v10012_v36, %v1130_v16  ;;  %v1457_v18 = vmul.f32 %v10015_v37, %v1130_v16  ;;  %v1135_v38 = vpop.permute.xlu0 %1134  ;;  %v9500_v6 = vld [vmem:[%s14104_s5 + $0x90] ss:$8 sps:$4 sm:$0xff]   ;;  %v9502_v16 = vld [vmem:[%s14104_s5 + $0x94] ss:$8 sps:$4 sm:$0xff]  }
 0x28c   : > { %v2876_v51 = vmax.f32 %v2620_v19, 0.0  ;;  %v2875_v13 = vmax.f32 %v2619_v11, 0.0  ;;  %v3516_v21 = vadd.f32 %v3515_v39, %v10739_v1  ;;  %v3517_v10 = vpop.f32.mrb[38].mxu0  ;;  %4668 = vmatprep.subr.bf16.mxu1 %v9502_v16 }
 0x28d   : > { %v3518_v31 = vadd.f32 %v3517_v10, %v10736_v48  ;;  %v3519_v24 = vpop.f32.mrb[39].mxu0  ;;  %v4098_v45 = vmax.f32 %v3514_v52, 0.0  ;;  %4669 = vmatpush1.bf16.msra.mxu1 %v9500_v6  ;;  %v1458_v10 = vmul.f32 %v10012_v36, %v1135_v38  ;;  %v571_v6 = vld [vmem:[%s9775_s23 + $0x3d0] sm:$0xff] }
 0x28e   : > { %1977 = vperm.xlu1 %9398, %v9654_v28   ;;  %v3094_v43 = vpack.c.bf16 %v2876_v51, %v2874_v25  ;;  %v3093_v26 = vpack.c.bf16 %v2875_v13, %v2873_v60  ;;  %v3520_v46 = vadd.f32 %v3519_v24, %v10739_v1  ;;  %v4099_v25 = vmax.f32 %v3516_v21, 0.0 }
 0x28f   : > { %v1934_v53 = vpop.permute.xlu1 %1933  ;;  %v4100_v22 = vmax.f32 %v3518_v31, 0.0  ;;  %v1459_v31 = vmul.f32 %v10015_v37, %v1135_v38 }
 0x290   : > { %v2242_v19 = vmul.f32 %v10006_v33, %v1934_v53  ;;  %v2243_v11 = vmul.f32 %v10009_v34, %v1934_v53  ;;  %3601 = vmatprep.mubr.bf16.mxu0 %v3094_v43  ;;  %v4101_v28 = vmax.f32 %v3520_v46, 0.0  ;;  %v14251_v46 = vld [vmem:[#allocation19_spill] sm:$0xff] }
 0x291   : > { %3602 = vmatmul.mubr.bf16.gmra.mrb[72].mxu0 %v3093_v26  ;;  %v11507_v51 = vpack.c.bf16 %v4100_v22, %v4098_v45  ;;  %v770_v26 = vpop.permute.xlu0 %769  ;;  %v2098_v45 = vmul.f32 %v10006_v33, %v14251_v46  ;;  %v2099_v38 = vmul.f32 %v10009_v34, %v14251_v46 }
 0x292   : > { %9399 = vset.pattern.permute.xlu1 %v14167_v15  ;;  %v2498_v52 = vadd.f32 %v2242_v19, %v1456_v32  ;;  %v2499_v39 = vadd.f32 %v2243_v11, %v1457_v18  ;;  %v11509_v13 = vpack.c.bf16 %v4101_v28, %v4099_v25  ;;  %v1312_v22 = vmul.f32 %v10012_v36, %v770_v26 }
 0x293   : > { %824 = vperm.xlu1 %9399, %v498_v29   ;;  %v1938_v60 = vpop.permute.xlu1 %1937  ;;  %v1313_v19 = vmul.f32 %v10015_v37, %v770_v26 }
 0x294   : > { %v2244_v24 = vmul.f32 %v10006_v33, %v1938_v60  ;;  %v2245_v21 = vmul.f32 %v10009_v34, %v1938_v60  ;;  %v2766_v43 = vadd.f32 %v10032_v4, %v2499_v39  ;;  %v2765_v53 = vadd.f32 %v10029_v62, %v2498_v52 }
 0x295   : > { %v2355_v46 = vadd.f32 %v2099_v38, %v1313_v19 }
 0x296   : > { %v2500_v32 = vadd.f32 %v2244_v24, %v1458_v10  ;;  %v2501_v18 = vadd.f32 %v2245_v21, %v1459_v31  ;;  %v3021_v10 = vmax.f32 %v2765_v53, 0.0  ;;  %v2354_v24 = vadd.f32 %v2098_v45, %v1312_v22 }
 0x297   : > { %9400 = vset.pattern.permute.xlu1 %v14170_v14 }
 0x298   : > { %1689 = vperm.xlu1 %9400, %v498_v29   ;;  %v775_v11 = vpop.permute.xlu1 %774  ;;  %v2768_v16 = vadd.f32 %v10032_v4, %v2501_v18  ;;  %v2767_v25 = vadd.f32 %v10029_v62, %v2500_v32  ;;  %v3883_v28 = vpop.f32.mrb[56].mxu1  ;;  %v3022_v29 = vmax.f32 %v2766_v43, 0.0  ;;  %v2621_v38 = vadd.f32 %v10029_v62, %v2354_v24 }
 0x299   : > { %v3884_v52 = vadd.f32 %v3883_v28, %v10736_v48  ;;  %v3885_v39 = vpop.f32.mrb[57].mxu1  ;;  %v1314_v43 = vmul.f32 %v10012_v36, %v775_v11  ;;  %v1315_v47 = vmul.f32 %v10015_v37, %v775_v11  ;;  %v2622_v11 = vadd.f32 %v10032_v4, %v2355_v46 }
 0x29a   : > { %v3024_v60 = vmax.f32 %v2768_v16, 0.0  ;;  %v3023_v31 = vmax.f32 %v2767_v25, 0.0  ;;  %v3886_v21 = vadd.f32 %v3885_v39, %v10739_v1  ;;  %v3887_v26 = vpop.f32.mrb[58].mxu1 }
 0x29b   : > { %v3888_v18 = vadd.f32 %v3887_v26, %v10736_v48  ;;  %v3889_v12 = vpop.f32.mrb[59].mxu1  ;;  %v4246_v53 = vmax.f32 %v3884_v52, 0.0  ;;  %v9655_v26 = vld [vmem:[%s9775_s23 + $0x3d8] sm:$0xff] }
 0x29c   : > { %9401 = vset.pattern.permute.xlu1 %v14167_v15  ;;  %v3168_v32 = vpack.c.bf16 %v3024_v60, %v3022_v29  ;;  %v3167_v17 = vpack.c.bf16 %v3023_v31, %v3021_v10  ;;  %v3890_v16 = vadd.f32 %v3889_v12, %v10739_v1  ;;  %v4247_v19 = vmax.f32 %v3886_v21, 0.0  ;;  %v9503_v60 = vld [vmem:[%s14104_s5 + $0xa0] ss:$8 sps:$4 sm:$0xff]   ;;  %v9505_v10 = vld [vmem:[%s14104_s5 + $0xa4] ss:$8 sps:$4 sm:$0xff]  }
 0x29d   : > { %1189 = vperm.xlu1 %9401, %v571_v6   ;;  %v1650_v28 = vpop.permute.xlu1 %1649  ;;  %v4248_v25 = vmax.f32 %v3888_v18, 0.0  ;;  %4670 = vmatprep.subr.bf16.mxu1 %v9505_v10  ;;  %v2877_v18 = vmax.f32 %v2621_v38, 0.0  ;;  %v1145_v38 = vpop.permute.xlu0 %1144 }
 0x29e   : > { %v2100_v45 = vmul.f32 %v10006_v33, %v1650_v28  ;;  %v2101_v22 = vmul.f32 %v10009_v34, %v1650_v28  ;;  %3971 = vmatprep.mubr.bf16.mxu1 %v3168_v32  ;;  %v4249_v29 = vmax.f32 %v3890_v16, 0.0  ;;  %4671 = vmatpush1.bf16.msra.mxu1 %v9503_v60 }
 0x29f   : > { %3972 = vmatmul.mubr.bf16.gmra.mrb[92].mxu1 %v3167_v17  ;;  %v11539_v39 = vpack.c.bf16 %v4248_v25, %v4246_v53  ;;  %v500_v25 = vld [vmem:[%s9775_s23 + $0x198] sm:$0xff] }
 0x2a0   : > { %v2356_v12 = vadd.f32 %v2100_v45, %v1314_v43  ;;  %v2357_v52 = vadd.f32 %v2101_v22, %v1315_v47  ;;  %v11547_v31 = vpack.c.bf16 %v4249_v29, %v4247_v19 }
 0x2a1   : > { %9402 = vset.pattern.permute.xlu1 %v14170_v14  ;;  %14252 = vst [vmem:[#allocation19_spill] sm:$0xff] %v11539_v39 }
 0x2a2   : > { %1981 = vperm.xlu1 %9402, %v571_v6   ;;  %14253 = vst [vmem:[#allocation42_spill] sm:$0xff] %v11547_v31  ;;  %v1140_v24 = vpop.permute.xlu1 %1139  ;;  %v2624_v17 = vadd.f32 %v10032_v4, %v2357_v52  ;;  %v2623_v21 = vadd.f32 %v10029_v62, %v2356_v12  ;;  %v2878_v6 = vmax.f32 %v2622_v11, 0.0 }
 0x2a3   : > { %v3523_v47 = vpop.f32.mrb[40].mxu0  ;;  %v1460_v22 = vmul.f32 %v10012_v36, %v1140_v24  ;;  %v1461_v19 = vmul.f32 %v10015_v37, %v1140_v24 }
 0x2a4   : > { %v2880_v46 = vmax.f32 %v2624_v17, 0.0  ;;  %v2879_v32 = vmax.f32 %v2623_v21, 0.0  ;;  %v3524_v43 = vadd.f32 %v3523_v47, %v10736_v48  ;;  %v3525_v28 = vpop.f32.mrb[41].mxu0 }
 0x2a5   : > { %v3527_v16 = vpop.f32.mrb[42].mxu0  ;;  %v3526_v29 = vadd.f32 %v3525_v28, %v10739_v1  ;;  %v1462_v28 = vmul.f32 %v10012_v36, %v1145_v38 }
 0x2a6   : > { %1985 = vperm.xlu1 %9402, %v9655_v26   ;;  %v3096_v53 = vpack.c.bf16 %v2880_v46, %v2878_v6  ;;  %v3095_v45 = vpack.c.bf16 %v2879_v32, %v2877_v18  ;;  %v3528_v12 = vadd.f32 %v3527_v16, %v10736_v48  ;;  %v3529_v52 = vpop.f32.mrb[43].mxu0  ;;  %v4102_v21 = vmax.f32 %v3524_v43, 0.0 }
 0x2a7   : > { %v1942_v11 = vpop.permute.xlu1 %1941  ;;  %v3530_v17 = vadd.f32 %v3529_v52, %v10739_v1  ;;  %v4103_v46 = vmax.f32 %v3526_v29, 0.0  ;;  %v1463_v16 = vmul.f32 %v10015_v37, %v1145_v38 }
 0x2a8   : > { %v2246_v60 = vmul.f32 %v10006_v33, %v1942_v11  ;;  %v2247_v10 = vmul.f32 %v10009_v34, %v1942_v11  ;;  %3611 = vmatprep.mubr.bf16.mxu0 %v3096_v53  ;;  %v4104_v26 = vmax.f32 %v3528_v12, 0.0  ;;  %v14254_v12 = vld [vmem:[#allocation20_spill] sm:$0xff] }
 0x2a9   : > { %3612 = vmatmul.mubr.bf16.gmra.mrb[76].mxu0 %v3095_v45  ;;  %v4105_v6 = vmax.f32 %v3530_v17, 0.0  ;;  %v780_v45 = vpop.permute.xlu0 %779  ;;  %v2102_v38 = vmul.f32 %v10006_v33, %v14254_v12 }
 0x2aa   : > { %9403 = vset.pattern.permute.xlu1 %v14167_v15  ;;  %v2502_v24 = vadd.f32 %v2246_v60, %v1460_v22  ;;  %v2503_v47 = vadd.f32 %v2247_v10, %v1461_v19  ;;  %v11562_v32 = vpack.c.bf16 %v4104_v26, %v4102_v21  ;;  %v2103_v60 = vmul.f32 %v10009_v34, %v14254_v12 }
 0x2ab   : > { %834 = vperm.xlu1 %9403, %v500_v25   ;;  %v1946_v18 = vpop.permute.xlu1 %1945  ;;  %v11570_v53 = vpack.c.bf16 %v4105_v6, %v4103_v46  ;;  %v1316_v10 = vmul.f32 %v10012_v36, %v780_v45  ;;  %v1317_v17 = vmul.f32 %v10015_v37, %v780_v45  ;;  %v573_v6 = vld [vmem:[%s9775_s23 + $0x3e0] sm:$0xff] }
 0x2ac   : > { %v2248_v11 = vmul.f32 %v10006_v33, %v1946_v18  ;;  %v2249_v52 = vmul.f32 %v10009_v34, %v1946_v18  ;;  %v2770_v43 = vadd.f32 %v10032_v4, %v2503_v47  ;;  %v2769_v22 = vadd.f32 %v10029_v62, %v2502_v24 }
 0x2ae   : > { %v2504_v19 = vadd.f32 %v2248_v11, %v1462_v28  ;;  %v2505_v29 = vadd.f32 %v2249_v52, %v1463_v16  ;;  %v3026_v24 = vmax.f32 %v2770_v43, 0.0  ;;  %v3025_v18 = vmax.f32 %v2769_v22, 0.0  ;;  %v9506_v16 = vld [vmem:[%s14104_s5 + $0xb0] ss:$8 sps:$4 sm:$0xff]   ;;  %v9508_v43 = vld [vmem:[%s14104_s5 + $0xb4] ss:$8 sps:$4 sm:$0xff]  }
 0x2af   : > { %9404 = vset.pattern.permute.xlu1 %v14170_v14  ;;  %v2358_v11 = vadd.f32 %v2102_v38, %v1316_v10  ;;  %v2359_v52 = vadd.f32 %v2103_v60, %v1317_v17  ;;  %4672 = vmatprep.subr.bf16.mxu1 %v9508_v43 }
 0x2b0   : > { %1697 = vperm.xlu1 %9404, %v500_v25   ;;  %v2771_v21 = vadd.f32 %v10029_v62, %v2504_v19  ;;  %v2772_v26 = vadd.f32 %v10032_v4, %v2505_v29  ;;  %v785_v47 = vpop.permute.xlu1 %784  ;;  %4673 = vmatpush1.bf16.msra.mxu1 %v9506_v16 }
 0x2b1   : > { %v1319_v39 = vmul.f32 %v10015_v37, %v785_v47 }
 0x2b2   : > { %v3893_v25 = vpop.f32.mrb[60].mxu1  ;;  %v3028_v46 = vmax.f32 %v2772_v26, 0.0  ;;  %v3027_v28 = vmax.f32 %v2771_v21, 0.0  ;;  %v1318_v21 = vmul.f32 %v10012_v36, %v785_v47 }
 0x2b3   : > { %v3894_v45 = vadd.f32 %v3893_v25, %v10736_v48  ;;  %v3895_v19 = vpop.f32.mrb[61].mxu1 }
 0x2b4   : > { %9405 = vset.pattern.permute.xlu1 %v14167_v15  ;;  %v3896_v29 = vadd.f32 %v3895_v19, %v10739_v1  ;;  %v3897_v12 = vpop.f32.mrb[62].mxu1  ;;  %v3170_v26 = vpack.c.bf16 %v3028_v46, %v3026_v24  ;;  %v3169_v22 = vpack.c.bf16 %v3027_v28, %v3025_v18  ;;  %v2625_v24 = vadd.f32 %v10029_v62, %v2358_v11 }
 0x2b5   : > { %1199 = vperm.xlu1 %9405, %v573_v6   ;;  %v3898_v38 = vadd.f32 %v3897_v12, %v10736_v48  ;;  %v3899_v10 = vpop.f32.mrb[63].mxu1  ;;  %v2626_v46 = vadd.f32 %v10032_v4, %v2359_v52  ;;  %v4250_v18 = vmax.f32 %v3894_v45, 0.0  ;;  %v9656_v52 = vld [vmem:[%s9775_s23 + $0x3e8] sm:$0xff] }
 0x2b6   : > { %v3900_v31 = vadd.f32 %v3899_v10, %v10739_v1  ;;  %3981 = vmatprep.mubr.bf16.mxu1 %v3170_v26  ;;  %v4251_v28 = vmax.f32 %v3896_v29, 0.0  ;;  %v2881_v29 = vmax.f32 %v2625_v24, 0.0 }
 0x2b7   : > { %v1658_v60 = vpop.permute.xlu1 %1657  ;;  %v4252_v47 = vmax.f32 %v3898_v38, 0.0  ;;  %3982 = vmatmul.mubr.bf16.gmra.mrb[96].mxu1 %v3169_v22  ;;  %v2882_v38 = vmax.f32 %v2626_v46, 0.0 }
 0x2b8   : > { %v2104_v17 = vmul.f32 %v10006_v33, %v1658_v60  ;;  %v2105_v25 = vmul.f32 %v10009_v34, %v1658_v60  ;;  %v4253_v12 = vmax.f32 %v3900_v31, 0.0 }
 0x2b9   : > { %9406 = vset.pattern.permute.xlu1 %v14170_v14  ;;  %v11600_v60 = vpack.c.bf16 %v4252_v47, %v4250_v18 }
 0x2ba   : > { %v2360_v19 = vadd.f32 %v2104_v17, %v1318_v21  ;;  %v2361_v43 = vadd.f32 %v2105_v25, %v1319_v39  ;;  %1989 = vperm.xlu1 %9406, %v573_v6   ;;  %v11604_v10 = vpack.c.bf16 %v4253_v12, %v4251_v28  ;;  %v502_v25 = vld [vmem:[%s9775_s23 + $0x1a8] sm:$0xff] }
 0x2bb   : > { %14255 = vst [vmem:[#allocation20_spill] sm:$0xff] %v11600_v60 }
 0x2bc   : > { %v2627_v16 = vadd.f32 %v10029_v62, %v2360_v19  ;;  %v2628_v11 = vadd.f32 %v10032_v4, %v2361_v43  ;;  %v1150_v26 = vpop.permute.xlu1 %1149  ;;  %14256 = vst [vmem:[#allocation43_spill] sm:$0xff] %v11604_v10  ;;  %v3533_v45 = vpop.f32.mrb[44].mxu0 }
 0x2bd   : > { %v3534_v39 = vadd.f32 %v3533_v45, %v10736_v48  ;;  %v3535_v31 = vpop.f32.mrb[45].mxu0  ;;  %v1464_v47 = vmul.f32 %v10012_v36, %v1150_v26  ;;  %v1465_v19 = vmul.f32 %v10015_v37, %v1150_v26  ;;  %v9509_v26 = vld [vmem:[%s14104_s5 + $0xc0] ss:$8 sps:$4 sm:$0xff]   ;;  %v9511_v45 = vld [vmem:[%s14104_s5 + $0xc4] ss:$8 sps:$4 sm:$0xff]  }
 0x2be   : > { %1993 = vperm.xlu1 %9406, %v9656_v52   ;;  %v2884_v22 = vmax.f32 %v2628_v11, 0.0  ;;  %v2883_v21 = vmax.f32 %v2627_v16, 0.0  ;;  %v3537_v6 = vpop.f32.mrb[46].mxu0  ;;  %v3536_v28 = vadd.f32 %v3535_v31, %v10739_v1  ;;  %v1155_v11 = vpop.permute.xlu0 %1154  ;;  %4674 = vmatprep.subr.bf16.mxu1 %v9511_v45 }
 0x2bf   : > { %v3538_v43 = vadd.f32 %v3537_v6, %v10736_v48  ;;  %v3539_v46 = vpop.f32.mrb[47].mxu0  ;;  %4675 = vmatpush1.bf16.msra.mxu1 %v9509_v26  ;;  %v1467_v60 = vmul.f32 %v10015_v37, %v1155_v11 }
 0x2c0   : > { %v3098_v17 = vpack.c.bf16 %v2884_v22, %v2882_v38  ;;  %v3097_v18 = vpack.c.bf16 %v2883_v21, %v2881_v29  ;;  %v3540_v52 = vadd.f32 %v3539_v46, %v10739_v1  ;;  %v4106_v38 = vmax.f32 %v3534_v39, 0.0 }
 0x2c1   : > { %v1950_v12 = vpop.permute.xlu1 %1949  ;;  %v4108_v22 = vmax.f32 %v3538_v43, 0.0  ;;  %v4107_v6 = vmax.f32 %v3536_v28, 0.0  ;;  %v1466_v46 = vmul.f32 %v10012_v36, %v1155_v11 }
 0x2c2   : > { %v2250_v24 = vmul.f32 %v10006_v33, %v1950_v12  ;;  %v2251_v16 = vmul.f32 %v10009_v34, %v1950_v12  ;;  %9407 = vset.pattern.permute.xlu1 %v14167_v15  ;;  %3621 = vmatprep.mubr.bf16.mxu0 %v3098_v17  ;;  %v4109_v31 = vmax.f32 %v3540_v52, 0.0 }
 0x2c3   : > { %844 = vperm.xlu1 %9407, %v502_v25   ;;  %3622 = vmatmul.mubr.bf16.gmra.mrb[80].mxu0 %v3097_v18  ;;  %v11623_v17 = vpack.c.bf16 %v4108_v22, %v4106_v38 }
 0x2c4   : > { %v2506_v29 = vadd.f32 %v2250_v24, %v1464_v47  ;;  %v2507_v21 = vadd.f32 %v2251_v16, %v1465_v19  ;;  %v11630_v18 = vpack.c.bf16 %v4109_v31, %v4107_v6  ;;  %v790_v47 = vpop.permute.xlu0 %789  ;;  %v14257_v16 = vld [vmem:[#allocation22_spill] sm:$0xff]  ;;  %v575_v31 = vld [vmem:[%s9775_s23 + $0x3f0] sm:$0xff] }
 0x2c5   : > { %v1954_v12 = vpop.permute.xlu1 %1953  ;;  %v2106_v11 = vmul.f32 %v10006_v33, %v14257_v16  ;;  %v2107_v52 = vmul.f32 %v10009_v34, %v14257_v16  ;;  %v1320_v26 = vmul.f32 %v10012_v36, %v790_v47  ;;  %v1321_v45 = vmul.f32 %v10015_v37, %v790_v47 }
 0x2c6   : > { %v2252_v10 = vmul.f32 %v10006_v33, %v1954_v12  ;;  %v2253_v39 = vmul.f32 %v10009_v34, %v1954_v12  ;;  %v2773_v19 = vadd.f32 %v10029_v62, %v2506_v29  ;;  %v2774_v28 = vadd.f32 %v10032_v4, %v2507_v21 }
 0x2c7   : > { %9408 = vset.pattern.permute.xlu1 %v14170_v14  ;;  %v2362_v12 = vadd.f32 %v2106_v11, %v1320_v26 }
 0x2c8   : > { %v2508_v43 = vadd.f32 %v2252_v10, %v1466_v46  ;;  %v2509_v24 = vadd.f32 %v2253_v39, %v1467_v60  ;;  %1705 = vperm.xlu1 %9408, %v502_v25   ;;  %v3030_v10 = vmax.f32 %v2774_v28, 0.0  ;;  %v3029_v21 = vmax.f32 %v2773_v19, 0.0 }
 0x2c9   : > { %v2363_v46 = vadd.f32 %v2107_v52, %v1321_v45  ;;  %v2629_v45 = vadd.f32 %v10029_v62, %v2362_v12 }
 0x2ca   : > { %v2775_v38 = vadd.f32 %v10029_v62, %v2508_v43  ;;  %v2776_v22 = vadd.f32 %v10032_v4, %v2509_v24  ;;  %v795_v29 = vpop.permute.xlu1 %794  ;;  %v3903_v60 = vpop.f32.mrb[64].mxu1 }
 0x2cb   : > { %v3904_v39 = vadd.f32 %v3903_v60, %v10736_v48  ;;  %v3905_v16 = vpop.f32.mrb[65].mxu1  ;;  %v1322_v42 = vmul.f32 %v10012_v36, %v795_v29  ;;  %v1323_v19 = vmul.f32 %v10015_v37, %v795_v29 }
 0x2cc   : > { %9409 = vset.pattern.permute.xlu1 %v14167_v15  ;;  %v3032_v25 = vmax.f32 %v2776_v22, 0.0  ;;  %v3031_v6 = vmax.f32 %v2775_v38, 0.0  ;;  %v3906_v47 = vadd.f32 %v3905_v16, %v10739_v1  ;;  %v3907_v43 = vpop.f32.mrb[66].mxu1  ;;  %v2630_v38 = vadd.f32 %v10032_v4, %v2363_v46 }
 0x2cd   : > { %1209 = vperm.xlu1 %9409, %v575_v31   ;;  %v3908_v50 = vadd.f32 %v3907_v43, %v10736_v48  ;;  %v3909_v28 = vpop.f32.mrb[67].mxu1  ;;  %v4254_v22 = vmax.f32 %v3904_v39, 0.0  ;;  %v2885_v43 = vmax.f32 %v2629_v45, 0.0  ;;  %v1165_v45 = vpop.permute.xlu0 %1164 }
 0x2ce   : > { %v3172_v35 = vpack.c.bf16 %v3032_v25, %v3030_v10  ;;  %v3171_v24 = vpack.c.bf16 %v3031_v6, %v3029_v21  ;;  %v3910_v26 = vadd.f32 %v3909_v28, %v10739_v1  ;;  %v4255_v10 = vmax.f32 %v3906_v47, 0.0 }
 0x2cf   : > { %v1666_v57 = vpop.permute.xlu1 %1665  ;;  %v4256_v60 = vmax.f32 %v3908_v50, 0.0  ;;  %v2886_v16 = vmax.f32 %v2630_v38, 0.0 }
 0x2d0   : > { %v2108_v11 = vmul.f32 %v10006_v33, %v1666_v57  ;;  %v2109_v52 = vmul.f32 %v10009_v34, %v1666_v57  ;;  %3991 = vmatprep.mubr.bf16.mxu1 %v3172_v35  ;;  %v4257_v21 = vmax.f32 %v3910_v26, 0.0  ;;  %v9512_v57 = vld [vmem:[%s14104_s5 + $0xd0] ss:$8 sps:$4 sm:$0xff]   ;;  %v9514_v35 = vld [vmem:[%s14104_s5 + $0xd4] ss:$8 sps:$4 sm:$0xff]  }
 0x2d1   : > { %9410 = vset.pattern.permute.xlu1 %v14170_v14  ;;  %3992 = vmatmul.mubr.bf16.gmra.mrb[100].mxu1 %v3171_v24  ;;  %v11655_v6 = vpack.c.bf16 %v4256_v60, %v4254_v22  ;;  %v504_v26 = vld [vmem:[%s9775_s23 + $0x1b8] sm:$0xff] }
 0x2d2   : > { %v2364_v25 = vadd.f32 %v2108_v11, %v1322_v42  ;;  %v2365_v29 = vadd.f32 %v2109_v52, %v1323_v19  ;;  %1997 = vperm.xlu1 %9410, %v575_v31   ;;  %v11665_v42 = vpack.c.bf16 %v4257_v21, %v4255_v10  ;;  %4676 = vmatprep.subr.bf16.mxu1 %v9514_v35  ;;  %v9657_v31 = vld [vmem:[%s9775_s23 + $0x3f8] sm:$0xff] }
 0x2d3   : > { %14258 = vst [vmem:[#allocation22_spill] sm:$0xff] %v11655_v6  ;;  %4677 = vmatpush1.bf16.msra.mxu1 %v9512_v57 }
 0x2d4   : > { %v2631_v50 = vadd.f32 %v10029_v62, %v2364_v25  ;;  %v2632_v12 = vadd.f32 %v10032_v4, %v2365_v29  ;;  %v1160_v46 = vpop.permute.xlu1 %1159  ;;  %14259 = vst [vmem:[#allocation44_spill] sm:$0xff] %v11665_v42  ;;  %v3543_v39 = vpop.f32.mrb[48].mxu0 }
 0x2d5   : > { %v3544_v28 = vadd.f32 %v3543_v39, %v10736_v48  ;;  %v3545_v19 = vpop.f32.mrb[49].mxu0  ;;  %v1468_v60 = vmul.f32 %v10012_v36, %v1160_v46  ;;  %v1469_v10 = vmul.f32 %v10015_v37, %v1160_v46 }
 0x2d6   : > { %2001 = vperm.xlu1 %9410, %v9657_v31   ;;  %v2888_v47 = vmax.f32 %v2632_v12, 0.0  ;;  %v2887_v24 = vmax.f32 %v2631_v50, 0.0  ;;  %v3547_v11 = vpop.f32.mrb[50].mxu0  ;;  %v3546_v25 = vadd.f32 %v3545_v19, %v10739_v1  ;;  %v1470_v19 = vmul.f32 %v10012_v36, %v1165_v45 }
 0x2d7   : > { %v3548_v29 = vadd.f32 %v3547_v11, %v10736_v48  ;;  %v3549_v21 = vpop.f32.mrb[51].mxu0  ;;  %v4110_v12 = vmax.f32 %v3544_v28, 0.0  ;;  %v1471_v11 = vmul.f32 %v10015_v37, %v1165_v45 }
 0x2d8   : > { %v3100_v52 = vpack.c.bf16 %v2888_v47, %v2886_v16  ;;  %v3099_v22 = vpack.c.bf16 %v2887_v24, %v2885_v43  ;;  %v3550_v50 = vadd.f32 %v3549_v21, %v10739_v1  ;;  %v4111_v47 = vmax.f32 %v3546_v25, 0.0 }
 0x2d9   : > { %v1958_v38 = vpop.permute.xlu1 %1957  ;;  %v4112_v31 = vmax.f32 %v3548_v29, 0.0  ;;  %v14260_v29 = vld [vmem:[#allocation23_spill] sm:$0xff] }
 0x2da   : > { %v2254_v57 = vmul.f32 %v10006_v33, %v1958_v38  ;;  %v2255_v35 = vmul.f32 %v10009_v34, %v1958_v38  ;;  %9411 = vset.pattern.permute.xlu1 %v14167_v15  ;;  %3631 = vmatprep.mubr.bf16.mxu0 %v3100_v52  ;;  %v4113_v16 = vmax.f32 %v3550_v50, 0.0  ;;  %v800_v52 = vpop.permute.xlu0 %799  ;;  %v2110_v45 = vmul.f32 %v10006_v33, %v14260_v29 }
 0x2db   : > { %854 = vperm.xlu1 %9411, %v504_v26   ;;  %3632 = vmatmul.mubr.bf16.gmra.mrb[84].mxu0 %v3099_v22  ;;  %v11678_v24 = vpack.c.bf16 %v4112_v31, %v4110_v12  ;;  %v1325_v50 = vmul.f32 %v10015_v37, %v800_v52 }
 0x2dc   : > { %v2510_v46 = vadd.f32 %v2254_v57, %v1468_v60  ;;  %v2511_v39 = vadd.f32 %v2255_v35, %v1469_v10  ;;  %v11685_v28 = vpack.c.bf16 %v4113_v16, %v4111_v47  ;;  %v2111_v57 = vmul.f32 %v10009_v34, %v14260_v29  ;;  %v505_v16 = vld [vmem:[%s9775_s23 + $0x1c0] sm:$0xff]  ;;  %v9523_v29 = vld [vmem:[%s14104_s5 + $0xf4] ss:$8 sps:$4 sm:$0xff]  }
 0x2dd   : > { %v1962_v43 = vpop.permute.xlu1 %1961  ;;  %v1324_v35 = vmul.f32 %v10012_v36, %v800_v52  ;;  %v9520_v47 = vld [vmem:[%s14104_s5 + $0xe4] ss:$8 sps:$4 sm:$0xff]  }
 0x2de   : > { %v2256_v38 = vmul.f32 %v10006_v33, %v1962_v43  ;;  %v2257_v21 = vmul.f32 %v10009_v34, %v1962_v43  ;;  %v2777_v22 = vadd.f32 %v10029_v62, %v2510_v46  ;;  %v2778_v60 = vadd.f32 %v10032_v4, %v2511_v39  ;;  %v9517_v39 = vld [vmem:[%s14106_s7 + $0x4] ss:$8 sps:$4 sm:$0xff]   ;;  %4678 = vmatprep.subr.bf16.mxu1 %v9520_v47 }
 0x2df   : > { %9413 = vset.pattern.permute.xlu1 %v14170_v14  ;;  %v2366_v52 = vadd.f32 %v2110_v45, %v1324_v35  ;;  %5911 = vmatprep.subr.bf16.mxu0 %v9517_v39 }
 0x2e0   : > { %v2512_v10 = vadd.f32 %v2256_v38, %v1470_v19  ;;  %v2513_v25 = vadd.f32 %v2257_v21, %v1471_v11  ;;  %1713 = vperm.xlu1 %9413, %v504_v26   ;;  %v9515_v26 = vld [vmem:[%s14106_s7] ss:$8 sps:$4 sm:$0xff]   ;;  %v3034_v43 = vmax.f32 %v2778_v60, 0.0  ;;  %v3033_v11 = vmax.f32 %v2777_v22, 0.0 }
 0x2e1   : > { %v9518_v21 = vld [vmem:[%s14104_s5 + $0xe0] ss:$8 sps:$4 sm:$0xff]   ;;  %5912 = vmatpush1.bf16.msra.mxu0 %v9515_v26 }
 0x2e2   : > { %v2779_v12 = vadd.f32 %v10029_v62, %v2512_v10  ;;  %v2780_v31 = vadd.f32 %v10032_v4, %v2513_v25  ;;  %v805_v46 = vpop.permute.xlu1 %804  ;;  %v2367_v10 = vadd.f32 %v2111_v57, %v1325_v50  ;;  %v3913_v25 = vpop.f32.mrb[68].mxu1  ;;  %4679 = vmatpush1.bf16.msra.mxu1 %v9518_v21  ;;  %v9521_v50 = vld [vmem:[%s14104_s5 + $0xf0] ss:$8 sps:$4 sm:$0xff]  }
 0x2e3   : > { %v3914_v6 = vadd.f32 %v3913_v25, %v10736_v48  ;;  %v3915_v42 = vpop.f32.mrb[69].mxu1  ;;  %v1326_v22 = vmul.f32 %v10012_v36, %v805_v46  ;;  %4680 = vmatprep.subr.bf16.mxu1 %v9523_v29 }
 0x2e4   : > { %9414 = vset.pattern.permute.xlu1 %v14167_v15  ;;  %v3036_v19 = vmax.f32 %v2780_v31, 0.0  ;;  %v3035_v38 = vmax.f32 %v2779_v12, 0.0  ;;  %v1327_v12 = vmul.f32 %v10015_v37, %v805_v46  ;;  %v3916_v45 = vadd.f32 %v3915_v42, %v10739_v1  ;;  %v3917_v57 = vpop.f32.mrb[70].mxu1 }
 0x2e5   : > { %859 = vperm.xlu1 %9414, %v505_v16   ;;  %v3918_v39 = vadd.f32 %v3917_v57, %v10736_v48  ;;  %v3919_v47 = vpop.f32.mrb[71].mxu1  ;;  %v2633_v46 = vadd.f32 %v10029_v62, %v2366_v52  ;;  %v2634_v42 = vadd.f32 %v10032_v4, %v2367_v10 }
 0x2e6   : > { %v3174_v60 = vpack.c.bf16 %v3036_v19, %v3034_v43  ;;  %v3173_v31 = vpack.c.bf16 %v3035_v38, %v3033_v11  ;;  %v3920_v19 = vadd.f32 %v3919_v47, %v10739_v1  ;;  %v4258_v11 = vmax.f32 %v3914_v6, 0.0  ;;  %4681 = vmatpush1.bf16.msra.mxu1 %v9521_v50 }
 0x2e7   : > { %v1674_v35 = vpop.permute.xlu1 %1673  ;;  %v4260_v38 = vmax.f32 %v3918_v39, 0.0  ;;  %v4259_v57 = vmax.f32 %v3916_v45, 0.0  ;;  %v2890_v6 = vmax.f32 %v2634_v42, 0.0 }
 0x2e8   : > { %v2112_v43 = vmul.f32 %v10006_v33, %v1674_v35  ;;  %v2113_v26 = vmul.f32 %v10009_v34, %v1674_v35  ;;  %4001 = vmatprep.mubr.bf16.mxu1 %v3174_v60  ;;  %v4261_v35 = vmax.f32 %v3920_v19, 0.0 }
 0x2e9   : > { %9415 = vset.pattern.permute.xlu1 %v14170_v14  ;;  %4002 = vmatmul.mubr.bf16.gmra.mrb[104].mxu1 %v3173_v31  ;;  %v11728_v29 = vpack.c.bf16 %v4260_v38, %v4258_v11 }
 0x2ea   : > { %v2368_v21 = vadd.f32 %v2112_v43, %v1326_v22  ;;  %v2369_v25 = vadd.f32 %v2113_v26, %v1327_v12  ;;  %1717 = vperm.xlu1 %9415, %v505_v16   ;;  %v11732_v47 = vpack.c.bf16 %v4261_v35, %v4259_v57  ;;  %v2889_v22 = vmax.f32 %v2633_v46, 0.0  ;;  %v508_v43 = vld [vmem:[%s9775_s23 + $0x1d8] sm:$0xff] }
 0x2eb   : > { %14261 = vst [vmem:[#allocation23_spill] sm:$0xff] %v11728_v29 }
 0x2ec   : > { %v2635_v52 = vadd.f32 %v10029_v62, %v2368_v21  ;;  %v2636_v10 = vadd.f32 %v10032_v4, %v2369_v25  ;;  %v1170_v60 = vpop.permute.xlu1 %1169  ;;  %14262 = vst [vmem:[#allocation45_spill] sm:$0xff] %v11732_v47  ;;  %v3553_v16 = vpop.f32.mrb[52].mxu0 }
 0x2ed   : > { %v3555_v45 = vpop.f32.mrb[53].mxu0  ;;  %v1472_v26 = vmul.f32 %v10012_v36, %v1170_v60  ;;  %v1473_v19 = vmul.f32 %v10015_v37, %v1170_v60  ;;  %v3554_v11 = vadd.f32 %v3553_v16, %v10736_v48 }
 0x2ee   : > { %1721 = vperm.xlu1 %9415, %v9658_v5   ;;  %v2892_v31 = vmax.f32 %v2636_v10, 0.0  ;;  %v2891_v12 = vmax.f32 %v2635_v52, 0.0  ;;  %v3556_v38 = vadd.f32 %v3555_v45, %v10739_v1  ;;  %v3557_v21 = vpop.f32.mrb[54].mxu0  ;;  %v1175_v5 = vpop.permute.xlu0 %1174  ;;  %v9524_v52 = vld [vmem:[%s14106_s7 + $0x10] ss:$8 sps:$4 sm:$0xff]  }
 0x2ef   : > { %v3558_v42 = vadd.f32 %v3557_v21, %v10736_v48  ;;  %v3559_v35 = vpop.f32.mrb[55].mxu0  ;;  %v9526_v10 = vld [vmem:[%s14106_s7 + $0x14] ss:$8 sps:$4 sm:$0xff]   ;;  %v1474_v21 = vmul.f32 %v10012_v36, %v1175_v5 }
 0x2f0   : > { %v3102_v39 = vpack.c.bf16 %v2892_v31, %v2890_v6  ;;  %v3101_v50 = vpack.c.bf16 %v2891_v12, %v2889_v22  ;;  %v3560_v60 = vadd.f32 %v3559_v35, %v10739_v1  ;;  %5913 = vmatprep.subr.bf16.mxu0 %v9526_v10  ;;  %v4114_v12 = vmax.f32 %v3554_v11, 0.0 }
 0x2f1   : > { %v1966_v25 = vpop.permute.xlu1 %1965  ;;  %v4116_v6 = vmax.f32 %v3558_v42, 0.0  ;;  %v4115_v16 = vmax.f32 %v3556_v38, 0.0  ;;  %5914 = vmatpush1.bf16.msra.mxu0 %v9524_v52 }
 0x2f2   : > { %v2258_v46 = vmul.f32 %v10006_v33, %v1966_v25  ;;  %v2259_v57 = vmul.f32 %v10009_v34, %v1966_v25  ;;  %9416 = vset.pattern.permute.xlu1 %v14167_v15  ;;  %3641 = vmatprep.mubr.bf16.mxu0 %v3102_v39  ;;  %v4117_v45 = vmax.f32 %v3560_v60, 0.0  ;;  %v1475_v25 = vmul.f32 %v10015_v37, %v1175_v5  ;;  %v14263_v5 = vld [vmem:[#allocation24_spill] sm:$0xff] }
 0x2f3   : > { %874 = vperm.xlu1 %9416, %v508_v43   ;;  %3642 = vmatmul.mubr.bf16.gmra.mrb[88].mxu0 %v3101_v50  ;;  %v2115_v52 = vmul.f32 %v10009_v34, %v14263_v5 }
 0x2f4   : > { %v2514_v31 = vadd.f32 %v2258_v46, %v1472_v26  ;;  %v2515_v22 = vadd.f32 %v2259_v57, %v1473_v19  ;;  %v11756_v50 = vpack.c.bf16 %v4117_v45, %v4115_v16  ;;  %v11758_v26 = vpack.c.bf16 %v4116_v6, %v4114_v12  ;;  %v810_v19 = vpop.permute.xlu0 %809  ;;  %v509_v12 = vld [vmem:[%s9775_s23 + $0x1e0] sm:$0xff] }
 0x2f5   : > { %v1970_v39 = vpop.permute.xlu1 %1969  ;;  %v2114_v57 = vmul.f32 %v10006_v33, %v14263_v5  ;;  %v1328_v35 = vmul.f32 %v10012_v36, %v810_v19  ;;  %v1329_v10 = vmul.f32 %v10015_v37, %v810_v19 }
 0x2f6   : > { %v2260_v29 = vmul.f32 %v10006_v33, %v1970_v39  ;;  %v2261_v47 = vmul.f32 %v10009_v34, %v1970_v39  ;;  %v2781_v11 = vadd.f32 %v10029_v62, %v2514_v31  ;;  %v2782_v38 = vadd.f32 %v10032_v4, %v2515_v22 }
 0x2f7   : > { %9419 = vset.pattern.permute.xlu1 %v14170_v14  ;;  %v2370_v16 = vadd.f32 %v2114_v57, %v1328_v35  ;;  %v2371_v45 = vadd.f32 %v2115_v52, %v1329_v10 }
 0x2f8   : > { %v2516_v42 = vadd.f32 %v2260_v29, %v1474_v21  ;;  %v2517_v46 = vadd.f32 %v2261_v47, %v1475_v25  ;;  %1729 = vperm.xlu1 %9419, %v508_v43   ;;  %v3038_v29 = vmax.f32 %v2782_v38, 0.0  ;;  %v3037_v43 = vmax.f32 %v2781_v11, 0.0 }
 0x2f9   : > { %v2637_v57 = vadd.f32 %v10029_v62, %v2370_v16  ;;  %v9532_v16 = vld [vmem:[%s14108_s9 + $0x4] ss:$8 sps:$4 sm:$0xff]  }
 0x2fa   : > { %v2783_v60 = vadd.f32 %v10029_v62, %v2516_v42  ;;  %v2784_v6 = vadd.f32 %v10032_v4, %v2517_v46  ;;  %v815_v31 = vpop.permute.xlu1 %814  ;;  %7172 = vmatprep.subr.bf16.mxu1 %v9532_v16  ;;  %v1185_v16 = vpop.permute.xlu0 %1184 }
 0x2fb   : > { %v3923_v39 = vpop.f32.mrb[72].mxu1  ;;  %v1330_v46 = vmul.f32 %v10012_v36, %v815_v31  ;;  %v1331_v56 = vmul.f32 %v10015_v37, %v815_v31  ;;  %v2638_v31 = vadd.f32 %v10032_v4, %v2371_v45 }
 0x2fc   : > { %9420 = vset.pattern.permute.xlu1 %v14167_v15  ;;  %v3040_v47 = vmax.f32 %v2784_v6, 0.0  ;;  %v3039_v22 = vmax.f32 %v2783_v60, 0.0  ;;  %v3924_v19 = vadd.f32 %v3923_v39, %v10736_v48  ;;  %v3925_v5 = vpop.f32.mrb[73].mxu1  ;;  %v9527_v60 = vld [vmem:[%s14106_s7 + $0x20] ss:$8 sps:$4 sm:$0xff]  }
 0x2fd   : > { %879 = vperm.xlu1 %9420, %v509_v12   ;;  %v3927_v58 = vpop.f32.mrb[74].mxu1  ;;  %v3926_v35 = vadd.f32 %v3925_v5, %v10739_v1  ;;  %v9529_v6 = vld [vmem:[%s14106_s7 + $0x24] ss:$8 sps:$4 sm:$0xff]  }
 0x2fe   : > { %v3176_v21 = vpack.c.bf16 %v3040_v47, %v3038_v29  ;;  %v3175_v25 = vpack.c.bf16 %v3039_v22, %v3037_v43  ;;  %v3928_v52 = vadd.f32 %v3927_v58, %v10736_v48  ;;  %v3929_v10 = vpop.f32.mrb[75].mxu1  ;;  %v4262_v58 = vmax.f32 %v3924_v19, 0.0  ;;  %5915 = vmatprep.subr.bf16.mxu0 %v9529_v6 }
 0x2ff   : > { %v1682_v42 = vpop.permute.xlu1 %1681  ;;  %v3930_v43 = vadd.f32 %v3929_v10, %v10739_v1  ;;  %5916 = vmatpush1.bf16.msra.mxu0 %v9527_v60  ;;  %v4263_v5 = vmax.f32 %v3926_v35, 0.0  ;;  %v2894_v19 = vmax.f32 %v2638_v31, 0.0 }
 0x300   : > { %v2116_v38 = vmul.f32 %v10006_v33, %v1682_v42  ;;  %v2117_v11 = vmul.f32 %v10009_v34, %v1682_v42  ;;  %4011 = vmatprep.mubr.bf16.mxu1 %v3176_v21  ;;  %v4264_v22 = vmax.f32 %v3928_v52, 0.0 }
 0x301   : > { %9421 = vset.pattern.permute.xlu1 %v14170_v14  ;;  %4012 = vmatmul.mubr.bf16.gmra.mrb[108].mxu1 %v3175_v25  ;;  %v4265_v25 = vmax.f32 %v3930_v43, 0.0 }
 0x302   : > { %v2372_v29 = vadd.f32 %v2116_v38, %v1330_v46  ;;  %v2373_v47 = vadd.f32 %v2117_v11, %v1331_v56  ;;  %1733 = vperm.xlu1 %9421, %v509_v12   ;;  %v11794_v56 = vpack.c.bf16 %v4264_v22, %v4262_v58  ;;  %v9659_v12 = vld [vmem:[%s9775_s23 + $0x1e8] sm:$0xff]  ;;  %v2893_v46 = vmax.f32 %v2637_v57, 0.0 }
 0x303   : > { %v11797_v52 = vpack.c.bf16 %v4265_v25, %v4263_v5 }
 0x304   : > { %v2639_v39 = vadd.f32 %v10029_v62, %v2372_v29  ;;  %v2640_v21 = vadd.f32 %v10032_v4, %v2373_v47  ;;  %v1180_v45 = vpop.permute.xlu1 %1179  ;;  %14264 = vst [vmem:[#allocation24_spill] sm:$0xff] %v11794_v56  ;;  %v512_v29 = vld [vmem:[%s9775_s23 + $0x1f8] sm:$0xff] }
 0x305   : > { %14265 = vst [vmem:[#allocation46_spill] sm:$0xff] %v11797_v52  ;;  %v1476_v43 = vmul.f32 %v10012_v36, %v1180_v45  ;;  %v1477_v35 = vmul.f32 %v10015_v37, %v1180_v45 }
 0x306   : > { %1737 = vperm.xlu1 %9421, %v9659_v12   ;;  %v2896_v42 = vmax.f32 %v2640_v21, 0.0  ;;  %v2895_v38 = vmax.f32 %v2639_v39, 0.0 }
 0x308   : > { %v3104_v6 = vpack.c.bf16 %v2896_v42, %v2894_v19  ;;  %v3103_v47 = vpack.c.bf16 %v2895_v38, %v2893_v46 }
 0x309   : > { %v3563_v11 = vpop.f32.mrb[56].mxu0  ;;  %v1974_v31 = vpop.permute.xlu1 %1973 }
 0x30a   : > { %v3565_v10 = vpop.f32.mrb[57].mxu0  ;;  %v3564_v60 = vadd.f32 %v3563_v11, %v10736_v48  ;;  %v2262_v39 = vmul.f32 %v10006_v33, %v1974_v31  ;;  %v2263_v21 = vmul.f32 %v10009_v34, %v1974_v31  ;;  %9422 = vset.pattern.permute.xlu1 %v14167_v15  ;;  %3651 = vmatprep.mubr.bf16.mxu0 %v3104_v6 }
 0x30b   : > { %v3566_v58 = vadd.f32 %v3565_v10, %v10739_v1  ;;  %v3567_v22 = vpop.f32.mrb[58].mxu0  ;;  %894 = vperm.xlu1 %9422, %v512_v29   ;;  %3652 = vmatmul.mubr.bf16.gmra.mrb[92].mxu0 %v3103_v47  ;;  %v1478_v10 = vmul.f32 %v10012_v36, %v1185_v16 }
 0x30c   : > { %v3568_v57 = vadd.f32 %v3567_v22, %v10736_v48  ;;  %v3569_v25 = vpop.f32.mrb[59].mxu0  ;;  %v2518_v12 = vadd.f32 %v2262_v39, %v1476_v43  ;;  %v2519_v19 = vadd.f32 %v2263_v21, %v1477_v35  ;;  %v4118_v42 = vmax.f32 %v3564_v60, 0.0  ;;  %v820_v43 = vpop.permute.xlu0 %819  ;;  %v14267_v39 = vld [vmem:[#allocation25_spill] sm:$0xff] }
 0x30d   : > { %v3570_v5 = vadd.f32 %v3569_v25, %v10739_v1  ;;  %v4119_v46 = vmax.f32 %v3566_v58, 0.0  ;;  %v1978_v11 = vpop.permute.xlu1 %1977  ;;  %v1479_v22 = vmul.f32 %v10015_v37, %v1185_v16  ;;  %v2118_v16 = vmul.f32 %v10006_v33, %v14267_v39 }
 0x30e   : > { %v4120_v45 = vmax.f32 %v3568_v57, 0.0  ;;  %v2264_v31 = vmul.f32 %v10006_v33, %v1978_v11  ;;  %v2265_v56 = vmul.f32 %v10009_v34, %v1978_v11  ;;  %v2785_v35 = vadd.f32 %v10029_v62, %v2518_v12 }
 0x30f   : > { %v4121_v38 = vmax.f32 %v3570_v5, 0.0  ;;  %9424 = vset.pattern.permute.xlu1 %v14170_v14  ;;  %v2786_v60 = vadd.f32 %v10032_v4, %v2519_v19  ;;  %v2119_v21 = vmul.f32 %v10009_v34, %v14267_v39  ;;  %v1332_v14 = vmul.f32 %v10012_v36, %v820_v43 }
 0x310   : > { %v11816_v47 = vpack.c.bf16 %v4120_v45, %v4118_v42  ;;  %v2520_v58 = vadd.f32 %v2264_v31, %v1478_v10  ;;  %v2521_v57 = vadd.f32 %v2265_v56, %v1479_v22  ;;  %1745 = vperm.xlu1 %9424, %v512_v29   ;;  %v1333_v25 = vmul.f32 %v10015_v37, %v820_v43  ;;  %v9533_v56 = vld [vmem:[%s14106_s7 + $0x30] ss:$8 sps:$4 sm:$0xff]   ;;  %v9535_v29 = vld [vmem:[%s14106_s7 + $0x34] ss:$8 sps:$4 sm:$0xff]  }
 0x311   : > { %v11814_v6 = vpack.c.bf16 %v4121_v38, %v4119_v46  ;;  %v3042_v19 = vmax.f32 %v2786_v60, 0.0  ;;  %v3041_v46 = vmax.f32 %v2785_v35, 0.0  ;;  %v2374_v11 = vadd.f32 %v2118_v16, %v1332_v14  ;;  %5917 = vmatprep.subr.bf16.mxu0 %v9535_v29 }
 0x312   : > { %14266 = vst [vmem:[#allocation47_spill] sm:$0xff] %v11816_v47  ;;  %v2787_v5 = vadd.f32 %v10029_v62, %v2520_v58  ;;  %v2788_v45 = vadd.f32 %v10032_v4, %v2521_v57  ;;  %v825_v12 = vpop.permute.xlu1 %824  ;;  %v2375_v10 = vadd.f32 %v2119_v21, %v1333_v25  ;;  %5918 = vmatpush1.bf16.msra.mxu0 %v9533_v56 }
 0x313   : > { %v1334_v39 = vmul.f32 %v10012_v36, %v825_v12  ;;  %v1335_v60 = vmul.f32 %v10015_v37, %v825_v12  ;;  %v2641_v25 = vadd.f32 %v10029_v62, %v2374_v11  ;;  %v9536_v11 = vld [vmem:[%s14106_s7 + $0x40] ss:$8 sps:$4 sm:$0xff]  }
 0x314   : > { %v3044_v42 = vmax.f32 %v2788_v45, 0.0  ;;  %v3043_v38 = vmax.f32 %v2787_v5, 0.0  ;;  %v2642_v5 = vadd.f32 %v10032_v4, %v2375_v10  ;;  %v9538_v10 = vld [vmem:[%s14106_s7 + $0x44] ss:$8 sps:$4 sm:$0xff]  }
 0x315   : > { %5919 = vmatprep.subr.bf16.mxu0 %v9538_v10 }
 0x316   : > { %v3933_v22 = vpop.f32.mrb[76].mxu1  ;;  %v3178_v58 = vpack.c.bf16 %v3044_v42, %v3042_v19  ;;  %v3177_v57 = vpack.c.bf16 %v3043_v38, %v3041_v46  ;;  %5920 = vmatpush1.bf16.msra.mxu0 %v9536_v11 }
 0x317   : > { %v3934_v31 = vadd.f32 %v3933_v22, %v10736_v48  ;;  %v3935_v43 = vpop.f32.mrb[77].mxu1  ;;  %v1690_v47 = vpop.permute.xlu1 %1689 }
 0x318   : > { %v3936_v52 = vadd.f32 %v3935_v43, %v10739_v1  ;;  %v3937_v27 = vpop.f32.mrb[78].mxu1  ;;  %v2120_v16 = vmul.f32 %v10006_v33, %v1690_v47  ;;  %v2121_v21 = vmul.f32 %v10009_v34, %v1690_v47  ;;  %4021 = vmatprep.mubr.bf16.mxu1 %v3178_v58 }
 0x319   : > { %v3938_v35 = vadd.f32 %v3937_v27, %v10736_v48  ;;  %v3939_v14 = vpop.f32.mrb[79].mxu1  ;;  %4022 = vmatmul.mubr.bf16.gmra.mrb[112].mxu1 %v3177_v57  ;;  %v4266_v56 = vmax.f32 %v3934_v31, 0.0  ;;  %v2897_v57 = vmax.f32 %v2641_v25, 0.0 }
 0x31a   : > { %v3940_v45 = vadd.f32 %v3939_v14, %v10739_v1  ;;  %v2376_v19 = vadd.f32 %v2120_v16, %v1334_v39  ;;  %v2377_v42 = vadd.f32 %v2121_v21, %v1335_v60  ;;  %v4267_v12 = vmax.f32 %v3936_v52, 0.0 }
 0x31b   : > { %v4268_v29 = vmax.f32 %v3938_v35, 0.0  ;;  %v2898_v52 = vmax.f32 %v2642_v5, 0.0  ;;  %v1195_v5 = vpop.permute.xlu0 %1194 }
 0x31c   : > { %v4269_v46 = vmax.f32 %v3940_v45, 0.0  ;;  %v2643_v38 = vadd.f32 %v10029_v62, %v2376_v19  ;;  %v2644_v47 = vadd.f32 %v10032_v4, %v2377_v42  ;;  %v1190_v22 = vpop.permute.xlu1 %1189 }
 0x31d   : > { %v11844_v27 = vpack.c.bf16 %v4268_v29, %v4266_v56  ;;  %v1480_v45 = vmul.f32 %v10012_v36, %v1190_v22  ;;  %v1481_v25 = vmul.f32 %v10015_v37, %v1190_v22  ;;  %v1483_v22 = vmul.f32 %v10015_v37, %v1195_v5 }
 0x31e   : > { %v11854_v31 = vpack.c.bf16 %v4269_v46, %v4267_v12  ;;  %v3573_v43 = vpop.f32.mrb[60].mxu0  ;;  %v2900_v58 = vmax.f32 %v2644_v47, 0.0  ;;  %v2899_v39 = vmax.f32 %v2643_v38, 0.0 }
 0x31f   : > { %14268 = vst [vmem:[#allocation25_spill] sm:$0xff] %v11844_v27  ;;  %v3574_v60 = vadd.f32 %v3573_v43, %v10736_v48  ;;  %v3575_v35 = vpop.f32.mrb[61].mxu0 }
 0x320   : > { %14269 = vst [vmem:[#allocation48_spill] sm:$0xff] %v11854_v31  ;;  %v3577_v16 = vpop.f32.mrb[62].mxu0  ;;  %v3106_v21 = vpack.c.bf16 %v2900_v58, %v2898_v52  ;;  %v3105_v14 = vpack.c.bf16 %v2899_v39, %v2897_v57  ;;  %v3576_v56 = vadd.f32 %v3575_v35, %v10739_v1  ;;  %v1482_v35 = vmul.f32 %v10012_v36, %v1195_v5 }
 0x321   : > { %v3578_v29 = vadd.f32 %v3577_v16, %v10736_v48  ;;  %v1982_v19 = vpop.permute.xlu1 %1981  ;;  %v3579_v42 = vpop.f32.mrb[63].mxu0  ;;  %v4122_v47 = vmax.f32 %v3574_v60, 0.0 }
 0x322   : > { %v2266_v12 = vmul.f32 %v10006_v33, %v1982_v19  ;;  %v2267_v46 = vmul.f32 %v10009_v34, %v1982_v19  ;;  %v3580_v38 = vadd.f32 %v3579_v42, %v10739_v1  ;;  %3661 = vmatprep.mubr.bf16.mxu0 %v3106_v21  ;;  %v4123_v58 = vmax.f32 %v3576_v56, 0.0  ;;  %v830_v60 = vpop.permute.xlu0 %829 }
 0x323   : > { %v4124_v11 = vmax.f32 %v3578_v29, 0.0  ;;  %3662 = vmatmul.mubr.bf16.gmra.mrb[96].mxu0 %v3105_v14  ;;  %v14272_v29 = vld [vmem:[#allocation26_spill] sm:$0xff]  ;;  %v1336_v5 = vmul.f32 %v10012_v36, %v830_v60 }
 0x324   : > { %v2522_v10 = vadd.f32 %v2266_v12, %v1480_v45  ;;  %v2523_v43 = vadd.f32 %v2267_v46, %v1481_v25  ;;  %v4125_v52 = vmax.f32 %v3580_v38, 0.0  ;;  %v2122_v25 = vmul.f32 %v10006_v33, %v14272_v29 }
 0x325   : > { %v1986_v57 = vpop.permute.xlu1 %1985  ;;  %v11864_v39 = vpack.c.bf16 %v4124_v11, %v4122_v47  ;;  %v2123_v12 = vmul.f32 %v10009_v34, %v14272_v29  ;;  %v1337_v46 = vmul.f32 %v10015_v37, %v830_v60 }
 0x326   : > { %v2268_v16 = vmul.f32 %v10006_v33, %v1986_v57  ;;  %v2269_v19 = vmul.f32 %v10009_v34, %v1986_v57  ;;  %v11870_v42 = vpack.c.bf16 %v4125_v52, %v4123_v58  ;;  %v2789_v21 = vadd.f32 %v10029_v62, %v2522_v10 }
 0x327   : > { %14270 = vst [vmem:[#allocation49_spill] sm:$0xff] %v11864_v39  ;;  %v2790_v14 = vadd.f32 %v10032_v4, %v2523_v43 }
 0x328   : > { %14271 = vst [vmem:[#allocation50_spill] sm:$0xff] %v11870_v42  ;;  %v2524_v45 = vadd.f32 %v2268_v16, %v1482_v35  ;;  %v2525_v56 = vadd.f32 %v2269_v19, %v1483_v22  ;;  %v3045_v58 = vmax.f32 %v2789_v21, 0.0  ;;  %v2378_v35 = vadd.f32 %v2122_v25, %v1336_v5 }
 0x329   : > { %v3046_v52 = vmax.f32 %v2790_v14, 0.0  ;;  %v2379_v22 = vadd.f32 %v2123_v12, %v1337_v46 }
 0x32a   : > { %v2791_v38 = vadd.f32 %v10029_v62, %v2524_v45  ;;  %v2792_v47 = vadd.f32 %v10032_v4, %v2525_v56  ;;  %v835_v11 = vpop.permute.xlu1 %834  ;;  %v3943_v10 = vpop.f32.mrb[80].mxu1  ;;  %v2645_v5 = vadd.f32 %v10029_v62, %v2378_v35 }
 0x32b   : > { %v3944_v16 = vadd.f32 %v3943_v10, %v10736_v48  ;;  %v3945_v19 = vpop.f32.mrb[81].mxu1  ;;  %v1338_v45 = vmul.f32 %v10012_v36, %v835_v11  ;;  %v1339_v14 = vmul.f32 %v10015_v37, %v835_v11  ;;  %v2646_v46 = vadd.f32 %v10032_v4, %v2379_v22  ;;  %v9544_v11 = vld [vmem:[%s14106_s7 + $0x54] ss:$8 sps:$4 sm:$0xff]  }
 0x32c   : > { %v3048_v43 = vmax.f32 %v2792_v47, 0.0  ;;  %v3047_v57 = vmax.f32 %v2791_v38, 0.0  ;;  %v3946_v29 = vadd.f32 %v3945_v19, %v10739_v1  ;;  %v3947_v27 = vpop.f32.mrb[82].mxu1  ;;  %5921 = vmatprep.subr.bf16.mxu0 %v9544_v11 }
 0x32d   : > { %v3948_v56 = vadd.f32 %v3947_v27, %v10736_v48  ;;  %v3949_v42 = vpop.f32.mrb[83].mxu1  ;;  %v4270_v38 = vmax.f32 %v3944_v16, 0.0  ;;  %v9542_v27 = vld [vmem:[%s14106_s7 + $0x50] ss:$8 sps:$4 sm:$0xff]   ;;  %v2902_v16 = vmax.f32 %v2646_v46, 0.0 }
 0x32e   : > { %v3180_v31 = vpack.c.bf16 %v3048_v43, %v3046_v52  ;;  %v3179_v60 = vpack.c.bf16 %v3047_v57, %v3045_v58  ;;  %v3950_v12 = vadd.f32 %v3949_v42, %v10739_v1  ;;  %v4271_v10 = vmax.f32 %v3946_v29, 0.0  ;;  %5922 = vmatpush1.bf16.msra.mxu0 %v9542_v27 }
 0x32f   : > { %v1698_v39 = vpop.permute.xlu1 %1697  ;;  %v4272_v47 = vmax.f32 %v3948_v56, 0.0 }
 0x330   : > { %v2124_v21 = vmul.f32 %v10006_v33, %v1698_v39  ;;  %v2125_v25 = vmul.f32 %v10009_v34, %v1698_v39  ;;  %4031 = vmatprep.mubr.bf16.mxu1 %v3180_v31  ;;  %v4273_v42 = vmax.f32 %v3950_v12, 0.0 }
 0x331   : > { %4032 = vmatmul.mubr.bf16.gmra.mrb[116].mxu1 %v3179_v60  ;;  %v11898_v31 = vpack.c.bf16 %v4272_v47, %v4270_v38  ;;  %v2901_v60 = vmax.f32 %v2645_v5, 0.0 }
 0x332   : > { %v2380_v39 = vadd.f32 %v2124_v21, %v1338_v45  ;;  %v2381_v52 = vadd.f32 %v2125_v25, %v1339_v14  ;;  %v11902_v35 = vpack.c.bf16 %v4273_v42, %v4271_v10  ;;  %v1205_v10 = vpop.permute.xlu0 %1204 }
 0x333   : > { %14273 = vst [vmem:[#allocation26_spill] sm:$0xff] %v11898_v31 }
 0x334   : > { %v2647_v43 = vadd.f32 %v10029_v62, %v2380_v39  ;;  %v2648_v58 = vadd.f32 %v10032_v4, %v2381_v52  ;;  %v1200_v57 = vpop.permute.xlu1 %1199  ;;  %14274 = vst [vmem:[#allocation51_spill] sm:$0xff] %v11902_v35  ;;  %v3583_v22 = vpop.f32.mrb[64].mxu0 }
 0x335   : > { %v3584_v29 = vadd.f32 %v3583_v22, %v10736_v48  ;;  %v3585_v45 = vpop.f32.mrb[65].mxu0  ;;  %v1484_v12 = vmul.f32 %v10012_v36, %v1200_v57  ;;  %v1485_v46 = vmul.f32 %v10015_v37, %v1200_v57  ;;  %v1487_v57 = vmul.f32 %v10015_v37, %v1205_v10 }
 0x336   : > { %v2904_v19 = vmax.f32 %v2648_v58, 0.0  ;;  %v2903_v56 = vmax.f32 %v2647_v43, 0.0  ;;  %v3587_v14 = vpop.f32.mrb[66].mxu0  ;;  %v3586_v38 = vadd.f32 %v3585_v45, %v10739_v1  ;;  %v1486_v45 = vmul.f32 %v10012_v36, %v1205_v10 }
 0x337   : > { %v3588_v47 = vadd.f32 %v3587_v14, %v10736_v48  ;;  %v3589_v11 = vpop.f32.mrb[67].mxu0  ;;  %v4126_v42 = vmax.f32 %v3584_v29, 0.0  ;;  %v840_v29 = vpop.permute.xlu0 %839 }
 0x338   : > { %v3108_v21 = vpack.c.bf16 %v2904_v19, %v2902_v16  ;;  %v3107_v25 = vpack.c.bf16 %v2903_v56, %v2901_v60  ;;  %v3590_v52 = vadd.f32 %v3589_v11, %v10739_v1  ;;  %v4127_v19 = vmax.f32 %v3586_v38, 0.0 }
 0x339   : > { %v1990_v27 = vpop.permute.xlu1 %1989  ;;  %v4128_v43 = vmax.f32 %v3588_v47, 0.0  ;;  %v14277_v47 = vld [vmem:[#allocation27_spill] sm:$0xff]  ;;  %v1340_v10 = vmul.f32 %v10012_v36, %v840_v29 }
 0x33a   : > { %v2270_v5 = vmul.f32 %v10006_v33, %v1990_v27  ;;  %v2271_v39 = vmul.f32 %v10009_v34, %v1990_v27  ;;  %3671 = vmatprep.mubr.bf16.mxu0 %v3108_v21  ;;  %v4129_v16 = vmax.f32 %v3590_v52, 0.0 }
 0x33b   : > { %3672 = vmatmul.mubr.bf16.gmra.mrb[100].mxu0 %v3107_v25  ;;  %v11912_v56 = vpack.c.bf16 %v4128_v43, %v4126_v42 }
 0x33c   : > { %v2526_v58 = vadd.f32 %v2270_v5, %v1484_v12  ;;  %v2527_v22 = vadd.f32 %v2271_v39, %v1485_v46  ;;  %v11918_v11 = vpack.c.bf16 %v4129_v16, %v4127_v19  ;;  %v2126_v46 = vmul.f32 %v10006_v33, %v14277_v47 }
 0x33d   : > { %v1994_v60 = vpop.permute.xlu1 %1993  ;;  %14275 = vst [vmem:[#allocation52_spill] sm:$0xff] %v11912_v56  ;;  %v2127_v5 = vmul.f32 %v10009_v34, %v14277_v47  ;;  %v1341_v39 = vmul.f32 %v10015_v37, %v840_v29 }
 0x33e   : > { %v2272_v14 = vmul.f32 %v10006_v33, %v1994_v60  ;;  %v2273_v27 = vmul.f32 %v10009_v34, %v1994_v60  ;;  %14276 = vst [vmem:[#allocation53_spill] sm:$0xff] %v11918_v11  ;;  %v2793_v21 = vadd.f32 %v10029_v62, %v2526_v58  ;;  %v2794_v25 = vadd.f32 %v10032_v4, %v2527_v22  ;;  %v9545_v58 = vld [vmem:[%s14106_s7 + $0x60] ss:$8 sps:$4 sm:$0xff]   ;;  %v9547_v22 = vld [vmem:[%s14106_s7 + $0x64] ss:$8 sps:$4 sm:$0xff]  }
 0x33f   : > { %5923 = vmatprep.subr.bf16.mxu0 %v9547_v22 }
 0x340   : > { %v2528_v12 = vadd.f32 %v2272_v14, %v1486_v45  ;;  %v2529_v38 = vadd.f32 %v2273_v27, %v1487_v57  ;;  %v3050_v19 = vmax.f32 %v2794_v25, 0.0  ;;  %v3049_v45 = vmax.f32 %v2793_v21, 0.0  ;;  %5924 = vmatpush1.bf16.msra.mxu0 %v9545_v58 }
 0x341   : > { %v2382_v14 = vadd.f32 %v2126_v46, %v1340_v10  ;;  %v2383_v27 = vadd.f32 %v2127_v5, %v1341_v39 }
 0x342   : > { %v2795_v52 = vadd.f32 %v10029_v62, %v2528_v12  ;;  %v2796_v42 = vadd.f32 %v10032_v4, %v2529_v38  ;;  %v845_v43 = vpop.permute.xlu1 %844  ;;  %v3953_v16 = vpop.f32.mrb[84].mxu1 }
 0x343   : > { %v3954_v29 = vadd.f32 %v3953_v16, %v10736_v48  ;;  %v3955_v12 = vpop.f32.mrb[85].mxu1  ;;  %v1342_v56 = vmul.f32 %v10012_v36, %v845_v43  ;;  %v1343_v21 = vmul.f32 %v10015_v37, %v845_v43  ;;  %v2649_v39 = vadd.f32 %v10029_v62, %v2382_v14 }
 0x344   : > { %v3052_v60 = vmax.f32 %v2796_v42, 0.0  ;;  %v3051_v57 = vmax.f32 %v2795_v52, 0.0  ;;  %v3956_v38 = vadd.f32 %v3955_v12, %v10739_v1  ;;  %v3957_v47 = vpop.f32.mrb[86].mxu1  ;;  %v2650_v52 = vadd.f32 %v10032_v4, %v2383_v27 }
 0x345   : > { %v3958_v11 = vadd.f32 %v3957_v47, %v10736_v48  ;;  %v3959_v42 = vpop.f32.mrb[87].mxu1  ;;  %v4274_v58 = vmax.f32 %v3954_v29, 0.0  ;;  %v2905_v29 = vmax.f32 %v2649_v39, 0.0 }
 0x346   : > { %v3182_v31 = vpack.c.bf16 %v3052_v60, %v3050_v19  ;;  %v3181_v35 = vpack.c.bf16 %v3051_v57, %v3049_v45  ;;  %v3960_v10 = vadd.f32 %v3959_v42, %v10739_v1  ;;  %v4275_v16 = vmax.f32 %v3956_v38, 0.0 }
 0x347   : > { %v1706_v25 = vpop.permute.xlu1 %1705  ;;  %v4276_v22 = vmax.f32 %v3958_v11, 0.0  ;;  %v9553_v11 = vld [vmem:[%s14106_s7 + $0x74] ss:$8 sps:$4 sm:$0xff]   ;;  %v2906_v14 = vmax.f32 %v2650_v52, 0.0 }
 0x348   : > { %v2128_v46 = vmul.f32 %v10006_v33, %v1706_v25  ;;  %v2129_v5 = vmul.f32 %v10009_v34, %v1706_v25  ;;  %4041 = vmatprep.mubr.bf16.mxu1 %v3182_v31  ;;  %v4277_v45 = vmax.f32 %v3960_v10, 0.0  ;;  %v9551_v31 = vld [vmem:[%s14106_s7 + $0x70] ss:$8 sps:$4 sm:$0xff]   ;;  %5925 = vmatprep.subr.bf16.mxu0 %v9553_v11 }
 0x349   : > { %4042 = vmatmul.mubr.bf16.gmra.mrb[120].mxu1 %v3181_v35  ;;  %v11946_v57 = vpack.c.bf16 %v4276_v22, %v4274_v58  ;;  %5926 = vmatpush1.bf16.msra.mxu0 %v9551_v31 }
 0x34a   : > { %v2384_v19 = vadd.f32 %v2128_v46, %v1342_v56  ;;  %v2385_v60 = vadd.f32 %v2129_v5, %v1343_v21  ;;  %v11956_v35 = vpack.c.bf16 %v4277_v45, %v4275_v16  ;;  %v1215_v21 = vpop.permute.xlu0 %1214 }
 0x34b   : > { %14278 = vst [vmem:[#allocation27_spill] sm:$0xff] %v11946_v57 }
 0x34c   : > { %v2651_v43 = vadd.f32 %v10029_v62, %v2384_v19  ;;  %v2652_v12 = vadd.f32 %v10032_v4, %v2385_v60  ;;  %v1210_v47 = vpop.permute.xlu1 %1209  ;;  %14279 = vst [vmem:[#allocation54_spill] sm:$0xff] %v11956_v35  ;;  %v3593_v56 = vpop.f32.mrb[68].mxu0 }
 0x34d   : > { %v3594_v25 = vadd.f32 %v3593_v56, %v10736_v48  ;;  %v3595_v42 = vpop.f32.mrb[69].mxu0  ;;  %v1488_v58 = vmul.f32 %v10012_v36, %v1210_v47  ;;  %v1489_v39 = vmul.f32 %v10015_v37, %v1210_v47  ;;  %v1491_v47 = vmul.f32 %v10015_v37, %v1215_v21 }
 0x34e   : > { %v2908_v27 = vmax.f32 %v2652_v12, 0.0  ;;  %v2907_v38 = vmax.f32 %v2651_v43, 0.0  ;;  %v3597_v46 = vpop.f32.mrb[70].mxu0  ;;  %v3596_v22 = vadd.f32 %v3595_v42, %v10739_v1  ;;  %v1490_v42 = vmul.f32 %v10012_v36, %v1215_v21 }
 0x34f   : > { %v3598_v16 = vadd.f32 %v3597_v46, %v10736_v48  ;;  %v3599_v52 = vpop.f32.mrb[71].mxu0  ;;  %v4130_v12 = vmax.f32 %v3594_v25, 0.0  ;;  %v850_v46 = vpop.permute.xlu0 %849 }
 0x350   : > { %v3110_v5 = vpack.c.bf16 %v2908_v27, %v2906_v14  ;;  %v3109_v10 = vpack.c.bf16 %v2907_v38, %v2905_v29  ;;  %v3600_v43 = vadd.f32 %v3599_v52, %v10739_v1  ;;  %v4131_v27 = vmax.f32 %v3596_v22, 0.0 }
 0x351   : > { %v1998_v19 = vpop.permute.xlu1 %1997  ;;  %v4132_v31 = vmax.f32 %v3598_v16, 0.0  ;;  %v14282_v16 = vld [vmem:[#allocation29_spill] sm:$0xff]  ;;  %v1344_v21 = vmul.f32 %v10012_v36, %v850_v46 }
 0x352   : > { %v2274_v60 = vmul.f32 %v10006_v33, %v1998_v19  ;;  %v2275_v45 = vmul.f32 %v10009_v34, %v1998_v19  ;;  %3681 = vmatprep.mubr.bf16.mxu0 %v3110_v5  ;;  %v4133_v14 = vmax.f32 %v3600_v43, 0.0 }
 0x353   : > { %3682 = vmatmul.mubr.bf16.gmra.mrb[104].mxu0 %v3109_v10  ;;  %v11966_v38 = vpack.c.bf16 %v4132_v31, %v4130_v12 }
 0x354   : > { %v2530_v11 = vadd.f32 %v2274_v60, %v1488_v58  ;;  %v2531_v56 = vadd.f32 %v2275_v45, %v1489_v39  ;;  %v11972_v5 = vpack.c.bf16 %v4133_v14, %v4131_v27  ;;  %v2130_v39 = vmul.f32 %v10006_v33, %v14282_v16 }
 0x355   : > { %v2002_v29 = vpop.permute.xlu1 %2001  ;;  %14280 = vst [vmem:[#allocation55_spill] sm:$0xff] %v11966_v38  ;;  %v2131_v60 = vmul.f32 %v10009_v34, %v14282_v16  ;;  %v1345_v45 = vmul.f32 %v10015_v37, %v850_v46 }
 0x356   : > { %v2276_v19 = vmul.f32 %v10006_v33, %v2002_v29  ;;  %v2277_v52 = vmul.f32 %v10009_v34, %v2002_v29  ;;  %14281 = vst [vmem:[#allocation56_spill] sm:$0xff] %v11972_v5  ;;  %v2797_v25 = vadd.f32 %v10029_v62, %v2530_v11  ;;  %v2798_v10 = vadd.f32 %v10032_v4, %v2531_v56 }
 0x358   : > { %v2532_v58 = vadd.f32 %v2276_v19, %v1490_v42  ;;  %v2533_v22 = vadd.f32 %v2277_v52, %v1491_v47  ;;  %v3054_v14 = vmax.f32 %v2798_v10, 0.0  ;;  %v3053_v27 = vmax.f32 %v2797_v25, 0.0 }
 0x359   : > { %v2386_v42 = vadd.f32 %v2130_v39, %v1344_v21  ;;  %v2387_v47 = vadd.f32 %v2131_v60, %v1345_v45 }
 0x35a   : > { %v2799_v43 = vadd.f32 %v10029_v62, %v2532_v58  ;;  %v2800_v12 = vadd.f32 %v10032_v4, %v2533_v22  ;;  %v855_v31 = vpop.permute.xlu1 %854  ;;  %v3963_v11 = vpop.f32.mrb[88].mxu1 }
 0x35b   : > { %v3964_v19 = vadd.f32 %v3963_v11, %v10736_v48  ;;  %v3965_v52 = vpop.f32.mrb[89].mxu1  ;;  %v1346_v58 = vmul.f32 %v10012_v36, %v855_v31  ;;  %v1347_v10 = vmul.f32 %v10015_v37, %v855_v31  ;;  %v2653_v21 = vadd.f32 %v10029_v62, %v2386_v42  ;;  %v9556_v31 = vld [vmem:[%s14106_s7 + $0x84] ss:$8 sps:$4 sm:$0xff]  }
 0x35c   : > { %v3056_v56 = vmax.f32 %v2800_v12, 0.0  ;;  %v3055_v29 = vmax.f32 %v2799_v43, 0.0  ;;  %v3966_v16 = vadd.f32 %v3965_v52, %v10739_v1  ;;  %v3967_v57 = vpop.f32.mrb[90].mxu1  ;;  %v2654_v45 = vadd.f32 %v10032_v4, %v2387_v47  ;;  %5927 = vmatprep.subr.bf16.mxu0 %v9556_v31 }
 0x35d   : > { %v3968_v22 = vadd.f32 %v3967_v57, %v10736_v48  ;;  %v3969_v5 = vpop.f32.mrb[91].mxu1  ;;  %v4278_v43 = vmax.f32 %v3964_v19, 0.0  ;;  %v9554_v57 = vld [vmem:[%s14106_s7 + $0x80] ss:$8 sps:$4 sm:$0xff]  }
 0x35e   : > { %v3184_v35 = vpack.c.bf16 %v3056_v56, %v3054_v14  ;;  %v3183_v46 = vpack.c.bf16 %v3055_v29, %v3053_v27  ;;  %v3970_v60 = vadd.f32 %v3969_v5, %v10739_v1  ;;  %v4279_v11 = vmax.f32 %v3966_v16, 0.0  ;;  %v865_v56 = vpop.permute.xlu0 %864  ;;  %5928 = vmatpush1.bf16.msra.mxu0 %v9554_v57 }
 0x35f   : > { %v1714_v38 = vpop.permute.xlu1 %1713  ;;  %v4280_v12 = vmax.f32 %v3968_v22, 0.0  ;;  %v2910_v52 = vmax.f32 %v2654_v45, 0.0 }
 0x360   : > { %v2132_v25 = vmul.f32 %v10006_v33, %v1714_v38  ;;  %v2133_v39 = vmul.f32 %v10009_v34, %v1714_v38  ;;  %4051 = vmatprep.mubr.bf16.mxu1 %v3184_v35  ;;  %v4281_v5 = vmax.f32 %v3970_v60, 0.0 }
 0x361   : > { %4052 = vmatmul.mubr.bf16.gmra.mrb[124].mxu1 %v3183_v46  ;;  %v12001_v35 = vpack.c.bf16 %v4280_v12, %v4278_v43  ;;  %v2909_v46 = vmax.f32 %v2653_v21, 0.0  ;;  %v9541_v12 = vld [vmem:[%s14108_s9 + $0x14] ss:$8 sps:$4 sm:$0xff]  }
 0x362   : > { %v2388_v38 = vadd.f32 %v2132_v25, %v1346_v58  ;;  %v2389_v14 = vadd.f32 %v2133_v39, %v1347_v10  ;;  %4682 = vmatprep.mubr.bf16.mxu1 %v11115_v44  ;;  %v12005_v47 = vpack.c.bf16 %v4281_v5, %v4279_v11  ;;  %v9530_v10 = vld [vmem:[%s14108_s9] ss:$8 sps:$4 sm:$0xff]   ;;  %v1726_v43 = vpop.permute.xlu0 %1725 }
 0x364   : > { %v2655_v27 = vadd.f32 %v10029_v62, %v2388_v38  ;;  %v2656_v29 = vadd.f32 %v10032_v4, %v2389_v14  ;;  %v860_v42 = vpop.permute.xlu1 %859  ;;  %v3603_v19 = vpop.f32.mrb[72].mxu0 }
 0x365   : > { %v3604_v22 = vadd.f32 %v3603_v19, %v10736_v48  ;;  %v3605_v44 = vpop.f32.mrb[73].mxu0  ;;  %v1348_v45 = vmul.f32 %v10012_v36, %v860_v42  ;;  %v1349_v21 = vmul.f32 %v10015_v37, %v860_v42  ;;  %v9539_v42 = vld [vmem:[%s14108_s9 + $0x10] ss:$8 sps:$4 sm:$0xff]  }
 0x366   : > { %v2912_v16 = vmax.f32 %v2656_v29, 0.0  ;;  %v2911_v58 = vmax.f32 %v2655_v27, 0.0  ;;  %v3607_v25 = vpop.f32.mrb[74].mxu0  ;;  %v3606_v57 = vadd.f32 %v3605_v44, %v10739_v1 }
 0x367   : > { %v3608_v31 = vadd.f32 %v3607_v25, %v10736_v48  ;;  %v3609_v38 = vpop.f32.mrb[75].mxu0  ;;  %v4134_v29 = vmax.f32 %v3604_v22, 0.0 }
 0x368   : > { %v3112_v39 = vpack.c.bf16 %v2912_v16, %v2910_v52  ;;  %v3111_v60 = vpack.c.bf16 %v2911_v58, %v2909_v46  ;;  %v3610_v27 = vadd.f32 %v3609_v38, %v10739_v1  ;;  %v9550_v46 = vld [vmem:[%s14108_s9 + $0x24] ss:$8 sps:$4 sm:$0xff]   ;;  %v1350_v58 = vmul.f32 %v10012_v36, %v865_v56 }
 0x369   : > { %v1718_v11 = vpop.permute.xlu1 %1717  ;;  %4683 = vmatmul.mubr.bf16.vlgmr.msra.gmra.mrb[128].mxu1 %v11055_v8  ;;  %v4136_v19 = vmax.f32 %v3608_v31, 0.0  ;;  %v4135_v44 = vmax.f32 %v3606_v57, 0.0  ;;  %v9548_v57 = vld [vmem:[%s14108_s9 + $0x20] ss:$8 sps:$4 sm:$0xff]  }
 0x36a   : > { %v2134_v14 = vmul.f32 %v10006_v33, %v1718_v11  ;;  %v2135_v5 = vmul.f32 %v10009_v34, %v1718_v11  ;;  %3691 = vmatprep.mubr.bf16.mxu0 %v3112_v39  ;;  %4692 = vmatprep.mubr.bf16.mxu1 %v11122_v54  ;;  %v4137_v8 = vmax.f32 %v3610_v27, 0.0 }
 0x36b   : > { %3692 = vmatmul.mubr.bf16.gmra.mrb[108].mxu0 %v3111_v60  ;;  %7173 = vmatpush1.bf16.msra.mxu1 %v9530_v10  ;;  %v12030_v22 = vpack.c.bf16 %v4136_v19, %v4134_v29  ;;  %v1351_v10 = vmul.f32 %v10015_v37, %v865_v56  ;;  %v2138_v60 = vmul.f32 %v10006_v33, %v1726_v43 }
 0x36c   : > { %v2390_v52 = vadd.f32 %v2134_v14, %v1348_v45  ;;  %v2391_v16 = vadd.f32 %v2135_v5, %v1349_v21  ;;  %7174 = vmatprep.subr.bf16.mxu1 %v9541_v12  ;;  %v870_v45 = vpop.permute.xlu0 %869  ;;  %v2139_v12 = vmul.f32 %v10009_v34, %v1726_v43  ;;  %v12042_v11 = vpack.c.bf16 %v4137_v8, %v4135_v44  ;;  %v9559_v43 = vld [vmem:[%s14108_s9 + $0x34] ss:$8 sps:$4 sm:$0xff]   ;;  %v9560_v8 = vld [vmem:[%s14106_s7 + $0x90] ss:$8 sps:$4 sm:$0xff]  }
 0x36d   : > { %v1722_v54 = vpop.permute.xlu1 %1721  ;;  %v1352_v21 = vmul.f32 %v10012_v36, %v870_v45  ;;  %v1353_v31 = vmul.f32 %v10015_v37, %v870_v45 }
 0x36e   : > { %v2136_v25 = vmul.f32 %v10006_v33, %v1722_v54  ;;  %v2137_v39 = vmul.f32 %v10009_v34, %v1722_v54  ;;  %v2657_v56 = vadd.f32 %v10029_v62, %v2390_v52  ;;  %v2658_v38 = vadd.f32 %v10032_v4, %v2391_v16  ;;  %v9557_v16 = vld [vmem:[%s14108_s9 + $0x30] ss:$8 sps:$4 sm:$0xff]  }
 0x36f   : > { %7175 = vmatpush1.bf16.msra.mxu1 %v9539_v42  ;;  %v2394_v42 = vadd.f32 %v2138_v60, %v1352_v21  ;;  %v2395_v52 = vadd.f32 %v2139_v12, %v1353_v31 }
 0x370   : > { %v2392_v14 = vadd.f32 %v2136_v25, %v1350_v58  ;;  %v2393_v5 = vadd.f32 %v2137_v39, %v1351_v10  ;;  %7176 = vmatprep.subr.bf16.mxu1 %v9550_v46  ;;  %v2914_v58 = vmax.f32 %v2658_v38, 0.0  ;;  %v2913_v54 = vmax.f32 %v2657_v56, 0.0 }
 0x371   : > { %4693 = vmatmul.mubr.bf16.gmra.mrb[132].mxu1 %v11164_v2  ;;  %v9562_v2 = vld [vmem:[%s14106_s7 + $0x94] ss:$8 sps:$4 sm:$0xff]   ;;  %v2661_v31 = vadd.f32 %v10029_v62, %v2394_v42 }
 0x372   : > { %v2659_v27 = vadd.f32 %v10029_v62, %v2392_v14  ;;  %v2660_v29 = vadd.f32 %v10032_v4, %v2393_v5  ;;  %v875_v19 = vpop.permute.xlu1 %874  ;;  %4702 = vmatprep.mubr.bf16.mxu1 %v11174_v63  ;;  %v3973_v46 = vpop.f32.mrb[92].mxu1  ;;  %5929 = vmatprep.subr.bf16.mxu0 %v9562_v2 }
 0x373   : > { %7177 = vmatpush1.bf16.msra.mxu1 %v9548_v57  ;;  %v3974_v10 = vadd.f32 %v3973_v46, %v10736_v48  ;;  %v3975_v25 = vpop.f32.mrb[93].mxu1  ;;  %5930 = vmatpush1.bf16.msra.mxu0 %v9560_v8  ;;  %v1354_v21 = vmul.f32 %v10012_v36, %v875_v19  ;;  %v2662_v57 = vadd.f32 %v10032_v4, %v2395_v52 }
 0x374   : > { %v2916_v44 = vmax.f32 %v2660_v29, 0.0  ;;  %v2915_v63 = vmax.f32 %v2659_v27, 0.0  ;;  %7178 = vmatprep.subr.bf16.mxu1 %v9559_v43  ;;  %v3976_v39 = vadd.f32 %v3975_v25, %v10739_v1  ;;  %v3977_v60 = vpop.f32.mrb[94].mxu1  ;;  %v1355_v5 = vmul.f32 %v10015_v37, %v875_v19 }
 0x375   : > { %v3978_v56 = vadd.f32 %v3977_v60, %v10736_v48  ;;  %v3979_v14 = vpop.f32.mrb[95].mxu1  ;;  %v4282_v8 = vmax.f32 %v3974_v10, 0.0 }
 0x376   : > { %v3114_v45 = vpack.c.bf16 %v2916_v44, %v2914_v58  ;;  %v3113_v12 = vpack.c.bf16 %v2915_v63, %v2913_v54  ;;  %v3980_v29 = vadd.f32 %v3979_v14, %v10739_v1  ;;  %v4283_v42 = vmax.f32 %v3976_v39, 0.0  ;;  %v885_v44 = vpop.permute.xlu0 %884  ;;  %v9565_v39 = vld [vmem:[%s14106_s7 + $0xa4] ss:$8 sps:$4 sm:$0xff]  }
 0x377   : > { %v1730_v38 = vpop.permute.xlu1 %1729  ;;  %7179 = vmatpush1.bf16.msra.mxu1 %v9557_v16  ;;  %v4284_v2 = vmax.f32 %v3978_v56, 0.0  ;;  %v2918_v16 = vmax.f32 %v2662_v57, 0.0  ;;  %v2917_v54 = vmax.f32 %v2661_v31, 0.0  ;;  %5931 = vmatprep.subr.bf16.mxu0 %v9565_v39 }
 0x378   : > { %v2140_v43 = vmul.f32 %v10006_v33, %v1730_v38  ;;  %v2141_v27 = vmul.f32 %v10009_v34, %v1730_v38  ;;  %3701 = vmatprep.mubr.bf16.mxu0 %v3114_v45  ;;  %v4285_v58 = vmax.f32 %v3980_v29, 0.0  ;;  %v9568_v45 = vld [vmem:[%s14108_s9 + $0x44] ss:$8 sps:$4 sm:$0xff]  }
 0x379   : > { %3702 = vmatmul.mubr.bf16.gmra.mrb[112].mxu0 %v3113_v12  ;;  %4703 = vmatmul.mubr.bf16.gmra.mrb[136].mxu1 %v11187_v59  ;;  %v12074_v19 = vpack.c.bf16 %v4284_v2, %v4282_v8  ;;  %v9563_v59 = vld [vmem:[%s14106_s7 + $0xa0] ss:$8 sps:$4 sm:$0xff]  }
 0x37a   : > { %v2396_v52 = vadd.f32 %v2140_v43, %v1354_v21  ;;  %v2397_v46 = vadd.f32 %v2141_v27, %v1355_v5  ;;  %4712 = vmatprep.mubr.bf16.mxu1 %v11193_v0  ;;  %v9566_v0 = vld [vmem:[%s14108_s9 + $0x40] ss:$8 sps:$4 sm:$0xff]   ;;  %v12087_v60 = vpack.c.bf16 %v4285_v58, %v4283_v42  ;;  %5932 = vmatpush1.bf16.msra.mxu0 %v9563_v59  ;;  %v890_v38 = vpop.permute.xlu0 %889 }
 0x37b   : > { %7180 = vmatprep.subr.bf16.mxu1 %v9568_v45 }
 0x37c   : > { %v2663_v63 = vadd.f32 %v10029_v62, %v2396_v52  ;;  %v2664_v25 = vadd.f32 %v10032_v4, %v2397_v46  ;;  %v880_v10 = vpop.permute.xlu1 %879  ;;  %v3613_v12 = vpop.f32.mrb[76].mxu0  ;;  %7181 = vmatpush1.bf16.msra.mxu1 %v9566_v0 }
 0x37d   : > { %v3614_v57 = vadd.f32 %v3613_v12, %v10736_v48  ;;  %v3615_v56 = vpop.f32.mrb[77].mxu0  ;;  %v1356_v27 = vmul.f32 %v10012_v36, %v880_v10  ;;  %v1357_v29 = vmul.f32 %v10015_v37, %v880_v10  ;;  %v1359_v12 = vmul.f32 %v10015_v37, %v885_v44 }
 0x37e   : > { %v2920_v21 = vmax.f32 %v2664_v25, 0.0  ;;  %v2919_v31 = vmax.f32 %v2663_v63, 0.0  ;;  %v3617_v14 = vpop.f32.mrb[78].mxu0  ;;  %v3616_v8 = vadd.f32 %v3615_v56, %v10739_v1 }
 0x37f   : > { %v3618_v2 = vadd.f32 %v3617_v14, %v10736_v48  ;;  %v3619_v52 = vpop.f32.mrb[79].mxu0 }
 0x380   : > { %v3116_v5 = vpack.c.bf16 %v2920_v21, %v2918_v16  ;;  %v3115_v43 = vpack.c.bf16 %v2919_v31, %v2917_v54  ;;  %v3620_v16 = vadd.f32 %v3619_v52, %v10739_v1  ;;  %v4138_v54 = vmax.f32 %v3614_v57, 0.0  ;;  %v1742_v21 = vpop.permute.xlu0 %1741 }
 0x381   : > { %v1734_v42 = vpop.permute.xlu1 %1733  ;;  %4713 = vmatmul.mubr.bf16.gmra.mrb[140].mxu1 %v11189_v30  ;;  %v4140_v63 = vmax.f32 %v3618_v2, 0.0  ;;  %v4139_v39 = vmax.f32 %v3616_v8, 0.0  ;;  %v1358_v30 = vmul.f32 %v10012_v36, %v885_v44  ;;  %v2146_v8 = vmul.f32 %v10006_v33, %v1742_v21 }
 0x382   : > { %v2142_v46 = vmul.f32 %v10006_v33, %v1734_v42  ;;  %v2143_v58 = vmul.f32 %v10009_v34, %v1734_v42  ;;  %3711 = vmatprep.mubr.bf16.mxu0 %v3116_v5  ;;  %4722 = vmatprep.mubr.bf16.mxu1 %v11252_v7  ;;  %v4141_v59 = vmax.f32 %v3620_v16, 0.0  ;;  %v2147_v44 = vmul.f32 %v10009_v34, %v1742_v21 }
 0x383   : > { %3712 = vmatmul.mubr.bf16.gmra.mrb[116].mxu0 %v3115_v43  ;;  %v12102_v45 = vpack.c.bf16 %v4140_v63, %v4138_v54 }
 0x384   : > { %v2398_v25 = vadd.f32 %v2142_v46, %v1356_v27  ;;  %v2399_v10 = vadd.f32 %v2143_v58, %v1357_v29  ;;  %v12108_v7 = vpack.c.bf16 %v4141_v59, %v4139_v39  ;;  %v1360_v27 = vmul.f32 %v10012_v36, %v890_v38 }
 0x385   : > { %v1738_v0 = vpop.permute.xlu1 %1737  ;;  %v1361_v29 = vmul.f32 %v10015_v37, %v890_v38 }
 0x386   : > { %v2144_v31 = vmul.f32 %v10006_v33, %v1738_v0  ;;  %v2145_v56 = vmul.f32 %v10009_v34, %v1738_v0  ;;  %v2665_v57 = vadd.f32 %v10029_v62, %v2398_v25  ;;  %v2666_v14 = vadd.f32 %v10032_v4, %v2399_v10 }
 0x387   : > { %v2402_v25 = vadd.f32 %v2146_v8, %v1360_v27  ;;  %v2403_v38 = vadd.f32 %v2147_v44, %v1361_v29 }
 0x388   : > { %v2400_v5 = vadd.f32 %v2144_v31, %v1358_v30  ;;  %v2401_v43 = vadd.f32 %v2145_v56, %v1359_v12  ;;  %v2922_v58 = vmax.f32 %v2666_v14, 0.0  ;;  %v2921_v54 = vmax.f32 %v2665_v57, 0.0 }
 0x389   : > { %4723 = vmatmul.mubr.bf16.gmra.mrb[144].mxu1 %v11249_v9  ;;  %v2670_v27 = vadd.f32 %v10032_v4, %v2403_v38 }
 0x38a   : > { %v2667_v2 = vadd.f32 %v10029_v62, %v2400_v5  ;;  %v2668_v42 = vadd.f32 %v10032_v4, %v2401_v43  ;;  %v895_v52 = vpop.permute.xlu1 %894  ;;  %4732 = vmatprep.mubr.bf16.mxu1 %v11287_v55  ;;  %v3983_v46 = vpop.f32.mrb[96].mxu1  ;;  %v2669_v43 = vadd.f32 %v10029_v62, %v2402_v25 }
 0x38b   : > { %v3984_v10 = vadd.f32 %v3983_v46, %v10736_v48  ;;  %v3985_v59 = vpop.f32.mrb[97].mxu1  ;;  %v1362_v12 = vmul.f32 %v10012_v36, %v895_v52  ;;  %v1363_v56 = vmul.f32 %v10015_v37, %v895_v52  ;;  %v9569_v36 = vld [vmem:[%s14106_s7 + $0xb0] ss:$8 sps:$4 sm:$0xff]  }
 0x38c   : > { %v2924_v16 = vmax.f32 %v2668_v42, 0.0  ;;  %v2923_v63 = vmax.f32 %v2667_v2, 0.0  ;;  %v3986_v39 = vadd.f32 %v3985_v59, %v10739_v1  ;;  %v3987_v9 = vpop.f32.mrb[98].mxu1 }
 0x38d   : > { %v3988_v21 = vadd.f32 %v3987_v9, %v10736_v48  ;;  %v3989_v31 = vpop.f32.mrb[99].mxu1  ;;  %v4286_v29 = vmax.f32 %v3984_v10, 0.0 }
 0x38e   : > { %v3118_v0 = vpack.c.bf16 %v2924_v16, %v2922_v58  ;;  %v3117_v30 = vpack.c.bf16 %v2923_v63, %v2921_v54  ;;  %v3990_v5 = vadd.f32 %v3989_v31, %v10739_v1  ;;  %v2925_v58 = vmax.f32 %v2669_v43, 0.0 }
 0x38f   : > { %v1746_v55 = vpop.permute.xlu1 %1745  ;;  %v4288_v8 = vmax.f32 %v3988_v21, 0.0  ;;  %v2926_v16 = vmax.f32 %v2670_v27, 0.0 }
 0x390   : > { %v2148_v57 = vmul.f32 %v10006_v33, %v1746_v55  ;;  %v2149_v14 = vmul.f32 %v10009_v34, %v1746_v55  ;;  %3721 = vmatprep.mubr.bf16.mxu0 %v3118_v0  ;;  %v9571_v33 = vld [vmem:[%s14106_s7 + $0xb4] ss:$8 sps:$4 sm:$0xff]   ;;  %v4287_v34 = vmax.f32 %v3986_v39, 0.0  ;;  %v4289_v2 = vmax.f32 %v3990_v5, 0.0 }
 0x391   : > { %3722 = vmatmul.mubr.bf16.gmra.mrb[120].mxu0 %v3117_v30  ;;  %4733 = vmatmul.mubr.bf16.gmra.mrb[148].mxu1 %v11276_v41  ;;  %v12138_v42 = vpack.c.bf16 %v4288_v8, %v4286_v29  ;;  %v9577_v5 = vld [vmem:[%s14108_s9 + $0x54] ss:$8 sps:$4 sm:$0xff]  }
 0x392   : > { %v2404_v37 = vadd.f32 %v2148_v57, %v1362_v12  ;;  %v2405_v44 = vadd.f32 %v2149_v14, %v1363_v56  ;;  %4742 = vmatprep.mubr.bf16.mxu1 %v11329_v3  ;;  %5933 = vmatprep.subr.bf16.mxu0 %v9571_v33  ;;  %v12142_v46 = vpack.c.bf16 %v4289_v2, %v4287_v34  ;;  %v9575_v57 = vld [vmem:[%s14108_s9 + $0x50] ss:$8 sps:$4 sm:$0xff]  }
 0x393   : > { %5934 = vmatpush1.bf16.msra.mxu0 %v9569_v36  ;;  %7182 = vmatprep.subr.bf16.mxu1 %v9577_v5  ;;  %v9581_v5 = vld [vmem:[%s14106_s7 + $0xe0] ss:$8 sps:$4 sm:$0xff]  }
 0x394   : > { %v2671_v52 = vadd.f32 %v10029_v62, %v2404_v37  ;;  %v2672_v41 = vadd.f32 %v10032_v4, %v2405_v44  ;;  %7183 = vmatpush1.bf16.msra.mxu1 %v9575_v57 }
 0x396   : > { %v2927_v54 = vmax.f32 %v2671_v52, 0.0  ;;  %v2928_v63 = vmax.f32 %v2672_v41, 0.0  ;;  %v3623_v25 = vpop.f32.mrb[80].mxu0  ;;  %v9578_v52 = vld [vmem:[%s14106_s7 + $0xd0] ss:$8 sps:$4 sm:$0xff]  }
 0x397   : > { %v3624_v38 = vadd.f32 %v3623_v25, %v10736_v48  ;;  %v3625_v10 = vpop.f32.mrb[81].mxu0  ;;  %v9580_v41 = vld [vmem:[%s14106_s7 + $0xd4] ss:$8 sps:$4 sm:$0xff]  }
 0x398   : > { %v3626_v3 = vadd.f32 %v3625_v10, %v10739_v1  ;;  %v3627_v59 = vpop.f32.mrb[82].mxu0  ;;  %v3120_v39 = vpack.c.bf16 %v2928_v63, %v2926_v16  ;;  %v3119_v9 = vpack.c.bf16 %v2927_v54, %v2925_v58 }
 0x399   : > { %v3628_v62 = vadd.f32 %v3627_v59, %v10736_v48  ;;  %v3629_v0 = vpop.f32.mrb[83].mxu0  ;;  %4743 = vmatmul.mubr.bf16.gmra.mrb[152].mxu1 %v11327_v61  ;;  %v4142_v30 = vmax.f32 %v3624_v38, 0.0  ;;  %v9572_v61 = vld [vmem:[%s14106_s7 + $0xc0] ss:$8 sps:$4 sm:$0xff]  }
 0x39a   : > { %v3630_v4 = vadd.f32 %v3629_v0, %v10739_v1  ;;  %3731 = vmatprep.mubr.bf16.mxu0 %v3120_v39  ;;  %4752 = vmatprep.mubr.bf16.mxu1 %v11390_v23  ;;  %v4143_v21 = vmax.f32 %v3626_v3, 0.0  ;;  %v9574_v23 = vld [vmem:[%s14106_s7 + $0xc4] ss:$8 sps:$4 sm:$0xff]  }
 0x39b   : > { %v4144_v12 = vmax.f32 %v3628_v62, 0.0  ;;  %3732 = vmatmul.mubr.bf16.gmra.mrb[124].mxu0 %v3119_v9  ;;  %5935 = vmatprep.subr.bf16.mxu0 %v9574_v23 }
 0x39c   : > { %v4145_v55 = vmax.f32 %v3630_v4, 0.0  ;;  %5936 = vmatpush1.bf16.msra.mxu0 %v9572_v61 }
 0x39d   : > { %v12150_v31 = vpack.c.bf16 %v4144_v12, %v4142_v30  ;;  %5937 = vmatprep.subr.bf16.mxu0 %v9580_v41 }
 0x39e   : > { %v12152_v56 = vpack.c.bf16 %v4145_v55, %v4143_v21 }
 0x3a0   : > { %5938 = vmatpush1.bf16.msra.mxu0 %v9578_v52 }
 0x3a1   : > { %4753 = vmatmul.mubr.bf16.gmra.mrb[156].mxu1 %v11388_v40 }
 0x3a2   : > { %4762 = vmatprep.mubr.bf16.mxu1 %v11449_v49 }
 0x3a4   : > { %v3993_v14 = vpop.f32.mrb[100].mxu1 }
 0x3a5   : > { %v3994_v40 = vadd.f32 %v3993_v14, %v10736_v48  ;;  %v3995_v49 = vpop.f32.mrb[101].mxu1 }
 0x3a6   : > { %v3996_v43 = vadd.f32 %v3995_v49, %v10739_v1  ;;  %v3997_v27 = vpop.f32.mrb[102].mxu1  ;;  %v9584_v49 = vld [vmem:[%s14108_s9 + $0x60] ss:$8 sps:$4 sm:$0xff]  }
 0x3a7   : > { %v3998_v29 = vadd.f32 %v3997_v27, %v10736_v48  ;;  %v3999_v8 = vpop.f32.mrb[103].mxu1  ;;  %v4290_v33 = vmax.f32 %v3994_v40, 0.0  ;;  %v9583_v40 = vld [vmem:[%s14106_s7 + $0xe4] ss:$8 sps:$4 sm:$0xff]  }
 0x3a8   : > { %v4000_v36 = vadd.f32 %v3999_v8, %v10739_v1  ;;  %v4291_v37 = vmax.f32 %v3996_v43, 0.0  ;;  %5939 = vmatprep.subr.bf16.mxu0 %v9583_v40 }
 0x3a9   : > { %v4292_v34 = vmax.f32 %v3998_v29, 0.0  ;;  %4763 = vmatmul.mubr.bf16.gmra.mrb[160].mxu1 %v11446_v20  ;;  %5940 = vmatpush1.bf16.msra.mxu0 %v9581_v5  ;;  %v9587_v29 = vld [vmem:[%s14106_s7 + $0xf0] ss:$8 sps:$4 sm:$0xff]  }
 0x3aa   : > { %v4293_v44 = vmax.f32 %v4000_v36, 0.0  ;;  %4772 = vmatprep.mubr.bf16.mxu1 %v11509_v13  ;;  %v14285_v5 = vld [vmem:[#allocation49_spill] sm:$0xff] }
 0x3ab   : > { %v12174_v2 = vpack.c.bf16 %v4292_v34, %v4290_v33 }
 0x3ac   : > { %v12182_v58 = vpack.c.bf16 %v4293_v44, %v4291_v37 }
 0x3ae   : > { %v3633_v16 = vpop.f32.mrb[84].mxu0 }
 0x3af   : > { %v3634_v20 = vadd.f32 %v3633_v16, %v10736_v48  ;;  %v3635_v54 = vpop.f32.mrb[85].mxu0 }
 0x3b0   : > { %v3636_v13 = vadd.f32 %v3635_v54, %v10739_v1  ;;  %v3637_v63 = vpop.f32.mrb[86].mxu0 }
 0x3b1   : > { %v3638_v25 = vadd.f32 %v3637_v63, %v10736_v48  ;;  %v3639_v38 = vpop.f32.mrb[87].mxu0  ;;  %4773 = vmatmul.mubr.bf16.gmra.mrb[164].mxu1 %v11507_v51  ;;  %v4146_v3 = vmax.f32 %v3634_v20, 0.0 }
 0x3b2   : > { %v3640_v10 = vadd.f32 %v3639_v38, %v10739_v1  ;;  %4782 = vmatprep.mubr.bf16.mxu1 %v11570_v53  ;;  %v4147_v39 = vmax.f32 %v3636_v13, 0.0 }
 0x3b3   : > { %v4148_v59 = vmax.f32 %v3638_v25, 0.0 }
 0x3b4   : > { %v4149_v9 = vmax.f32 %v3640_v10, 0.0 }
 0x3b5   : > { %v12190_v62 = vpack.c.bf16 %v4148_v59, %v4146_v3 }
 0x3b6   : > { %v12192_v0 = vpack.c.bf16 %v4149_v9, %v4147_v39 }
 0x3b9   : > { %4783 = vmatmul.mubr.bf16.gmra.mrb[168].mxu1 %v11562_v32 }
 0x3ba   : > { %4792 = vmatprep.mubr.bf16.mxu1 %v11630_v18 }
 0x3bc   : > { %v4003_v4 = vpop.f32.mrb[104].mxu1 }
 0x3bd   : > { %v4004_v30 = vadd.f32 %v4003_v4, %v10736_v48  ;;  %v4005_v51 = vpop.f32.mrb[105].mxu1 }
 0x3be   : > { %v4006_v12 = vadd.f32 %v4005_v51, %v10739_v1  ;;  %v4007_v21 = vpop.f32.mrb[106].mxu1 }
 0x3bf   : > { %v4008_v53 = vadd.f32 %v4007_v21, %v10736_v48  ;;  %v4009_v55 = vpop.f32.mrb[107].mxu1  ;;  %v4294_v23 = vmax.f32 %v4004_v30, 0.0  ;;  %v14283_v30 = vld [vmem:[#allocation47_spill] sm:$0xff] }
 0x3c0   : > { %v4010_v61 = vadd.f32 %v4009_v55, %v10739_v1  ;;  %v4295_v14 = vmax.f32 %v4006_v12, 0.0  ;;  %v14284_v12 = vld [vmem:[#allocation50_spill] sm:$0xff] }
 0x3c1   : > { %v4296_v57 = vmax.f32 %v4008_v53, 0.0  ;;  %4793 = vmatmul.mubr.bf16.gmra.mrb[172].mxu1 %v11623_v17  ;;  %v9586_v17 = vld [vmem:[%s14108_s9 + $0x64] ss:$8 sps:$4 sm:$0xff]  }
 0x3c2   : > { %v4297_v32 = vmax.f32 %v4010_v61, 0.0  ;;  %4802 = vmatprep.mubr.bf16.mxu1 %v11685_v28  ;;  %v9589_v28 = vld [vmem:[%s14106_s7 + $0xf4] ss:$8 sps:$4 sm:$0xff]   ;;  %7184 = vmatprep.subr.bf16.mxu1 %v9586_v17  ;;  %v9591_v17 = vld [vmem:[%s14108_s9 + $0x70] ss:$8 sps:$4 sm:$0xff]  }
 0x3c3   : > { %v12202_v18 = vpack.c.bf16 %v4296_v57, %v4294_v23  ;;  %7185 = vmatpush1.bf16.msra.mxu1 %v9584_v49  ;;  %5941 = vmatprep.subr.bf16.mxu0 %v9589_v28  ;;  %v14286_v49 = vld [vmem:[#allocation53_spill] sm:$0xff] }
 0x3c4   : > { %v12219_v43 = vpack.c.bf16 %v4297_v32, %v4295_v14  ;;  %5942 = vmatpush1.bf16.msra.mxu0 %v9587_v29  ;;  %v9593_v28 = vld [vmem:[%s14108_s9 + $0x74] ss:$8 sps:$4 sm:$0xff]  }
 0x3c5   : > { %8364 = vmatprep.subr.bf16.mxu0 %v14167_v15  ;;  %7186 = vmatprep.subr.bf16.mxu1 %v9593_v28 }
 0x3c6   : > { %v3643_v27 = vpop.f32.mrb[88].mxu0 }
 0x3c7   : > { %v3644_v8 = vadd.f32 %v3643_v27, %v10736_v48  ;;  %v3645_v36 = vpop.f32.mrb[89].mxu0  ;;  %7187 = vmatpush1.bf16.msra.mxu1 %v9591_v17 }
 0x3c8   : > { %v3646_v33 = vadd.f32 %v3645_v36, %v10739_v1  ;;  %v3647_v34 = vpop.f32.mrb[90].mxu0 }
 0x3c9   : > { %v3648_v37 = vadd.f32 %v3647_v34, %v10736_v48  ;;  %v3649_v44 = vpop.f32.mrb[91].mxu0  ;;  %4803 = vmatmul.mubr.bf16.gmra.mrb[176].mxu1 %v11678_v24  ;;  %v4150_v41 = vmax.f32 %v3644_v8, 0.0 }
 0x3ca   : > { %v3650_v52 = vadd.f32 %v3649_v44, %v10739_v1  ;;  %4812 = vmatprep.mubr.bf16.mxu1 %v11756_v50  ;;  %v4151_v20 = vmax.f32 %v3646_v33, 0.0  ;;  %v14288_v44 = vld [vmem:[#allocation56_spill] sm:$0xff] }
 0x3cb   : > { %v4152_v16 = vmax.f32 %v3648_v37, 0.0  ;;  %v14287_v37 = vld [vmem:[#allocation52_spill] sm:$0xff] }
 0x3cc   : > { %v4153_v54 = vmax.f32 %v3650_v52, 0.0 }
 0x3cd   : > { %v12231_v13 = vpack.c.bf16 %v4152_v16, %v4150_v41 }
 0x3ce   : > { %v12233_v63 = vpack.c.bf16 %v4153_v54, %v4151_v20 }
 0x3d1   : > { %4813 = vmatmul.mubr.bf16.gmra.mrb[180].mxu1 %v11758_v26 }
 0x3d2   : > { %4822 = vmatprep.mubr.bf16.mxu1 %v11814_v6 }
 0x3d4   : > { %v4013_v24 = vpop.f32.mrb[108].mxu1 }
 0x3d5   : > { %v4014_v25 = vadd.f32 %v4013_v24, %v10736_v48  ;;  %v4015_v38 = vpop.f32.mrb[109].mxu1 }
 0x3d6   : > { %v4016_v50 = vadd.f32 %v4015_v38, %v10739_v1  ;;  %v4017_v10 = vpop.f32.mrb[110].mxu1 }
 0x3d7   : > { %v4018_v3 = vadd.f32 %v4017_v10, %v10736_v48  ;;  %v4019_v59 = vpop.f32.mrb[111].mxu1  ;;  %v4298_v9 = vmax.f32 %v4014_v25, 0.0 }
 0x3d8   : > { %v4020_v39 = vadd.f32 %v4019_v59, %v10739_v1  ;;  %v4299_v51 = vmax.f32 %v4016_v50, 0.0 }
 0x3d9   : > { %v4300_v4 = vmax.f32 %v4018_v3, 0.0  ;;  %4823 = vmatmul.mubr.bf16.gmra.mrb[184].mxu1 %v14283_v30  ;;  %v14289_v3 = vld [vmem:[#allocation55_spill] sm:$0xff] }
 0x3da   : > { %v4301_v26 = vmax.f32 %v4020_v39, 0.0  ;;  %4832 = vmatprep.mubr.bf16.mxu1 %v14284_v12 }
 0x3db   : > { %v12243_v6 = vpack.c.bf16 %v4300_v4, %v4298_v9 }
 0x3dc   : > { %v12245_v21 = vpack.c.bf16 %v4301_v26, %v4299_v51 }
 0x3de   : > { %v3653_v53 = vpop.f32.mrb[92].mxu0 }
 0x3df   : > { %v3654_v55 = vadd.f32 %v3653_v53, %v10736_v48  ;;  %v3655_v61 = vpop.f32.mrb[93].mxu0 }
 0x3e0   : > { %v3656_v23 = vadd.f32 %v3655_v61, %v10739_v1  ;;  %v3657_v57 = vpop.f32.mrb[94].mxu0 }
 0x3e1   : > { %v3658_v14 = vadd.f32 %v3657_v57, %v10736_v48  ;;  %v3659_v32 = vpop.f32.mrb[95].mxu0  ;;  %4833 = vmatmul.mubr.bf16.gmra.mrb[188].mxu1 %v14285_v5  ;;  %v4154_v27 = vmax.f32 %v3654_v55, 0.0 }
 0x3e2   : > { %v3660_v40 = vadd.f32 %v3659_v32, %v10739_v1  ;;  %4842 = vmatprep.mubr.bf16.mxu1 %v14286_v49  ;;  %v4155_v8 = vmax.f32 %v3656_v23, 0.0  ;;  %v9595_v49 = vld [vmem:[%s14108_s9 + $0x80] ss:$8 sps:$4 sm:$0xff]  }
 0x3e3   : > { %v4156_v29 = vmax.f32 %v3658_v14, 0.0 }
 0x3e4   : > { %v4157_v36 = vmax.f32 %v3660_v40, 0.0 }
 0x3e5   : > { %v12259_v33 = vpack.c.bf16 %v4156_v29, %v4154_v27 }
 0x3e6   : > { %v12261_v34 = vpack.c.bf16 %v4157_v36, %v4155_v8 }
 0x3e9   : > { %4843 = vmatmul.mubr.bf16.gmra.mrb[192].mxu1 %v14287_v37 }
 0x3ea   : > { %4852 = vmatprep.mubr.bf16.mxu1 %v14288_v44 }
 0x3ec   : > { %v4023_v52 = vpop.f32.mrb[112].mxu1 }
 0x3ed   : > { %v4024_v41 = vadd.f32 %v4023_v52, %v10736_v48  ;;  %v4025_v16 = vpop.f32.mrb[113].mxu1 }
 0x3ee   : > { %v4026_v20 = vadd.f32 %v4025_v16, %v10739_v1  ;;  %v4027_v54 = vpop.f32.mrb[114].mxu1 }
 0x3ef   : > { %v4028_v24 = vadd.f32 %v4027_v54, %v10736_v48  ;;  %v4029_v25 = vpop.f32.mrb[115].mxu1  ;;  %v4302_v50 = vmax.f32 %v4024_v41, 0.0 }
 0x3f0   : > { %v4030_v38 = vadd.f32 %v4029_v25, %v10739_v1  ;;  %v4303_v59 = vmax.f32 %v4026_v20, 0.0 }
 0x3f1   : > { %v4304_v10 = vmax.f32 %v4028_v24, 0.0  ;;  %4853 = vmatmul.mubr.bf16.gmra.mrb[196].mxu1 %v14289_v3 }
 0x3f2   : > { %v4305_v39 = vmax.f32 %v4030_v38, 0.0  ;;  %4862 = vmatprep.mubr.bf16.mxu1 %v12042_v11 }
 0x3f3   : > { %v12271_v9 = vpack.c.bf16 %v4304_v10, %v4302_v50 }
 0x3f4   : > { %v12273_v4 = vpack.c.bf16 %v4305_v39, %v4303_v59 }
 0x3f6   : > { %v3663_v30 = vpop.f32.mrb[96].mxu0 }
 0x3f7   : > { %v3664_v51 = vadd.f32 %v3663_v30, %v10736_v48  ;;  %v3665_v26 = vpop.f32.mrb[97].mxu0 }
 0x3f8   : > { %v3666_v12 = vadd.f32 %v3665_v26, %v10739_v1  ;;  %v3667_v53 = vpop.f32.mrb[98].mxu0 }
 0x3f9   : > { %v3668_v55 = vadd.f32 %v3667_v53, %v10736_v48  ;;  %v3669_v61 = vpop.f32.mrb[99].mxu0  ;;  %4863 = vmatmul.mubr.bf16.gmra.mrb[200].mxu1 %v12030_v22  ;;  %v4158_v11 = vmax.f32 %v3664_v51, 0.0  ;;  %v9597_v22 = vld [vmem:[%s14108_s9 + $0x84] ss:$8 sps:$4 sm:$0xff]  }
 0x3fa   : > { %v3670_v23 = vadd.f32 %v3669_v61, %v10739_v1  ;;  %4872 = vmatprep.mubr.bf16.mxu1 %v12108_v7  ;;  %v4159_v14 = vmax.f32 %v3666_v12, 0.0  ;;  %7188 = vmatprep.subr.bf16.mxu1 %v9597_v22 }
 0x3fb   : > { %v4160_v57 = vmax.f32 %v3668_v55, 0.0  ;;  %7189 = vmatpush1.bf16.msra.mxu1 %v9595_v49 }
 0x3fc   : > { %v4161_v32 = vmax.f32 %v3670_v23, 0.0 }
 0x3fd   : > { %v12281_v5 = vpack.c.bf16 %v4160_v57, %v4158_v11 }
 0x3fe   : > { %v4367_v40 = vpack.c.bf16 %v4161_v32, %v4159_v14  ;;  %v9601_v32 = vld [vmem:[%s14108_s9 + $0x94] ss:$8 sps:$4 sm:$0xff]  }
 0x3ff   : > { %7190 = vmatprep.subr.bf16.mxu1 %v9601_v32 }
 0x401   : > { %4873 = vmatmul.mubr.bf16.gmra.mrb[204].mxu1 %v12102_v45 }
 0x402   : > { %4882 = vmatprep.mubr.bf16.mxu1 %v12152_v56 }
 0x404   : > { %v4033_v7 = vpop.f32.mrb[116].mxu1 }
 0x405   : > { %v4034_v17 = vadd.f32 %v4033_v7, %v10736_v48  ;;  %v4035_v28 = vpop.f32.mrb[117].mxu1 }
 0x406   : > { %v4036_v27 = vadd.f32 %v4035_v28, %v10739_v1  ;;  %v4037_v29 = vpop.f32.mrb[118].mxu1 }
 0x407   : > { %v4038_v45 = vadd.f32 %v4037_v29, %v10736_v48  ;;  %v4039_v56 = vpop.f32.mrb[119].mxu1  ;;  %v4306_v36 = vmax.f32 %v4034_v17, 0.0 }
 0x408   : > { %v4040_v8 = vadd.f32 %v4039_v56, %v10739_v1  ;;  %v4307_v44 = vmax.f32 %v4036_v27, 0.0 }
 0x409   : > { %v4308_v37 = vmax.f32 %v4038_v45, 0.0  ;;  %4883 = vmatmul.mubr.bf16.gmra.mrb[208].mxu1 %v12150_v31 }
 0x40a   : > { %v4309_v52 = vmax.f32 %v4040_v8, 0.0  ;;  %4892 = vmatprep.mubr.bf16.mxu1 %v12192_v0 }
 0x40b   : > { %v12297_v41 = vpack.c.bf16 %v4308_v37, %v4306_v36 }
 0x40c   : > { %v12299_v16 = vpack.c.bf16 %v4309_v52, %v4307_v44 }
 0x40e   : > { %v3673_v20 = vpop.f32.mrb[100].mxu0 }
 0x40f   : > { %v3674_v54 = vadd.f32 %v3673_v20, %v10736_v48  ;;  %v3675_v24 = vpop.f32.mrb[101].mxu0 }
 0x410   : > { %v3676_v25 = vadd.f32 %v3675_v24, %v10739_v1  ;;  %v3677_v38 = vpop.f32.mrb[102].mxu0 }
 0x411   : > { %v3678_v50 = vadd.f32 %v3677_v38, %v10736_v48  ;;  %v3679_v10 = vpop.f32.mrb[103].mxu0  ;;  %4893 = vmatmul.mubr.bf16.gmra.mrb[212].mxu1 %v12190_v62  ;;  %v4162_v0 = vmax.f32 %v3674_v54, 0.0 }
 0x412   : > { %v3680_v31 = vadd.f32 %v3679_v10, %v10739_v1  ;;  %4902 = vmatprep.mubr.bf16.mxu1 %v12233_v63  ;;  %v4163_v59 = vmax.f32 %v3676_v25, 0.0 }
 0x413   : > { %v4164_v3 = vmax.f32 %v3678_v50, 0.0 }
 0x414   : > { %v4165_v39 = vmax.f32 %v3680_v31, 0.0 }
 0x415   : > { %v4368_v30 = vpack.c.bf16 %v4164_v3, %v4162_v0 }
 0x416   : > { %v4369_v51 = vpack.c.bf16 %v4165_v39, %v4163_v59  ;;  %v14290_v59 = vld [vmem:[#allocation4_spill] sm:$0xff] }
 0x419   : > { %4903 = vmatmul.mubr.bf16.gmra.mrb[216].mxu1 %v12231_v13 }
 0x41a   : > { %4912 = vmatprep.mubr.bf16.mxu1 %v12261_v34  ;;  %v9599_v34 = vld [vmem:[%s14108_s9 + $0x90] ss:$8 sps:$4 sm:$0xff]  }
 0x41b   : > { %7191 = vmatpush1.bf16.msra.mxu1 %v9599_v34 }
 0x41c   : > { %v4043_v26 = vpop.f32.mrb[120].mxu1 }
 0x41d   : > { %v4044_v12 = vadd.f32 %v4043_v26, %v10736_v48  ;;  %v4045_v53 = vpop.f32.mrb[121].mxu1  ;;  %v14291_v26 = vld [vmem:[#allocation3_spill] sm:$0xff] }
 0x41e   : > { %v4046_v62 = vadd.f32 %v4045_v53, %v10739_v1  ;;  %v4047_v55 = vpop.f32.mrb[122].mxu1 }
 0x41f   : > { %v4048_v61 = vadd.f32 %v4047_v55, %v10736_v48  ;;  %v4049_v63 = vpop.f32.mrb[123].mxu1  ;;  %v4310_v11 = vmax.f32 %v4044_v12, 0.0 }
 0x420   : > { %v4050_v23 = vadd.f32 %v4049_v63, %v10739_v1  ;;  %v4311_v14 = vmax.f32 %v4046_v62, 0.0 }
 0x421   : > { %v4312_v57 = vmax.f32 %v4048_v61, 0.0  ;;  %4913 = vmatmul.mubr.bf16.gmra.mrb[220].mxu1 %v12259_v33 }
 0x422   : > { %v4313_v13 = vmax.f32 %v4050_v23, 0.0  ;;  %4922 = vmatprep.mubr.bf16.mxu1 %v4367_v40 }
 0x423   : > { %v12320_v49 = vpack.c.bf16 %v4312_v57, %v4310_v11 }
 0x424   : > { %v12322_v22 = vpack.c.bf16 %v4313_v13, %v4311_v14 }
 0x426   : > { %v3683_v7 = vpop.f32.mrb[104].mxu0 }
 0x427   : > { %v3684_v33 = vadd.f32 %v3683_v7, %v10736_v48  ;;  %v3685_v17 = vpop.f32.mrb[105].mxu0 }
 0x428   : > { %v3686_v40 = vadd.f32 %v3685_v17, %v10739_v1  ;;  %v3687_v28 = vpop.f32.mrb[106].mxu0 }
 0x429   : > { %v3688_v27 = vadd.f32 %v3687_v28, %v10736_v48  ;;  %v3689_v29 = vpop.f32.mrb[107].mxu0  ;;  %4923 = vmatmul.mubr.bf16.gmra.mrb[224].mxu1 %v12281_v5  ;;  %v4166_v56 = vmax.f32 %v3684_v33, 0.0  ;;  %v4478_v5 = vld [vmem:[%s14105_s6] sm:$0x3] }
 0x42a   : > { %v3690_v45 = vadd.f32 %v3689_v29, %v10739_v1  ;;  %4932 = vmatprep.mubr.bf16.mxu1 %v4369_v51  ;;  %v4167_v36 = vmax.f32 %v3686_v40, 0.0  ;;  %v12337_v39 = vrot.slane %v4478_v5, %v14290_v59  ;;  %v12340_v12 = vrot.slane %v4478_v5, %v14291_v26  ;;  %v9590_v5 = vld [vmem:[%s14110_s11] sm:$0xff]  }
 0x42b   : > { %v4168_v8 = vmax.f32 %v3688_v27, 0.0 }
 0x42c   : > { %v4169_v37 = vmax.f32 %v3690_v45, 0.0 }
 0x42d   : > { %v4370_v44 = vpack.c.bf16 %v4168_v8, %v4166_v56 }
 0x42e   : > { %v4371_v52 = vpack.c.bf16 %v4169_v37, %v4167_v36  ;;  %v9603_v36 = vld [vmem:[%s14108_s9 + $0xa0] ss:$8 sps:$4 sm:$0xff]  }
 0x431   : > { %4933 = vmatmul.mubr.bf16.gmra.mrb[228].mxu1 %v4368_v30 }
 0x432   : > { %4942 = vmatprep.mubr.bf16.mxu1 %v4371_v52 }
 0x434   : > { %v4053_v20 = vpop.f32.mrb[124].mxu1 }
 0x435   : > { %v4054_v54 = vadd.f32 %v4053_v20, %v10736_v48  ;;  %v4055_v24 = vpop.f32.mrb[125].mxu1  ;;  %v9605_v20 = vld [vmem:[%s14108_s9 + $0xa4] ss:$8 sps:$4 sm:$0xff]  }
 0x436   : > { %v4056_v25 = vadd.f32 %v4055_v24, %v10739_v1  ;;  %v4057_v38 = vpop.f32.mrb[126].mxu1  ;;  %7192 = vmatprep.subr.bf16.mxu1 %v9605_v20 }
 0x437   : > { %v4058_v50 = vadd.f32 %v4057_v38, %v10736_v48  ;;  %v4059_v10 = vpop.f32.mrb[127].mxu1  ;;  %v4314_v0 = vmax.f32 %v4054_v54, 0.0  ;;  %7193 = vmatpush1.bf16.msra.mxu1 %v9603_v36 }
 0x438   : > { %v4060_v31 = vadd.f32 %v4059_v10, %v10739_v1  ;;  %v4315_v30 = vmax.f32 %v4056_v25, 0.0 }
 0x439   : > { %v4316_v3 = vmax.f32 %v4058_v50, 0.0  ;;  %4943 = vmatmul.mubr.bf16.gmra.mrb[232].mxu1 %v4370_v44 }
 0x43a   : > { %v4317_v51 = vmax.f32 %v4060_v31, 0.0 }
 0x43b   : > { %v12342_v53 = vpack.c.bf16 %v4316_v3, %v4314_v0 }
 0x43c   : > { %v4684_v62 = vpop.f32.mrb[128].mxu1  ;;  %v12344_v55 = vpack.c.bf16 %v4317_v51, %v4315_v30 }
 0x43d   : > { %v4685_v61 = vadd.f32 %v4684_v62, %v12337_v39  ;;  %v4686_v63 = vpop.f32.mrb[129].mxu1 }
 0x43e   : > { %v4687_v23 = vadd.f32 %v4686_v63, %v12340_v12  ;;  %v3693_v11 = vpop.f32.mrb[108].mxu0  ;;  %v4688_v57 = vpop.f32.mrb[130].mxu1  ;;  %v9594_v63 = vld [vmem:[%s14110_s11 + $0x8] sm:$0xff]  }
 0x43f   : > { %v3694_v14 = vadd.f32 %v3693_v11, %v10736_v48  ;;  %v4689_v13 = vadd.f32 %v4688_v57, %v12337_v39  ;;  %v3695_v34 = vpop.f32.mrb[109].mxu0  ;;  %v4690_v32 = vpop.f32.mrb[131].mxu1  ;;  %v5323_v40 = vmax.f32 %v4685_v61, 0.0 }
 0x440   : > { %v3696_v7 = vadd.f32 %v3695_v34, %v10739_v1  ;;  %v4691_v33 = vadd.f32 %v4690_v32, %v12340_v12  ;;  %v3697_v17 = vpop.f32.mrb[110].mxu0  ;;  %v5324_v45 = vmax.f32 %v4687_v23, 0.0 }
 0x441   : > { %v5325_v28 = vmax.f32 %v4689_v13, 0.0  ;;  %v3698_v27 = vadd.f32 %v3697_v17, %v10736_v48  ;;  %v3699_v29 = vpop.f32.mrb[111].mxu0  ;;  %v4170_v37 = vmax.f32 %v3694_v14, 0.0 }
 0x442   : > { %v5326_v56 = vmax.f32 %v4691_v33, 0.0  ;;  %v3700_v8 = vadd.f32 %v3699_v29, %v10739_v1  ;;  %v4171_v54 = vmax.f32 %v3696_v7, 0.0  ;;  %v9598_v33 = vld [vmem:[%s14110_s11 + $0x10] sm:$0xff]  }
 0x443   : > { %v5579_v44 = vpack.c.bf16 %v5325_v28, %v5323_v40  ;;  %v4172_v52 = vmax.f32 %v3698_v27, 0.0 }
 0x444   : > { %v4173_v24 = vmax.f32 %v3700_v8, 0.0  ;;  %v4694_v25 = vpop.f32.mrb[132].mxu1  ;;  %v5580_v38 = vpack.c.bf16 %v5326_v56, %v5324_v45 }
 0x445   : > { %v4695_v50 = vadd.f32 %v4694_v25, %v12337_v39  ;;  %v4696_v10 = vpop.f32.mrb[133].mxu1  ;;  %v4372_v31 = vpack.c.bf16 %v4172_v52, %v4170_v37 }
 0x446   : > { %v4697_v0 = vadd.f32 %v4696_v10, %v12340_v12  ;;  %v4698_v3 = vpop.f32.mrb[134].mxu1  ;;  %5943 = vmatprep.mubr.bf16.mxu0 %v5580_v38  ;;  %v4373_v30 = vpack.c.bf16 %v4173_v24, %v4171_v54  ;;  %v9602_v24 = vld [vmem:[%s14110_s11 + $0x18] sm:$0xff]  }
 0x447   : > { %v4699_v51 = vadd.f32 %v4698_v3, %v12337_v39  ;;  %v4700_v62 = vpop.f32.mrb[135].mxu1  ;;  %5944 = vmatmul.mubr.bf16.vlgmr.msra.gmra.mrb[128].mxu0 %v5579_v44  ;;  %v5327_v23 = vmax.f32 %v4695_v50, 0.0 }
 0x448   : > { %v4701_v61 = vadd.f32 %v4700_v62, %v12340_v12  ;;  %4952 = vmatprep.mubr.bf16.mxu1 %v4373_v30  ;;  %8365 = vmatpush1.bf16.msra.mxu0 %v9590_v5  ;;  %v5328_v57 = vmax.f32 %v4697_v0, 0.0 }
 0x449   : > { %v5329_v11 = vmax.f32 %v4699_v51, 0.0  ;;  %4953 = vmatmul.mubr.bf16.gmra.mrb[236].mxu1 %v4372_v31  ;;  %8366 = vmatprep.subr.bf16.mxu0 %v14167_v15 }
 0x44a   : > { %v5330_v14 = vmax.f32 %v4701_v61, 0.0 }
 0x44b   : > { %v5581_v13 = vpack.c.bf16 %v5329_v11, %v5327_v23 }
 0x44c   : > { %v3703_v34 = vpop.f32.mrb[112].mxu0  ;;  %v4704_v32 = vpop.f32.mrb[136].mxu1  ;;  %v5582_v7 = vpack.c.bf16 %v5330_v14, %v5328_v57  ;;  %8367 = vmatpush1.bf16.msra.mxu0 %v9594_v63 }
 0x44d   : > { %v3704_v17 = vadd.f32 %v3703_v34, %v10736_v48  ;;  %v4705_v40 = vadd.f32 %v4704_v32, %v12337_v39  ;;  %v3705_v28 = vpop.f32.mrb[113].mxu0  ;;  %v4706_v27 = vpop.f32.mrb[137].mxu1  ;;  %8368 = vmatprep.subr.bf16.mxu0 %v14167_v15 }
 0x44e   : > { %v3706_v29 = vadd.f32 %v3705_v28, %v10739_v1  ;;  %v4707_v45 = vadd.f32 %v4706_v27, %v12340_v12  ;;  %v3707_v56 = vpop.f32.mrb[114].mxu0  ;;  %v4708_v8 = vpop.f32.mrb[138].mxu1  ;;  %5953 = vmatprep.mubr.bf16.mxu0 %v5582_v7 }
 0x44f   : > { %v3708_v36 = vadd.f32 %v3707_v56, %v10736_v48  ;;  %v4709_v37 = vadd.f32 %v4708_v8, %v12337_v39  ;;  %v3709_v44 = vpop.f32.mrb[115].mxu0  ;;  %v4710_v52 = vpop.f32.mrb[139].mxu1  ;;  %5954 = vmatmul.mubr.bf16.gmra.mrb[132].mxu0 %v5581_v13  ;;  %v4174_v25 = vmax.f32 %v3704_v17, 0.0  ;;  %v5331_v38 = vmax.f32 %v4705_v40, 0.0 }
 0x450   : > { %v3710_v20 = vadd.f32 %v3709_v44, %v10739_v1  ;;  %v4711_v54 = vadd.f32 %v4710_v52, %v12340_v12  ;;  %8369 = vmatpush1.bf16.msra.mxu0 %v9598_v33  ;;  %v4175_v10 = vmax.f32 %v3706_v29, 0.0  ;;  %v5332_v31 = vmax.f32 %v4707_v45, 0.0 }
 0x451   : > { %v4176_v5 = vmax.f32 %v3708_v36, 0.0  ;;  %v5333_v50 = vmax.f32 %v4709_v37, 0.0  ;;  %8370 = vmatprep.subr.bf16.mxu0 %v14167_v15 }
 0x452   : > { %v4177_v0 = vmax.f32 %v3710_v20, 0.0  ;;  %v5334_v3 = vmax.f32 %v4711_v54, 0.0 }
 0x453   : > { %v4374_v30 = vpack.c.bf16 %v4176_v5, %v4174_v25  ;;  %v5583_v51 = vpack.c.bf16 %v5333_v50, %v5331_v38 }
 0x454   : > { %v4714_v62 = vpop.f32.mrb[140].mxu1  ;;  %v4375_v61 = vpack.c.bf16 %v4177_v0, %v4175_v10  ;;  %v5584_v63 = vpack.c.bf16 %v5334_v3, %v5332_v31  ;;  %8371 = vmatpush1.bf16.msra.mxu0 %v9602_v24 }
 0x455   : > { %v4715_v23 = vadd.f32 %v4714_v62, %v12337_v39  ;;  %v4716_v11 = vpop.f32.mrb[141].mxu1  ;;  %8372 = vmatprep.subr.bf16.mxu0 %v14167_v15 }
 0x456   : > { %v4717_v57 = vadd.f32 %v4716_v11, %v12340_v12  ;;  %v3713_v14 = vpop.f32.mrb[116].mxu0  ;;  %v4718_v13 = vpop.f32.mrb[142].mxu1  ;;  %4962 = vmatprep.mubr.bf16.mxu1 %v4375_v61  ;;  %5963 = vmatprep.mubr.bf16.mxu0 %v5584_v63 }
 0x457   : > { %v3714_v34 = vadd.f32 %v3713_v14, %v10736_v48  ;;  %v4719_v32 = vadd.f32 %v4718_v13, %v12337_v39  ;;  %v3715_v7 = vpop.f32.mrb[117].mxu0  ;;  %v4720_v33 = vpop.f32.mrb[143].mxu1  ;;  %4963 = vmatmul.mubr.bf16.gmra.mrb[240].mxu1 %v4374_v30  ;;  %5964 = vmatmul.mubr.bf16.gmra.mrb[136].mxu0 %v5583_v51  ;;  %v5335_v27 = vmax.f32 %v4715_v23, 0.0  ;;  %v9607_v14 = vld [vmem:[%s14108_s9 + $0xb0] ss:$8 sps:$4 sm:$0xff]  }
 0x458   : > { %v3716_v17 = vadd.f32 %v3715_v7, %v10739_v1  ;;  %v4721_v40 = vadd.f32 %v4720_v33, %v12340_v12  ;;  %v3717_v28 = vpop.f32.mrb[118].mxu0  ;;  %v5336_v8 = vmax.f32 %v4717_v57, 0.0  ;;  %v9606_v57 = vld [vmem:[%s14110_s11 + $0x20] sm:$0xff]   ;;  %v9609_v13 = vld [vmem:[%s14108_s9 + $0xb4] ss:$8 sps:$4 sm:$0xff]  }
 0x459   : > { %v5337_v29 = vmax.f32 %v4719_v32, 0.0  ;;  %v3718_v45 = vadd.f32 %v3717_v28, %v10736_v48  ;;  %v3719_v56 = vpop.f32.mrb[119].mxu0  ;;  %v4178_v44 = vmax.f32 %v3714_v34, 0.0  ;;  %8373 = vmatpush1.bf16.msra.mxu0 %v9606_v57  ;;  %7194 = vmatprep.subr.bf16.mxu1 %v9609_v13 }
 0x45a   : > { %v5338_v36 = vmax.f32 %v4721_v40, 0.0  ;;  %v3720_v37 = vadd.f32 %v3719_v56, %v10739_v1  ;;  %v4179_v54 = vmax.f32 %v3716_v17, 0.0  ;;  %7195 = vmatpush1.bf16.msra.mxu1 %v9607_v14  ;;  %8374 = vmatprep.subr.bf16.mxu0 %v14167_v15 }
 0x45b   : > { %v4180_v52 = vmax.f32 %v3718_v45, 0.0  ;;  %v5585_v20 = vpack.c.bf16 %v5337_v29, %v5335_v27 }
 0x45c   : > { %v4181_v24 = vmax.f32 %v3720_v37, 0.0  ;;  %v4724_v25 = vpop.f32.mrb[144].mxu1  ;;  %v5586_v38 = vpack.c.bf16 %v5338_v36, %v5336_v8 }
 0x45d   : > { %v4725_v5 = vadd.f32 %v4724_v25, %v12337_v39  ;;  %v4726_v50 = vpop.f32.mrb[145].mxu1  ;;  %v4376_v10 = vpack.c.bf16 %v4180_v52, %v4178_v44 }
 0x45e   : > { %v4727_v31 = vadd.f32 %v4726_v50, %v12340_v12  ;;  %v4728_v0 = vpop.f32.mrb[146].mxu1  ;;  %5973 = vmatprep.mubr.bf16.mxu0 %v5586_v38  ;;  %v4377_v3 = vpack.c.bf16 %v4181_v24, %v4179_v54 }
 0x45f   : > { %v4729_v30 = vadd.f32 %v4728_v0, %v12337_v39  ;;  %v4730_v51 = vpop.f32.mrb[147].mxu1  ;;  %5974 = vmatmul.mubr.bf16.gmra.mrb[140].mxu0 %v5585_v20  ;;  %v5339_v61 = vmax.f32 %v4725_v5, 0.0 }
 0x460   : > { %v4731_v62 = vadd.f32 %v4730_v51, %v12340_v12  ;;  %4972 = vmatprep.mubr.bf16.mxu1 %v4377_v3  ;;  %v5340_v63 = vmax.f32 %v4727_v31, 0.0 }
 0x461   : > { %v5341_v23 = vmax.f32 %v4729_v30, 0.0  ;;  %4973 = vmatmul.mubr.bf16.gmra.mrb[244].mxu1 %v4376_v10 }
 0x462   : > { %v5342_v11 = vmax.f32 %v4731_v62, 0.0 }
 0x463   : > { %v5587_v34 = vpack.c.bf16 %v5341_v23, %v5339_v61 }
 0x464   : > { %v3723_v32 = vpop.f32.mrb[120].mxu0  ;;  %v4734_v7 = vpop.f32.mrb[148].mxu1  ;;  %v5588_v33 = vpack.c.bf16 %v5342_v11, %v5340_v63 }
 0x465   : > { %v3724_v17 = vadd.f32 %v3723_v32, %v10736_v48  ;;  %v4735_v40 = vadd.f32 %v4734_v7, %v12337_v39  ;;  %v3725_v28 = vpop.f32.mrb[121].mxu0  ;;  %v4736_v27 = vpop.f32.mrb[149].mxu1 }
 0x466   : > { %v3726_v29 = vadd.f32 %v3725_v28, %v10739_v1  ;;  %v4737_v45 = vadd.f32 %v4736_v27, %v12340_v12  ;;  %v3727_v56 = vpop.f32.mrb[122].mxu0  ;;  %v4738_v8 = vpop.f32.mrb[150].mxu1  ;;  %5983 = vmatprep.mubr.bf16.mxu0 %v5588_v33 }
 0x467   : > { %v3728_v36 = vadd.f32 %v3727_v56, %v10736_v48  ;;  %v4739_v37 = vadd.f32 %v4738_v8, %v12337_v39  ;;  %v3729_v44 = vpop.f32.mrb[123].mxu0  ;;  %v4740_v52 = vpop.f32.mrb[151].mxu1  ;;  %5984 = vmatmul.mubr.bf16.gmra.mrb[144].mxu0 %v5587_v34  ;;  %v4182_v24 = vmax.f32 %v3724_v17, 0.0  ;;  %v5343_v25 = vmax.f32 %v4735_v40, 0.0 }
 0x468   : > { %v3730_v20 = vadd.f32 %v3729_v44, %v10739_v1  ;;  %v4741_v54 = vadd.f32 %v4740_v52, %v12340_v12  ;;  %v4183_v50 = vmax.f32 %v3726_v29, 0.0  ;;  %v5344_v10 = vmax.f32 %v4737_v45, 0.0 }
 0x469   : > { %v4184_v38 = vmax.f32 %v3728_v36, 0.0  ;;  %v5345_v5 = vmax.f32 %v4739_v37, 0.0 }
 0x46a   : > { %v4185_v31 = vmax.f32 %v3730_v20, 0.0  ;;  %v5346_v0 = vmax.f32 %v4741_v54, 0.0 }
 0x46b   : > { %v4378_v3 = vpack.c.bf16 %v4184_v38, %v4182_v24  ;;  %v5589_v30 = vpack.c.bf16 %v5345_v5, %v5343_v25 }
 0x46c   : > { %v4744_v51 = vpop.f32.mrb[152].mxu1  ;;  %v4379_v62 = vpack.c.bf16 %v4185_v31, %v4183_v50  ;;  %v5590_v61 = vpack.c.bf16 %v5346_v0, %v5344_v10 }
 0x46d   : > { %v4745_v63 = vadd.f32 %v4744_v51, %v12337_v39  ;;  %v4746_v23 = vpop.f32.mrb[153].mxu1 }
 0x46e   : > { %v4747_v11 = vadd.f32 %v4746_v23, %v12340_v12  ;;  %v3733_v57 = vpop.f32.mrb[124].mxu0  ;;  %v4748_v14 = vpop.f32.mrb[154].mxu1  ;;  %4982 = vmatprep.mubr.bf16.mxu1 %v4379_v62  ;;  %5993 = vmatprep.mubr.bf16.mxu0 %v5590_v61 }
 0x46f   : > { %v3734_v13 = vadd.f32 %v3733_v57, %v10736_v48  ;;  %v4749_v34 = vadd.f32 %v4748_v14, %v12337_v39  ;;  %v3735_v32 = vpop.f32.mrb[125].mxu0  ;;  %v4750_v7 = vpop.f32.mrb[155].mxu1  ;;  %4983 = vmatmul.mubr.bf16.gmra.mrb[248].mxu1 %v4378_v3  ;;  %5994 = vmatmul.mubr.bf16.gmra.mrb[148].mxu0 %v5589_v30  ;;  %v5347_v28 = vmax.f32 %v4745_v63, 0.0  ;;  %v14292_v63 = vld [vmem:[#allocation30_spill] sm:$0xff] }
 0x470   : > { %v3736_v33 = vadd.f32 %v3735_v32, %v10739_v1  ;;  %v4751_v17 = vadd.f32 %v4750_v7, %v12340_v12  ;;  %v3737_v40 = vpop.f32.mrb[126].mxu0  ;;  %v5348_v56 = vmax.f32 %v4747_v11, 0.0 }
 0x471   : > { %v5349_v27 = vmax.f32 %v4749_v34, 0.0  ;;  %v3738_v29 = vadd.f32 %v3737_v40, %v10736_v48  ;;  %v3739_v45 = vpop.f32.mrb[127].mxu0  ;;  %v4186_v37 = vmax.f32 %v3734_v13, 0.0 }
 0x472   : > { %v5350_v8 = vmax.f32 %v4751_v17, 0.0  ;;  %v3740_v36 = vadd.f32 %v3739_v45, %v10739_v1  ;;  %v4187_v20 = vmax.f32 %v3736_v33, 0.0 }
 0x473   : > { %v4188_v44 = vmax.f32 %v3738_v29, 0.0  ;;  %v5591_v52 = vpack.c.bf16 %v5349_v27, %v5347_v28  ;;  %v14293_v29 = vld [vmem:[#allocation28_spill] sm:$0xff] }
 0x474   : > { %v4189_v54 = vmax.f32 %v3740_v36, 0.0  ;;  %v4754_v24 = vpop.f32.mrb[156].mxu1  ;;  %v5592_v25 = vpack.c.bf16 %v5350_v8, %v5348_v56  ;;  %v14294_v56 = vld [vmem:[#allocation32_spill] sm:$0xff] }
 0x475   : > { %v4755_v38 = vadd.f32 %v4754_v24, %v12337_v39  ;;  %v4756_v5 = vpop.f32.mrb[157].mxu1  ;;  %v4380_v50 = vpack.c.bf16 %v4188_v44, %v4186_v37  ;;  %v9610_v8 = vld [vmem:[%s14110_s11 + $0x28] sm:$0xff]  }
 0x476   : > { %v4757_v10 = vadd.f32 %v4756_v5, %v12340_v12  ;;  %v4758_v31 = vpop.f32.mrb[158].mxu1  ;;  %6003 = vmatprep.mubr.bf16.mxu0 %v5592_v25  ;;  %v4381_v48 = vpack.c.bf16 %v4189_v54, %v4187_v20  ;;  %v9611_v36 = vld [vmem:[%s14108_s9 + $0xc0] ss:$8 sps:$4 sm:$0xff]   ;;  %v9613_v37 = vld [vmem:[%s14108_s9 + $0xc4] ss:$8 sps:$4 sm:$0xff]   ;;  %8375 = vmatpush1.bf16.msra.mxu0 %v9610_v8 }
 0x477   : > { %v4759_v0 = vadd.f32 %v4758_v31, %v12337_v39  ;;  %v4760_v3 = vpop.f32.mrb[159].mxu1  ;;  %6004 = vmatmul.mubr.bf16.gmra.mrb[152].mxu0 %v5591_v52  ;;  %v5351_v30 = vmax.f32 %v4755_v38, 0.0  ;;  %7196 = vmatprep.subr.bf16.mxu1 %v9613_v37 }
 0x478   : > { %v4761_v1 = vadd.f32 %v4760_v3, %v12340_v12  ;;  %4992 = vmatprep.mubr.bf16.mxu1 %v4381_v48  ;;  %v5352_v62 = vmax.f32 %v4757_v10, 0.0  ;;  %7197 = vmatpush1.bf16.msra.mxu1 %v9611_v36 }
 0x479   : > { %v5353_v51 = vmax.f32 %v4759_v0, 0.0  ;;  %4993 = vmatmul.mubr.bf16.gmra.mrb[252].mxu1 %v4380_v50  ;;  %8376 = vmatprep.subr.bf16.mxu0 %v14167_v15  ;;  %v14295_v0 = vld [vmem:[#allocation31_spill] sm:$0xff] }
 0x47a   : > { %v5354_v61 = vmax.f32 %v4761_v1, 0.0  ;;  %5002 = vmatprep.mubr.bf16.mxu1 %v14292_v63 }
 0x47b   : > { %v5593_v23 = vpack.c.bf16 %v5353_v51, %v5351_v30  ;;  %v14296_v30 = vld [vmem:[#allocation18_spill] sm:$0xff] }
 0x47c   : > { %v4764_v11 = vpop.f32.mrb[160].mxu1  ;;  %v5594_v57 = vpack.c.bf16 %v5354_v61, %v5352_v62 }
 0x47d   : > { %v4765_v14 = vadd.f32 %v4764_v11, %v12337_v39  ;;  %v4766_v13 = vpop.f32.mrb[161].mxu1 }
 0x47e   : > { %v4767_v34 = vadd.f32 %v4766_v13, %v12340_v12  ;;  %v4768_v32 = vpop.f32.mrb[162].mxu1  ;;  %6013 = vmatprep.mubr.bf16.mxu0 %v5594_v57 }
 0x47f   : > { %v4769_v7 = vadd.f32 %v4768_v32, %v12337_v39  ;;  %v4770_v33 = vpop.f32.mrb[163].mxu1  ;;  %6014 = vmatmul.mubr.bf16.gmra.mrb[156].mxu0 %v5593_v23  ;;  %v5355_v40 = vmax.f32 %v4765_v14, 0.0 }
 0x480   : > { %v4771_v17 = vadd.f32 %v4770_v33, %v12340_v12  ;;  %v5356_v28 = vmax.f32 %v4767_v34, 0.0  ;;  %v14297_v33 = vld [vmem:[#allocation33_spill] sm:$0xff] }
 0x481   : > { %v5357_v27 = vmax.f32 %v4769_v7, 0.0  ;;  %5003 = vmatmul.mubr.bf16.gmra.mrb[0].mxu1 %v14293_v29 }
 0x482   : > { %v5358_v45 = vmax.f32 %v4771_v17, 0.0  ;;  %5012 = vmatprep.mubr.bf16.mxu1 %v14294_v56 }
 0x483   : > { %v5595_v44 = vpack.c.bf16 %v5357_v27, %v5355_v40 }
 0x484   : > { %v4774_v52 = vpop.f32.mrb[164].mxu1  ;;  %v5596_v20 = vpack.c.bf16 %v5358_v45, %v5356_v28  ;;  %v14298_v28 = vld [vmem:[#allocation9_spill] sm:$0xff] }
 0x485   : > { %v4775_v54 = vadd.f32 %v4774_v52, %v12337_v39  ;;  %v4776_v24 = vpop.f32.mrb[165].mxu1 }
 0x486   : > { %v4777_v25 = vadd.f32 %v4776_v24, %v12340_v12  ;;  %v4778_v38 = vpop.f32.mrb[166].mxu1  ;;  %6023 = vmatprep.mubr.bf16.mxu0 %v5596_v20 }
 0x487   : > { %v4779_v5 = vadd.f32 %v4778_v38, %v12337_v39  ;;  %v4780_v50 = vpop.f32.mrb[167].mxu1  ;;  %6024 = vmatmul.mubr.bf16.gmra.mrb[160].mxu0 %v5595_v44  ;;  %v5359_v31 = vmax.f32 %v4775_v54, 0.0 }
 0x488   : > { %v4781_v10 = vadd.f32 %v4780_v50, %v12340_v12  ;;  %v5360_v3 = vmax.f32 %v4777_v25, 0.0  ;;  %v14299_v25 = vld [vmem:[#allocation5_spill] sm:$0xff]  ;;  %v14300_v50 = vld [vmem:[#allocation10_spill] sm:$0xff] }
 0x489   : > { %v5361_v48 = vmax.f32 %v4779_v5, 0.0  ;;  %5013 = vmatmul.mubr.bf16.gmra.mrb[4].mxu1 %v14295_v0 }
 0x48a   : > { %v5362_v1 = vmax.f32 %v4781_v10, 0.0  ;;  %5022 = vmatprep.mubr.bf16.mxu1 %v14296_v30 }
 0x48b   : > { %v5597_v51 = vpack.c.bf16 %v5361_v48, %v5359_v31 }
 0x48c   : > { %v4784_v62 = vpop.f32.mrb[168].mxu1  ;;  %v5598_v61 = vpack.c.bf16 %v5362_v1, %v5360_v3 }
 0x48d   : > { %v4785_v63 = vadd.f32 %v4784_v62, %v12337_v39  ;;  %v4786_v23 = vpop.f32.mrb[169].mxu1 }
 0x48e   : > { %v4787_v11 = vadd.f32 %v4786_v23, %v12340_v12  ;;  %v4788_v57 = vpop.f32.mrb[170].mxu1  ;;  %6033 = vmatprep.mubr.bf16.mxu0 %v5598_v61 }
 0x48f   : > { %v4789_v14 = vadd.f32 %v4788_v57, %v12337_v39  ;;  %v4790_v13 = vpop.f32.mrb[171].mxu1  ;;  %6034 = vmatmul.mubr.bf16.gmra.mrb[164].mxu0 %v5597_v51  ;;  %v5363_v32 = vmax.f32 %v4785_v63, 0.0  ;;  %v14301_v57 = vld [vmem:[#allocation21_spill] sm:$0xff] }
 0x490   : > { %v4791_v34 = vadd.f32 %v4790_v13, %v12340_v12  ;;  %v5364_v17 = vmax.f32 %v4787_v11, 0.0  ;;  %v14302_v13 = vld [vmem:[#allocation11_spill] sm:$0xff] }
 0x491   : > { %v5365_v7 = vmax.f32 %v4789_v14, 0.0  ;;  %5023 = vmatmul.mubr.bf16.gmra.mrb[8].mxu1 %v14297_v33 }
 0x492   : > { %v5366_v40 = vmax.f32 %v4791_v34, 0.0  ;;  %5032 = vmatprep.mubr.bf16.mxu1 %v14298_v28  ;;  %v9614_v34 = vld [vmem:[%s14110_s11 + $0x30] sm:$0xff]  }
 0x493   : > { %v5599_v27 = vpack.c.bf16 %v5365_v7, %v5363_v32  ;;  %v9615_v32 = vld [vmem:[%s14108_s9 + $0xd0] ss:$8 sps:$4 sm:$0xff]   ;;  %v9617_v7 = vld [vmem:[%s14108_s9 + $0xd4] ss:$8 sps:$4 sm:$0xff]   ;;  %8377 = vmatpush1.bf16.msra.mxu0 %v9614_v34 }
 0x494   : > { %v4794_v29 = vpop.f32.mrb[172].mxu1  ;;  %v5600_v45 = vpack.c.bf16 %v5366_v40, %v5364_v17  ;;  %7198 = vmatprep.subr.bf16.mxu1 %v9617_v7  ;;  %8378 = vmatprep.subr.bf16.mxu0 %v14167_v15 }
 0x495   : > { %v4795_v56 = vadd.f32 %v4794_v29, %v12337_v39  ;;  %v4796_v8 = vpop.f32.mrb[173].mxu1  ;;  %7199 = vmatpush1.bf16.msra.mxu1 %v9615_v32 }
 0x496   : > { %v4797_v36 = vadd.f32 %v4796_v8, %v12340_v12  ;;  %v4798_v37 = vpop.f32.mrb[174].mxu1  ;;  %6043 = vmatprep.mubr.bf16.mxu0 %v5600_v45 }
 0x497   : > { %v4799_v44 = vadd.f32 %v4798_v37, %v12337_v39  ;;  %v4800_v52 = vpop.f32.mrb[175].mxu1  ;;  %6044 = vmatmul.mubr.bf16.gmra.mrb[168].mxu0 %v5599_v27  ;;  %v5367_v54 = vmax.f32 %v4795_v56, 0.0 }
 0x498   : > { %v4801_v20 = vadd.f32 %v4800_v52, %v12340_v12  ;;  %v5368_v38 = vmax.f32 %v4797_v36, 0.0  ;;  %v14303_v52 = vld [vmem:[#allocation6_spill] sm:$0xff] }
 0x499   : > { %v5369_v24 = vmax.f32 %v4799_v44, 0.0  ;;  %5033 = vmatmul.mubr.bf16.gmra.mrb[12].mxu1 %v14299_v25 }
 0x49a   : > { %v5370_v5 = vmax.f32 %v4801_v20, 0.0  ;;  %5042 = vmatprep.mubr.bf16.mxu1 %v14300_v50 }
 0x49b   : > { %v5601_v10 = vpack.c.bf16 %v5369_v24, %v5367_v54  ;;  %v14304_v24 = vld [vmem:[#allocation12_spill] sm:$0xff] }
 0x49c   : > { %v4804_v31 = vpop.f32.mrb[176].mxu1  ;;  %v5602_v48 = vpack.c.bf16 %v5370_v5, %v5368_v38 }
 0x49d   : > { %v4805_v0 = vadd.f32 %v4804_v31, %v12337_v39  ;;  %v4806_v3 = vpop.f32.mrb[177].mxu1 }
 0x49e   : > { %v4807_v1 = vadd.f32 %v4806_v3, %v12340_v12  ;;  %v4808_v30 = vpop.f32.mrb[178].mxu1  ;;  %6053 = vmatprep.mubr.bf16.mxu0 %v5602_v48 }
 0x49f   : > { %v4809_v51 = vadd.f32 %v4808_v30, %v12337_v39  ;;  %v4810_v62 = vpop.f32.mrb[179].mxu1  ;;  %6054 = vmatmul.mubr.bf16.gmra.mrb[172].mxu0 %v5601_v10  ;;  %v5371_v63 = vmax.f32 %v4805_v0, 0.0 }
 0x4a0   : > { %v4811_v61 = vadd.f32 %v4810_v62, %v12340_v12  ;;  %v5372_v23 = vmax.f32 %v4807_v1, 0.0  ;;  %v14305_v62 = vld [vmem:[#allocation7_spill] sm:$0xff] }
 0x4a1   : > { %v5373_v11 = vmax.f32 %v4809_v51, 0.0  ;;  %5043 = vmatmul.mubr.bf16.gmra.mrb[16].mxu1 %v14301_v57 }
 0x4a2   : > { %v5374_v14 = vmax.f32 %v4811_v61, 0.0  ;;  %5052 = vmatprep.mubr.bf16.mxu1 %v14302_v13 }
 0x4a3   : > { %v5603_v33 = vpack.c.bf16 %v5373_v11, %v5371_v63 }
 0x4a4   : > { %v4814_v17 = vpop.f32.mrb[180].mxu1  ;;  %v5604_v40 = vpack.c.bf16 %v5374_v14, %v5372_v23  ;;  %v14306_v23 = vld [vmem:[#allocation14_spill] sm:$0xff] }
 0x4a5   : > { %v4815_v28 = vadd.f32 %v4814_v17, %v12337_v39  ;;  %v4816_v27 = vpop.f32.mrb[181].mxu1 }
 0x4a6   : > { %v4817_v29 = vadd.f32 %v4816_v27, %v12340_v12  ;;  %v4818_v45 = vpop.f32.mrb[182].mxu1  ;;  %6063 = vmatprep.mubr.bf16.mxu0 %v5604_v40 }
 0x4a7   : > { %v4819_v56 = vadd.f32 %v4818_v45, %v12337_v39  ;;  %v4820_v8 = vpop.f32.mrb[183].mxu1  ;;  %6064 = vmatmul.mubr.bf16.gmra.mrb[176].mxu0 %v5603_v33  ;;  %v5375_v37 = vmax.f32 %v4815_v28, 0.0 }
 0x4a8   : > { %v4821_v36 = vadd.f32 %v4820_v8, %v12340_v12  ;;  %v5376_v20 = vmax.f32 %v4817_v29, 0.0  ;;  %v14307_v29 = vld [vmem:[#allocation8_spill] sm:$0xff]  ;;  %v14308_v8 = vld [vmem:[#allocation34_spill] sm:$0xff] }
 0x4a9   : > { %v5377_v44 = vmax.f32 %v4819_v56, 0.0  ;;  %5053 = vmatmul.mubr.bf16.gmra.mrb[20].mxu1 %v14303_v52 }
 0x4aa   : > { %v5378_v54 = vmax.f32 %v4821_v36, 0.0  ;;  %5062 = vmatprep.mubr.bf16.mxu1 %v14304_v24 }
 0x4ab   : > { %v5605_v25 = vpack.c.bf16 %v5377_v44, %v5375_v37 }
 0x4ac   : > { %v4824_v38 = vpop.f32.mrb[184].mxu1  ;;  %v5606_v5 = vpack.c.bf16 %v5378_v54, %v5376_v20 }
 0x4ad   : > { %v4825_v50 = vadd.f32 %v4824_v38, %v12337_v39  ;;  %v4826_v10 = vpop.f32.mrb[185].mxu1 }
 0x4ae   : > { %v4827_v31 = vadd.f32 %v4826_v10, %v12340_v12  ;;  %v4828_v48 = vpop.f32.mrb[186].mxu1  ;;  %6073 = vmatprep.mubr.bf16.mxu0 %v5606_v5 }
 0x4af   : > { %v4829_v0 = vadd.f32 %v4828_v48, %v12337_v39  ;;  %v4830_v3 = vpop.f32.mrb[187].mxu1  ;;  %6074 = vmatmul.mubr.bf16.gmra.mrb[180].mxu0 %v5605_v25  ;;  %v5379_v30 = vmax.f32 %v4825_v50, 0.0  ;;  %v9618_v48 = vld [vmem:[%s14110_s11 + $0x38] sm:$0xff]  }
 0x4b0   : > { %v4831_v1 = vadd.f32 %v4830_v3, %v12340_v12  ;;  %v5380_v61 = vmax.f32 %v4827_v31, 0.0  ;;  %v14309_v31 = vld [vmem:[#allocation13_spill] sm:$0xff]  ;;  %v9621_v3 = vld [vmem:[%s14108_s9 + $0xe4] ss:$8 sps:$4 sm:$0xff]   ;;  %8379 = vmatpush1.bf16.msra.mxu0 %v9618_v48 }
 0x4b1   : > { %v5381_v51 = vmax.f32 %v4829_v0, 0.0  ;;  %5063 = vmatmul.mubr.bf16.gmra.mrb[24].mxu1 %v14305_v62  ;;  %v9619_v0 = vld [vmem:[%s14108_s9 + $0xe0] ss:$8 sps:$4 sm:$0xff]   ;;  %7200 = vmatprep.subr.bf16.mxu1 %v9621_v3 }
 0x4b2   : > { %v5382_v63 = vmax.f32 %v4831_v1, 0.0  ;;  %5072 = vmatprep.mubr.bf16.mxu1 %v14306_v23  ;;  %7201 = vmatpush1.bf16.msra.mxu1 %v9619_v0 }
 0x4b3   : > { %v5607_v11 = vpack.c.bf16 %v5381_v51, %v5379_v30  ;;  %v14310_v51 = vld [vmem:[#allocation36_spill] sm:$0xff]  ;;  %8380 = vmatprep.subr.bf16.mxu0 %v14167_v15 }
 0x4b4   : > { %v4834_v57 = vpop.f32.mrb[188].mxu1  ;;  %v5608_v14 = vpack.c.bf16 %v5382_v63, %v5380_v61 }
 0x4b5   : > { %v4835_v13 = vadd.f32 %v4834_v57, %v12337_v39  ;;  %v4836_v34 = vpop.f32.mrb[189].mxu1 }
 0x4b6   : > { %v4837_v32 = vadd.f32 %v4836_v34, %v12340_v12  ;;  %v4838_v7 = vpop.f32.mrb[190].mxu1  ;;  %6083 = vmatprep.mubr.bf16.mxu0 %v5608_v14 }
 0x4b7   : > { %v4839_v33 = vadd.f32 %v4838_v7, %v12337_v39  ;;  %v4840_v17 = vpop.f32.mrb[191].mxu1  ;;  %6084 = vmatmul.mubr.bf16.gmra.mrb[184].mxu0 %v5607_v11  ;;  %v5383_v28 = vmax.f32 %v4835_v13, 0.0 }
 0x4b8   : > { %v4841_v40 = vadd.f32 %v4840_v17, %v12340_v12  ;;  %v5384_v45 = vmax.f32 %v4837_v32, 0.0  ;;  %v14311_v17 = vld [vmem:[#allocation35_spill] sm:$0xff] }
 0x4b9   : > { %v5385_v27 = vmax.f32 %v4839_v33, 0.0  ;;  %5073 = vmatmul.mubr.bf16.gmra.mrb[28].mxu1 %v14307_v29 }
 0x4ba   : > { %v5386_v56 = vmax.f32 %v4841_v40, 0.0  ;;  %5082 = vmatprep.mubr.bf16.mxu1 %v14308_v8 }
 0x4bb   : > { %v5609_v36 = vpack.c.bf16 %v5385_v27, %v5383_v28  ;;  %v14312_v27 = vld [vmem:[#allocation38_spill] sm:$0xff] }
 0x4bc   : > { %v4844_v37 = vpop.f32.mrb[192].mxu1  ;;  %v5610_v44 = vpack.c.bf16 %v5386_v56, %v5384_v45 }
 0x4bd   : > { %v4845_v52 = vadd.f32 %v4844_v37, %v12337_v39  ;;  %v4846_v20 = vpop.f32.mrb[193].mxu1 }
 0x4be   : > { %v4847_v54 = vadd.f32 %v4846_v20, %v12340_v12  ;;  %v4848_v24 = vpop.f32.mrb[194].mxu1  ;;  %6093 = vmatprep.mubr.bf16.mxu0 %v5610_v44 }
 0x4bf   : > { %v4849_v25 = vadd.f32 %v4848_v24, %v12337_v39  ;;  %v4850_v38 = vpop.f32.mrb[195].mxu1  ;;  %6094 = vmatmul.mubr.bf16.gmra.mrb[188].mxu0 %v5609_v36  ;;  %v5387_v5 = vmax.f32 %v4845_v52, 0.0 }
 0x4c0   : > { %v4851_v50 = vadd.f32 %v4850_v38, %v12340_v12  ;;  %v5388_v1 = vmax.f32 %v4847_v54, 0.0  ;;  %v14313_v38 = vld [vmem:[#allocation37_spill] sm:$0xff] }
 0x4c1   : > { %v5389_v10 = vmax.f32 %v4849_v25, 0.0  ;;  %5083 = vmatmul.mubr.bf16.gmra.mrb[32].mxu1 %v14309_v31 }
 0x4c2   : > { %v5390_v30 = vmax.f32 %v4851_v50, 0.0  ;;  %5092 = vmatprep.mubr.bf16.mxu1 %v14310_v51 }
 0x4c3   : > { %v5611_v62 = vpack.c.bf16 %v5389_v10, %v5387_v5  ;;  %v14314_v10 = vld [vmem:[#allocation39_spill] sm:$0xff] }
 0x4c4   : > { %v4854_v61 = vpop.f32.mrb[196].mxu1  ;;  %v5612_v63 = vpack.c.bf16 %v5390_v30, %v5388_v1 }
 0x4c5   : > { %v4855_v23 = vadd.f32 %v4854_v61, %v12337_v39  ;;  %v4856_v11 = vpop.f32.mrb[197].mxu1 }
 0x4c6   : > { %v4857_v57 = vadd.f32 %v4856_v11, %v12340_v12  ;;  %v4858_v14 = vpop.f32.mrb[198].mxu1  ;;  %6103 = vmatprep.mubr.bf16.mxu0 %v5612_v63 }
 0x4c7   : > { %v4859_v13 = vadd.f32 %v4858_v14, %v12337_v39  ;;  %v4860_v34 = vpop.f32.mrb[199].mxu1  ;;  %6104 = vmatmul.mubr.bf16.gmra.mrb[192].mxu0 %v5611_v62  ;;  %v5391_v7 = vmax.f32 %v4855_v23, 0.0 }
 0x4c8   : > { %v4861_v32 = vadd.f32 %v4860_v34, %v12340_v12  ;;  %v5392_v40 = vmax.f32 %v4857_v57, 0.0  ;;  %v14315_v57 = vld [vmem:[#allocation15_spill] sm:$0xff]  ;;  %v14316_v34 = vld [vmem:[#allocation40_spill] sm:$0xff] }
 0x4c9   : > { %v5393_v33 = vmax.f32 %v4859_v13, 0.0  ;;  %5093 = vmatmul.mubr.bf16.gmra.mrb[36].mxu1 %v14311_v17 }
 0x4ca   : > { %v5394_v28 = vmax.f32 %v4861_v32, 0.0  ;;  %5102 = vmatprep.mubr.bf16.mxu1 %v14312_v27 }
 0x4cb   : > { %v5613_v29 = vpack.c.bf16 %v5393_v33, %v5391_v7 }
 0x4cc   : > { %v4864_v45 = vpop.f32.mrb[200].mxu1  ;;  %v5614_v56 = vpack.c.bf16 %v5394_v28, %v5392_v40 }
 0x4cd   : > { %v4865_v8 = vadd.f32 %v4864_v45, %v12337_v39  ;;  %v4866_v36 = vpop.f32.mrb[201].mxu1 }
 0x4ce   : > { %v4867_v37 = vadd.f32 %v4866_v36, %v12340_v12  ;;  %v4868_v44 = vpop.f32.mrb[202].mxu1  ;;  %6113 = vmatprep.mubr.bf16.mxu0 %v5614_v56 }
 0x4cf   : > { %v4869_v52 = vadd.f32 %v4868_v44, %v12337_v39  ;;  %v4870_v20 = vpop.f32.mrb[203].mxu1  ;;  %6114 = vmatmul.mubr.bf16.gmra.mrb[196].mxu0 %v5613_v29  ;;  %v5395_v24 = vmax.f32 %v4865_v8, 0.0 }
 0x4d0   : > { %v4871_v54 = vadd.f32 %v4870_v20, %v12340_v12  ;;  %v5396_v5 = vmax.f32 %v4867_v37, 0.0  ;;  %v14317_v37 = vld [vmem:[#allocation16_spill] sm:$0xff]  ;;  %v14318_v20 = vld [vmem:[#allocation41_spill] sm:$0xff] }
 0x4d1   : > { %v5397_v25 = vmax.f32 %v4869_v52, 0.0  ;;  %5103 = vmatmul.mubr.bf16.gmra.mrb[40].mxu1 %v14313_v38  ;;  %v9625_v38 = vld [vmem:[%s14108_s9 + $0xf4] ss:$8 sps:$4 sm:$0xff]  }
 0x4d2   : > { %v5398_v50 = vmax.f32 %v4871_v54, 0.0  ;;  %5112 = vmatprep.mubr.bf16.mxu1 %v14314_v10  ;;  %7202 = vmatprep.subr.bf16.mxu1 %v9625_v38 }
 0x4d3   : > { %v5615_v31 = vpack.c.bf16 %v5397_v25, %v5395_v24  ;;  %v9622_v24 = vld [vmem:[%s14110_s11 + $0x40] sm:$0xff]   ;;  %v9623_v25 = vld [vmem:[%s14108_s9 + $0xf0] ss:$8 sps:$4 sm:$0xff]  }
 0x4d4   : > { %v4874_v48 = vpop.f32.mrb[204].mxu1  ;;  %v5616_v0 = vpack.c.bf16 %v5398_v50, %v5396_v5  ;;  %8381 = vmatpush1.bf16.msra.mxu0 %v9622_v24  ;;  %7203 = vmatpush1.bf16.msra.mxu1 %v9623_v25 }
 0x4d5   : > { %v4875_v3 = vadd.f32 %v4874_v48, %v12337_v39  ;;  %v4876_v1 = vpop.f32.mrb[205].mxu1  ;;  %8382 = vmatprep.subr.bf16.mxu0 %v14167_v15 }
 0x4d6   : > { %v4877_v30 = vadd.f32 %v4876_v1, %v12340_v12  ;;  %v4878_v51 = vpop.f32.mrb[206].mxu1  ;;  %6123 = vmatprep.mubr.bf16.mxu0 %v5616_v0 }
 0x4d7   : > { %v4879_v62 = vadd.f32 %v4878_v51, %v12337_v39  ;;  %v4880_v61 = vpop.f32.mrb[207].mxu1  ;;  %6124 = vmatmul.mubr.bf16.gmra.mrb[200].mxu0 %v5615_v31  ;;  %v5399_v23 = vmax.f32 %v4875_v3, 0.0 }
 0x4d8   : > { %v4881_v63 = vadd.f32 %v4880_v61, %v12340_v12  ;;  %v5400_v14 = vmax.f32 %v4877_v30, 0.0  ;;  %v14319_v61 = vld [vmem:[#allocation17_spill] sm:$0xff] }
 0x4d9   : > { %v5401_v11 = vmax.f32 %v4879_v62, 0.0  ;;  %5113 = vmatmul.mubr.bf16.gmra.mrb[44].mxu1 %v14315_v57 }
 0x4da   : > { %v5402_v13 = vmax.f32 %v4881_v63, 0.0  ;;  %5122 = vmatprep.mubr.bf16.mxu1 %v14316_v34 }
 0x4db   : > { %v5617_v32 = vpack.c.bf16 %v5401_v11, %v5399_v23  ;;  %v14320_v11 = vld [vmem:[#allocation42_spill] sm:$0xff] }
 0x4dc   : > { %v4884_v7 = vpop.f32.mrb[208].mxu1  ;;  %v5618_v33 = vpack.c.bf16 %v5402_v13, %v5400_v14 }
 0x4dd   : > { %v4885_v17 = vadd.f32 %v4884_v7, %v12337_v39  ;;  %v4886_v40 = vpop.f32.mrb[209].mxu1 }
 0x4de   : > { %v4887_v28 = vadd.f32 %v4886_v40, %v12340_v12  ;;  %v4888_v27 = vpop.f32.mrb[210].mxu1  ;;  %6133 = vmatprep.mubr.bf16.mxu0 %v5618_v33 }
 0x4df   : > { %v4889_v29 = vadd.f32 %v4888_v27, %v12337_v39  ;;  %v4890_v45 = vpop.f32.mrb[211].mxu1  ;;  %6134 = vmatmul.mubr.bf16.gmra.mrb[204].mxu0 %v5617_v32  ;;  %v5403_v8 = vmax.f32 %v4885_v17, 0.0 }
 0x4e0   : > { %v4891_v56 = vadd.f32 %v4890_v45, %v12340_v12  ;;  %v5404_v44 = vmax.f32 %v4887_v28, 0.0  ;;  %v14321_v45 = vld [vmem:[#allocation19_spill] sm:$0xff] }
 0x4e1   : > { %v5405_v36 = vmax.f32 %v4889_v29, 0.0  ;;  %5123 = vmatmul.mubr.bf16.gmra.mrb[48].mxu1 %v14317_v37 }
 0x4e2   : > { %v5406_v52 = vmax.f32 %v4891_v56, 0.0  ;;  %5132 = vmatprep.mubr.bf16.mxu1 %v14318_v20 }
 0x4e3   : > { %v5619_v54 = vpack.c.bf16 %v5405_v36, %v5403_v8  ;;  %v14322_v36 = vld [vmem:[#allocation43_spill] sm:$0xff] }
 0x4e4   : > { %v4894_v5 = vpop.f32.mrb[212].mxu1  ;;  %v5620_v50 = vpack.c.bf16 %v5406_v52, %v5404_v44 }
 0x4e5   : > { %v4895_v10 = vadd.f32 %v4894_v5, %v12337_v39  ;;  %v4896_v31 = vpop.f32.mrb[213].mxu1 }
 0x4e6   : > { %v4897_v48 = vadd.f32 %v4896_v31, %v12340_v12  ;;  %v4898_v0 = vpop.f32.mrb[214].mxu1  ;;  %6143 = vmatprep.mubr.bf16.mxu0 %v5620_v50 }
 0x4e7   : > { %v4899_v3 = vadd.f32 %v4898_v0, %v12337_v39  ;;  %v4900_v1 = vpop.f32.mrb[215].mxu1  ;;  %6144 = vmatmul.mubr.bf16.gmra.mrb[208].mxu0 %v5619_v54  ;;  %v5407_v51 = vmax.f32 %v4895_v10, 0.0 }
 0x4e8   : > { %v4901_v30 = vadd.f32 %v4900_v1, %v12340_v12  ;;  %v5408_v63 = vmax.f32 %v4897_v48, 0.0  ;;  %v14323_v48 = vld [vmem:[#allocation20_spill] sm:$0xff] }
 0x4e9   : > { %v5409_v62 = vmax.f32 %v4899_v3, 0.0  ;;  %5133 = vmatmul.mubr.bf16.gmra.mrb[52].mxu1 %v14319_v61  ;;  %v14324_v1 = vld [vmem:[#allocation44_spill] sm:$0xff] }
 0x4ea   : > { %v5410_v23 = vmax.f32 %v4901_v30, 0.0  ;;  %5142 = vmatprep.mubr.bf16.mxu1 %v14320_v11 }
 0x4eb   : > { %v5621_v57 = vpack.c.bf16 %v5409_v62, %v5407_v51 }
 0x4ec   : > { %v4904_v14 = vpop.f32.mrb[216].mxu1  ;;  %v5622_v13 = vpack.c.bf16 %v5410_v23, %v5408_v63 }
 0x4ed   : > { %v4905_v34 = vadd.f32 %v4904_v14, %v12337_v39  ;;  %v4906_v32 = vpop.f32.mrb[217].mxu1 }
 0x4ee   : > { %v4907_v7 = vadd.f32 %v4906_v32, %v12340_v12  ;;  %v4908_v33 = vpop.f32.mrb[218].mxu1  ;;  %6153 = vmatprep.mubr.bf16.mxu0 %v5622_v13 }
 0x4ef   : > { %v4909_v17 = vadd.f32 %v4908_v33, %v12337_v39  ;;  %v4910_v40 = vpop.f32.mrb[219].mxu1  ;;  %6154 = vmatmul.mubr.bf16.gmra.mrb[212].mxu0 %v5621_v57  ;;  %v5411_v27 = vmax.f32 %v4905_v34, 0.0 }
 0x4f0   : > { %v4911_v28 = vadd.f32 %v4910_v40, %v12340_v12  ;;  %v5412_v56 = vmax.f32 %v4907_v7, 0.0  ;;  %v14325_v7 = vld [vmem:[#allocation22_spill] sm:$0xff]  ;;  %v14326_v40 = vld [vmem:[#allocation45_spill] sm:$0xff] }
 0x4f1   : > { %v5413_v29 = vmax.f32 %v4909_v17, 0.0  ;;  %5143 = vmatmul.mubr.bf16.gmra.mrb[56].mxu1 %v14321_v45 }
 0x4f2   : > { %v5414_v8 = vmax.f32 %v4911_v28, 0.0  ;;  %5152 = vmatprep.mubr.bf16.mxu1 %v14322_v36 }
 0x4f3   : > { %v5623_v37 = vpack.c.bf16 %v5413_v29, %v5411_v27  ;;  %v9626_v27 = vld [vmem:[%s14110_s11 + $0x48] sm:$0xff]  }
 0x4f4   : > { %v4914_v44 = vpop.f32.mrb[220].mxu1  ;;  %v5624_v52 = vpack.c.bf16 %v5414_v8, %v5412_v56  ;;  %8383 = vmatpush1.bf16.msra.mxu0 %v9626_v27 }
 0x4f5   : > { %v4915_v20 = vadd.f32 %v4914_v44, %v12337_v39  ;;  %v4916_v54 = vpop.f32.mrb[221].mxu1  ;;  %8384 = vmatprep.subr.bf16.mxu0 %v14167_v15 }
 0x4f6   : > { %v4917_v24 = vadd.f32 %v4916_v54, %v12340_v12  ;;  %v4918_v25 = vpop.f32.mrb[222].mxu1  ;;  %6163 = vmatprep.mubr.bf16.mxu0 %v5624_v52 }
 0x4f7   : > { %v4919_v38 = vadd.f32 %v4918_v25, %v12337_v39  ;;  %v4920_v5 = vpop.f32.mrb[223].mxu1  ;;  %6164 = vmatmul.mubr.bf16.gmra.mrb[216].mxu0 %v5623_v37  ;;  %v5415_v10 = vmax.f32 %v4915_v20, 0.0  ;;  %v14327_v25 = vld [vmem:[#allocation23_spill] sm:$0xff] }
 0x4f8   : > { %v4921_v50 = vadd.f32 %v4920_v5, %v12340_v12  ;;  %v5416_v0 = vmax.f32 %v4917_v24, 0.0 }
 0x4f9   : > { %v5417_v31 = vmax.f32 %v4919_v38, 0.0  ;;  %5153 = vmatmul.mubr.bf16.gmra.mrb[60].mxu1 %v14323_v48 }
 0x4fa   : > { %v5418_v3 = vmax.f32 %v4921_v50, 0.0  ;;  %5162 = vmatprep.mubr.bf16.mxu1 %v14324_v1  ;;  %v14328_v50 = vld [vmem:[#allocation46_spill] sm:$0xff] }
 0x4fb   : > { %v5625_v30 = vpack.c.bf16 %v5417_v31, %v5415_v10 }
 0x4fc   : > { %v4924_v51 = vpop.f32.mrb[224].mxu1  ;;  %v5626_v62 = vpack.c.bf16 %v5418_v3, %v5416_v0 }
 0x4fd   : > { %v4925_v61 = vadd.f32 %v4924_v51, %v12337_v39  ;;  %v4926_v63 = vpop.f32.mrb[225].mxu1 }
 0x4fe   : > { %v4927_v23 = vadd.f32 %v4926_v63, %v12340_v12  ;;  %v4928_v11 = vpop.f32.mrb[226].mxu1  ;;  %6173 = vmatprep.mubr.bf16.mxu0 %v5626_v62 }
 0x4ff   : > { %v4929_v57 = vadd.f32 %v4928_v11, %v12337_v39  ;;  %v4930_v14 = vpop.f32.mrb[227].mxu1  ;;  %6174 = vmatmul.mubr.bf16.gmra.mrb[220].mxu0 %v5625_v30  ;;  %v5419_v34 = vmax.f32 %v4925_v61, 0.0  ;;  %v14329_v11 = vld [vmem:[#allocation24_spill] sm:$0xff] }
 0x500   : > { %v4931_v13 = vadd.f32 %v4930_v14, %v12340_v12  ;;  %v5420_v33 = vmax.f32 %v4927_v23, 0.0 }
 0x501   : > { %v5421_v32 = vmax.f32 %v4929_v57, 0.0  ;;  %5163 = vmatmul.mubr.bf16.gmra.mrb[64].mxu1 %v14325_v7  ;;  %v5739_v7 = vld [vmem:[%s14107_s8] sm:$0x3] }
 0x502   : > { %v5422_v17 = vmax.f32 %v4931_v13, 0.0  ;;  %5172 = vmatprep.mubr.bf16.mxu1 %v14326_v40  ;;  %v14330_v13 = vld [vmem:[#allocation48_spill] sm:$0xff]  ;;  %v14331_v40 = vld [vmem:[#allocation25_spill] sm:$0xff] }
 0x503   : > { %v5627_v28 = vpack.c.bf16 %v5421_v32, %v5419_v34 }
 0x504   : > { %v4934_v29 = vpop.f32.mrb[228].mxu1  ;;  %v5628_v45 = vpack.c.bf16 %v5422_v17, %v5420_v33  ;;  %v12593_v33 = vrot.slane %v5739_v7, %v14290_v59  ;;  %v12596_v17 = vrot.slane %v5739_v7, %v14291_v26 }
 0x505   : > { %v4935_v56 = vadd.f32 %v4934_v29, %v12337_v39  ;;  %v4936_v8 = vpop.f32.mrb[229].mxu1 }
 0x506   : > { %v4937_v36 = vadd.f32 %v4936_v8, %v12340_v12  ;;  %v4938_v37 = vpop.f32.mrb[230].mxu1  ;;  %6183 = vmatprep.mubr.bf16.mxu0 %v5628_v45 }
 0x507   : > { %v4939_v44 = vadd.f32 %v4938_v37, %v12337_v39  ;;  %v4940_v52 = vpop.f32.mrb[231].mxu1  ;;  %6184 = vmatmul.mubr.bf16.gmra.mrb[224].mxu0 %v5627_v28  ;;  %v5423_v54 = vmax.f32 %v4935_v56, 0.0  ;;  %v14332_v28 = vld [vmem:[#allocation51_spill] sm:$0xff] }
 0x508   : > { %v4941_v20 = vadd.f32 %v4940_v52, %v12340_v12  ;;  %v5424_v38 = vmax.f32 %v4937_v36, 0.0 }
 0x509   : > { %v5425_v24 = vmax.f32 %v4939_v44, 0.0  ;;  %5173 = vmatmul.mubr.bf16.gmra.mrb[68].mxu1 %v14327_v25 }
 0x50a   : > { %v5426_v5 = vmax.f32 %v4941_v20, 0.0  ;;  %5182 = vmatprep.mubr.bf16.mxu1 %v14328_v50 }
 0x50b   : > { %v5629_v10 = vpack.c.bf16 %v5425_v24, %v5423_v54 }
 0x50c   : > { %v4944_v31 = vpop.f32.mrb[232].mxu1  ;;  %v5630_v48 = vpack.c.bf16 %v5426_v5, %v5424_v38 }
 0x50d   : > { %v4945_v0 = vadd.f32 %v4944_v31, %v12337_v39  ;;  %v4946_v3 = vpop.f32.mrb[233].mxu1 }
 0x50e   : > { %v4947_v1 = vadd.f32 %v4946_v3, %v12340_v12  ;;  %v4948_v30 = vpop.f32.mrb[234].mxu1  ;;  %6193 = vmatprep.mubr.bf16.mxu0 %v5630_v48 }
 0x50f   : > { %v4949_v51 = vadd.f32 %v4948_v30, %v12337_v39  ;;  %v4950_v62 = vpop.f32.mrb[235].mxu1  ;;  %6194 = vmatmul.mubr.bf16.gmra.mrb[228].mxu0 %v5629_v10  ;;  %v5427_v63 = vmax.f32 %v4945_v0, 0.0 }
 0x510   : > { %v4951_v61 = vadd.f32 %v4950_v62, %v12340_v12  ;;  %v5428_v57 = vmax.f32 %v4947_v1, 0.0 }
 0x511   : > { %v5429_v23 = vmax.f32 %v4949_v51, 0.0  ;;  %5183 = vmatmul.mubr.bf16.gmra.mrb[72].mxu1 %v14329_v11  ;;  %v14333_v51 = vld [vmem:[#allocation26_spill] sm:$0xff] }
 0x512   : > { %v5430_v14 = vmax.f32 %v4951_v61, 0.0  ;;  %5192 = vmatprep.mubr.bf16.mxu1 %v14330_v13 }
 0x513   : > { %v5631_v34 = vpack.c.bf16 %v5429_v23, %v5427_v63  ;;  %v14334_v63 = vld [vmem:[#allocation54_spill] sm:$0xff] }
 0x514   : > { %v5632_v32 = vpack.c.bf16 %v5430_v14, %v5428_v57 }
 0x516   : > { %6203 = vmatprep.mubr.bf16.mxu0 %v5632_v32 }
 0x517   : > { %6204 = vmatmul.mubr.bf16.gmra.mrb[232].mxu0 %v5631_v34  ;;  %v9627_v34 = vld [vmem:[%s14110_s11 + $0x50] sm:$0xff]  }
 0x518   : > { %8385 = vmatpush1.bf16.msra.mxu0 %v9627_v34 }
 0x519   : > { %5193 = vmatmul.mubr.bf16.gmra.mrb[76].mxu1 %v14331_v40  ;;  %8386 = vmatprep.subr.bf16.mxu0 %v14167_v15 }
 0x51a   : > { %5202 = vmatprep.mubr.bf16.mxu1 %v14332_v28  ;;  %v5945_v27 = vpop.f32.mrb[128].mxu0 }
 0x51b   : > { %v5946_v29 = vadd.f32 %v5945_v27, %v12593_v33  ;;  %v5947_v45 = vpop.f32.mrb[129].mxu0 }
 0x51c   : > { %v5948_v56 = vadd.f32 %v5947_v45, %v12596_v17  ;;  %v4954_v8 = vpop.f32.mrb[236].mxu1  ;;  %v5949_v36 = vpop.f32.mrb[130].mxu0 }
 0x51d   : > { %v4955_v37 = vadd.f32 %v4954_v8, %v12337_v39  ;;  %v5950_v44 = vadd.f32 %v5949_v36, %v12593_v33  ;;  %v4956_v52 = vpop.f32.mrb[237].mxu1  ;;  %v5951_v20 = vpop.f32.mrb[131].mxu0  ;;  %v6584_v38 = vmax.f32 %v5946_v29, 0.0 }
 0x51e   : > { %v4957_v54 = vadd.f32 %v4956_v52, %v12340_v12  ;;  %v5952_v24 = vadd.f32 %v5951_v20, %v12596_v17  ;;  %v4958_v25 = vpop.f32.mrb[238].mxu1  ;;  %v6585_v31 = vmax.f32 %v5948_v56, 0.0 }
 0x51f   : > { %v6586_v5 = vmax.f32 %v5950_v44, 0.0  ;;  %v4959_v50 = vadd.f32 %v4958_v25, %v12337_v39  ;;  %v4960_v10 = vpop.f32.mrb[239].mxu1  ;;  %v5431_v3 = vmax.f32 %v4955_v37, 0.0  ;;  %v14335_v44 = vld [vmem:[#allocation27_spill] sm:$0xff] }
 0x520   : > { %v6587_v48 = vmax.f32 %v5952_v24, 0.0  ;;  %v4961_v0 = vadd.f32 %v4960_v10, %v12340_v12  ;;  %v5432_v62 = vmax.f32 %v4957_v54, 0.0 }
 0x521   : > { %v12608_v1 = vpack.c.bf16 %v6586_v5, %v6584_v38  ;;  %v5433_v30 = vmax.f32 %v4959_v50, 0.0  ;;  %5203 = vmatmul.mubr.bf16.gmra.mrb[80].mxu1 %v14333_v51 }
 0x522   : > { %v5434_v61 = vmax.f32 %v4961_v0, 0.0  ;;  %5212 = vmatprep.mubr.bf16.mxu1 %v14334_v63  ;;  %v5955_v23 = vpop.f32.mrb[132].mxu0  ;;  %v12612_v11 = vpack.c.bf16 %v6587_v48, %v6585_v31 }
 0x523   : > { %v5956_v57 = vadd.f32 %v5955_v23, %v12593_v33  ;;  %v5957_v14 = vpop.f32.mrb[133].mxu0  ;;  %v5633_v13 = vpack.c.bf16 %v5433_v30, %v5431_v3 }
 0x524   : > { %v5958_v32 = vadd.f32 %v5957_v14, %v12596_v17  ;;  %v5959_v7 = vpop.f32.mrb[134].mxu0  ;;  %v5634_v40 = vpack.c.bf16 %v5434_v61, %v5432_v62 }
 0x525   : > { %v5960_v28 = vadd.f32 %v5959_v7, %v12593_v33  ;;  %v5961_v27 = vpop.f32.mrb[135].mxu0  ;;  %v6588_v45 = vmax.f32 %v5956_v57, 0.0 }
 0x526   : > { %v5962_v29 = vadd.f32 %v5961_v27, %v12596_v17  ;;  %6213 = vmatprep.mubr.bf16.mxu0 %v5634_v40  ;;  %v6589_v8 = vmax.f32 %v5958_v32, 0.0 }
 0x527   : > { %v6590_v56 = vmax.f32 %v5960_v28, 0.0  ;;  %6214 = vmatmul.mubr.bf16.gmra.mrb[236].mxu0 %v5633_v13 }
 0x528   : > { %v6591_v36 = vmax.f32 %v5962_v29, 0.0 }
 0x529   : > { %v12622_v37 = vpack.c.bf16 %v6590_v56, %v6588_v45  ;;  %5213 = vmatmul.mubr.bf16.gmra.mrb[84].mxu1 %v14335_v44 }
 0x52a   : > { %v4964_v52 = vpop.f32.mrb[240].mxu1  ;;  %5222 = vmatprep.mubr.bf16.mxu1 %v12005_v47  ;;  %v5965_v20 = vpop.f32.mrb[136].mxu0  ;;  %v12626_v54 = vpack.c.bf16 %v6591_v36, %v6589_v8 }
 0x52b   : > { %v4965_v24 = vadd.f32 %v4964_v52, %v12337_v39  ;;  %v5966_v25 = vadd.f32 %v5965_v20, %v12593_v33  ;;  %v4966_v38 = vpop.f32.mrb[241].mxu1  ;;  %v5967_v5 = vpop.f32.mrb[137].mxu0 }
 0x52c   : > { %v4967_v50 = vadd.f32 %v4966_v38, %v12340_v12  ;;  %v5968_v10 = vadd.f32 %v5967_v5, %v12596_v17  ;;  %v4968_v31 = vpop.f32.mrb[242].mxu1  ;;  %v5969_v48 = vpop.f32.mrb[138].mxu0 }
 0x52d   : > { %v4969_v0 = vadd.f32 %v4968_v31, %v12337_v39  ;;  %v5970_v3 = vadd.f32 %v5969_v48, %v12593_v33  ;;  %v4970_v47 = vpop.f32.mrb[243].mxu1  ;;  %v5971_v30 = vpop.f32.mrb[139].mxu0  ;;  %v5435_v61 = vmax.f32 %v4965_v24, 0.0  ;;  %v6592_v63 = vmax.f32 %v5966_v25, 0.0 }
 0x52e   : > { %v4971_v51 = vadd.f32 %v4970_v47, %v12340_v12  ;;  %v5972_v62 = vadd.f32 %v5971_v30, %v12596_v17  ;;  %v5436_v14 = vmax.f32 %v4967_v50, 0.0  ;;  %v6593_v13 = vmax.f32 %v5968_v10, 0.0 }
 0x52f   : > { %v5437_v23 = vmax.f32 %v4969_v0, 0.0  ;;  %v6594_v57 = vmax.f32 %v5970_v3, 0.0 }
 0x530   : > { %v5438_v34 = vmax.f32 %v4971_v51, 0.0  ;;  %v6595_v32 = vmax.f32 %v5972_v62, 0.0 }
 0x531   : > { %v12636_v7 = vpack.c.bf16 %v6594_v57, %v6592_v63  ;;  %5223 = vmatmul.mubr.bf16.gmra.mrb[88].mxu1 %v12001_v35  ;;  %v5635_v40 = vpack.c.bf16 %v5437_v23, %v5435_v61 }
 0x532   : > { %5232 = vmatprep.mubr.bf16.mxu1 %v12087_v60  ;;  %v5975_v28 = vpop.f32.mrb[140].mxu0  ;;  %v5636_v27 = vpack.c.bf16 %v5438_v34, %v5436_v14  ;;  %v12640_v29 = vpack.c.bf16 %v6595_v32, %v6593_v13 }
 0x533   : > { %v5976_v45 = vadd.f32 %v5975_v28, %v12593_v33  ;;  %v5977_v56 = vpop.f32.mrb[141].mxu0 }
 0x534   : > { %v5978_v8 = vadd.f32 %v5977_v56, %v12596_v17  ;;  %v4974_v36 = vpop.f32.mrb[244].mxu1  ;;  %v5979_v44 = vpop.f32.mrb[142].mxu0  ;;  %6223 = vmatprep.mubr.bf16.mxu0 %v5636_v27 }
 0x535   : > { %v4975_v52 = vadd.f32 %v4974_v36, %v12337_v39  ;;  %v5980_v20 = vadd.f32 %v5979_v44, %v12593_v33  ;;  %v4976_v35 = vpop.f32.mrb[245].mxu1  ;;  %v5981_v24 = vpop.f32.mrb[143].mxu0  ;;  %6224 = vmatmul.mubr.bf16.gmra.mrb[240].mxu0 %v5635_v40  ;;  %v6596_v5 = vmax.f32 %v5976_v45, 0.0 }
 0x536   : > { %v4977_v60 = vadd.f32 %v4976_v35, %v12340_v12  ;;  %v5982_v25 = vadd.f32 %v5981_v24, %v12596_v17  ;;  %v4978_v38 = vpop.f32.mrb[246].mxu1  ;;  %v6597_v48 = vmax.f32 %v5978_v8, 0.0 }
 0x537   : > { %v6598_v50 = vmax.f32 %v5980_v20, 0.0  ;;  %v4979_v10 = vadd.f32 %v4978_v38, %v12337_v39  ;;  %v4980_v31 = vpop.f32.mrb[247].mxu1  ;;  %v5439_v47 = vmax.f32 %v4975_v52, 0.0  ;;  %v9628_v38 = vld [vmem:[%s14110_s11 + $0x58] sm:$0xff]  }
 0x538   : > { %v6599_v0 = vmax.f32 %v5982_v25, 0.0  ;;  %v4981_v3 = vadd.f32 %v4980_v31, %v12340_v12  ;;  %v5440_v62 = vmax.f32 %v4977_v60, 0.0  ;;  %8387 = vmatpush1.bf16.msra.mxu0 %v9628_v38 }
 0x539   : > { %v12650_v30 = vpack.c.bf16 %v6598_v50, %v6596_v5  ;;  %v5441_v51 = vmax.f32 %v4979_v10, 0.0  ;;  %5233 = vmatmul.mubr.bf16.gmra.mrb[92].mxu1 %v12074_v19  ;;  %8388 = vmatprep.subr.bf16.mxu0 %v14167_v15 }
 0x53a   : > { %v5442_v61 = vmax.f32 %v4981_v3, 0.0  ;;  %5242 = vmatprep.mubr.bf16.mxu1 %v12142_v46  ;;  %v5985_v63 = vpop.f32.mrb[144].mxu0  ;;  %v12654_v23 = vpack.c.bf16 %v6599_v0, %v6597_v48 }
 0x53b   : > { %v5986_v57 = vadd.f32 %v5985_v63, %v12593_v33  ;;  %v5987_v14 = vpop.f32.mrb[145].mxu0  ;;  %v5637_v13 = vpack.c.bf16 %v5441_v51, %v5439_v47 }
 0x53c   : > { %v5988_v34 = vadd.f32 %v5987_v14, %v12596_v17  ;;  %v5989_v32 = vpop.f32.mrb[146].mxu0  ;;  %v5638_v40 = vpack.c.bf16 %v5442_v61, %v5440_v62 }
 0x53d   : > { %v5990_v28 = vadd.f32 %v5989_v32, %v12593_v33  ;;  %v5991_v27 = vpop.f32.mrb[147].mxu0  ;;  %v6600_v45 = vmax.f32 %v5986_v57, 0.0 }
 0x53e   : > { %v5992_v19 = vadd.f32 %v5991_v27, %v12596_v17  ;;  %6233 = vmatprep.mubr.bf16.mxu0 %v5638_v40  ;;  %v6601_v46 = vmax.f32 %v5988_v34, 0.0 }
 0x53f   : > { %v6602_v56 = vmax.f32 %v5990_v28, 0.0  ;;  %6234 = vmatmul.mubr.bf16.gmra.mrb[244].mxu0 %v5637_v13 }
 0x540   : > { %v6603_v8 = vmax.f32 %v5992_v19, 0.0 }
 0x541   : > { %v12660_v36 = vpack.c.bf16 %v6602_v56, %v6600_v45  ;;  %5243 = vmatmul.mubr.bf16.gmra.mrb[96].mxu1 %v12138_v42 }
 0x542   : > { %v4984_v44 = vpop.f32.mrb[248].mxu1  ;;  %5252 = vmatprep.mubr.bf16.mxu1 %v12182_v58  ;;  %v5995_v52 = vpop.f32.mrb[148].mxu0  ;;  %v12664_v20 = vpack.c.bf16 %v6603_v8, %v6601_v46 }
 0x543   : > { %v4985_v35 = vadd.f32 %v4984_v44, %v12337_v39  ;;  %v5996_v24 = vadd.f32 %v5995_v52, %v12593_v33  ;;  %v4986_v60 = vpop.f32.mrb[249].mxu1  ;;  %v5997_v25 = vpop.f32.mrb[149].mxu0 }
 0x544   : > { %v4987_v5 = vadd.f32 %v4986_v60, %v12340_v12  ;;  %v5998_v42 = vadd.f32 %v5997_v25, %v12596_v17  ;;  %v4988_v50 = vpop.f32.mrb[250].mxu1  ;;  %v5999_v10 = vpop.f32.mrb[150].mxu0 }
 0x545   : > { %v4989_v58 = vadd.f32 %v4988_v50, %v12337_v39  ;;  %v6000_v31 = vadd.f32 %v5999_v10, %v12593_v33  ;;  %v4990_v48 = vpop.f32.mrb[251].mxu1  ;;  %v6001_v0 = vpop.f32.mrb[151].mxu0  ;;  %v5443_v51 = vmax.f32 %v4985_v35, 0.0  ;;  %v6604_v62 = vmax.f32 %v5996_v24, 0.0 }
 0x546   : > { %v4991_v3 = vadd.f32 %v4990_v48, %v12340_v12  ;;  %v6002_v47 = vadd.f32 %v6001_v0, %v12596_v17  ;;  %v5444_v57 = vmax.f32 %v4987_v5, 0.0  ;;  %v6605_v14 = vmax.f32 %v5998_v42, 0.0 }
 0x547   : > { %v5445_v61 = vmax.f32 %v4989_v58, 0.0  ;;  %v6606_v63 = vmax.f32 %v6000_v31, 0.0 }
 0x548   : > { %v5446_v13 = vmax.f32 %v4991_v3, 0.0  ;;  %v6607_v34 = vmax.f32 %v6002_v47, 0.0 }
 0x549   : > { %v12678_v32 = vpack.c.bf16 %v6606_v63, %v6604_v62  ;;  %5253 = vmatmul.mubr.bf16.gmra.mrb[100].mxu1 %v12174_v2  ;;  %v5639_v40 = vpack.c.bf16 %v5445_v61, %v5443_v51 }
 0x54a   : > { %5262 = vmatprep.mubr.bf16.mxu1 %v12219_v43  ;;  %v6005_v28 = vpop.f32.mrb[152].mxu0  ;;  %v5640_v27 = vpack.c.bf16 %v5446_v13, %v5444_v57  ;;  %v12682_v19 = vpack.c.bf16 %v6607_v34, %v6605_v14 }
 0x54b   : > { %v6006_v45 = vadd.f32 %v6005_v28, %v12593_v33  ;;  %v6007_v56 = vpop.f32.mrb[153].mxu0 }
 0x54c   : > { %v6008_v46 = vadd.f32 %v6007_v56, %v12596_v17  ;;  %v4994_v8 = vpop.f32.mrb[252].mxu1  ;;  %v6009_v44 = vpop.f32.mrb[154].mxu0  ;;  %6243 = vmatprep.mubr.bf16.mxu0 %v5640_v27 }
 0x54d   : > { %v4995_v52 = vadd.f32 %v4994_v8, %v12337_v39  ;;  %v6010_v35 = vadd.f32 %v6009_v44, %v12593_v33  ;;  %v4996_v2 = vpop.f32.mrb[253].mxu1  ;;  %v6011_v24 = vpop.f32.mrb[155].mxu0  ;;  %6244 = vmatmul.mubr.bf16.gmra.mrb[248].mxu0 %v5639_v40  ;;  %v6608_v38 = vmax.f32 %v6006_v45, 0.0 }
 0x54e   : > { %v4997_v43 = vadd.f32 %v4996_v2, %v12340_v12  ;;  %v6012_v60 = vadd.f32 %v6011_v24, %v12596_v17  ;;  %v4998_v25 = vpop.f32.mrb[254].mxu1  ;;  %v6609_v10 = vmax.f32 %v6008_v46, 0.0 }
 0x54f   : > { %v6610_v5 = vmax.f32 %v6010_v35, 0.0  ;;  %v4999_v42 = vadd.f32 %v4998_v25, %v12337_v39  ;;  %v5000_v50 = vpop.f32.mrb[255].mxu1  ;;  %v5447_v48 = vmax.f32 %v4995_v52, 0.0 }
 0x550   : > { %v6611_v58 = vmax.f32 %v6012_v60, 0.0  ;;  %v5001_v31 = vadd.f32 %v5000_v50, %v12340_v12  ;;  %v5448_v47 = vmax.f32 %v4997_v43, 0.0 }
 0x551   : > { %v12692_v0 = vpack.c.bf16 %v6610_v5, %v6608_v38  ;;  %v5449_v3 = vmax.f32 %v4999_v42, 0.0  ;;  %5263 = vmatmul.mubr.bf16.gmra.mrb[104].mxu1 %v12202_v18 }
 0x552   : > { %v5450_v51 = vmax.f32 %v5001_v31, 0.0  ;;  %5272 = vmatprep.mubr.bf16.mxu1 %v12245_v21  ;;  %v6015_v62 = vpop.f32.mrb[156].mxu0  ;;  %v12696_v61 = vpack.c.bf16 %v6611_v58, %v6609_v10 }
 0x553   : > { %v6016_v63 = vadd.f32 %v6015_v62, %v12593_v33  ;;  %v6017_v57 = vpop.f32.mrb[157].mxu0  ;;  %v5641_v14 = vpack.c.bf16 %v5449_v3, %v5447_v48 }
 0x554   : > { %v6018_v13 = vadd.f32 %v6017_v57, %v12596_v17  ;;  %v5004_v34 = vpop.f32.mrb[0].mxu1  ;;  %v6019_v40 = vpop.f32.mrb[158].mxu0  ;;  %v5642_v28 = vpack.c.bf16 %v5450_v51, %v5448_v47 }
 0x555   : > { %v5005_v27 = vadd.f32 %v5004_v34, %v12337_v39  ;;  %v6020_v18 = vadd.f32 %v6019_v40, %v12593_v33  ;;  %v5006_v45 = vpop.f32.mrb[1].mxu1  ;;  %v6021_v56 = vpop.f32.mrb[159].mxu0  ;;  %v6612_v44 = vmax.f32 %v6016_v63, 0.0 }
 0x556   : > { %v5007_v21 = vadd.f32 %v5006_v45, %v12340_v12  ;;  %v6022_v46 = vadd.f32 %v6021_v56, %v12596_v17  ;;  %v5008_v8 = vpop.f32.mrb[2].mxu1  ;;  %6253 = vmatprep.mubr.bf16.mxu0 %v5642_v28  ;;  %v6613_v24 = vmax.f32 %v6018_v13, 0.0 }
 0x557   : > { %v6614_v52 = vmax.f32 %v6020_v18, 0.0  ;;  %v5009_v35 = vadd.f32 %v5008_v8, %v12337_v39  ;;  %v5010_v2 = vpop.f32.mrb[3].mxu1  ;;  %6254 = vmatmul.mubr.bf16.gmra.mrb[252].mxu0 %v5641_v14  ;;  %v5451_v25 = vmax.f32 %v5005_v27, 0.0 }
 0x558   : > { %v6615_v43 = vmax.f32 %v6022_v46, 0.0  ;;  %v5011_v60 = vadd.f32 %v5010_v2, %v12340_v12  ;;  %v5452_v42 = vmax.f32 %v5007_v21, 0.0 }
 0x559   : > { %v12706_v38 = vpack.c.bf16 %v6614_v52, %v6612_v44  ;;  %v5453_v5 = vmax.f32 %v5009_v35, 0.0  ;;  %5273 = vmatmul.mubr.bf16.gmra.mrb[108].mxu1 %v12243_v6 }
 0x55a   : > { %v5454_v50 = vmax.f32 %v5011_v60, 0.0  ;;  %5282 = vmatprep.mubr.bf16.mxu1 %v12273_v4  ;;  %v6025_v10 = vpop.f32.mrb[160].mxu0  ;;  %v12710_v58 = vpack.c.bf16 %v6615_v43, %v6613_v24 }
 0x55b   : > { %v5643_v31 = vpack.c.bf16 %v5453_v5, %v5451_v25  ;;  %v6026_v48 = vadd.f32 %v6025_v10, %v12593_v33  ;;  %v6027_v3 = vpop.f32.mrb[161].mxu0 }
 0x55c   : > { %v6028_v47 = vadd.f32 %v6027_v3, %v12596_v17  ;;  %v5014_v51 = vpop.f32.mrb[4].mxu1  ;;  %v6029_v62 = vpop.f32.mrb[162].mxu0  ;;  %v5644_v63 = vpack.c.bf16 %v5454_v50, %v5452_v42  ;;  %v9629_v42 = vld [vmem:[%s14110_s11 + $0x60] sm:$0xff]  }
 0x55d   : > { %v5015_v57 = vadd.f32 %v5014_v51, %v12337_v39  ;;  %v6030_v6 = vadd.f32 %v6029_v62, %v12593_v33  ;;  %v5016_v14 = vpop.f32.mrb[5].mxu1  ;;  %v6031_v13 = vpop.f32.mrb[163].mxu0  ;;  %v6616_v28 = vmax.f32 %v6026_v48, 0.0  ;;  %8389 = vmatpush1.bf16.msra.mxu0 %v9629_v42 }
 0x55e   : > { %v5017_v4 = vadd.f32 %v5016_v14, %v12340_v12  ;;  %v6032_v34 = vadd.f32 %v6031_v13, %v12596_v17  ;;  %v5018_v40 = vpop.f32.mrb[6].mxu1  ;;  %6263 = vmatprep.mubr.bf16.mxu0 %v5644_v63  ;;  %v6617_v56 = vmax.f32 %v6028_v47, 0.0  ;;  %8390 = vmatprep.subr.bf16.mxu0 %v14167_v15 }
 0x55f   : > { %v6618_v27 = vmax.f32 %v6030_v6, 0.0  ;;  %v5019_v18 = vadd.f32 %v5018_v40, %v12337_v39  ;;  %v5020_v45 = vpop.f32.mrb[7].mxu1  ;;  %6264 = vmatmul.mubr.bf16.gmra.mrb[0].mxu0 %v5643_v31  ;;  %v5455_v8 = vmax.f32 %v5015_v57, 0.0 }
 0x560   : > { %v6619_v21 = vmax.f32 %v6032_v34, 0.0  ;;  %v5021_v46 = vadd.f32 %v5020_v45, %v12340_v12  ;;  %v5456_v35 = vmax.f32 %v5017_v4, 0.0 }
 0x561   : > { %v12720_v44 = vpack.c.bf16 %v6618_v27, %v6616_v28  ;;  %v5457_v52 = vmax.f32 %v5019_v18, 0.0  ;;  %5283 = vmatmul.mubr.bf16.gmra.mrb[112].mxu1 %v12271_v9 }
 0x562   : > { %v5458_v2 = vmax.f32 %v5021_v46, 0.0  ;;  %5292 = vmatprep.mubr.bf16.mxu1 %v12299_v16  ;;  %v6035_v24 = vpop.f32.mrb[164].mxu0  ;;  %v12724_v43 = vpack.c.bf16 %v6619_v21, %v6617_v56 }
 0x563   : > { %v5645_v60 = vpack.c.bf16 %v5457_v52, %v5455_v8  ;;  %v6036_v25 = vadd.f32 %v6035_v24, %v12593_v33  ;;  %v6037_v5 = vpop.f32.mrb[165].mxu0 }
 0x564   : > { %v6038_v50 = vadd.f32 %v6037_v5, %v12596_v17  ;;  %v5024_v10 = vpop.f32.mrb[8].mxu1  ;;  %v6039_v31 = vpop.f32.mrb[166].mxu0  ;;  %v5646_v9 = vpack.c.bf16 %v5458_v2, %v5456_v35 }
 0x565   : > { %v5025_v48 = vadd.f32 %v5024_v10, %v12337_v39  ;;  %v6040_v16 = vadd.f32 %v6039_v31, %v12593_v33  ;;  %v5026_v3 = vpop.f32.mrb[9].mxu1  ;;  %v6041_v47 = vpop.f32.mrb[167].mxu0  ;;  %v6620_v57 = vmax.f32 %v6036_v25, 0.0 }
 0x566   : > { %v5027_v51 = vadd.f32 %v5026_v3, %v12340_v12  ;;  %v6042_v62 = vadd.f32 %v6041_v47, %v12596_v17  ;;  %v5028_v63 = vpop.f32.mrb[10].mxu1  ;;  %6273 = vmatprep.mubr.bf16.mxu0 %v5646_v9  ;;  %v6621_v4 = vmax.f32 %v6038_v50, 0.0 }
 0x567   : > { %v6622_v6 = vmax.f32 %v6040_v16, 0.0  ;;  %v5029_v14 = vadd.f32 %v5028_v63, %v12337_v39  ;;  %v5030_v13 = vpop.f32.mrb[11].mxu1  ;;  %6274 = vmatmul.mubr.bf16.gmra.mrb[4].mxu0 %v5645_v60  ;;  %v5459_v28 = vmax.f32 %v5025_v48, 0.0 }
 0x568   : > { %v6623_v34 = vmax.f32 %v6042_v62, 0.0  ;;  %v5031_v40 = vadd.f32 %v5030_v13, %v12340_v12  ;;  %v5460_v45 = vmax.f32 %v5027_v51, 0.0 }
 0x569   : > { %v12738_v27 = vpack.c.bf16 %v6622_v6, %v6620_v57  ;;  %v5461_v18 = vmax.f32 %v5029_v14, 0.0  ;;  %5293 = vmatmul.mubr.bf16.gmra.mrb[116].mxu1 %v12297_v41 }
 0x56a   : > { %v5462_v56 = vmax.f32 %v5031_v40, 0.0  ;;  %5302 = vmatprep.mubr.bf16.mxu1 %v12322_v22  ;;  %v6045_v21 = vpop.f32.mrb[168].mxu0  ;;  %v12742_v46 = vpack.c.bf16 %v6623_v34, %v6621_v4 }
 0x56b   : > { %v5647_v8 = vpack.c.bf16 %v5461_v18, %v5459_v28  ;;  %v6046_v52 = vadd.f32 %v6045_v21, %v12593_v33  ;;  %v6047_v35 = vpop.f32.mrb[169].mxu0 }
 0x56c   : > { %v6048_v2 = vadd.f32 %v6047_v35, %v12596_v17  ;;  %v5034_v24 = vpop.f32.mrb[12].mxu1  ;;  %v6049_v60 = vpop.f32.mrb[170].mxu0  ;;  %v5648_v25 = vpack.c.bf16 %v5462_v56, %v5460_v45 }
 0x56d   : > { %v5035_v5 = vadd.f32 %v5034_v24, %v12337_v39  ;;  %v6050_v41 = vadd.f32 %v6049_v60, %v12593_v33  ;;  %v5036_v42 = vpop.f32.mrb[13].mxu1  ;;  %v6051_v50 = vpop.f32.mrb[171].mxu0  ;;  %v6624_v9 = vmax.f32 %v6046_v52, 0.0 }
 0x56e   : > { %v5037_v22 = vadd.f32 %v5036_v42, %v12340_v12  ;;  %v6052_v10 = vadd.f32 %v6051_v50, %v12596_v17  ;;  %v5038_v31 = vpop.f32.mrb[14].mxu1  ;;  %6283 = vmatprep.mubr.bf16.mxu0 %v5648_v25  ;;  %v6625_v47 = vmax.f32 %v6048_v2, 0.0 }
 0x56f   : > { %v6626_v48 = vmax.f32 %v6050_v41, 0.0  ;;  %v5039_v16 = vadd.f32 %v5038_v31, %v12337_v39  ;;  %v5040_v3 = vpop.f32.mrb[15].mxu1  ;;  %6284 = vmatmul.mubr.bf16.gmra.mrb[8].mxu0 %v5647_v8  ;;  %v5463_v63 = vmax.f32 %v5035_v5, 0.0 }
 0x570   : > { %v6627_v51 = vmax.f32 %v6052_v10, 0.0  ;;  %v5041_v62 = vadd.f32 %v5040_v3, %v12340_v12  ;;  %v5464_v14 = vmax.f32 %v5037_v22, 0.0 }
 0x571   : > { %v12752_v57 = vpack.c.bf16 %v6626_v48, %v6624_v9  ;;  %v5465_v6 = vmax.f32 %v5039_v16, 0.0  ;;  %5303 = vmatmul.mubr.bf16.gmra.mrb[120].mxu1 %v12320_v49 }
 0x572   : > { %v5466_v13 = vmax.f32 %v5041_v62, 0.0  ;;  %5312 = vmatprep.mubr.bf16.mxu1 %v12344_v55  ;;  %v6055_v4 = vpop.f32.mrb[172].mxu0  ;;  %v12756_v34 = vpack.c.bf16 %v6627_v51, %v6625_v47 }
 0x573   : > { %v5649_v40 = vpack.c.bf16 %v5465_v6, %v5463_v63  ;;  %v6056_v28 = vadd.f32 %v6055_v4, %v12593_v33  ;;  %v6057_v18 = vpop.f32.mrb[173].mxu0 }
 0x574   : > { %v6058_v45 = vadd.f32 %v6057_v18, %v12596_v17  ;;  %v5044_v56 = vpop.f32.mrb[16].mxu1  ;;  %v6059_v21 = vpop.f32.mrb[174].mxu0  ;;  %v5650_v8 = vpack.c.bf16 %v5466_v13, %v5464_v14 }
 0x575   : > { %v5045_v52 = vadd.f32 %v5044_v56, %v12337_v39  ;;  %v6060_v49 = vadd.f32 %v6059_v21, %v12593_v33  ;;  %v5046_v35 = vpop.f32.mrb[17].mxu1  ;;  %v6061_v2 = vpop.f32.mrb[175].mxu0  ;;  %v6628_v25 = vmax.f32 %v6056_v28, 0.0 }
 0x576   : > { %v5047_v55 = vadd.f32 %v5046_v35, %v12340_v12  ;;  %v6062_v24 = vadd.f32 %v6061_v2, %v12596_v17  ;;  %v5048_v60 = vpop.f32.mrb[18].mxu1  ;;  %6293 = vmatprep.mubr.bf16.mxu0 %v5650_v8  ;;  %v6629_v50 = vmax.f32 %v6058_v45, 0.0 }
 0x577   : > { %v6630_v5 = vmax.f32 %v6060_v49, 0.0  ;;  %v5049_v41 = vadd.f32 %v5048_v60, %v12337_v39  ;;  %v5050_v42 = vpop.f32.mrb[19].mxu1  ;;  %6294 = vmatmul.mubr.bf16.gmra.mrb[12].mxu0 %v5649_v40  ;;  %v5467_v31 = vmax.f32 %v5045_v52, 0.0 }
 0x578   : > { %v6631_v22 = vmax.f32 %v6062_v24, 0.0  ;;  %v5051_v10 = vadd.f32 %v5050_v42, %v12340_v12  ;;  %v5468_v16 = vmax.f32 %v5047_v55, 0.0 }
 0x579   : > { %v12766_v9 = vpack.c.bf16 %v6630_v5, %v6628_v25  ;;  %v5469_v48 = vmax.f32 %v5049_v41, 0.0  ;;  %5313 = vmatmul.mubr.bf16.gmra.mrb[124].mxu1 %v12342_v53 }
 0x57a   : > { %v5470_v3 = vmax.f32 %v5051_v10, 0.0  ;;  %v6065_v47 = vpop.f32.mrb[176].mxu0  ;;  %7204 = vmatprep.mubr.bf16.mxu1 %v12612_v11  ;;  %v12770_v51 = vpack.c.bf16 %v6631_v22, %v6629_v50 }
 0x57b   : > { %v5651_v62 = vpack.c.bf16 %v5469_v48, %v5467_v31  ;;  %v6066_v63 = vadd.f32 %v6065_v47, %v12593_v33  ;;  %v6067_v6 = vpop.f32.mrb[177].mxu0 }
 0x57c   : > { %v6068_v14 = vadd.f32 %v6067_v6, %v12596_v17  ;;  %v5054_v13 = vpop.f32.mrb[20].mxu1  ;;  %v6069_v4 = vpop.f32.mrb[178].mxu0  ;;  %v5652_v40 = vpack.c.bf16 %v5470_v3, %v5468_v16  ;;  %v9630_v16 = vld [vmem:[%s14110_s11 + $0x68] sm:$0xff]  }
 0x57d   : > { %v5055_v28 = vadd.f32 %v5054_v13, %v12337_v39  ;;  %v6070_v53 = vadd.f32 %v6069_v4, %v12593_v33  ;;  %v5056_v18 = vpop.f32.mrb[21].mxu1  ;;  %v6071_v45 = vpop.f32.mrb[179].mxu0  ;;  %v6632_v8 = vmax.f32 %v6066_v63, 0.0  ;;  %8391 = vmatpush1.bf16.msra.mxu0 %v9630_v16 }
 0x57e   : > { %v5057_v56 = vadd.f32 %v5056_v18, %v12340_v12  ;;  %v6072_v11 = vadd.f32 %v6071_v45, %v12596_v17  ;;  %v5058_v21 = vpop.f32.mrb[22].mxu1  ;;  %6303 = vmatprep.mubr.bf16.mxu0 %v5652_v40  ;;  %v6633_v2 = vmax.f32 %v6068_v14, 0.0  ;;  %8392 = vmatprep.subr.bf16.mxu0 %v14167_v15 }
 0x57f   : > { %v6634_v52 = vmax.f32 %v6070_v53, 0.0  ;;  %v5059_v49 = vadd.f32 %v5058_v21, %v12337_v39  ;;  %v5060_v35 = vpop.f32.mrb[23].mxu1  ;;  %6304 = vmatmul.mubr.bf16.gmra.mrb[16].mxu0 %v5651_v62  ;;  %v5471_v60 = vmax.f32 %v5055_v28, 0.0 }
 0x580   : > { %v6635_v55 = vmax.f32 %v6072_v11, 0.0  ;;  %v5061_v24 = vadd.f32 %v5060_v35, %v12340_v12  ;;  %v5472_v41 = vmax.f32 %v5057_v56, 0.0 }
 0x581   : > { %v12780_v25 = vpack.c.bf16 %v6634_v52, %v6632_v8  ;;  %v5473_v5 = vmax.f32 %v5059_v49, 0.0  ;;  %7205 = vmatmul.mubr.bf16.vlgmr.msra.gmra.mrb[128].mxu1 %v12608_v1 }
 0x582   : > { %v5474_v42 = vmax.f32 %v5061_v24, 0.0  ;;  %v6075_v50 = vpop.f32.mrb[180].mxu0  ;;  %7214 = vmatprep.mubr.bf16.mxu1 %v12626_v54  ;;  %v12784_v22 = vpack.c.bf16 %v6635_v55, %v6633_v2 }
 0x583   : > { %v5653_v10 = vpack.c.bf16 %v5473_v5, %v5471_v60  ;;  %v6076_v31 = vadd.f32 %v6075_v50, %v12593_v33  ;;  %v6077_v48 = vpop.f32.mrb[181].mxu0 }
 0x584   : > { %v6078_v3 = vadd.f32 %v6077_v48, %v12596_v17  ;;  %v5064_v47 = vpop.f32.mrb[24].mxu1  ;;  %v6079_v62 = vpop.f32.mrb[182].mxu0  ;;  %v5654_v1 = vpack.c.bf16 %v5474_v42, %v5472_v41 }
 0x585   : > { %v5065_v63 = vadd.f32 %v5064_v47, %v12337_v39  ;;  %v6080_v6 = vadd.f32 %v6079_v62, %v12593_v33  ;;  %v5066_v54 = vpop.f32.mrb[25].mxu1  ;;  %v6081_v14 = vpop.f32.mrb[183].mxu0  ;;  %v6636_v28 = vmax.f32 %v6076_v31, 0.0 }
 0x586   : > { %v5067_v13 = vadd.f32 %v5066_v54, %v12340_v12  ;;  %v6082_v4 = vadd.f32 %v6081_v14, %v12596_v17  ;;  %v5068_v40 = vpop.f32.mrb[26].mxu1  ;;  %6313 = vmatprep.mubr.bf16.mxu0 %v5654_v1  ;;  %v6637_v56 = vmax.f32 %v6078_v3, 0.0 }
 0x587   : > { %v6638_v53 = vmax.f32 %v6080_v6, 0.0  ;;  %v5069_v18 = vadd.f32 %v5068_v40, %v12337_v39  ;;  %v5070_v45 = vpop.f32.mrb[27].mxu1  ;;  %6314 = vmatmul.mubr.bf16.gmra.mrb[20].mxu0 %v5653_v10  ;;  %v5475_v8 = vmax.f32 %v5065_v63, 0.0 }
 0x588   : > { %v6639_v11 = vmax.f32 %v6082_v4, 0.0  ;;  %v5071_v21 = vadd.f32 %v5070_v45, %v12340_v12  ;;  %v5476_v35 = vmax.f32 %v5067_v13, 0.0 }
 0x589   : > { %v12798_v52 = vpack.c.bf16 %v6638_v53, %v6636_v28  ;;  %v5477_v49 = vmax.f32 %v5069_v18, 0.0  ;;  %7215 = vmatmul.mubr.bf16.gmra.mrb[132].mxu1 %v12622_v37 }
 0x58a   : > { %v5478_v2 = vmax.f32 %v5071_v21, 0.0  ;;  %v6085_v55 = vpop.f32.mrb[184].mxu0  ;;  %7224 = vmatprep.mubr.bf16.mxu1 %v12640_v29  ;;  %v12802_v24 = vpack.c.bf16 %v6639_v11, %v6637_v56 }
 0x58b   : > { %v5655_v60 = vpack.c.bf16 %v5477_v49, %v5475_v8  ;;  %v6086_v5 = vadd.f32 %v6085_v55, %v12593_v33  ;;  %v6087_v41 = vpop.f32.mrb[185].mxu0 }
 0x58c   : > { %v6088_v42 = vadd.f32 %v6087_v41, %v12596_v17  ;;  %v5074_v50 = vpop.f32.mrb[28].mxu1  ;;  %v6089_v10 = vpop.f32.mrb[186].mxu0  ;;  %v5656_v31 = vpack.c.bf16 %v5478_v2, %v5476_v35 }
 0x58d   : > { %v5075_v48 = vadd.f32 %v5074_v50, %v12337_v39  ;;  %v6090_v37 = vadd.f32 %v6089_v10, %v12593_v33  ;;  %v5076_v16 = vpop.f32.mrb[29].mxu1  ;;  %v6091_v3 = vpop.f32.mrb[187].mxu0  ;;  %v6640_v1 = vmax.f32 %v6086_v5, 0.0 }
 0x58e   : > { %v5077_v47 = vadd.f32 %v5076_v16, %v12340_v12  ;;  %v6092_v29 = vadd.f32 %v6091_v3, %v12596_v17  ;;  %v5078_v62 = vpop.f32.mrb[30].mxu1  ;;  %6323 = vmatprep.mubr.bf16.mxu0 %v5656_v31  ;;  %v6641_v14 = vmax.f32 %v6088_v42, 0.0 }
 0x58f   : > { %v6642_v63 = vmax.f32 %v6090_v37, 0.0  ;;  %v5079_v6 = vadd.f32 %v5078_v62, %v12337_v39  ;;  %v5080_v54 = vpop.f32.mrb[31].mxu1  ;;  %6324 = vmatmul.mubr.bf16.gmra.mrb[24].mxu0 %v5655_v60  ;;  %v5479_v40 = vmax.f32 %v5075_v48, 0.0 }
 0x590   : > { %v6643_v13 = vmax.f32 %v6092_v29, 0.0  ;;  %v5081_v4 = vadd.f32 %v5080_v54, %v12340_v12  ;;  %v5480_v18 = vmax.f32 %v5077_v47, 0.0 }
 0x591   : > { %v12812_v28 = vpack.c.bf16 %v6642_v63, %v6640_v1  ;;  %v5481_v53 = vmax.f32 %v5079_v6, 0.0  ;;  %7225 = vmatmul.mubr.bf16.gmra.mrb[136].mxu1 %v12636_v7 }
 0x592   : > { %v5482_v45 = vmax.f32 %v5081_v4, 0.0  ;;  %v6095_v56 = vpop.f32.mrb[188].mxu0  ;;  %7234 = vmatprep.mubr.bf16.mxu1 %v12654_v23  ;;  %v12816_v11 = vpack.c.bf16 %v6643_v13, %v6641_v14 }
 0x593   : > { %v5657_v21 = vpack.c.bf16 %v5481_v53, %v5479_v40  ;;  %v6096_v8 = vadd.f32 %v6095_v56, %v12593_v33  ;;  %v6097_v49 = vpop.f32.mrb[189].mxu0 }
 0x594   : > { %v6098_v35 = vadd.f32 %v6097_v49, %v12596_v17  ;;  %v5084_v2 = vpop.f32.mrb[32].mxu1  ;;  %v6099_v55 = vpop.f32.mrb[190].mxu0  ;;  %v5658_v60 = vpack.c.bf16 %v5482_v45, %v5480_v18 }
 0x595   : > { %v5085_v5 = vadd.f32 %v5084_v2, %v12337_v39  ;;  %v6100_v7 = vadd.f32 %v6099_v55, %v12593_v33  ;;  %v5086_v41 = vpop.f32.mrb[33].mxu1  ;;  %v6101_v42 = vpop.f32.mrb[191].mxu0  ;;  %v6644_v31 = vmax.f32 %v6096_v8, 0.0 }
 0x596   : > { %v5087_v50 = vadd.f32 %v5086_v41, %v12340_v12  ;;  %v6102_v23 = vadd.f32 %v6101_v42, %v12596_v17  ;;  %v5088_v10 = vpop.f32.mrb[34].mxu1  ;;  %6333 = vmatprep.mubr.bf16.mxu0 %v5658_v60  ;;  %v6645_v3 = vmax.f32 %v6098_v35, 0.0 }
 0x597   : > { %v6646_v48 = vmax.f32 %v6100_v7, 0.0  ;;  %v5089_v37 = vadd.f32 %v5088_v10, %v12337_v39  ;;  %v5090_v16 = vpop.f32.mrb[35].mxu1  ;;  %6334 = vmatmul.mubr.bf16.gmra.mrb[28].mxu0 %v5657_v21  ;;  %v5483_v62 = vmax.f32 %v5085_v5, 0.0 }
 0x598   : > { %v6647_v47 = vmax.f32 %v6102_v23, 0.0  ;;  %v5091_v29 = vadd.f32 %v5090_v16, %v12340_v12  ;;  %v5484_v6 = vmax.f32 %v5087_v50, 0.0 }
 0x599   : > { %v12826_v1 = vpack.c.bf16 %v6646_v48, %v6644_v31  ;;  %v5485_v63 = vmax.f32 %v5089_v37, 0.0  ;;  %7235 = vmatmul.mubr.bf16.gmra.mrb[140].mxu1 %v12650_v30 }
 0x59a   : > { %v5486_v54 = vmax.f32 %v5091_v29, 0.0  ;;  %v6105_v14 = vpop.f32.mrb[192].mxu0  ;;  %7244 = vmatprep.mubr.bf16.mxu1 %v12664_v20  ;;  %v12830_v13 = vpack.c.bf16 %v6647_v47, %v6645_v3 }
 0x59b   : > { %v5659_v4 = vpack.c.bf16 %v5485_v63, %v5483_v62  ;;  %v6106_v40 = vadd.f32 %v6105_v14, %v12593_v33  ;;  %v6107_v53 = vpop.f32.mrb[193].mxu0 }
 0x59c   : > { %v6108_v18 = vadd.f32 %v6107_v53, %v12596_v17  ;;  %v5094_v45 = vpop.f32.mrb[36].mxu1  ;;  %v6109_v56 = vpop.f32.mrb[194].mxu0  ;;  %v5660_v21 = vpack.c.bf16 %v5486_v54, %v5484_v6  ;;  %v9631_v6 = vld [vmem:[%s14110_s11 + $0x70] sm:$0xff]  }
 0x59d   : > { %v5095_v8 = vadd.f32 %v5094_v45, %v12337_v39  ;;  %v6110_v30 = vadd.f32 %v6109_v56, %v12593_v33  ;;  %v5096_v49 = vpop.f32.mrb[37].mxu1  ;;  %v6111_v35 = vpop.f32.mrb[195].mxu0  ;;  %v6648_v60 = vmax.f32 %v6106_v40, 0.0  ;;  %8393 = vmatpush1.bf16.msra.mxu0 %v9631_v6 }
 0x59e   : > { %v5097_v2 = vadd.f32 %v5096_v49, %v12340_v12  ;;  %v6112_v20 = vadd.f32 %v6111_v35, %v12596_v17  ;;  %v5098_v55 = vpop.f32.mrb[38].mxu1  ;;  %6343 = vmatprep.mubr.bf16.mxu0 %v5660_v21  ;;  %v6649_v42 = vmax.f32 %v6108_v18, 0.0  ;;  %8394 = vmatprep.subr.bf16.mxu0 %v14167_v15 }
 0x59f   : > { %v6650_v5 = vmax.f32 %v6110_v30, 0.0  ;;  %v5099_v7 = vadd.f32 %v5098_v55, %v12337_v39  ;;  %v5100_v41 = vpop.f32.mrb[39].mxu1  ;;  %6344 = vmatmul.mubr.bf16.gmra.mrb[32].mxu0 %v5659_v4  ;;  %v5487_v10 = vmax.f32 %v5095_v8, 0.0 }
 0x5a0   : > { %v6651_v50 = vmax.f32 %v6112_v20, 0.0  ;;  %v5101_v23 = vadd.f32 %v5100_v41, %v12340_v12  ;;  %v5488_v37 = vmax.f32 %v5097_v2, 0.0 }
 0x5a1   : > { %v12840_v31 = vpack.c.bf16 %v6650_v5, %v6648_v60  ;;  %v5489_v48 = vmax.f32 %v5099_v7, 0.0  ;;  %7245 = vmatmul.mubr.bf16.gmra.mrb[144].mxu1 %v12660_v36 }
 0x5a2   : > { %v5490_v16 = vmax.f32 %v5101_v23, 0.0  ;;  %v6115_v3 = vpop.f32.mrb[196].mxu0  ;;  %7254 = vmatprep.mubr.bf16.mxu1 %v12682_v19  ;;  %v12844_v47 = vpack.c.bf16 %v6651_v50, %v6649_v42 }
 0x5a3   : > { %v5661_v29 = vpack.c.bf16 %v5489_v48, %v5487_v10  ;;  %v6116_v62 = vadd.f32 %v6115_v3, %v12593_v33  ;;  %v6117_v63 = vpop.f32.mrb[197].mxu0 }
 0x5a4   : > { %v6118_v54 = vadd.f32 %v6117_v63, %v12596_v17  ;;  %v5104_v14 = vpop.f32.mrb[40].mxu1  ;;  %v6119_v4 = vpop.f32.mrb[198].mxu0  ;;  %v5662_v36 = vpack.c.bf16 %v5490_v16, %v5488_v37 }
 0x5a5   : > { %v5105_v40 = vadd.f32 %v5104_v14, %v12337_v39  ;;  %v6120_v53 = vadd.f32 %v6119_v4, %v12593_v33  ;;  %v5106_v19 = vpop.f32.mrb[41].mxu1  ;;  %v6121_v18 = vpop.f32.mrb[199].mxu0  ;;  %v6652_v8 = vmax.f32 %v6116_v62, 0.0 }
 0x5a6   : > { %v5107_v45 = vadd.f32 %v5106_v19, %v12340_v12  ;;  %v6122_v56 = vadd.f32 %v6121_v18, %v12596_v17  ;;  %v5108_v21 = vpop.f32.mrb[42].mxu1  ;;  %6353 = vmatprep.mubr.bf16.mxu0 %v5662_v36  ;;  %v6653_v2 = vmax.f32 %v6118_v54, 0.0 }
 0x5a7   : > { %v6654_v30 = vmax.f32 %v6120_v53, 0.0  ;;  %v5109_v49 = vadd.f32 %v5108_v21, %v12337_v39  ;;  %v5110_v35 = vpop.f32.mrb[43].mxu1  ;;  %6354 = vmatmul.mubr.bf16.gmra.mrb[36].mxu0 %v5661_v29  ;;  %v5491_v60 = vmax.f32 %v5105_v40, 0.0 }
 0x5a8   : > { %v6655_v20 = vmax.f32 %v6122_v56, 0.0  ;;  %v5111_v55 = vadd.f32 %v5110_v35, %v12340_v12  ;;  %v5492_v41 = vmax.f32 %v5107_v45, 0.0 }
 0x5a9   : > { %v12858_v5 = vpack.c.bf16 %v6654_v30, %v6652_v8  ;;  %v5493_v7 = vmax.f32 %v5109_v49, 0.0  ;;  %7255 = vmatmul.mubr.bf16.gmra.mrb[148].mxu1 %v12678_v32 }
 0x5aa   : > { %v5494_v42 = vmax.f32 %v5111_v55, 0.0  ;;  %v6125_v50 = vpop.f32.mrb[200].mxu0  ;;  %7264 = vmatprep.mubr.bf16.mxu1 %v12696_v61  ;;  %v12862_v15 = vpack.c.bf16 %v6655_v20, %v6653_v2 }
 0x5ab   : > { %v5663_v23 = vpack.c.bf16 %v5493_v7, %v5491_v60  ;;  %v6126_v10 = vadd.f32 %v6125_v50, %v12593_v33  ;;  %v6127_v48 = vpop.f32.mrb[201].mxu0 }
 0x5ac   : > { %v6128_v37 = vadd.f32 %v6127_v48, %v12596_v17  ;;  %v5114_v16 = vpop.f32.mrb[44].mxu1  ;;  %v6129_v3 = vpop.f32.mrb[202].mxu0  ;;  %v5664_v29 = vpack.c.bf16 %v5494_v42, %v5492_v41 }
 0x5ad   : > { %v5115_v62 = vadd.f32 %v5114_v16, %v12337_v39  ;;  %v6130_v32 = vadd.f32 %v6129_v3, %v12593_v33  ;;  %v5116_v63 = vpop.f32.mrb[45].mxu1  ;;  %v6131_v6 = vpop.f32.mrb[203].mxu0  ;;  %v6656_v4 = vmax.f32 %v6126_v10, 0.0 }
 0x5ae   : > { %v5117_v54 = vadd.f32 %v5116_v63, %v12340_v12  ;;  %v6132_v61 = vadd.f32 %v6131_v6, %v12596_v17  ;;  %v5118_v14 = vpop.f32.mrb[46].mxu1  ;;  %6363 = vmatprep.mubr.bf16.mxu0 %v5664_v29  ;;  %v6657_v19 = vmax.f32 %v6128_v37, 0.0 }
 0x5af   : > { %v6658_v36 = vmax.f32 %v6130_v32, 0.0  ;;  %v5119_v40 = vadd.f32 %v5118_v14, %v12337_v39  ;;  %v5120_v53 = vpop.f32.mrb[47].mxu1  ;;  %6364 = vmatmul.mubr.bf16.gmra.mrb[40].mxu0 %v5663_v23  ;;  %v5495_v56 = vmax.f32 %v5115_v62, 0.0 }
 0x5b0   : > { %v6659_v18 = vmax.f32 %v6132_v61, 0.0  ;;  %v5121_v45 = vadd.f32 %v5120_v53, %v12340_v12  ;;  %v5496_v30 = vmax.f32 %v5117_v54, 0.0 }
 0x5b1   : > { %v12872_v21 = vpack.c.bf16 %v6658_v36, %v6656_v4  ;;  %v5497_v8 = vmax.f32 %v5119_v40, 0.0  ;;  %7265 = vmatmul.mubr.bf16.gmra.mrb[152].mxu1 %v12692_v0 }
 0x5b2   : > { %v5498_v49 = vmax.f32 %v5121_v45, 0.0  ;;  %v6135_v35 = vpop.f32.mrb[204].mxu0  ;;  %7274 = vmatprep.mubr.bf16.mxu1 %v12710_v58  ;;  %v12876_v2 = vpack.c.bf16 %v6659_v18, %v6657_v19 }
 0x5b3   : > { %v5665_v20 = vpack.c.bf16 %v5497_v8, %v5495_v56  ;;  %v6136_v55 = vadd.f32 %v6135_v35, %v12593_v33  ;;  %v6137_v60 = vpop.f32.mrb[205].mxu0 }
 0x5b4   : > { %v6138_v7 = vadd.f32 %v6137_v60, %v12596_v17  ;;  %v5124_v41 = vpop.f32.mrb[48].mxu1  ;;  %v6139_v42 = vpop.f32.mrb[206].mxu0  ;;  %v5666_v50 = vpack.c.bf16 %v5498_v49, %v5496_v30 }
 0x5b5   : > { %v5125_v23 = vadd.f32 %v5124_v41, %v12337_v39  ;;  %v6140_v0 = vadd.f32 %v6139_v42, %v12593_v33  ;;  %v5126_v10 = vpop.f32.mrb[49].mxu1  ;;  %v6141_v48 = vpop.f32.mrb[207].mxu0  ;;  %v6660_v3 = vmax.f32 %v6136_v55, 0.0 }
 0x5b6   : > { %v5127_v37 = vadd.f32 %v5126_v10, %v12340_v12  ;;  %v6142_v58 = vadd.f32 %v6141_v48, %v12596_v17  ;;  %v5128_v16 = vpop.f32.mrb[50].mxu1  ;;  %6373 = vmatprep.mubr.bf16.mxu0 %v5666_v50  ;;  %v6661_v63 = vmax.f32 %v6138_v7, 0.0 }
 0x5b7   : > { %v6662_v29 = vmax.f32 %v6140_v0, 0.0  ;;  %v5129_v62 = vadd.f32 %v5128_v16, %v12337_v39  ;;  %v5130_v32 = vpop.f32.mrb[51].mxu1  ;;  %6374 = vmatmul.mubr.bf16.gmra.mrb[44].mxu0 %v5665_v20  ;;  %v5499_v61 = vmax.f32 %v5125_v23, 0.0 }
 0x5b8   : > { %v6663_v6 = vmax.f32 %v6142_v58, 0.0  ;;  %v5131_v54 = vadd.f32 %v5130_v32, %v12340_v12  ;;  %v5500_v36 = vmax.f32 %v5127_v37, 0.0 }
 0x5b9   : > { %v12886_v14 = vpack.c.bf16 %v6662_v29, %v6660_v3  ;;  %v5501_v4 = vmax.f32 %v5129_v62, 0.0  ;;  %7275 = vmatmul.mubr.bf16.gmra.mrb[156].mxu1 %v12706_v38 }
 0x5ba   : > { %v5502_v40 = vmax.f32 %v5131_v54, 0.0  ;;  %v6145_v53 = vpop.f32.mrb[208].mxu0  ;;  %7284 = vmatprep.mubr.bf16.mxu1 %v12724_v43  ;;  %v12890_v19 = vpack.c.bf16 %v6663_v6, %v6661_v63 }
 0x5bb   : > { %v5667_v18 = vpack.c.bf16 %v5501_v4, %v5499_v61  ;;  %v6146_v45 = vadd.f32 %v6145_v53, %v12593_v33  ;;  %v6147_v56 = vpop.f32.mrb[209].mxu0  ;;  %v9632_v4 = vld [vmem:[%s14110_s11 + $0x78] sm:$0xff]  }
 0x5bc   : > { %v6148_v8 = vadd.f32 %v6147_v56, %v12596_v17  ;;  %v5134_v30 = vpop.f32.mrb[52].mxu1  ;;  %v6149_v49 = vpop.f32.mrb[210].mxu0  ;;  %v5668_v35 = vpack.c.bf16 %v5502_v40, %v5500_v36  ;;  %8395 = vmatpush1.bf16.msra.mxu0 %v9632_v4 }
 0x5bd   : > { %v5135_v20 = vadd.f32 %v5134_v30, %v12337_v39  ;;  %v6150_v38 = vadd.f32 %v6149_v49, %v12593_v33  ;;  %v5136_v55 = vpop.f32.mrb[53].mxu1  ;;  %v6151_v60 = vpop.f32.mrb[211].mxu0  ;;  %v6664_v42 = vmax.f32 %v6146_v45, 0.0 }
 0x5be   : > { %v5137_v7 = vadd.f32 %v5136_v55, %v12340_v12  ;;  %v6152_v43 = vadd.f32 %v6151_v60, %v12596_v17  ;;  %v5138_v41 = vpop.f32.mrb[54].mxu1  ;;  %6383 = vmatprep.mubr.bf16.mxu0 %v5668_v35  ;;  %v6665_v10 = vmax.f32 %v6148_v8, 0.0 }
 0x5bf   : > { %v6666_v50 = vmax.f32 %v6150_v38, 0.0  ;;  %v5139_v23 = vadd.f32 %v5138_v41, %v12337_v39  ;;  %v5140_v0 = vpop.f32.mrb[55].mxu1  ;;  %6384 = vmatmul.mubr.bf16.gmra.mrb[48].mxu0 %v5667_v18  ;;  %v5503_v58 = vmax.f32 %v5135_v20, 0.0 }
 0x5c0   : > { %v6667_v48 = vmax.f32 %v6152_v43, 0.0  ;;  %v5141_v37 = vadd.f32 %v5140_v0, %v12340_v12  ;;  %v5504_v29 = vmax.f32 %v5137_v7, 0.0 }
 0x5c1   : > { %v12900_v16 = vpack.c.bf16 %v6666_v50, %v6664_v42  ;;  %v5505_v3 = vmax.f32 %v5139_v23, 0.0  ;;  %7285 = vmatmul.mubr.bf16.gmra.mrb[160].mxu1 %v12720_v44 }
 0x5c2   : > { %v5506_v62 = vmax.f32 %v5141_v37, 0.0  ;;  %v6155_v32 = vpop.f32.mrb[212].mxu0  ;;  %7294 = vmatprep.mubr.bf16.mxu1 %v12742_v46  ;;  %v12904_v63 = vpack.c.bf16 %v6667_v48, %v6665_v10 }
 0x5c3   : > { %v5669_v6 = vpack.c.bf16 %v5505_v3, %v5503_v58  ;;  %v6156_v54 = vadd.f32 %v6155_v32, %v12593_v33  ;;  %v6157_v61 = vpop.f32.mrb[213].mxu0 }
 0x5c4   : > { %v6158_v36 = vadd.f32 %v6157_v61, %v12596_v17  ;;  %v5144_v40 = vpop.f32.mrb[56].mxu1  ;;  %v6159_v53 = vpop.f32.mrb[214].mxu0  ;;  %v5670_v44 = vpack.c.bf16 %v5506_v62, %v5504_v29 }
 0x5c5   : > { %v5145_v18 = vadd.f32 %v5144_v40, %v12337_v39  ;;  %v6160_v45 = vadd.f32 %v6159_v53, %v12593_v33  ;;  %v5146_v46 = vpop.f32.mrb[57].mxu1  ;;  %v6161_v56 = vpop.f32.mrb[215].mxu0  ;;  %v6668_v35 = vmax.f32 %v6156_v54, 0.0 }
 0x5c6   : > { %v5147_v8 = vadd.f32 %v5146_v46, %v12340_v12  ;;  %v6162_v30 = vadd.f32 %v6161_v56, %v12596_v17  ;;  %v5148_v49 = vpop.f32.mrb[58].mxu1  ;;  %6393 = vmatprep.mubr.bf16.mxu0 %v5670_v44  ;;  %v6669_v60 = vmax.f32 %v6158_v36, 0.0 }
 0x5c7   : > { %v6670_v20 = vmax.f32 %v6160_v45, 0.0  ;;  %v5149_v38 = vadd.f32 %v5148_v49, %v12337_v39  ;;  %v5150_v55 = vpop.f32.mrb[59].mxu1  ;;  %6394 = vmatmul.mubr.bf16.gmra.mrb[52].mxu0 %v5669_v6  ;;  %v5507_v41 = vmax.f32 %v5145_v18, 0.0 }
 0x5c8   : > { %v6671_v7 = vmax.f32 %v6162_v30, 0.0  ;;  %v5151_v43 = vadd.f32 %v5150_v55, %v12340_v12  ;;  %v5508_v23 = vmax.f32 %v5147_v8, 0.0 }
 0x5c9   : > { %v12917_v42 = vpack.c.bf16 %v6670_v20, %v6668_v35  ;;  %v5509_v50 = vmax.f32 %v5149_v38, 0.0  ;;  %7295 = vmatmul.mubr.bf16.gmra.mrb[164].mxu1 %v12738_v27 }
 0x5ca   : > { %v5510_v0 = vmax.f32 %v5151_v43, 0.0  ;;  %v6165_v10 = vpop.f32.mrb[216].mxu0  ;;  %7304 = vmatprep.mubr.bf16.mxu1 %v12756_v34  ;;  %v12921_v48 = vpack.c.bf16 %v6671_v7, %v6669_v60 }
 0x5cb   : > { %v5671_v37 = vpack.c.bf16 %v5509_v50, %v5507_v41  ;;  %v6166_v58 = vadd.f32 %v6165_v10, %v12593_v33  ;;  %v6167_v3 = vpop.f32.mrb[217].mxu0 }
 0x5cc   : > { %v6168_v29 = vadd.f32 %v6167_v3, %v12596_v17  ;;  %v5154_v62 = vpop.f32.mrb[60].mxu1  ;;  %v6169_v32 = vpop.f32.mrb[218].mxu0  ;;  %v5672_v6 = vpack.c.bf16 %v5510_v0, %v5508_v23 }
 0x5cd   : > { %v5155_v54 = vadd.f32 %v5154_v62, %v12337_v39  ;;  %v6170_v27 = vadd.f32 %v6169_v32, %v12593_v33  ;;  %v5156_v61 = vpop.f32.mrb[61].mxu1  ;;  %v6171_v4 = vpop.f32.mrb[219].mxu0  ;;  %v6672_v53 = vmax.f32 %v6166_v58, 0.0 }
 0x5ce   : > { %v5157_v36 = vadd.f32 %v5156_v61, %v12340_v12  ;;  %v6172_v34 = vadd.f32 %v6171_v4, %v12596_v17  ;;  %v5158_v40 = vpop.f32.mrb[62].mxu1  ;;  %6403 = vmatprep.mubr.bf16.mxu0 %v5672_v6  ;;  %v6673_v46 = vmax.f32 %v6168_v29, 0.0 }
 0x5cf   : > { %v6674_v44 = vmax.f32 %v6170_v27, 0.0  ;;  %v5159_v18 = vadd.f32 %v5158_v40, %v12337_v39  ;;  %v5160_v45 = vpop.f32.mrb[63].mxu1  ;;  %6404 = vmatmul.mubr.bf16.gmra.mrb[56].mxu0 %v5671_v37  ;;  %v5511_v30 = vmax.f32 %v5155_v54, 0.0 }
 0x5d0   : > { %v6675_v56 = vmax.f32 %v6172_v34, 0.0  ;;  %v5161_v8 = vadd.f32 %v5160_v45, %v12340_v12  ;;  %v5512_v20 = vmax.f32 %v5157_v36, 0.0 }
 0x5d1   : > { %v12931_v49 = vpack.c.bf16 %v6674_v44, %v6672_v53  ;;  %v5513_v35 = vmax.f32 %v5159_v18, 0.0  ;;  %7305 = vmatmul.mubr.bf16.gmra.mrb[168].mxu1 %v12752_v57 }
 0x5d2   : > { %v5514_v38 = vmax.f32 %v5161_v8, 0.0  ;;  %v6175_v55 = vpop.f32.mrb[220].mxu0  ;;  %7314 = vmatprep.mubr.bf16.mxu1 %v12770_v51  ;;  %v12935_v60 = vpack.c.bf16 %v6675_v56, %v6673_v46 }
 0x5d3   : > { %v5673_v7 = vpack.c.bf16 %v5513_v35, %v5511_v30  ;;  %v6176_v43 = vadd.f32 %v6175_v55, %v12593_v33  ;;  %v6177_v41 = vpop.f32.mrb[221].mxu0 }
 0x5d4   : > { %v6178_v50 = vadd.f32 %v6177_v41, %v12596_v17  ;;  %v5164_v23 = vpop.f32.mrb[64].mxu1  ;;  %v6179_v0 = vpop.f32.mrb[222].mxu0  ;;  %v5674_v10 = vpack.c.bf16 %v5514_v38, %v5512_v20 }
 0x5d5   : > { %v5165_v37 = vadd.f32 %v5164_v23, %v12337_v39  ;;  %v6180_v57 = vadd.f32 %v6179_v0, %v12593_v33  ;;  %v5166_v58 = vpop.f32.mrb[65].mxu1  ;;  %v6181_v3 = vpop.f32.mrb[223].mxu0  ;;  %v6676_v32 = vmax.f32 %v6176_v43, 0.0 }
 0x5d6   : > { %v5167_v29 = vadd.f32 %v5166_v58, %v12340_v12  ;;  %v6182_v51 = vadd.f32 %v6181_v3, %v12596_v17  ;;  %v5168_v62 = vpop.f32.mrb[66].mxu1  ;;  %6413 = vmatprep.mubr.bf16.mxu0 %v5674_v10  ;;  %v6677_v61 = vmax.f32 %v6178_v50, 0.0 }
 0x5d7   : > { %v6678_v6 = vmax.f32 %v6180_v57, 0.0  ;;  %v5169_v54 = vadd.f32 %v5168_v62, %v12337_v39  ;;  %v5170_v27 = vpop.f32.mrb[67].mxu1  ;;  %6414 = vmatmul.mubr.bf16.gmra.mrb[60].mxu0 %v5673_v7  ;;  %v5515_v34 = vmax.f32 %v5165_v37, 0.0 }
 0x5d8   : > { %v6679_v4 = vmax.f32 %v6182_v51, 0.0  ;;  %v5171_v36 = vadd.f32 %v5170_v27, %v12340_v12  ;;  %v5516_v44 = vmax.f32 %v5167_v29, 0.0 }
 0x5d9   : > { %v12945_v40 = vpack.c.bf16 %v6678_v6, %v6676_v32  ;;  %v5517_v53 = vmax.f32 %v5169_v54, 0.0  ;;  %7315 = vmatmul.mubr.bf16.gmra.mrb[172].mxu1 %v12766_v9 }
 0x5da   : > { %v5518_v18 = vmax.f32 %v5171_v36, 0.0  ;;  %v6185_v45 = vpop.f32.mrb[224].mxu0  ;;  %7324 = vmatprep.mubr.bf16.mxu1 %v12784_v22  ;;  %v12949_v46 = vpack.c.bf16 %v6679_v4, %v6677_v61 }
 0x5db   : > { %v5675_v56 = vpack.c.bf16 %v5517_v53, %v5515_v34  ;;  %v6186_v8 = vadd.f32 %v6185_v45, %v12593_v33  ;;  %v6187_v30 = vpop.f32.mrb[225].mxu0 }
 0x5dc   : > { %v6188_v35 = vadd.f32 %v6187_v30, %v12596_v17  ;;  %v5174_v20 = vpop.f32.mrb[68].mxu1  ;;  %v6189_v38 = vpop.f32.mrb[226].mxu0  ;;  %v5676_v55 = vpack.c.bf16 %v5518_v18, %v5516_v44 }
 0x5dd   : > { %v5175_v7 = vadd.f32 %v5174_v20, %v12337_v39  ;;  %v6190_v9 = vadd.f32 %v6189_v38, %v12593_v33  ;;  %v5176_v43 = vpop.f32.mrb[69].mxu1  ;;  %v6191_v41 = vpop.f32.mrb[227].mxu0  ;;  %v6680_v0 = vmax.f32 %v6186_v8, 0.0 }
 0x5de   : > { %v5177_v50 = vadd.f32 %v5176_v43, %v12340_v12  ;;  %v6192_v22 = vadd.f32 %v6191_v41, %v12596_v17  ;;  %v5178_v23 = vpop.f32.mrb[70].mxu1  ;;  %6423 = vmatprep.mubr.bf16.mxu0 %v5676_v55  ;;  %v6681_v58 = vmax.f32 %v6188_v35, 0.0 }
 0x5df   : > { %v6682_v10 = vmax.f32 %v6190_v9, 0.0  ;;  %v5179_v37 = vadd.f32 %v5178_v23, %v12337_v39  ;;  %v5180_v57 = vpop.f32.mrb[71].mxu1  ;;  %6424 = vmatmul.mubr.bf16.gmra.mrb[64].mxu0 %v5675_v56  ;;  %v5519_v51 = vmax.f32 %v5175_v7, 0.0 }
 0x5e0   : > { %v6683_v3 = vmax.f32 %v6192_v22, 0.0  ;;  %v5181_v29 = vadd.f32 %v5180_v57, %v12340_v12  ;;  %v5520_v6 = vmax.f32 %v5177_v50, 0.0 }
 0x5e1   : > { %v12959_v62 = vpack.c.bf16 %v6682_v10, %v6680_v0  ;;  %v5521_v32 = vmax.f32 %v5179_v37, 0.0  ;;  %7325 = vmatmul.mubr.bf16.gmra.mrb[176].mxu1 %v12780_v25 }
 0x5e2   : > { %v5522_v54 = vmax.f32 %v5181_v29, 0.0  ;;  %v6195_v27 = vpop.f32.mrb[228].mxu0  ;;  %7334 = vmatprep.mubr.bf16.mxu1 %v12802_v24  ;;  %v12963_v61 = vpack.c.bf16 %v6683_v3, %v6681_v58 }
 0x5e3   : > { %v5677_v4 = vpack.c.bf16 %v5521_v32, %v5519_v51  ;;  %v6196_v36 = vadd.f32 %v6195_v27, %v12593_v33  ;;  %v6197_v34 = vpop.f32.mrb[229].mxu0 }
 0x5e4   : > { %v6198_v53 = vadd.f32 %v6197_v34, %v12596_v17  ;;  %v5184_v44 = vpop.f32.mrb[72].mxu1  ;;  %v6199_v18 = vpop.f32.mrb[230].mxu0  ;;  %v5678_v45 = vpack.c.bf16 %v5522_v54, %v5520_v6 }
 0x5e5   : > { %v5185_v56 = vadd.f32 %v5184_v44, %v12337_v39  ;;  %v6200_v25 = vadd.f32 %v6199_v18, %v12593_v33  ;;  %v5186_v8 = vpop.f32.mrb[73].mxu1  ;;  %v6201_v30 = vpop.f32.mrb[231].mxu0  ;;  %v6684_v38 = vmax.f32 %v6196_v36, 0.0 }
 0x5e6   : > { %v5187_v35 = vadd.f32 %v5186_v8, %v12340_v12  ;;  %v6202_v24 = vadd.f32 %v6201_v30, %v12596_v17  ;;  %v5188_v20 = vpop.f32.mrb[74].mxu1  ;;  %6433 = vmatprep.mubr.bf16.mxu0 %v5678_v45  ;;  %v6685_v43 = vmax.f32 %v6198_v53, 0.0 }
 0x5e7   : > { %v6686_v55 = vmax.f32 %v6200_v25, 0.0  ;;  %v5189_v7 = vadd.f32 %v5188_v20, %v12337_v39  ;;  %v5190_v9 = vpop.f32.mrb[75].mxu1  ;;  %6434 = vmatmul.mubr.bf16.gmra.mrb[68].mxu0 %v5677_v4  ;;  %v5523_v22 = vmax.f32 %v5185_v56, 0.0 }
 0x5e8   : > { %v6687_v41 = vmax.f32 %v6202_v24, 0.0  ;;  %v5191_v50 = vadd.f32 %v5190_v9, %v12340_v12  ;;  %v5524_v10 = vmax.f32 %v5187_v35, 0.0 }
 0x5e9   : > { %v12973_v23 = vpack.c.bf16 %v6686_v55, %v6684_v38  ;;  %v5525_v0 = vmax.f32 %v5189_v7, 0.0  ;;  %7335 = vmatmul.mubr.bf16.gmra.mrb[180].mxu1 %v12798_v52 }
 0x5ea   : > { %v5526_v37 = vmax.f32 %v5191_v50, 0.0  ;;  %v6205_v57 = vpop.f32.mrb[232].mxu0  ;;  %7344 = vmatprep.mubr.bf16.mxu1 %v12816_v11  ;;  %v12977_v58 = vpack.c.bf16 %v6687_v41, %v6685_v43 }
 0x5eb   : > { %v5679_v3 = vpack.c.bf16 %v5525_v0, %v5523_v22  ;;  %v6206_v29 = vadd.f32 %v6205_v57, %v12593_v33  ;;  %v6207_v51 = vpop.f32.mrb[233].mxu0 }
 0x5ec   : > { %v6208_v32 = vadd.f32 %v6207_v51, %v12596_v17  ;;  %v5194_v6 = vpop.f32.mrb[76].mxu1  ;;  %v6209_v54 = vpop.f32.mrb[234].mxu0  ;;  %v5680_v27 = vpack.c.bf16 %v5526_v37, %v5524_v10 }
 0x5ed   : > { %v5195_v4 = vadd.f32 %v5194_v6, %v12337_v39  ;;  %v6210_v52 = vadd.f32 %v6209_v54, %v12593_v33  ;;  %v5196_v36 = vpop.f32.mrb[77].mxu1  ;;  %v6211_v34 = vpop.f32.mrb[235].mxu0  ;;  %v6688_v18 = vmax.f32 %v6206_v29, 0.0 }
 0x5ee   : > { %v5197_v53 = vadd.f32 %v5196_v36, %v12340_v12  ;;  %v6212_v11 = vadd.f32 %v6211_v34, %v12596_v17  ;;  %v5198_v44 = vpop.f32.mrb[78].mxu1  ;;  %6443 = vmatprep.mubr.bf16.mxu0 %v5680_v27  ;;  %v6689_v8 = vmax.f32 %v6208_v32, 0.0 }
 0x5ef   : > { %v6690_v45 = vmax.f32 %v6210_v52, 0.0  ;;  %v5199_v56 = vadd.f32 %v5198_v44, %v12337_v39  ;;  %v5200_v25 = vpop.f32.mrb[79].mxu1  ;;  %6444 = vmatmul.mubr.bf16.gmra.mrb[72].mxu0 %v5679_v3  ;;  %v5527_v24 = vmax.f32 %v5195_v4, 0.0 }
 0x5f0   : > { %v6691_v30 = vmax.f32 %v6212_v11, 0.0  ;;  %v5201_v35 = vadd.f32 %v5200_v25, %v12340_v12  ;;  %v5528_v55 = vmax.f32 %v5197_v53, 0.0 }
 0x5f1   : > { %v12987_v20 = vpack.c.bf16 %v6690_v45, %v6688_v18  ;;  %v5529_v38 = vmax.f32 %v5199_v56, 0.0  ;;  %7345 = vmatmul.mubr.bf16.gmra.mrb[184].mxu1 %v12812_v28 }
 0x5f2   : > { %v5530_v7 = vmax.f32 %v5201_v35, 0.0  ;;  %7354 = vmatprep.mubr.bf16.mxu1 %v12830_v13  ;;  %v12991_v9 = vpack.c.bf16 %v6691_v30, %v6689_v8 }
 0x5f3   : > { %v5681_v43 = vpack.c.bf16 %v5529_v38, %v5527_v24 }
 0x5f4   : > { %v5204_v41 = vpop.f32.mrb[80].mxu1  ;;  %v5682_v50 = vpack.c.bf16 %v5530_v7, %v5528_v55 }
 0x5f5   : > { %v5205_v22 = vadd.f32 %v5204_v41, %v12337_v39  ;;  %v5206_v0 = vpop.f32.mrb[81].mxu1 }
 0x5f6   : > { %v5207_v10 = vadd.f32 %v5206_v0, %v12340_v12  ;;  %v5208_v37 = vpop.f32.mrb[82].mxu1  ;;  %6453 = vmatprep.mubr.bf16.mxu0 %v5682_v50 }
 0x5f7   : > { %v5209_v57 = vadd.f32 %v5208_v37, %v12337_v39  ;;  %v5210_v3 = vpop.f32.mrb[83].mxu1  ;;  %6454 = vmatmul.mubr.bf16.gmra.mrb[76].mxu0 %v5681_v43  ;;  %v5531_v29 = vmax.f32 %v5205_v22, 0.0 }
 0x5f8   : > { %v5211_v28 = vadd.f32 %v5210_v3, %v12340_v12  ;;  %v5532_v51 = vmax.f32 %v5207_v10, 0.0 }
 0x5f9   : > { %v5533_v13 = vmax.f32 %v5209_v57, 0.0  ;;  %7355 = vmatmul.mubr.bf16.gmra.mrb[188].mxu1 %v12826_v1 }
 0x5fa   : > { %v5534_v32 = vmax.f32 %v5211_v28, 0.0  ;;  %v6215_v6 = vpop.f32.mrb[236].mxu0  ;;  %7364 = vmatprep.mubr.bf16.mxu1 %v12844_v47 }
 0x5fb   : > { %v5683_v54 = vpack.c.bf16 %v5533_v13, %v5531_v29  ;;  %v6216_v27 = vadd.f32 %v6215_v6, %v12593_v33  ;;  %v6217_v4 = vpop.f32.mrb[237].mxu0 }
 0x5fc   : > { %v6218_v52 = vadd.f32 %v6217_v4, %v12596_v17  ;;  %v5214_v36 = vpop.f32.mrb[84].mxu1  ;;  %v6219_v34 = vpop.f32.mrb[238].mxu0  ;;  %v5684_v53 = vpack.c.bf16 %v5534_v32, %v5532_v51 }
 0x5fd   : > { %v5215_v11 = vadd.f32 %v5214_v36, %v12337_v39  ;;  %v6220_v44 = vadd.f32 %v6219_v34, %v12593_v33  ;;  %v5216_v18 = vpop.f32.mrb[85].mxu1  ;;  %v6221_v1 = vpop.f32.mrb[239].mxu0  ;;  %v6692_v25 = vmax.f32 %v6216_v27, 0.0 }
 0x5fe   : > { %v5217_v45 = vadd.f32 %v5216_v18, %v12340_v12  ;;  %v6222_v56 = vadd.f32 %v6221_v1, %v12596_v17  ;;  %v5218_v47 = vpop.f32.mrb[86].mxu1  ;;  %6463 = vmatprep.mubr.bf16.mxu0 %v5684_v53  ;;  %v6693_v24 = vmax.f32 %v6218_v52, 0.0 }
 0x5ff   : > { %v6694_v8 = vmax.f32 %v6220_v44, 0.0  ;;  %v5219_v30 = vadd.f32 %v5218_v47, %v12337_v39  ;;  %v5220_v35 = vpop.f32.mrb[87].mxu1  ;;  %6464 = vmatmul.mubr.bf16.gmra.mrb[80].mxu0 %v5683_v54  ;;  %v5535_v7 = vmax.f32 %v5215_v11, 0.0 }
 0x600   : > { %v6695_v38 = vmax.f32 %v6222_v56, 0.0  ;;  %v5221_v55 = vadd.f32 %v5220_v35, %v12340_v12  ;;  %v5536_v50 = vmax.f32 %v5217_v45, 0.0 }
 0x601   : > { %v13007_v43 = vpack.c.bf16 %v6694_v8, %v6692_v25  ;;  %v5537_v41 = vmax.f32 %v5219_v30, 0.0  ;;  %7365 = vmatmul.mubr.bf16.gmra.mrb[192].mxu1 %v12840_v31 }
 0x602   : > { %v5538_v22 = vmax.f32 %v5221_v55, 0.0  ;;  %7374 = vmatprep.mubr.bf16.mxu1 %v12862_v15  ;;  %v13011_v0 = vpack.c.bf16 %v6695_v38, %v6693_v24 }
 0x603   : > { %v5685_v10 = vpack.c.bf16 %v5537_v41, %v5535_v7 }
 0x604   : > { %v5224_v37 = vpop.f32.mrb[88].mxu1  ;;  %v5686_v57 = vpack.c.bf16 %v5538_v22, %v5536_v50 }
 0x605   : > { %v5225_v3 = vadd.f32 %v5224_v37, %v12337_v39  ;;  %v5226_v28 = vpop.f32.mrb[89].mxu1 }
 0x606   : > { %v5227_v29 = vadd.f32 %v5226_v28, %v12340_v12  ;;  %v5228_v13 = vpop.f32.mrb[90].mxu1  ;;  %6473 = vmatprep.mubr.bf16.mxu0 %v5686_v57 }
 0x607   : > { %v5229_v51 = vadd.f32 %v5228_v13, %v12337_v39  ;;  %v5230_v32 = vpop.f32.mrb[91].mxu1  ;;  %6474 = vmatmul.mubr.bf16.gmra.mrb[84].mxu0 %v5685_v10  ;;  %v5539_v15 = vmax.f32 %v5225_v3, 0.0 }
 0x608   : > { %v5231_v31 = vadd.f32 %v5230_v32, %v12340_v12  ;;  %v6225_v6 = vpop.f32.mrb[240].mxu0  ;;  %v5540_v52 = vmax.f32 %v5227_v29, 0.0 }
 0x609   : > { %v5541_v54 = vmax.f32 %v5229_v51, 0.0  ;;  %v6226_v27 = vadd.f32 %v6225_v6, %v12593_v33  ;;  %v6227_v4 = vpop.f32.mrb[241].mxu0  ;;  %7375 = vmatmul.mubr.bf16.gmra.mrb[196].mxu1 %v12858_v5 }
 0x60a   : > { %v5542_v36 = vmax.f32 %v5231_v31, 0.0  ;;  %v6228_v34 = vadd.f32 %v6227_v4, %v12596_v17  ;;  %v6229_v53 = vpop.f32.mrb[242].mxu0  ;;  %7384 = vmatprep.mubr.bf16.mxu1 %v12876_v2 }
 0x60b   : > { %v5687_v11 = vpack.c.bf16 %v5541_v54, %v5539_v15  ;;  %v6230_v44 = vadd.f32 %v6229_v53, %v12593_v33  ;;  %v6231_v18 = vpop.f32.mrb[243].mxu0  ;;  %v6696_v47 = vmax.f32 %v6226_v27, 0.0 }
 0x60c   : > { %v6232_v1 = vadd.f32 %v6231_v18, %v12596_v17  ;;  %v5234_v45 = vpop.f32.mrb[92].mxu1  ;;  %v5688_v56 = vpack.c.bf16 %v5542_v36, %v5540_v52  ;;  %v6697_v30 = vmax.f32 %v6228_v34, 0.0 }
 0x60d   : > { %v6698_v25 = vmax.f32 %v6230_v44, 0.0  ;;  %v5235_v8 = vadd.f32 %v5234_v45, %v12337_v39  ;;  %v5236_v5 = vpop.f32.mrb[93].mxu1 }
 0x60e   : > { %v6699_v35 = vmax.f32 %v6232_v1, 0.0  ;;  %v5237_v24 = vadd.f32 %v5236_v5, %v12340_v12  ;;  %v5238_v38 = vpop.f32.mrb[94].mxu1  ;;  %6483 = vmatprep.mubr.bf16.mxu0 %v5688_v56 }
 0x60f   : > { %v13025_v2 = vpack.c.bf16 %v6698_v25, %v6696_v47  ;;  %v5239_v55 = vadd.f32 %v5238_v38, %v12337_v39  ;;  %v5240_v7 = vpop.f32.mrb[95].mxu1  ;;  %6484 = vmatmul.mubr.bf16.gmra.mrb[88].mxu0 %v5687_v11  ;;  %v5543_v22 = vmax.f32 %v5235_v8, 0.0 }
 0x610   : > { %v5241_v41 = vadd.f32 %v5240_v7, %v12340_v12  ;;  %v13029_v50 = vpack.c.bf16 %v6699_v35, %v6697_v30  ;;  %v5544_v37 = vmax.f32 %v5237_v24, 0.0 }
 0x611   : > { %v5545_v10 = vmax.f32 %v5239_v55, 0.0  ;;  %7385 = vmatmul.mubr.bf16.gmra.mrb[200].mxu1 %v12872_v21 }
 0x612   : > { %v5546_v57 = vmax.f32 %v5241_v41, 0.0  ;;  %v6235_v3 = vpop.f32.mrb[244].mxu0  ;;  %7394 = vmatprep.mubr.bf16.mxu1 %v12890_v19 }
 0x613   : > { %v5689_v28 = vpack.c.bf16 %v5545_v10, %v5543_v22  ;;  %v6236_v29 = vadd.f32 %v6235_v3, %v12593_v33  ;;  %v6237_v13 = vpop.f32.mrb[245].mxu0 }
 0x614   : > { %v6238_v51 = vadd.f32 %v6237_v13, %v12596_v17  ;;  %v5244_v32 = vpop.f32.mrb[96].mxu1  ;;  %v6239_v31 = vpop.f32.mrb[246].mxu0  ;;  %v5690_v6 = vpack.c.bf16 %v5546_v57, %v5544_v37 }
 0x615   : > { %v5245_v15 = vadd.f32 %v5244_v32, %v12337_v39  ;;  %v6240_v54 = vadd.f32 %v6239_v31, %v12593_v33  ;;  %v5246_v27 = vpop.f32.mrb[97].mxu1  ;;  %v6241_v21 = vpop.f32.mrb[247].mxu0  ;;  %v6700_v36 = vmax.f32 %v6236_v29, 0.0 }
 0x616   : > { %v5247_v4 = vadd.f32 %v5246_v27, %v12340_v12  ;;  %v6242_v52 = vadd.f32 %v6241_v21, %v12596_v17  ;;  %v5248_v19 = vpop.f32.mrb[98].mxu1  ;;  %6493 = vmatprep.mubr.bf16.mxu0 %v5690_v6  ;;  %v6701_v44 = vmax.f32 %v6238_v51, 0.0 }
 0x617   : > { %v6702_v34 = vmax.f32 %v6240_v54, 0.0  ;;  %v5249_v53 = vadd.f32 %v5248_v19, %v12337_v39  ;;  %v5250_v11 = vpop.f32.mrb[99].mxu1  ;;  %6494 = vmatmul.mubr.bf16.gmra.mrb[92].mxu0 %v5689_v28  ;;  %v5547_v45 = vmax.f32 %v5245_v15, 0.0 }
 0x618   : > { %v6703_v18 = vmax.f32 %v6242_v52, 0.0  ;;  %v5251_v1 = vadd.f32 %v5250_v11, %v12340_v12  ;;  %v5548_v25 = vmax.f32 %v5247_v4, 0.0 }
 0x619   : > { %v13041_v56 = vpack.c.bf16 %v6702_v34, %v6700_v36  ;;  %v5549_v47 = vmax.f32 %v5249_v53, 0.0  ;;  %7395 = vmatmul.mubr.bf16.gmra.mrb[204].mxu1 %v12886_v14 }
 0x61a   : > { %v5550_v8 = vmax.f32 %v5251_v1, 0.0  ;;  %7404 = vmatprep.mubr.bf16.mxu1 %v12904_v63  ;;  %v13045_v5 = vpack.c.bf16 %v6703_v18, %v6701_v44 }
 0x61b   : > { %v5691_v30 = vpack.c.bf16 %v5549_v47, %v5547_v45 }
 0x61c   : > { %v5254_v35 = vpop.f32.mrb[100].mxu1  ;;  %v5692_v24 = vpack.c.bf16 %v5550_v8, %v5548_v25 }
 0x61d   : > { %v5255_v38 = vadd.f32 %v5254_v35, %v12337_v39  ;;  %v5256_v55 = vpop.f32.mrb[101].mxu1 }
 0x61e   : > { %v5257_v7 = vadd.f32 %v5256_v55, %v12340_v12  ;;  %v5258_v41 = vpop.f32.mrb[102].mxu1  ;;  %6503 = vmatprep.mubr.bf16.mxu0 %v5692_v24 }
 0x61f   : > { %v5259_v22 = vadd.f32 %v5258_v41, %v12337_v39  ;;  %v5260_v10 = vpop.f32.mrb[103].mxu1  ;;  %6504 = vmatmul.mubr.bf16.gmra.mrb[96].mxu0 %v5691_v30  ;;  %v5551_v63 = vmax.f32 %v5255_v38, 0.0 }
 0x620   : > { %v5261_v14 = vadd.f32 %v5260_v10, %v12340_v12  ;;  %v6245_v37 = vpop.f32.mrb[248].mxu0  ;;  %v5552_v29 = vmax.f32 %v5257_v7, 0.0 }
 0x621   : > { %v5553_v57 = vmax.f32 %v5259_v22, 0.0  ;;  %v6246_v3 = vadd.f32 %v6245_v37, %v12593_v33  ;;  %v6247_v28 = vpop.f32.mrb[249].mxu0  ;;  %7405 = vmatmul.mubr.bf16.gmra.mrb[208].mxu1 %v12900_v16 }
 0x622   : > { %v5554_v13 = vmax.f32 %v5261_v14, 0.0  ;;  %v6248_v51 = vadd.f32 %v6247_v28, %v12596_v17  ;;  %v6249_v32 = vpop.f32.mrb[250].mxu0  ;;  %7414 = vmatprep.mubr.bf16.mxu1 %v12921_v48 }
 0x623   : > { %v5693_v31 = vpack.c.bf16 %v5553_v57, %v5551_v63  ;;  %v6250_v6 = vadd.f32 %v6249_v32, %v12593_v33  ;;  %v6251_v15 = vpop.f32.mrb[251].mxu0  ;;  %v6704_v4 = vmax.f32 %v6246_v3, 0.0 }
 0x624   : > { %v6252_v54 = vadd.f32 %v6251_v15, %v12596_v17  ;;  %v5264_v27 = vpop.f32.mrb[104].mxu1  ;;  %v5694_v21 = vpack.c.bf16 %v5554_v13, %v5552_v29  ;;  %v6705_v36 = vmax.f32 %v6248_v51, 0.0 }
 0x625   : > { %v6706_v52 = vmax.f32 %v6250_v6, 0.0  ;;  %v5265_v19 = vadd.f32 %v5264_v27, %v12337_v39  ;;  %v5266_v16 = vpop.f32.mrb[105].mxu1 }
 0x626   : > { %v6707_v34 = vmax.f32 %v6252_v54, 0.0  ;;  %v5267_v53 = vadd.f32 %v5266_v16, %v12340_v12  ;;  %v5268_v11 = vpop.f32.mrb[106].mxu1  ;;  %6513 = vmatprep.mubr.bf16.mxu0 %v5694_v21 }
 0x627   : > { %v13059_v48 = vpack.c.bf16 %v6706_v52, %v6704_v4  ;;  %v5269_v44 = vadd.f32 %v5268_v11, %v12337_v39  ;;  %v5270_v18 = vpop.f32.mrb[107].mxu1  ;;  %6514 = vmatmul.mubr.bf16.gmra.mrb[100].mxu0 %v5693_v31  ;;  %v5555_v47 = vmax.f32 %v5265_v19, 0.0 }
 0x628   : > { %v5271_v1 = vadd.f32 %v5270_v18, %v12340_v12  ;;  %v13063_v45 = vpack.c.bf16 %v6707_v34, %v6705_v36  ;;  %v5556_v8 = vmax.f32 %v5267_v53, 0.0 }
 0x629   : > { %v5557_v25 = vmax.f32 %v5269_v44, 0.0  ;;  %7415 = vmatmul.mubr.bf16.gmra.mrb[212].mxu1 %v12917_v42 }
 0x62a   : > { %v5558_v30 = vmax.f32 %v5271_v1, 0.0  ;;  %v6255_v35 = vpop.f32.mrb[252].mxu0  ;;  %7424 = vmatprep.mubr.bf16.mxu1 %v12935_v60 }
 0x62b   : > { %v5695_v24 = vpack.c.bf16 %v5557_v25, %v5555_v47  ;;  %v6256_v38 = vadd.f32 %v6255_v35, %v12593_v33  ;;  %v6257_v55 = vpop.f32.mrb[253].mxu0 }
 0x62c   : > { %v6258_v7 = vadd.f32 %v6257_v55, %v12596_v17  ;;  %v5274_v41 = vpop.f32.mrb[108].mxu1  ;;  %v6259_v22 = vpop.f32.mrb[254].mxu0  ;;  %v5696_v10 = vpack.c.bf16 %v5558_v30, %v5556_v8 }
 0x62d   : > { %v5275_v14 = vadd.f32 %v5274_v41, %v12337_v39  ;;  %v6260_v37 = vadd.f32 %v6259_v22, %v12593_v33  ;;  %v5276_v63 = vpop.f32.mrb[109].mxu1  ;;  %v6261_v42 = vpop.f32.mrb[255].mxu0  ;;  %v6708_v28 = vmax.f32 %v6256_v38, 0.0 }
 0x62e   : > { %v5277_v57 = vadd.f32 %v5276_v63, %v12340_v12  ;;  %v6262_v3 = vadd.f32 %v6261_v42, %v12596_v17  ;;  %v5278_v60 = vpop.f32.mrb[110].mxu1  ;;  %6523 = vmatprep.mubr.bf16.mxu0 %v5696_v10  ;;  %v6709_v32 = vmax.f32 %v6258_v7, 0.0 }
 0x62f   : > { %v6710_v29 = vmax.f32 %v6260_v37, 0.0  ;;  %v5279_v13 = vadd.f32 %v5278_v60, %v12337_v39  ;;  %v5280_v51 = vpop.f32.mrb[111].mxu1  ;;  %6524 = vmatmul.mubr.bf16.gmra.mrb[104].mxu0 %v5695_v24  ;;  %v5559_v15 = vmax.f32 %v5275_v14, 0.0 }
 0x630   : > { %v6711_v31 = vmax.f32 %v6262_v3, 0.0  ;;  %v5281_v6 = vadd.f32 %v5280_v51, %v12340_v12  ;;  %v5560_v21 = vmax.f32 %v5277_v57, 0.0 }
 0x631   : > { %v13075_v54 = vpack.c.bf16 %v6710_v29, %v6708_v28  ;;  %v5561_v27 = vmax.f32 %v5279_v13, 0.0  ;;  %7425 = vmatmul.mubr.bf16.gmra.mrb[216].mxu1 %v12931_v49 }
 0x632   : > { %v5562_v4 = vmax.f32 %v5281_v6, 0.0  ;;  %v6265_v52 = vpop.f32.mrb[0].mxu0  ;;  %7434 = vmatprep.mubr.bf16.mxu1 %v12949_v46  ;;  %v13079_v19 = vpack.c.bf16 %v6711_v31, %v6709_v32 }
 0x633   : > { %v5697_v16 = vpack.c.bf16 %v5561_v27, %v5559_v15  ;;  %v6266_v36 = vadd.f32 %v6265_v52, %v12593_v33  ;;  %v6267_v34 = vpop.f32.mrb[1].mxu0 }
 0x634   : > { %v6268_v53 = vadd.f32 %v6267_v34, %v12596_v17  ;;  %v5284_v11 = vpop.f32.mrb[112].mxu1  ;;  %v6269_v44 = vpop.f32.mrb[2].mxu0  ;;  %v5698_v18 = vpack.c.bf16 %v5562_v4, %v5560_v21 }
 0x635   : > { %v5285_v1 = vadd.f32 %v5284_v11, %v12337_v39  ;;  %v6270_v49 = vadd.f32 %v6269_v44, %v12593_v33  ;;  %v5286_v47 = vpop.f32.mrb[113].mxu1  ;;  %v6271_v25 = vpop.f32.mrb[3].mxu0  ;;  %v6712_v35 = vmax.f32 %v6266_v36, 0.0 }
 0x636   : > { %v5287_v8 = vadd.f32 %v5286_v47, %v12340_v12  ;;  %v6272_v46 = vadd.f32 %v6271_v25, %v12596_v17  ;;  %v5288_v30 = vpop.f32.mrb[114].mxu1  ;;  %6533 = vmatprep.mubr.bf16.mxu0 %v5698_v18  ;;  %v6713_v7 = vmax.f32 %v6268_v53, 0.0 }
 0x637   : > { %v6714_v24 = vmax.f32 %v6270_v49, 0.0  ;;  %v5289_v38 = vadd.f32 %v5288_v30, %v12337_v39  ;;  %v5290_v55 = vpop.f32.mrb[115].mxu1  ;;  %6534 = vmatmul.mubr.bf16.gmra.mrb[108].mxu0 %v5697_v16  ;;  %v5563_v10 = vmax.f32 %v5285_v1, 0.0 }
 0x638   : > { %v6715_v41 = vmax.f32 %v6272_v46, 0.0  ;;  %v5291_v22 = vadd.f32 %v5290_v55, %v12340_v12  ;;  %v5564_v63 = vmax.f32 %v5287_v8, 0.0 }
 0x639   : > { %v13089_v14 = vpack.c.bf16 %v6714_v24, %v6712_v35  ;;  %v5565_v37 = vmax.f32 %v5289_v38, 0.0  ;;  %7435 = vmatmul.mubr.bf16.gmra.mrb[220].mxu1 %v12945_v40 }
 0x63a   : > { %v5566_v42 = vmax.f32 %v5291_v22, 0.0  ;;  %v6275_v57 = vpop.f32.mrb[4].mxu0  ;;  %7444 = vmatprep.mubr.bf16.mxu1 %v12963_v61  ;;  %v13093_v3 = vpack.c.bf16 %v6715_v41, %v6713_v7 }
 0x63b   : > { %v5699_v60 = vpack.c.bf16 %v5565_v37, %v5563_v10  ;;  %v6276_v28 = vadd.f32 %v6275_v57, %v12593_v33  ;;  %v6277_v29 = vpop.f32.mrb[5].mxu0 }
 0x63c   : > { %v6278_v13 = vadd.f32 %v6277_v29, %v12596_v17  ;;  %v5294_v51 = vpop.f32.mrb[116].mxu1  ;;  %v6279_v32 = vpop.f32.mrb[6].mxu0  ;;  %v5700_v31 = vpack.c.bf16 %v5566_v42, %v5564_v63 }
 0x63d   : > { %v5295_v6 = vadd.f32 %v5294_v51, %v12337_v39  ;;  %v6280_v40 = vadd.f32 %v6279_v32, %v12593_v33  ;;  %v5296_v15 = vpop.f32.mrb[117].mxu1  ;;  %v6281_v27 = vpop.f32.mrb[7].mxu0  ;;  %v6716_v52 = vmax.f32 %v6276_v28, 0.0 }
 0x63e   : > { %v5297_v21 = vadd.f32 %v5296_v15, %v12340_v12  ;;  %v6282_v61 = vadd.f32 %v6281_v27, %v12596_v17  ;;  %v5298_v4 = vpop.f32.mrb[118].mxu1  ;;  %6543 = vmatprep.mubr.bf16.mxu0 %v5700_v31  ;;  %v6717_v53 = vmax.f32 %v6278_v13, 0.0 }
 0x63f   : > { %v6718_v16 = vmax.f32 %v6280_v40, 0.0  ;;  %v5299_v36 = vadd.f32 %v5298_v4, %v12337_v39  ;;  %v5300_v34 = vpop.f32.mrb[119].mxu1  ;;  %6544 = vmatmul.mubr.bf16.gmra.mrb[112].mxu0 %v5699_v60  ;;  %v5567_v18 = vmax.f32 %v5295_v6, 0.0 }
 0x640   : > { %v6719_v11 = vmax.f32 %v6282_v61, 0.0  ;;  %v5301_v44 = vadd.f32 %v5300_v34, %v12340_v12  ;;  %v5568_v47 = vmax.f32 %v5297_v21, 0.0 }
 0x641   : > { %v13103_v1 = vpack.c.bf16 %v6718_v16, %v6716_v52  ;;  %v5569_v49 = vmax.f32 %v5299_v36, 0.0  ;;  %7445 = vmatmul.mubr.bf16.gmra.mrb[224].mxu1 %v12959_v62 }
 0x642   : > { %v5570_v25 = vmax.f32 %v5301_v44, 0.0  ;;  %v6285_v8 = vpop.f32.mrb[8].mxu0  ;;  %7454 = vmatprep.mubr.bf16.mxu1 %v12977_v58  ;;  %v13107_v46 = vpack.c.bf16 %v6719_v11, %v6717_v53 }
 0x643   : > { %v5701_v30 = vpack.c.bf16 %v5569_v49, %v5567_v18  ;;  %v6286_v35 = vadd.f32 %v6285_v8, %v12593_v33  ;;  %v6287_v24 = vpop.f32.mrb[9].mxu0  ;;  %v7000_v8 = vld [vmem:[%s14109_s10] sm:$0x3] }
 0x644   : > { %v6288_v38 = vadd.f32 %v6287_v24, %v12596_v17  ;;  %v5304_v55 = vpop.f32.mrb[120].mxu1  ;;  %v6289_v7 = vpop.f32.mrb[10].mxu0  ;;  %v5702_v41 = vpack.c.bf16 %v5570_v25, %v5568_v47 }
 0x645   : > { %v5305_v22 = vadd.f32 %v5304_v55, %v12337_v39  ;;  %v6290_v62 = vadd.f32 %v6289_v7, %v12593_v33  ;;  %v5306_v10 = vpop.f32.mrb[121].mxu1  ;;  %v6291_v37 = vpop.f32.mrb[11].mxu0  ;;  %v6720_v57 = vmax.f32 %v6286_v35, 0.0 }
 0x646   : > { %v5307_v63 = vadd.f32 %v5306_v10, %v12340_v12  ;;  %v6292_v58 = vadd.f32 %v6291_v37, %v12596_v17  ;;  %v5308_v42 = vpop.f32.mrb[122].mxu1  ;;  %6553 = vmatprep.mubr.bf16.mxu0 %v5702_v41  ;;  %v6721_v13 = vmax.f32 %v6288_v38, 0.0  ;;  %v13138_v37 = vrot.slane %v7000_v8, %v14290_v59 }
 0x647   : > { %v6722_v60 = vmax.f32 %v6290_v62, 0.0  ;;  %v5309_v28 = vadd.f32 %v5308_v42, %v12337_v39  ;;  %v5310_v29 = vpop.f32.mrb[123].mxu1  ;;  %6554 = vmatmul.mubr.bf16.gmra.mrb[116].mxu0 %v5701_v30  ;;  %v5571_v31 = vmax.f32 %v5305_v22, 0.0 }
 0x648   : > { %v6723_v51 = vmax.f32 %v6292_v58, 0.0  ;;  %v5311_v32 = vadd.f32 %v5310_v29, %v12340_v12  ;;  %v5572_v15 = vmax.f32 %v5307_v63, 0.0 }
 0x649   : > { %v13117_v6 = vpack.c.bf16 %v6722_v60, %v6720_v57  ;;  %v5573_v40 = vmax.f32 %v5309_v28, 0.0  ;;  %7455 = vmatmul.mubr.bf16.gmra.mrb[228].mxu1 %v12973_v23 }
 0x64a   : > { %v5574_v27 = vmax.f32 %v5311_v32, 0.0  ;;  %v6295_v21 = vpop.f32.mrb[12].mxu0  ;;  %7464 = vmatprep.mubr.bf16.mxu1 %v12991_v9  ;;  %v13121_v61 = vpack.c.bf16 %v6723_v51, %v6721_v13 }
 0x64b   : > { %v5703_v4 = vpack.c.bf16 %v5573_v40, %v5571_v31  ;;  %v6296_v52 = vadd.f32 %v6295_v21, %v12593_v33  ;;  %v6297_v16 = vpop.f32.mrb[13].mxu0 }
 0x64c   : > { %v6298_v36 = vadd.f32 %v6297_v16, %v12596_v17  ;;  %v5314_v34 = vpop.f32.mrb[124].mxu1  ;;  %v6299_v53 = vpop.f32.mrb[14].mxu0  ;;  %v5704_v11 = vpack.c.bf16 %v5574_v27, %v5572_v15 }
 0x64d   : > { %v5315_v44 = vadd.f32 %v5314_v34, %v12337_v39  ;;  %v6300_v23 = vadd.f32 %v6299_v53, %v12593_v33  ;;  %v5316_v18 = vpop.f32.mrb[125].mxu1  ;;  %v6301_v49 = vpop.f32.mrb[15].mxu0  ;;  %v6724_v30 = vmax.f32 %v6296_v52, 0.0 }
 0x64e   : > { %v5317_v47 = vadd.f32 %v5316_v18, %v12340_v12  ;;  %v6302_v9 = vadd.f32 %v6301_v49, %v12596_v17  ;;  %v5318_v25 = vpop.f32.mrb[126].mxu1  ;;  %6563 = vmatprep.mubr.bf16.mxu0 %v5704_v11  ;;  %v6725_v55 = vmax.f32 %v6298_v36, 0.0 }
 0x64f   : > { %v6726_v35 = vmax.f32 %v6300_v23, 0.0  ;;  %v5319_v24 = vadd.f32 %v5318_v25, %v12337_v39  ;;  %v5320_v38 = vpop.f32.mrb[127].mxu1  ;;  %6564 = vmatmul.mubr.bf16.gmra.mrb[120].mxu0 %v5703_v4  ;;  %v5575_v22 = vmax.f32 %v5315_v44, 0.0  ;;  %v13142_v39 = vrot.slane %v7000_v8, %v14291_v26 }
 0x650   : > { %v6727_v7 = vmax.f32 %v6302_v9, 0.0  ;;  %v5321_v41 = vadd.f32 %v5320_v38, %v12340_v12  ;;  %v5576_v63 = vmax.f32 %v5317_v47, 0.0 }
 0x651   : > { %v13134_v62 = vpack.c.bf16 %v6726_v35, %v6724_v30  ;;  %v5577_v10 = vmax.f32 %v5319_v24, 0.0  ;;  %7465 = vmatmul.mubr.bf16.gmra.mrb[232].mxu1 %v12987_v20 }
 0x652   : > { %v5578_v58 = vmax.f32 %v5321_v41, 0.0  ;;  %v6305_v42 = vpop.f32.mrb[16].mxu0  ;;  %7474 = vmatprep.mubr.bf16.mxu1 %v13011_v0  ;;  %v13144_v57 = vpack.c.bf16 %v6727_v7, %v6725_v55 }
 0x653   : > { %v5705_v12 = vpack.c.bf16 %v5577_v10, %v5575_v22  ;;  %v6306_v60 = vadd.f32 %v6305_v42, %v12593_v33  ;;  %v6307_v28 = vpop.f32.mrb[17].mxu0 }
 0x654   : > { %v6308_v29 = vadd.f32 %v6307_v28, %v12596_v17  ;;  %v6309_v20 = vpop.f32.mrb[18].mxu0  ;;  %v7206_v13 = vpop.f32.mrb[128].mxu1  ;;  %v5706_v59 = vpack.c.bf16 %v5578_v58, %v5576_v63 }
 0x655   : > { %v6310_v51 = vadd.f32 %v6309_v20, %v12593_v33  ;;  %v7207_v32 = vadd.f32 %v7206_v13, %v13138_v37  ;;  %v6311_v31 = vpop.f32.mrb[19].mxu0  ;;  %v7208_v0 = vpop.f32.mrb[129].mxu1  ;;  %v6728_v27 = vmax.f32 %v6306_v60, 0.0 }
 0x656   : > { %v6312_v26 = vadd.f32 %v6311_v31, %v12596_v17  ;;  %v7209_v40 = vadd.f32 %v7208_v0, %v13142_v39  ;;  %6573 = vmatprep.mubr.bf16.mxu0 %v5706_v59  ;;  %v7210_v15 = vpop.f32.mrb[130].mxu1  ;;  %v6729_v16 = vmax.f32 %v6308_v29, 0.0 }
 0x657   : > { %v6730_v21 = vmax.f32 %v6310_v51, 0.0  ;;  %v7211_v4 = vadd.f32 %v7210_v15, %v13138_v37  ;;  %6574 = vmatmul.mubr.bf16.gmra.mrb[124].mxu0 %v5705_v12  ;;  %v7212_v52 = vpop.f32.mrb[131].mxu1  ;;  %v7845_v11 = vmax.f32 %v7207_v32, 0.0 }
 0x658   : > { %v6731_v36 = vmax.f32 %v6312_v26, 0.0  ;;  %v7213_v34 = vadd.f32 %v7212_v52, %v13142_v39  ;;  %v7846_v23 = vmax.f32 %v7209_v40, 0.0 }
 0x659   : > { %v13154_v53 = vpack.c.bf16 %v6730_v21, %v6728_v27  ;;  %v7847_v44 = vmax.f32 %v7211_v4, 0.0  ;;  %7475 = vmatmul.mubr.bf16.gmra.mrb[236].mxu1 %v13007_v43 }
 0x65a   : > { %v7848_v18 = vmax.f32 %v7213_v34, 0.0  ;;  %v6315_v49 = vpop.f32.mrb[20].mxu0  ;;  %7484 = vmatprep.mubr.bf16.mxu1 %v13029_v50  ;;  %v13158_v47 = vpack.c.bf16 %v6731_v36, %v6729_v16 }
 0x65b   : > { %v8101_v9 = vpack.c.bf16 %v7847_v44, %v7845_v11  ;;  %v6316_v25 = vadd.f32 %v6315_v49, %v12593_v33  ;;  %v6317_v8 = vpop.f32.mrb[21].mxu0 }
 0x65c   : > { %v8102_v30 = vpack.c.bf16 %v7848_v18, %v7846_v23  ;;  %v6318_v35 = vadd.f32 %v6317_v8, %v12596_v17  ;;  %v6319_v24 = vpop.f32.mrb[22].mxu0  ;;  %v7216_v38 = vpop.f32.mrb[132].mxu1 }
 0x65d   : > { %v6320_v55 = vadd.f32 %v6319_v24, %v12593_v33  ;;  %v7217_v43 = vadd.f32 %v7216_v38, %v13138_v37  ;;  %v6321_v7 = vpop.f32.mrb[23].mxu0  ;;  %v7218_v41 = vpop.f32.mrb[133].mxu1  ;;  %v6732_v63 = vmax.f32 %v6316_v25, 0.0 }
 0x65e   : > { %v6322_v22 = vadd.f32 %v6321_v7, %v12596_v17  ;;  %v7219_v50 = vadd.f32 %v7218_v41, %v13142_v39  ;;  %v7220_v10 = vpop.f32.mrb[134].mxu1  ;;  %8396 = vmatprep.mubr.bf16.mxu0 %v8102_v30  ;;  %v6733_v60 = vmax.f32 %v6318_v35, 0.0 }
 0x65f   : > { %v6734_v58 = vmax.f32 %v6320_v55, 0.0  ;;  %v7221_v42 = vadd.f32 %v7220_v10, %v13138_v37  ;;  %v7222_v12 = vpop.f32.mrb[135].mxu1  ;;  %8397 = vmatmul.mubr.bf16.vlgmr.msra.gmra.mrb[128].mxu0 %v8101_v9  ;;  %v7849_v13 = vmax.f32 %v7217_v43, 0.0 }
 0x660   : > { %v6735_v28 = vmax.f32 %v6322_v22, 0.0  ;;  %v7223_v29 = vadd.f32 %v7222_v12, %v13142_v39  ;;  %v7850_v51 = vmax.f32 %v7219_v50, 0.0 }
 0x661   : > { %v13168_v20 = vpack.c.bf16 %v6734_v58, %v6732_v63  ;;  %v7851_v59 = vmax.f32 %v7221_v42, 0.0  ;;  %7485 = vmatmul.mubr.bf16.gmra.mrb[240].mxu1 %v13025_v2 }
 0x662   : > { %v7852_v32 = vmax.f32 %v7223_v29, 0.0  ;;  %v6325_v31 = vpop.f32.mrb[24].mxu0  ;;  %7494 = vmatprep.mubr.bf16.mxu1 %v13045_v5  ;;  %v13172_v0 = vpack.c.bf16 %v6735_v28, %v6733_v60 }
 0x663   : > { %v8103_v26 = vpack.c.bf16 %v7851_v59, %v7849_v13  ;;  %v6326_v40 = vadd.f32 %v6325_v31, %v12593_v33  ;;  %v6327_v15 = vpop.f32.mrb[25].mxu0 }
 0x664   : > { %v8104_v27 = vpack.c.bf16 %v7852_v32, %v7850_v51  ;;  %v6328_v21 = vadd.f32 %v6327_v15, %v12596_v17  ;;  %v6329_v4 = vpop.f32.mrb[26].mxu0  ;;  %v7226_v52 = vpop.f32.mrb[136].mxu1 }
 0x665   : > { %v6330_v16 = vadd.f32 %v6329_v4, %v12593_v33  ;;  %v7227_v2 = vadd.f32 %v7226_v52, %v13138_v37  ;;  %v6331_v36 = vpop.f32.mrb[27].mxu0  ;;  %v7228_v34 = vpop.f32.mrb[137].mxu1  ;;  %v6736_v23 = vmax.f32 %v6326_v40, 0.0 }
 0x666   : > { %v6332_v11 = vadd.f32 %v6331_v36, %v12596_v17  ;;  %v7229_v5 = vadd.f32 %v7228_v34, %v13142_v39  ;;  %v7230_v44 = vpop.f32.mrb[138].mxu1  ;;  %8404 = vmatprep.mubr.bf16.mxu0 %v8104_v27  ;;  %v6737_v25 = vmax.f32 %v6328_v21, 0.0 }
 0x667   : > { %v6738_v18 = vmax.f32 %v6330_v16, 0.0  ;;  %v7231_v49 = vadd.f32 %v7230_v44, %v13138_v37  ;;  %v7232_v9 = vpop.f32.mrb[139].mxu1  ;;  %8405 = vmatmul.mubr.bf16.gmra.mrb[132].mxu0 %v8103_v26  ;;  %v7853_v24 = vmax.f32 %v7227_v2, 0.0 }
 0x668   : > { %v6739_v8 = vmax.f32 %v6332_v11, 0.0  ;;  %v7233_v30 = vadd.f32 %v7232_v9, %v13142_v39  ;;  %v7854_v55 = vmax.f32 %v7229_v5, 0.0 }
 0x669   : > { %v13182_v35 = vpack.c.bf16 %v6738_v18, %v6736_v23  ;;  %v7855_v38 = vmax.f32 %v7231_v49, 0.0  ;;  %7495 = vmatmul.mubr.bf16.gmra.mrb[244].mxu1 %v13041_v56 }
 0x66a   : > { %v7856_v43 = vmax.f32 %v7233_v30, 0.0  ;;  %v6335_v7 = vpop.f32.mrb[28].mxu0  ;;  %7504 = vmatprep.mubr.bf16.mxu1 %v13063_v45  ;;  %v13186_v41 = vpack.c.bf16 %v6739_v8, %v6737_v25 }
 0x66b   : > { %v8105_v22 = vpack.c.bf16 %v7855_v38, %v7853_v24  ;;  %v6336_v50 = vadd.f32 %v6335_v7, %v12593_v33  ;;  %v6337_v10 = vpop.f32.mrb[29].mxu0 }
 0x66c   : > { %v8106_v63 = vpack.c.bf16 %v7856_v43, %v7854_v55  ;;  %v6338_v58 = vadd.f32 %v6337_v10, %v12596_v17  ;;  %v6339_v42 = vpop.f32.mrb[30].mxu0  ;;  %v7236_v12 = vpop.f32.mrb[140].mxu1 }
 0x66d   : > { %v6340_v60 = vadd.f32 %v6339_v42, %v12593_v33  ;;  %v7237_v56 = vadd.f32 %v7236_v12, %v13138_v37  ;;  %v6341_v28 = vpop.f32.mrb[31].mxu0  ;;  %v7238_v29 = vpop.f32.mrb[141].mxu1  ;;  %v6740_v51 = vmax.f32 %v6336_v50, 0.0 }
 0x66e   : > { %v6342_v13 = vadd.f32 %v6341_v28, %v12596_v17  ;;  %v7239_v45 = vadd.f32 %v7238_v29, %v13142_v39  ;;  %v7240_v59 = vpop.f32.mrb[142].mxu1  ;;  %8412 = vmatprep.mubr.bf16.mxu0 %v8106_v63  ;;  %v6741_v40 = vmax.f32 %v6338_v58, 0.0 }
 0x66f   : > { %v6742_v32 = vmax.f32 %v6340_v60, 0.0  ;;  %v7241_v31 = vadd.f32 %v7240_v59, %v13138_v37  ;;  %v7242_v26 = vpop.f32.mrb[143].mxu1  ;;  %8413 = vmatmul.mubr.bf16.gmra.mrb[136].mxu0 %v8105_v22  ;;  %v7857_v4 = vmax.f32 %v7237_v56, 0.0 }
 0x670   : > { %v6743_v15 = vmax.f32 %v6342_v13, 0.0  ;;  %v7243_v27 = vadd.f32 %v7242_v26, %v13142_v39  ;;  %v7858_v16 = vmax.f32 %v7239_v45, 0.0 }
 0x671   : > { %v13196_v21 = vpack.c.bf16 %v6742_v32, %v6740_v51  ;;  %v7859_v52 = vmax.f32 %v7241_v31, 0.0  ;;  %7505 = vmatmul.mubr.bf16.gmra.mrb[248].mxu1 %v13059_v48 }
 0x672   : > { %v7860_v2 = vmax.f32 %v7243_v27, 0.0  ;;  %v6345_v36 = vpop.f32.mrb[32].mxu0  ;;  %7514 = vmatprep.mubr.bf16.mxu1 %v13079_v19  ;;  %v13200_v34 = vpack.c.bf16 %v6743_v15, %v6741_v40 }
 0x673   : > { %v8107_v11 = vpack.c.bf16 %v7859_v52, %v7857_v4  ;;  %v6346_v5 = vadd.f32 %v6345_v36, %v12593_v33  ;;  %v6347_v44 = vpop.f32.mrb[33].mxu0 }
 0x674   : > { %v8108_v23 = vpack.c.bf16 %v7860_v2, %v7858_v16  ;;  %v6348_v18 = vadd.f32 %v6347_v44, %v12596_v17  ;;  %v6349_v49 = vpop.f32.mrb[34].mxu0  ;;  %v7246_v9 = vpop.f32.mrb[144].mxu1 }
 0x675   : > { %v6350_v25 = vadd.f32 %v6349_v49, %v12593_v33  ;;  %v7247_v48 = vadd.f32 %v7246_v9, %v13138_v37  ;;  %v6351_v8 = vpop.f32.mrb[35].mxu0  ;;  %v7248_v30 = vpop.f32.mrb[145].mxu1  ;;  %v6744_v55 = vmax.f32 %v6346_v5, 0.0 }
 0x676   : > { %v6352_v24 = vadd.f32 %v6351_v8, %v12596_v17  ;;  %v7249_v19 = vadd.f32 %v7248_v30, %v13142_v39  ;;  %v7250_v38 = vpop.f32.mrb[146].mxu1  ;;  %8420 = vmatprep.mubr.bf16.mxu0 %v8108_v23  ;;  %v6745_v50 = vmax.f32 %v6348_v18, 0.0 }
 0x677   : > { %v6746_v43 = vmax.f32 %v6350_v25, 0.0  ;;  %v7251_v7 = vadd.f32 %v7250_v38, %v13138_v37  ;;  %v7252_v22 = vpop.f32.mrb[147].mxu1  ;;  %8421 = vmatmul.mubr.bf16.gmra.mrb[140].mxu0 %v8107_v11  ;;  %v7861_v42 = vmax.f32 %v7247_v48, 0.0 }
 0x678   : > { %v6747_v10 = vmax.f32 %v6352_v24, 0.0  ;;  %v7253_v63 = vadd.f32 %v7252_v22, %v13142_v39  ;;  %v7862_v60 = vmax.f32 %v7249_v19, 0.0 }
 0x679   : > { %v13210_v58 = vpack.c.bf16 %v6746_v43, %v6744_v55  ;;  %v7863_v12 = vmax.f32 %v7251_v7, 0.0  ;;  %7515 = vmatmul.mubr.bf16.gmra.mrb[252].mxu1 %v13075_v54 }
 0x67a   : > { %v7864_v56 = vmax.f32 %v7253_v63, 0.0  ;;  %v6355_v28 = vpop.f32.mrb[36].mxu0  ;;  %7524 = vmatprep.mubr.bf16.mxu1 %v13093_v3  ;;  %v13214_v29 = vpack.c.bf16 %v6747_v10, %v6745_v50 }
 0x67b   : > { %v8109_v13 = vpack.c.bf16 %v7863_v12, %v7861_v42  ;;  %v6356_v45 = vadd.f32 %v6355_v28, %v12593_v33  ;;  %v6357_v59 = vpop.f32.mrb[37].mxu0 }
 0x67c   : > { %v8110_v51 = vpack.c.bf16 %v7864_v56, %v7862_v60  ;;  %v6358_v32 = vadd.f32 %v6357_v59, %v12596_v17  ;;  %v6359_v31 = vpop.f32.mrb[38].mxu0  ;;  %v7256_v26 = vpop.f32.mrb[148].mxu1 }
 0x67d   : > { %v6360_v40 = vadd.f32 %v6359_v31, %v12593_v33  ;;  %v7257_v54 = vadd.f32 %v7256_v26, %v13138_v37  ;;  %v6361_v15 = vpop.f32.mrb[39].mxu0  ;;  %v7258_v27 = vpop.f32.mrb[149].mxu1  ;;  %v6748_v16 = vmax.f32 %v6356_v45, 0.0 }
 0x67e   : > { %v6362_v4 = vadd.f32 %v6361_v15, %v12596_v17  ;;  %v7259_v3 = vadd.f32 %v7258_v27, %v13142_v39  ;;  %v7260_v52 = vpop.f32.mrb[150].mxu1  ;;  %8428 = vmatprep.mubr.bf16.mxu0 %v8110_v51  ;;  %v6749_v5 = vmax.f32 %v6358_v32, 0.0 }
 0x67f   : > { %v6750_v2 = vmax.f32 %v6360_v40, 0.0  ;;  %v7261_v36 = vadd.f32 %v7260_v52, %v13138_v37  ;;  %v7262_v11 = vpop.f32.mrb[151].mxu1  ;;  %8429 = vmatmul.mubr.bf16.gmra.mrb[144].mxu0 %v8109_v13  ;;  %v7865_v49 = vmax.f32 %v7257_v54, 0.0 }
 0x680   : > { %v6751_v44 = vmax.f32 %v6362_v4, 0.0  ;;  %v7263_v23 = vadd.f32 %v7262_v11, %v13142_v39  ;;  %v7866_v25 = vmax.f32 %v7259_v3, 0.0 }
 0x681   : > { %v13224_v18 = vpack.c.bf16 %v6750_v2, %v6748_v16  ;;  %v7867_v9 = vmax.f32 %v7261_v36, 0.0  ;;  %7525 = vmatmul.mubr.bf16.gmra.mrb[0].mxu1 %v13089_v14 }
 0x682   : > { %v7868_v48 = vmax.f32 %v7263_v23, 0.0  ;;  %v6365_v8 = vpop.f32.mrb[40].mxu0  ;;  %7534 = vmatprep.mubr.bf16.mxu1 %v13107_v46  ;;  %v13228_v30 = vpack.c.bf16 %v6751_v44, %v6749_v5 }
 0x683   : > { %v8111_v24 = vpack.c.bf16 %v7867_v9, %v7865_v49  ;;  %v6366_v19 = vadd.f32 %v6365_v8, %v12593_v33  ;;  %v6367_v38 = vpop.f32.mrb[41].mxu0 }
 0x684   : > { %v8112_v55 = vpack.c.bf16 %v7868_v48, %v7866_v25  ;;  %v6368_v43 = vadd.f32 %v6367_v38, %v12596_v17  ;;  %v6369_v7 = vpop.f32.mrb[42].mxu0  ;;  %v7266_v22 = vpop.f32.mrb[152].mxu1 }
 0x685   : > { %v6370_v50 = vadd.f32 %v6369_v7, %v12593_v33  ;;  %v7267_v14 = vadd.f32 %v7266_v22, %v13138_v37  ;;  %v6371_v10 = vpop.f32.mrb[43].mxu0  ;;  %v7268_v63 = vpop.f32.mrb[153].mxu1  ;;  %v6752_v60 = vmax.f32 %v6366_v19, 0.0 }
 0x686   : > { %v6372_v42 = vadd.f32 %v6371_v10, %v12596_v17  ;;  %v7269_v46 = vadd.f32 %v7268_v63, %v13142_v39  ;;  %v7270_v12 = vpop.f32.mrb[154].mxu1  ;;  %8436 = vmatprep.mubr.bf16.mxu0 %v8112_v55  ;;  %v6753_v45 = vmax.f32 %v6368_v43, 0.0 }
 0x687   : > { %v6754_v56 = vmax.f32 %v6370_v50, 0.0  ;;  %v7271_v28 = vadd.f32 %v7270_v12, %v13138_v37  ;;  %v7272_v13 = vpop.f32.mrb[155].mxu1  ;;  %8437 = vmatmul.mubr.bf16.gmra.mrb[148].mxu0 %v8111_v24  ;;  %v7869_v31 = vmax.f32 %v7267_v14, 0.0 }
 0x688   : > { %v6755_v59 = vmax.f32 %v6372_v42, 0.0  ;;  %v7273_v51 = vadd.f32 %v7272_v13, %v13142_v39  ;;  %v7870_v40 = vmax.f32 %v7269_v46, 0.0 }
 0x689   : > { %v13238_v32 = vpack.c.bf16 %v6754_v56, %v6752_v60  ;;  %v7871_v26 = vmax.f32 %v7271_v28, 0.0  ;;  %7535 = vmatmul.mubr.bf16.gmra.mrb[4].mxu1 %v13103_v1 }
 0x68a   : > { %v7872_v54 = vmax.f32 %v7273_v51, 0.0  ;;  %v6375_v15 = vpop.f32.mrb[44].mxu0  ;;  %7544 = vmatprep.mubr.bf16.mxu1 %v13121_v61  ;;  %v13242_v27 = vpack.c.bf16 %v6755_v59, %v6753_v45 }
 0x68b   : > { %v8113_v4 = vpack.c.bf16 %v7871_v26, %v7869_v31  ;;  %v6376_v3 = vadd.f32 %v6375_v15, %v12593_v33  ;;  %v6377_v52 = vpop.f32.mrb[45].mxu0 }
 0x68c   : > { %v8114_v16 = vpack.c.bf16 %v7872_v54, %v7870_v40  ;;  %v6378_v2 = vadd.f32 %v6377_v52, %v12596_v17  ;;  %v6379_v36 = vpop.f32.mrb[46].mxu0  ;;  %v7276_v11 = vpop.f32.mrb[156].mxu1 }
 0x68d   : > { %v6380_v5 = vadd.f32 %v6379_v36, %v12593_v33  ;;  %v7277_v1 = vadd.f32 %v7276_v11, %v13138_v37  ;;  %v6381_v44 = vpop.f32.mrb[47].mxu0  ;;  %v7278_v23 = vpop.f32.mrb[157].mxu1  ;;  %v6756_v25 = vmax.f32 %v6376_v3, 0.0 }
 0x68e   : > { %v6382_v49 = vadd.f32 %v6381_v44, %v12596_v17  ;;  %v7279_v61 = vadd.f32 %v7278_v23, %v13142_v39  ;;  %v7280_v9 = vpop.f32.mrb[158].mxu1  ;;  %8444 = vmatprep.mubr.bf16.mxu0 %v8114_v16  ;;  %v6757_v19 = vmax.f32 %v6378_v2, 0.0 }
 0x68f   : > { %v6758_v48 = vmax.f32 %v6380_v5, 0.0  ;;  %v7281_v8 = vadd.f32 %v7280_v9, %v13138_v37  ;;  %v7282_v24 = vpop.f32.mrb[159].mxu1  ;;  %8445 = vmatmul.mubr.bf16.gmra.mrb[152].mxu0 %v8113_v4  ;;  %v7873_v7 = vmax.f32 %v7277_v1, 0.0 }
 0x690   : > { %v6759_v38 = vmax.f32 %v6382_v49, 0.0  ;;  %v7283_v55 = vadd.f32 %v7282_v24, %v13142_v39  ;;  %v7874_v50 = vmax.f32 %v7279_v61, 0.0 }
 0x691   : > { %v13252_v43 = vpack.c.bf16 %v6758_v48, %v6756_v25  ;;  %v7875_v22 = vmax.f32 %v7281_v8, 0.0  ;;  %7545 = vmatmul.mubr.bf16.gmra.mrb[8].mxu1 %v13117_v6 }
 0x692   : > { %v7876_v14 = vmax.f32 %v7283_v55, 0.0  ;;  %v6385_v10 = vpop.f32.mrb[48].mxu0  ;;  %7554 = vmatprep.mubr.bf16.mxu1 %v13144_v57  ;;  %v13256_v63 = vpack.c.bf16 %v6759_v38, %v6757_v19 }
 0x693   : > { %v8115_v42 = vpack.c.bf16 %v7875_v22, %v7873_v7  ;;  %v6386_v46 = vadd.f32 %v6385_v10, %v12593_v33  ;;  %v6387_v12 = vpop.f32.mrb[49].mxu0 }
 0x694   : > { %v8116_v60 = vpack.c.bf16 %v7876_v14, %v7874_v50  ;;  %v6388_v56 = vadd.f32 %v6387_v12, %v12596_v17  ;;  %v6389_v28 = vpop.f32.mrb[50].mxu0  ;;  %v7286_v13 = vpop.f32.mrb[160].mxu1 }
 0x695   : > { %v6390_v45 = vadd.f32 %v6389_v28, %v12593_v33  ;;  %v7287_v6 = vadd.f32 %v7286_v13, %v13138_v37  ;;  %v6391_v59 = vpop.f32.mrb[51].mxu0  ;;  %v7288_v51 = vpop.f32.mrb[161].mxu1  ;;  %v6760_v40 = vmax.f32 %v6386_v46, 0.0 }
 0x696   : > { %v6392_v31 = vadd.f32 %v6391_v59, %v12596_v17  ;;  %v7289_v57 = vadd.f32 %v7288_v51, %v13142_v39  ;;  %v7290_v26 = vpop.f32.mrb[162].mxu1  ;;  %8452 = vmatprep.mubr.bf16.mxu0 %v8116_v60  ;;  %v6761_v3 = vmax.f32 %v6388_v56, 0.0 }
 0x697   : > { %v6762_v54 = vmax.f32 %v6390_v45, 0.0  ;;  %v7291_v15 = vadd.f32 %v7290_v26, %v13138_v37  ;;  %v7292_v4 = vpop.f32.mrb[163].mxu1  ;;  %8453 = vmatmul.mubr.bf16.gmra.mrb[156].mxu0 %v8115_v42  ;;  %v7877_v36 = vmax.f32 %v7287_v6, 0.0 }
 0x698   : > { %v6763_v52 = vmax.f32 %v6392_v31, 0.0  ;;  %v7293_v16 = vadd.f32 %v7292_v4, %v13142_v39  ;;  %v7878_v5 = vmax.f32 %v7289_v57, 0.0 }
 0x699   : > { %v13266_v2 = vpack.c.bf16 %v6762_v54, %v6760_v40  ;;  %v7879_v11 = vmax.f32 %v7291_v15, 0.0  ;;  %7555 = vmatmul.mubr.bf16.gmra.mrb[12].mxu1 %v13134_v62 }
 0x69a   : > { %v7880_v1 = vmax.f32 %v7293_v16, 0.0  ;;  %v6395_v44 = vpop.f32.mrb[52].mxu0  ;;  %7564 = vmatprep.mubr.bf16.mxu1 %v13158_v47  ;;  %v13270_v23 = vpack.c.bf16 %v6763_v52, %v6761_v3 }
 0x69b   : > { %v8117_v49 = vpack.c.bf16 %v7879_v11, %v7877_v36  ;;  %v6396_v61 = vadd.f32 %v6395_v44, %v12593_v33  ;;  %v6397_v9 = vpop.f32.mrb[53].mxu0 }
 0x69c   : > { %v8118_v25 = vpack.c.bf16 %v7880_v1, %v7878_v5  ;;  %v6398_v48 = vadd.f32 %v6397_v9, %v12596_v17  ;;  %v6399_v8 = vpop.f32.mrb[54].mxu0  ;;  %v7296_v24 = vpop.f32.mrb[164].mxu1 }
 0x69d   : > { %v6400_v19 = vadd.f32 %v6399_v8, %v12593_v33  ;;  %v7297_v62 = vadd.f32 %v7296_v24, %v13138_v37  ;;  %v6401_v38 = vpop.f32.mrb[55].mxu0  ;;  %v7298_v55 = vpop.f32.mrb[165].mxu1  ;;  %v6764_v50 = vmax.f32 %v6396_v61, 0.0 }
 0x69e   : > { %v6402_v7 = vadd.f32 %v6401_v38, %v12596_v17  ;;  %v7299_v47 = vadd.f32 %v7298_v55, %v13142_v39  ;;  %v7300_v22 = vpop.f32.mrb[166].mxu1  ;;  %8460 = vmatprep.mubr.bf16.mxu0 %v8118_v25  ;;  %v6765_v46 = vmax.f32 %v6398_v48, 0.0 }
 0x69f   : > { %v6766_v14 = vmax.f32 %v6400_v19, 0.0  ;;  %v7301_v10 = vadd.f32 %v7300_v22, %v13138_v37  ;;  %v7302_v42 = vpop.f32.mrb[167].mxu1  ;;  %8461 = vmatmul.mubr.bf16.gmra.mrb[160].mxu0 %v8117_v49  ;;  %v7881_v28 = vmax.f32 %v7297_v62, 0.0 }
 0x6a0   : > { %v6767_v12 = vmax.f32 %v6402_v7, 0.0  ;;  %v7303_v60 = vadd.f32 %v7302_v42, %v13142_v39  ;;  %v7882_v45 = vmax.f32 %v7299_v47, 0.0 }
 0x6a1   : > { %v13280_v56 = vpack.c.bf16 %v6766_v14, %v6764_v50  ;;  %v7883_v13 = vmax.f32 %v7301_v10, 0.0  ;;  %7565 = vmatmul.mubr.bf16.gmra.mrb[16].mxu1 %v13154_v53 }
 0x6a2   : > { %v7884_v6 = vmax.f32 %v7303_v60, 0.0  ;;  %v6405_v59 = vpop.f32.mrb[56].mxu0  ;;  %7574 = vmatprep.mubr.bf16.mxu1 %v13172_v0  ;;  %v13284_v51 = vpack.c.bf16 %v6767_v12, %v6765_v46 }
 0x6a3   : > { %v8119_v31 = vpack.c.bf16 %v7883_v13, %v7881_v28  ;;  %v6406_v57 = vadd.f32 %v6405_v59, %v12593_v33  ;;  %v6407_v26 = vpop.f32.mrb[57].mxu0 }
 0x6a4   : > { %v8120_v40 = vpack.c.bf16 %v7884_v6, %v7882_v45  ;;  %v6408_v54 = vadd.f32 %v6407_v26, %v12596_v17  ;;  %v6409_v15 = vpop.f32.mrb[58].mxu0  ;;  %v7306_v4 = vpop.f32.mrb[168].mxu1 }
 0x6a5   : > { %v6410_v3 = vadd.f32 %v6409_v15, %v12593_v33  ;;  %v7307_v53 = vadd.f32 %v7306_v4, %v13138_v37  ;;  %v6411_v52 = vpop.f32.mrb[59].mxu0  ;;  %v7308_v16 = vpop.f32.mrb[169].mxu1  ;;  %v6768_v5 = vmax.f32 %v6406_v57, 0.0 }
 0x6a6   : > { %v6412_v36 = vadd.f32 %v6411_v52, %v12596_v17  ;;  %v7309_v0 = vadd.f32 %v7308_v16, %v13142_v39  ;;  %v7310_v11 = vpop.f32.mrb[170].mxu1  ;;  %8468 = vmatprep.mubr.bf16.mxu0 %v8120_v40  ;;  %v6769_v61 = vmax.f32 %v6408_v54, 0.0 }
 0x6a7   : > { %v6770_v1 = vmax.f32 %v6410_v3, 0.0  ;;  %v7311_v44 = vadd.f32 %v7310_v11, %v13138_v37  ;;  %v7312_v49 = vpop.f32.mrb[171].mxu1  ;;  %8469 = vmatmul.mubr.bf16.gmra.mrb[164].mxu0 %v8119_v31  ;;  %v7885_v8 = vmax.f32 %v7307_v53, 0.0 }
 0x6a8   : > { %v6771_v9 = vmax.f32 %v6412_v36, 0.0  ;;  %v7313_v25 = vadd.f32 %v7312_v49, %v13142_v39  ;;  %v7886_v19 = vmax.f32 %v7309_v0, 0.0 }
 0x6a9   : > { %v13294_v48 = vpack.c.bf16 %v6770_v1, %v6768_v5  ;;  %v7887_v24 = vmax.f32 %v7311_v44, 0.0  ;;  %7575 = vmatmul.mubr.bf16.gmra.mrb[20].mxu1 %v13168_v20 }
 0x6aa   : > { %v7888_v62 = vmax.f32 %v7313_v25, 0.0  ;;  %v6415_v38 = vpop.f32.mrb[60].mxu0  ;;  %7584 = vmatprep.mubr.bf16.mxu1 %v13186_v41  ;;  %v13298_v55 = vpack.c.bf16 %v6771_v9, %v6769_v61 }
 0x6ab   : > { %v8121_v7 = vpack.c.bf16 %v7887_v24, %v7885_v8  ;;  %v6416_v47 = vadd.f32 %v6415_v38, %v12593_v33  ;;  %v6417_v22 = vpop.f32.mrb[61].mxu0 }
 0x6ac   : > { %v8122_v50 = vpack.c.bf16 %v7888_v62, %v7886_v19  ;;  %v6418_v14 = vadd.f32 %v6417_v22, %v12596_v17  ;;  %v6419_v10 = vpop.f32.mrb[62].mxu0  ;;  %v7316_v42 = vpop.f32.mrb[172].mxu1 }
 0x6ad   : > { %v6420_v46 = vadd.f32 %v6419_v10, %v12593_v33  ;;  %v7317_v20 = vadd.f32 %v7316_v42, %v13138_v37  ;;  %v6421_v12 = vpop.f32.mrb[63].mxu0  ;;  %v7318_v60 = vpop.f32.mrb[173].mxu1  ;;  %v6772_v45 = vmax.f32 %v6416_v47, 0.0 }
 0x6ae   : > { %v6422_v28 = vadd.f32 %v6421_v12, %v12596_v17  ;;  %v7319_v41 = vadd.f32 %v7318_v60, %v13142_v39  ;;  %v7320_v13 = vpop.f32.mrb[174].mxu1  ;;  %8476 = vmatprep.mubr.bf16.mxu0 %v8122_v50  ;;  %v6773_v57 = vmax.f32 %v6418_v14, 0.0 }
 0x6af   : > { %v6774_v6 = vmax.f32 %v6420_v46, 0.0  ;;  %v7321_v59 = vadd.f32 %v7320_v13, %v13138_v37  ;;  %v7322_v31 = vpop.f32.mrb[175].mxu1  ;;  %8477 = vmatmul.mubr.bf16.gmra.mrb[168].mxu0 %v8121_v7  ;;  %v7889_v15 = vmax.f32 %v7317_v20, 0.0 }
 0x6b0   : > { %v6775_v26 = vmax.f32 %v6422_v28, 0.0  ;;  %v7323_v40 = vadd.f32 %v7322_v31, %v13142_v39  ;;  %v7890_v3 = vmax.f32 %v7319_v41, 0.0 }
 0x6b1   : > { %v13308_v54 = vpack.c.bf16 %v6774_v6, %v6772_v45  ;;  %v7891_v4 = vmax.f32 %v7321_v59, 0.0  ;;  %7585 = vmatmul.mubr.bf16.gmra.mrb[24].mxu1 %v13182_v35 }
 0x6b2   : > { %v7892_v53 = vmax.f32 %v7323_v40, 0.0  ;;  %v6425_v52 = vpop.f32.mrb[64].mxu0  ;;  %7594 = vmatprep.mubr.bf16.mxu1 %v13200_v34  ;;  %v13312_v16 = vpack.c.bf16 %v6775_v26, %v6773_v57 }
 0x6b3   : > { %v8123_v36 = vpack.c.bf16 %v7891_v4, %v7889_v15  ;;  %v6426_v0 = vadd.f32 %v6425_v52, %v12593_v33  ;;  %v6427_v11 = vpop.f32.mrb[65].mxu0 }
 0x6b4   : > { %v8124_v5 = vpack.c.bf16 %v7892_v53, %v7890_v3  ;;  %v6428_v1 = vadd.f32 %v6427_v11, %v12596_v17  ;;  %v6429_v44 = vpop.f32.mrb[66].mxu0  ;;  %v7326_v49 = vpop.f32.mrb[176].mxu1 }
 0x6b5   : > { %v6430_v61 = vadd.f32 %v6429_v44, %v12593_v33  ;;  %v7327_v35 = vadd.f32 %v7326_v49, %v13138_v37  ;;  %v6431_v9 = vpop.f32.mrb[67].mxu0  ;;  %v7328_v25 = vpop.f32.mrb[177].mxu1  ;;  %v6776_v19 = vmax.f32 %v6426_v0, 0.0 }
 0x6b6   : > { %v6432_v8 = vadd.f32 %v6431_v9, %v12596_v17  ;;  %v7329_v34 = vadd.f32 %v7328_v25, %v13142_v39  ;;  %v7330_v24 = vpop.f32.mrb[178].mxu1  ;;  %8484 = vmatprep.mubr.bf16.mxu0 %v8124_v5  ;;  %v6777_v47 = vmax.f32 %v6428_v1, 0.0 }
 0x6b7   : > { %v6778_v62 = vmax.f32 %v6430_v61, 0.0  ;;  %v7331_v38 = vadd.f32 %v7330_v24, %v13138_v37  ;;  %v7332_v7 = vpop.f32.mrb[179].mxu1  ;;  %8485 = vmatmul.mubr.bf16.gmra.mrb[172].mxu0 %v8123_v36  ;;  %v7893_v10 = vmax.f32 %v7327_v35, 0.0 }
 0x6b8   : > { %v6779_v22 = vmax.f32 %v6432_v8, 0.0  ;;  %v7333_v50 = vadd.f32 %v7332_v7, %v13142_v39  ;;  %v7894_v46 = vmax.f32 %v7329_v34, 0.0 }
 0x6b9   : > { %v13322_v14 = vpack.c.bf16 %v6778_v62, %v6776_v19  ;;  %v7895_v42 = vmax.f32 %v7331_v38, 0.0  ;;  %7595 = vmatmul.mubr.bf16.gmra.mrb[28].mxu1 %v13196_v21 }
 0x6ba   : > { %v7896_v20 = vmax.f32 %v7333_v50, 0.0  ;;  %v6435_v12 = vpop.f32.mrb[68].mxu0  ;;  %7604 = vmatprep.mubr.bf16.mxu1 %v13214_v29  ;;  %v13326_v60 = vpack.c.bf16 %v6779_v22, %v6777_v47 }
 0x6bb   : > { %v8125_v28 = vpack.c.bf16 %v7895_v42, %v7893_v10  ;;  %v6436_v41 = vadd.f32 %v6435_v12, %v12593_v33  ;;  %v6437_v13 = vpop.f32.mrb[69].mxu0 }
 0x6bc   : > { %v8126_v45 = vpack.c.bf16 %v7896_v20, %v7894_v46  ;;  %v6438_v6 = vadd.f32 %v6437_v13, %v12596_v17  ;;  %v6439_v59 = vpop.f32.mrb[70].mxu0  ;;  %v7336_v31 = vpop.f32.mrb[180].mxu1 }
 0x6bd   : > { %v6440_v57 = vadd.f32 %v6439_v59, %v12593_v33  ;;  %v7337_v21 = vadd.f32 %v7336_v31, %v13138_v37  ;;  %v6441_v26 = vpop.f32.mrb[71].mxu0  ;;  %v7338_v40 = vpop.f32.mrb[181].mxu1  ;;  %v6780_v3 = vmax.f32 %v6436_v41, 0.0 }
 0x6be   : > { %v6442_v15 = vadd.f32 %v6441_v26, %v12596_v17  ;;  %v7339_v29 = vadd.f32 %v7338_v40, %v13142_v39  ;;  %v7340_v4 = vpop.f32.mrb[182].mxu1  ;;  %8492 = vmatprep.mubr.bf16.mxu0 %v8126_v45  ;;  %v6781_v0 = vmax.f32 %v6438_v6, 0.0 }
 0x6bf   : > { %v6782_v53 = vmax.f32 %v6440_v57, 0.0  ;;  %v7341_v52 = vadd.f32 %v7340_v4, %v13138_v37  ;;  %v7342_v36 = vpop.f32.mrb[183].mxu1  ;;  %8493 = vmatmul.mubr.bf16.gmra.mrb[176].mxu0 %v8125_v28  ;;  %v7897_v44 = vmax.f32 %v7337_v21, 0.0 }
 0x6c0   : > { %v6783_v11 = vmax.f32 %v6442_v15, 0.0  ;;  %v7343_v5 = vadd.f32 %v7342_v36, %v13142_v39  ;;  %v7898_v61 = vmax.f32 %v7339_v29, 0.0 }
 0x6c1   : > { %v13336_v1 = vpack.c.bf16 %v6782_v53, %v6780_v3  ;;  %v7899_v49 = vmax.f32 %v7341_v52, 0.0  ;;  %7605 = vmatmul.mubr.bf16.gmra.mrb[32].mxu1 %v13210_v58 }
 0x6c2   : > { %v7900_v35 = vmax.f32 %v7343_v5, 0.0  ;;  %v6445_v9 = vpop.f32.mrb[72].mxu0  ;;  %7614 = vmatprep.mubr.bf16.mxu1 %v13228_v30  ;;  %v13340_v25 = vpack.c.bf16 %v6783_v11, %v6781_v0 }
 0x6c3   : > { %v8127_v8 = vpack.c.bf16 %v7899_v49, %v7897_v44  ;;  %v6446_v34 = vadd.f32 %v6445_v9, %v12593_v33  ;;  %v6447_v24 = vpop.f32.mrb[73].mxu0 }
 0x6c4   : > { %v8128_v19 = vpack.c.bf16 %v7900_v35, %v7898_v61  ;;  %v6448_v62 = vadd.f32 %v6447_v24, %v12596_v17  ;;  %v6449_v38 = vpop.f32.mrb[74].mxu0  ;;  %v7346_v7 = vpop.f32.mrb[184].mxu1 }
 0x6c5   : > { %v6450_v47 = vadd.f32 %v6449_v38, %v12593_v33  ;;  %v7347_v58 = vadd.f32 %v7346_v7, %v13138_v37  ;;  %v6451_v22 = vpop.f32.mrb[75].mxu0  ;;  %v7348_v50 = vpop.f32.mrb[185].mxu1  ;;  %v6784_v46 = vmax.f32 %v6446_v34, 0.0 }
 0x6c6   : > { %v6452_v10 = vadd.f32 %v6451_v22, %v12596_v17  ;;  %v7349_v30 = vadd.f32 %v7348_v50, %v13142_v39  ;;  %v7350_v42 = vpop.f32.mrb[186].mxu1  ;;  %8500 = vmatprep.mubr.bf16.mxu0 %v8128_v19  ;;  %v6785_v41 = vmax.f32 %v6448_v62, 0.0 }
 0x6c7   : > { %v6786_v20 = vmax.f32 %v6450_v47, 0.0  ;;  %v7351_v12 = vadd.f32 %v7350_v42, %v13138_v37  ;;  %v7352_v28 = vpop.f32.mrb[187].mxu1  ;;  %8501 = vmatmul.mubr.bf16.gmra.mrb[180].mxu0 %v8127_v8  ;;  %v7901_v59 = vmax.f32 %v7347_v58, 0.0 }
 0x6c8   : > { %v6787_v13 = vmax.f32 %v6452_v10, 0.0  ;;  %v7353_v45 = vadd.f32 %v7352_v28, %v13142_v39  ;;  %v7902_v57 = vmax.f32 %v7349_v30, 0.0 }
 0x6c9   : > { %v13350_v6 = vpack.c.bf16 %v6786_v20, %v6784_v46  ;;  %v7903_v31 = vmax.f32 %v7351_v12, 0.0  ;;  %7615 = vmatmul.mubr.bf16.gmra.mrb[36].mxu1 %v13224_v18 }
 0x6ca   : > { %v7904_v21 = vmax.f32 %v7353_v45, 0.0  ;;  %v6455_v26 = vpop.f32.mrb[76].mxu0  ;;  %7624 = vmatprep.mubr.bf16.mxu1 %v13242_v27  ;;  %v13354_v40 = vpack.c.bf16 %v6787_v13, %v6785_v41 }
 0x6cb   : > { %v8129_v15 = vpack.c.bf16 %v7903_v31, %v7901_v59  ;;  %v6456_v29 = vadd.f32 %v6455_v26, %v12593_v33  ;;  %v6457_v4 = vpop.f32.mrb[77].mxu0 }
 0x6cc   : > { %v8130_v3 = vpack.c.bf16 %v7904_v21, %v7902_v57  ;;  %v6458_v53 = vadd.f32 %v6457_v4, %v12596_v17  ;;  %v6459_v52 = vpop.f32.mrb[78].mxu0  ;;  %v7356_v36 = vpop.f32.mrb[188].mxu1 }
 0x6cd   : > { %v6460_v0 = vadd.f32 %v6459_v52, %v12593_v33  ;;  %v7357_v18 = vadd.f32 %v7356_v36, %v13138_v37  ;;  %v6461_v11 = vpop.f32.mrb[79].mxu0  ;;  %v7358_v5 = vpop.f32.mrb[189].mxu1  ;;  %v6788_v61 = vmax.f32 %v6456_v29, 0.0 }
 0x6ce   : > { %v6462_v44 = vadd.f32 %v6461_v11, %v12596_v17  ;;  %v7359_v27 = vadd.f32 %v7358_v5, %v13142_v39  ;;  %v7360_v49 = vpop.f32.mrb[190].mxu1  ;;  %8508 = vmatprep.mubr.bf16.mxu0 %v8130_v3  ;;  %v6789_v34 = vmax.f32 %v6458_v53, 0.0 }
 0x6cf   : > { %v6790_v35 = vmax.f32 %v6460_v0, 0.0  ;;  %v7361_v9 = vadd.f32 %v7360_v49, %v13138_v37  ;;  %v7362_v8 = vpop.f32.mrb[191].mxu1  ;;  %8509 = vmatmul.mubr.bf16.gmra.mrb[184].mxu0 %v8129_v15  ;;  %v7905_v38 = vmax.f32 %v7357_v18, 0.0 }
 0x6d0   : > { %v6791_v24 = vmax.f32 %v6462_v44, 0.0  ;;  %v7363_v19 = vadd.f32 %v7362_v8, %v13142_v39  ;;  %v7906_v47 = vmax.f32 %v7359_v27, 0.0 }
 0x6d1   : > { %v13364_v62 = vpack.c.bf16 %v6790_v35, %v6788_v61  ;;  %v7907_v7 = vmax.f32 %v7361_v9, 0.0  ;;  %7625 = vmatmul.mubr.bf16.gmra.mrb[40].mxu1 %v13238_v32 }
 0x6d2   : > { %v7908_v58 = vmax.f32 %v7363_v19, 0.0  ;;  %v6465_v22 = vpop.f32.mrb[80].mxu0  ;;  %7634 = vmatprep.mubr.bf16.mxu1 %v13256_v63  ;;  %v13368_v50 = vpack.c.bf16 %v6791_v24, %v6789_v34 }
 0x6d3   : > { %v8131_v10 = vpack.c.bf16 %v7907_v7, %v7905_v38  ;;  %v6466_v30 = vadd.f32 %v6465_v22, %v12593_v33  ;;  %v6467_v42 = vpop.f32.mrb[81].mxu0 }
 0x6d4   : > { %v8132_v46 = vpack.c.bf16 %v7908_v58, %v7906_v47  ;;  %v6468_v20 = vadd.f32 %v6467_v42, %v12596_v17  ;;  %v6469_v12 = vpop.f32.mrb[82].mxu0  ;;  %v7366_v28 = vpop.f32.mrb[192].mxu1 }
 0x6d5   : > { %v6470_v41 = vadd.f32 %v6469_v12, %v12593_v33  ;;  %v7367_v32 = vadd.f32 %v7366_v28, %v13138_v37  ;;  %v6471_v13 = vpop.f32.mrb[83].mxu0  ;;  %v7368_v45 = vpop.f32.mrb[193].mxu1  ;;  %v6792_v57 = vmax.f32 %v6466_v30, 0.0 }
 0x6d6   : > { %v6472_v59 = vadd.f32 %v6471_v13, %v12596_v17  ;;  %v7369_v63 = vadd.f32 %v7368_v45, %v13142_v39  ;;  %v7370_v31 = vpop.f32.mrb[194].mxu1  ;;  %8516 = vmatprep.mubr.bf16.mxu0 %v8132_v46  ;;  %v6793_v29 = vmax.f32 %v6468_v20, 0.0 }
 0x6d7   : > { %v6794_v21 = vmax.f32 %v6470_v41, 0.0  ;;  %v7371_v26 = vadd.f32 %v7370_v31, %v13138_v37  ;;  %v7372_v15 = vpop.f32.mrb[195].mxu1  ;;  %8517 = vmatmul.mubr.bf16.gmra.mrb[188].mxu0 %v8131_v10  ;;  %v7909_v52 = vmax.f32 %v7367_v32, 0.0 }
 0x6d8   : > { %v6795_v4 = vmax.f32 %v6472_v59, 0.0  ;;  %v7373_v3 = vadd.f32 %v7372_v15, %v13142_v39  ;;  %v7910_v0 = vmax.f32 %v7369_v63, 0.0 }
 0x6d9   : > { %v13378_v53 = vpack.c.bf16 %v6794_v21, %v6792_v57  ;;  %v7911_v36 = vmax.f32 %v7371_v26, 0.0  ;;  %7635 = vmatmul.mubr.bf16.gmra.mrb[44].mxu1 %v13252_v43 }
 0x6da   : > { %v7912_v18 = vmax.f32 %v7373_v3, 0.0  ;;  %v6475_v11 = vpop.f32.mrb[84].mxu0  ;;  %7644 = vmatprep.mubr.bf16.mxu1 %v13270_v23  ;;  %v13382_v5 = vpack.c.bf16 %v6795_v4, %v6793_v29 }
 0x6db   : > { %v8133_v44 = vpack.c.bf16 %v7911_v36, %v7909_v52  ;;  %v6476_v27 = vadd.f32 %v6475_v11, %v12593_v33  ;;  %v6477_v49 = vpop.f32.mrb[85].mxu0 }
 0x6dc   : > { %v8134_v61 = vpack.c.bf16 %v7912_v18, %v7910_v0  ;;  %v6478_v35 = vadd.f32 %v6477_v49, %v12596_v17  ;;  %v6479_v9 = vpop.f32.mrb[86].mxu0  ;;  %v7376_v8 = vpop.f32.mrb[196].mxu1 }
 0x6dd   : > { %v6480_v34 = vadd.f32 %v6479_v9, %v12593_v33  ;;  %v7377_v43 = vadd.f32 %v7376_v8, %v13138_v37  ;;  %v6481_v24 = vpop.f32.mrb[87].mxu0  ;;  %v7378_v19 = vpop.f32.mrb[197].mxu1  ;;  %v6796_v47 = vmax.f32 %v6476_v27, 0.0 }
 0x6de   : > { %v6482_v38 = vadd.f32 %v6481_v24, %v12596_v17  ;;  %v7379_v23 = vadd.f32 %v7378_v19, %v13142_v39  ;;  %v7380_v7 = vpop.f32.mrb[198].mxu1  ;;  %8524 = vmatprep.mubr.bf16.mxu0 %v8134_v61  ;;  %v6797_v30 = vmax.f32 %v6478_v35, 0.0 }
 0x6df   : > { %v6798_v58 = vmax.f32 %v6480_v34, 0.0  ;;  %v7381_v22 = vadd.f32 %v7380_v7, %v13138_v37  ;;  %v7382_v10 = vpop.f32.mrb[199].mxu1  ;;  %8525 = vmatmul.mubr.bf16.gmra.mrb[192].mxu0 %v8133_v44  ;;  %v7913_v12 = vmax.f32 %v7377_v43, 0.0 }
 0x6e0   : > { %v6799_v42 = vmax.f32 %v6482_v38, 0.0  ;;  %v7383_v46 = vadd.f32 %v7382_v10, %v13142_v39  ;;  %v7914_v41 = vmax.f32 %v7379_v23, 0.0 }
 0x6e1   : > { %v13392_v20 = vpack.c.bf16 %v6798_v58, %v6796_v47  ;;  %v7915_v28 = vmax.f32 %v7381_v22, 0.0  ;;  %7645 = vmatmul.mubr.bf16.gmra.mrb[48].mxu1 %v13266_v2 }
 0x6e2   : > { %v7916_v32 = vmax.f32 %v7383_v46, 0.0  ;;  %v6485_v13 = vpop.f32.mrb[88].mxu0  ;;  %7654 = vmatprep.mubr.bf16.mxu1 %v13284_v51  ;;  %v13396_v45 = vpack.c.bf16 %v6799_v42, %v6797_v30 }
 0x6e3   : > { %v8135_v59 = vpack.c.bf16 %v7915_v28, %v7913_v12  ;;  %v6486_v63 = vadd.f32 %v6485_v13, %v12593_v33  ;;  %v6487_v31 = vpop.f32.mrb[89].mxu0 }
 0x6e4   : > { %v8136_v57 = vpack.c.bf16 %v7916_v32, %v7914_v41  ;;  %v6488_v21 = vadd.f32 %v6487_v31, %v12596_v17  ;;  %v6489_v26 = vpop.f32.mrb[90].mxu0  ;;  %v7386_v15 = vpop.f32.mrb[200].mxu1 }
 0x6e5   : > { %v6490_v29 = vadd.f32 %v6489_v26, %v12593_v33  ;;  %v7387_v2 = vadd.f32 %v7386_v15, %v13138_v37  ;;  %v6491_v4 = vpop.f32.mrb[91].mxu0  ;;  %v7388_v3 = vpop.f32.mrb[201].mxu1  ;;  %v6800_v0 = vmax.f32 %v6486_v63, 0.0 }
 0x6e6   : > { %v6492_v52 = vadd.f32 %v6491_v4, %v12596_v17  ;;  %v7389_v51 = vadd.f32 %v7388_v3, %v13142_v39  ;;  %v7390_v36 = vpop.f32.mrb[202].mxu1  ;;  %8532 = vmatprep.mubr.bf16.mxu0 %v8136_v57  ;;  %v6801_v27 = vmax.f32 %v6488_v21, 0.0 }
 0x6e7   : > { %v6802_v18 = vmax.f32 %v6490_v29, 0.0  ;;  %v7391_v11 = vadd.f32 %v7390_v36, %v13138_v37  ;;  %v7392_v44 = vpop.f32.mrb[203].mxu1  ;;  %8533 = vmatmul.mubr.bf16.gmra.mrb[196].mxu0 %v8135_v59  ;;  %v7917_v9 = vmax.f32 %v7387_v2, 0.0 }
 0x6e8   : > { %v6803_v49 = vmax.f32 %v6492_v52, 0.0  ;;  %v7393_v61 = vadd.f32 %v7392_v44, %v13142_v39  ;;  %v7918_v34 = vmax.f32 %v7389_v51, 0.0 }
 0x6e9   : > { %v13406_v35 = vpack.c.bf16 %v6802_v18, %v6800_v0  ;;  %v7919_v8 = vmax.f32 %v7391_v11, 0.0  ;;  %7655 = vmatmul.mubr.bf16.gmra.mrb[52].mxu1 %v13280_v56 }
 0x6ea   : > { %v7920_v43 = vmax.f32 %v7393_v61, 0.0  ;;  %v6495_v24 = vpop.f32.mrb[92].mxu0  ;;  %7664 = vmatprep.mubr.bf16.mxu1 %v13298_v55  ;;  %v13410_v19 = vpack.c.bf16 %v6803_v49, %v6801_v27 }
 0x6eb   : > { %v8137_v38 = vpack.c.bf16 %v7919_v8, %v7917_v9  ;;  %v6496_v23 = vadd.f32 %v6495_v24, %v12593_v33  ;;  %v6497_v7 = vpop.f32.mrb[93].mxu0 }
 0x6ec   : > { %v8138_v47 = vpack.c.bf16 %v7920_v43, %v7918_v34  ;;  %v6498_v58 = vadd.f32 %v6497_v7, %v12596_v17  ;;  %v6499_v22 = vpop.f32.mrb[94].mxu0  ;;  %v7396_v10 = vpop.f32.mrb[204].mxu1 }
 0x6ed   : > { %v6500_v30 = vadd.f32 %v6499_v22, %v12593_v33  ;;  %v7397_v56 = vadd.f32 %v7396_v10, %v13138_v37  ;;  %v6501_v42 = vpop.f32.mrb[95].mxu0  ;;  %v7398_v46 = vpop.f32.mrb[205].mxu1  ;;  %v6804_v41 = vmax.f32 %v6496_v23, 0.0 }
 0x6ee   : > { %v6502_v12 = vadd.f32 %v6501_v42, %v12596_v17  ;;  %v7399_v55 = vadd.f32 %v7398_v46, %v13142_v39  ;;  %v7400_v28 = vpop.f32.mrb[206].mxu1  ;;  %8540 = vmatprep.mubr.bf16.mxu0 %v8138_v47  ;;  %v6805_v63 = vmax.f32 %v6498_v58, 0.0 }
 0x6ef   : > { %v6806_v32 = vmax.f32 %v6500_v30, 0.0  ;;  %v7401_v13 = vadd.f32 %v7400_v28, %v13138_v37  ;;  %v7402_v59 = vpop.f32.mrb[207].mxu1  ;;  %8541 = vmatmul.mubr.bf16.gmra.mrb[200].mxu0 %v8137_v38  ;;  %v7921_v26 = vmax.f32 %v7397_v56, 0.0 }
 0x6f0   : > { %v6807_v31 = vmax.f32 %v6502_v12, 0.0  ;;  %v7403_v57 = vadd.f32 %v7402_v59, %v13142_v39  ;;  %v7922_v29 = vmax.f32 %v7399_v55, 0.0 }
 0x6f1   : > { %v13420_v21 = vpack.c.bf16 %v6806_v32, %v6804_v41  ;;  %v7923_v15 = vmax.f32 %v7401_v13, 0.0  ;;  %7665 = vmatmul.mubr.bf16.gmra.mrb[56].mxu1 %v13294_v48 }
 0x6f2   : > { %v7924_v2 = vmax.f32 %v7403_v57, 0.0  ;;  %v6505_v4 = vpop.f32.mrb[96].mxu0  ;;  %7674 = vmatprep.mubr.bf16.mxu1 %v13312_v16  ;;  %v13424_v3 = vpack.c.bf16 %v6807_v31, %v6805_v63 }
 0x6f3   : > { %v8139_v52 = vpack.c.bf16 %v7923_v15, %v7921_v26  ;;  %v6506_v51 = vadd.f32 %v6505_v4, %v12593_v33  ;;  %v6507_v36 = vpop.f32.mrb[97].mxu0 }
 0x6f4   : > { %v8140_v0 = vpack.c.bf16 %v7924_v2, %v7922_v29  ;;  %v6508_v18 = vadd.f32 %v6507_v36, %v12596_v17  ;;  %v6509_v11 = vpop.f32.mrb[98].mxu0  ;;  %v7406_v44 = vpop.f32.mrb[208].mxu1 }
 0x6f5   : > { %v6510_v27 = vadd.f32 %v6509_v11, %v12593_v33  ;;  %v7407_v48 = vadd.f32 %v7406_v44, %v13138_v37  ;;  %v6511_v49 = vpop.f32.mrb[99].mxu0  ;;  %v7408_v61 = vpop.f32.mrb[209].mxu1  ;;  %v6808_v34 = vmax.f32 %v6506_v51, 0.0 }
 0x6f6   : > { %v6512_v9 = vadd.f32 %v6511_v49, %v12596_v17  ;;  %v7409_v16 = vadd.f32 %v7408_v61, %v13142_v39  ;;  %v7410_v8 = vpop.f32.mrb[210].mxu1  ;;  %8548 = vmatprep.mubr.bf16.mxu0 %v8140_v0  ;;  %v6809_v23 = vmax.f32 %v6508_v18, 0.0 }
 0x6f7   : > { %v6810_v43 = vmax.f32 %v6510_v27, 0.0  ;;  %v7411_v24 = vadd.f32 %v7410_v8, %v13138_v37  ;;  %v7412_v38 = vpop.f32.mrb[211].mxu1  ;;  %8549 = vmatmul.mubr.bf16.gmra.mrb[204].mxu0 %v8139_v52  ;;  %v7925_v22 = vmax.f32 %v7407_v48, 0.0 }
 0x6f8   : > { %v6811_v7 = vmax.f32 %v6512_v9, 0.0  ;;  %v7413_v47 = vadd.f32 %v7412_v38, %v13142_v39  ;;  %v7926_v30 = vmax.f32 %v7409_v16, 0.0 }
 0x6f9   : > { %v13434_v58 = vpack.c.bf16 %v6810_v43, %v6808_v34  ;;  %v7927_v10 = vmax.f32 %v7411_v24, 0.0  ;;  %7675 = vmatmul.mubr.bf16.gmra.mrb[60].mxu1 %v13308_v54 }
 0x6fa   : > { %v7928_v56 = vmax.f32 %v7413_v47, 0.0  ;;  %v6515_v42 = vpop.f32.mrb[100].mxu0  ;;  %7684 = vmatprep.mubr.bf16.mxu1 %v13326_v60  ;;  %v13438_v46 = vpack.c.bf16 %v6811_v7, %v6809_v23 }
 0x6fb   : > { %v8141_v12 = vpack.c.bf16 %v7927_v10, %v7925_v22  ;;  %v6516_v55 = vadd.f32 %v6515_v42, %v12593_v33  ;;  %v6517_v28 = vpop.f32.mrb[101].mxu0 }
 0x6fc   : > { %v8142_v41 = vpack.c.bf16 %v7928_v56, %v7926_v30  ;;  %v6518_v32 = vadd.f32 %v6517_v28, %v12596_v17  ;;  %v6519_v13 = vpop.f32.mrb[102].mxu0  ;;  %v7416_v59 = vpop.f32.mrb[212].mxu1 }
 0x6fd   : > { %v6520_v63 = vadd.f32 %v6519_v13, %v12593_v33  ;;  %v7417_v54 = vadd.f32 %v7416_v59, %v13138_v37  ;;  %v6521_v31 = vpop.f32.mrb[103].mxu0  ;;  %v7418_v57 = vpop.f32.mrb[213].mxu1  ;;  %v6812_v29 = vmax.f32 %v6516_v55, 0.0 }
 0x6fe   : > { %v6522_v26 = vadd.f32 %v6521_v31, %v12596_v17  ;;  %v7419_v60 = vadd.f32 %v7418_v57, %v13142_v39  ;;  %v7420_v15 = vpop.f32.mrb[214].mxu1  ;;  %8556 = vmatprep.mubr.bf16.mxu0 %v8142_v41  ;;  %v6813_v51 = vmax.f32 %v6518_v32, 0.0 }
 0x6ff   : > { %v6814_v2 = vmax.f32 %v6520_v63, 0.0  ;;  %v7421_v4 = vadd.f32 %v7420_v15, %v13138_v37  ;;  %v7422_v52 = vpop.f32.mrb[215].mxu1  ;;  %8557 = vmatmul.mubr.bf16.gmra.mrb[208].mxu0 %v8141_v12  ;;  %v7929_v11 = vmax.f32 %v7417_v54, 0.0 }
 0x700   : > { %v6815_v36 = vmax.f32 %v6522_v26, 0.0  ;;  %v7423_v0 = vadd.f32 %v7422_v52, %v13142_v39  ;;  %v7930_v27 = vmax.f32 %v7419_v60, 0.0 }
 0x701   : > { %v13448_v18 = vpack.c.bf16 %v6814_v2, %v6812_v29  ;;  %v7931_v44 = vmax.f32 %v7421_v4, 0.0  ;;  %7685 = vmatmul.mubr.bf16.gmra.mrb[64].mxu1 %v13322_v14 }
 0x702   : > { %v7932_v48 = vmax.f32 %v7423_v0, 0.0  ;;  %v6525_v49 = vpop.f32.mrb[104].mxu0  ;;  %7694 = vmatprep.mubr.bf16.mxu1 %v13340_v25  ;;  %v13452_v61 = vpack.c.bf16 %v6815_v36, %v6813_v51 }
 0x703   : > { %v8143_v9 = vpack.c.bf16 %v7931_v44, %v7929_v11  ;;  %v6526_v16 = vadd.f32 %v6525_v49, %v12593_v33  ;;  %v6527_v8 = vpop.f32.mrb[105].mxu0 }
 0x704   : > { %v8144_v34 = vpack.c.bf16 %v7932_v48, %v7930_v27  ;;  %v6528_v43 = vadd.f32 %v6527_v8, %v12596_v17  ;;  %v6529_v24 = vpop.f32.mrb[106].mxu0  ;;  %v7426_v38 = vpop.f32.mrb[216].mxu1 }
 0x705   : > { %v6530_v23 = vadd.f32 %v6529_v24, %v12593_v33  ;;  %v7427_v14 = vadd.f32 %v7426_v38, %v13138_v37  ;;  %v6531_v7 = vpop.f32.mrb[107].mxu0  ;;  %v7428_v47 = vpop.f32.mrb[217].mxu1  ;;  %v6816_v30 = vmax.f32 %v6526_v16, 0.0 }
 0x706   : > { %v6532_v22 = vadd.f32 %v6531_v7, %v12596_v17  ;;  %v7429_v25 = vadd.f32 %v7428_v47, %v13142_v39  ;;  %v7430_v10 = vpop.f32.mrb[218].mxu1  ;;  %8564 = vmatprep.mubr.bf16.mxu0 %v8144_v34  ;;  %v6817_v55 = vmax.f32 %v6528_v43, 0.0 }
 0x707   : > { %v6818_v56 = vmax.f32 %v6530_v23, 0.0  ;;  %v7431_v42 = vadd.f32 %v7430_v10, %v13138_v37  ;;  %v7432_v12 = vpop.f32.mrb[219].mxu1  ;;  %8565 = vmatmul.mubr.bf16.gmra.mrb[212].mxu0 %v8143_v9  ;;  %v7933_v13 = vmax.f32 %v7427_v14, 0.0 }
 0x708   : > { %v6819_v28 = vmax.f32 %v6532_v22, 0.0  ;;  %v7433_v41 = vadd.f32 %v7432_v12, %v13142_v39  ;;  %v7934_v63 = vmax.f32 %v7429_v25, 0.0 }
 0x709   : > { %v13462_v32 = vpack.c.bf16 %v6818_v56, %v6816_v30  ;;  %v7935_v59 = vmax.f32 %v7431_v42, 0.0  ;;  %7695 = vmatmul.mubr.bf16.gmra.mrb[68].mxu1 %v13336_v1 }
 0x70a   : > { %v7936_v54 = vmax.f32 %v7433_v41, 0.0  ;;  %v6535_v31 = vpop.f32.mrb[108].mxu0  ;;  %7704 = vmatprep.mubr.bf16.mxu1 %v13354_v40  ;;  %v13466_v57 = vpack.c.bf16 %v6819_v28, %v6817_v55 }
 0x70b   : > { %v8145_v26 = vpack.c.bf16 %v7935_v59, %v7933_v13  ;;  %v6536_v60 = vadd.f32 %v6535_v31, %v12593_v33  ;;  %v6537_v15 = vpop.f32.mrb[109].mxu0 }
 0x70c   : > { %v8146_v29 = vpack.c.bf16 %v7936_v54, %v7934_v63  ;;  %v6538_v2 = vadd.f32 %v6537_v15, %v12596_v17  ;;  %v6539_v4 = vpop.f32.mrb[110].mxu0  ;;  %v7436_v52 = vpop.f32.mrb[220].mxu1 }
 0x70d   : > { %v6540_v51 = vadd.f32 %v6539_v4, %v12593_v33  ;;  %v7437_v1 = vadd.f32 %v7436_v52, %v13138_v37  ;;  %v6541_v36 = vpop.f32.mrb[111].mxu0  ;;  %v7438_v0 = vpop.f32.mrb[221].mxu1  ;;  %v6820_v27 = vmax.f32 %v6536_v60, 0.0 }
 0x70e   : > { %v6542_v11 = vadd.f32 %v6541_v36, %v12596_v17  ;;  %v7439_v40 = vadd.f32 %v7438_v0, %v13142_v39  ;;  %v7440_v44 = vpop.f32.mrb[222].mxu1  ;;  %8572 = vmatprep.mubr.bf16.mxu0 %v8146_v29  ;;  %v6821_v16 = vmax.f32 %v6538_v2, 0.0 }
 0x70f   : > { %v6822_v48 = vmax.f32 %v6540_v51, 0.0  ;;  %v7441_v49 = vadd.f32 %v7440_v44, %v13138_v37  ;;  %v7442_v9 = vpop.f32.mrb[223].mxu1  ;;  %8573 = vmatmul.mubr.bf16.gmra.mrb[216].mxu0 %v8145_v26  ;;  %v7937_v24 = vmax.f32 %v7437_v1, 0.0 }
 0x710   : > { %v6823_v8 = vmax.f32 %v6542_v11, 0.0  ;;  %v7443_v34 = vadd.f32 %v7442_v9, %v13142_v39  ;;  %v7938_v23 = vmax.f32 %v7439_v40, 0.0 }
 0x711   : > { %v13476_v43 = vpack.c.bf16 %v6822_v48, %v6820_v27  ;;  %v7939_v38 = vmax.f32 %v7441_v49, 0.0  ;;  %7705 = vmatmul.mubr.bf16.gmra.mrb[72].mxu1 %v13350_v6 }
 0x712   : > { %v7940_v14 = vmax.f32 %v7443_v34, 0.0  ;;  %v6545_v7 = vpop.f32.mrb[112].mxu0  ;;  %7714 = vmatprep.mubr.bf16.mxu1 %v13368_v50  ;;  %v13480_v47 = vpack.c.bf16 %v6823_v8, %v6821_v16 }
 0x713   : > { %v8147_v22 = vpack.c.bf16 %v7939_v38, %v7937_v24  ;;  %v6546_v25 = vadd.f32 %v6545_v7, %v12593_v33  ;;  %v6547_v10 = vpop.f32.mrb[113].mxu0 }
 0x714   : > { %v8148_v30 = vpack.c.bf16 %v7940_v14, %v7938_v23  ;;  %v6548_v56 = vadd.f32 %v6547_v10, %v12596_v17  ;;  %v6549_v42 = vpop.f32.mrb[114].mxu0  ;;  %v7446_v12 = vpop.f32.mrb[224].mxu1 }
 0x715   : > { %v6550_v55 = vadd.f32 %v6549_v42, %v12593_v33  ;;  %v7447_v6 = vadd.f32 %v7446_v12, %v13138_v37  ;;  %v6551_v28 = vpop.f32.mrb[115].mxu0  ;;  %v7448_v41 = vpop.f32.mrb[225].mxu1  ;;  %v6824_v63 = vmax.f32 %v6546_v25, 0.0 }
 0x716   : > { %v6552_v13 = vadd.f32 %v6551_v28, %v12596_v17  ;;  %v7449_v50 = vadd.f32 %v7448_v41, %v13142_v39  ;;  %v7450_v59 = vpop.f32.mrb[226].mxu1  ;;  %8580 = vmatprep.mubr.bf16.mxu0 %v8148_v30  ;;  %v6825_v60 = vmax.f32 %v6548_v56, 0.0 }
 0x717   : > { %v6826_v54 = vmax.f32 %v6550_v55, 0.0  ;;  %v7451_v31 = vadd.f32 %v7450_v59, %v13138_v37  ;;  %v7452_v26 = vpop.f32.mrb[227].mxu1  ;;  %8581 = vmatmul.mubr.bf16.gmra.mrb[220].mxu0 %v8147_v22  ;;  %v7941_v4 = vmax.f32 %v7447_v6, 0.0 }
 0x718   : > { %v6827_v15 = vmax.f32 %v6552_v13, 0.0  ;;  %v7453_v29 = vadd.f32 %v7452_v26, %v13142_v39  ;;  %v7942_v51 = vmax.f32 %v7449_v50, 0.0 }
 0x719   : > { %v13490_v2 = vpack.c.bf16 %v6826_v54, %v6824_v63  ;;  %v7943_v52 = vmax.f32 %v7451_v31, 0.0  ;;  %7715 = vmatmul.mubr.bf16.gmra.mrb[76].mxu1 %v13364_v62 }
 0x71a   : > { %v7944_v1 = vmax.f32 %v7453_v29, 0.0  ;;  %v6555_v36 = vpop.f32.mrb[116].mxu0  ;;  %7724 = vmatprep.mubr.bf16.mxu1 %v13382_v5  ;;  %v13494_v0 = vpack.c.bf16 %v6827_v15, %v6825_v60 }
 0x71b   : > { %v8149_v11 = vpack.c.bf16 %v7943_v52, %v7941_v4  ;;  %v6556_v40 = vadd.f32 %v6555_v36, %v12593_v33  ;;  %v6557_v44 = vpop.f32.mrb[117].mxu0 }
 0x71c   : > { %v8150_v27 = vpack.c.bf16 %v7944_v1, %v7942_v51  ;;  %v6558_v48 = vadd.f32 %v6557_v44, %v12596_v17  ;;  %v6559_v49 = vpop.f32.mrb[118].mxu0  ;;  %v7456_v9 = vpop.f32.mrb[228].mxu1 }
 0x71d   : > { %v6560_v16 = vadd.f32 %v6559_v49, %v12593_v33  ;;  %v7457_v62 = vadd.f32 %v7456_v9, %v13138_v37  ;;  %v6561_v8 = vpop.f32.mrb[119].mxu0  ;;  %v7458_v34 = vpop.f32.mrb[229].mxu1  ;;  %v6828_v23 = vmax.f32 %v6556_v40, 0.0 }
 0x71e   : > { %v6562_v24 = vadd.f32 %v6561_v8, %v12596_v17  ;;  %v7459_v5 = vadd.f32 %v7458_v34, %v13142_v39  ;;  %v7460_v38 = vpop.f32.mrb[230].mxu1  ;;  %8588 = vmatprep.mubr.bf16.mxu0 %v8150_v27  ;;  %v6829_v25 = vmax.f32 %v6558_v48, 0.0 }
 0x71f   : > { %v6830_v14 = vmax.f32 %v6560_v16, 0.0  ;;  %v7461_v7 = vadd.f32 %v7460_v38, %v13138_v37  ;;  %v7462_v22 = vpop.f32.mrb[231].mxu1  ;;  %8589 = vmatmul.mubr.bf16.gmra.mrb[224].mxu0 %v8149_v11  ;;  %v7945_v42 = vmax.f32 %v7457_v62, 0.0 }
 0x720   : > { %v6831_v10 = vmax.f32 %v6562_v24, 0.0  ;;  %v7463_v30 = vadd.f32 %v7462_v22, %v13142_v39  ;;  %v7946_v55 = vmax.f32 %v7459_v5, 0.0 }
 0x721   : > { %v13504_v56 = vpack.c.bf16 %v6830_v14, %v6828_v23  ;;  %v7947_v12 = vmax.f32 %v7461_v7, 0.0  ;;  %7725 = vmatmul.mubr.bf16.gmra.mrb[80].mxu1 %v13378_v53 }
 0x722   : > { %v7948_v6 = vmax.f32 %v7463_v30, 0.0  ;;  %v6565_v28 = vpop.f32.mrb[120].mxu0  ;;  %7734 = vmatprep.mubr.bf16.mxu1 %v13396_v45  ;;  %v13508_v41 = vpack.c.bf16 %v6831_v10, %v6829_v25 }
 0x723   : > { %v8151_v13 = vpack.c.bf16 %v7947_v12, %v7945_v42  ;;  %v6566_v50 = vadd.f32 %v6565_v28, %v12593_v33  ;;  %v6567_v59 = vpop.f32.mrb[121].mxu0 }
 0x724   : > { %v8152_v63 = vpack.c.bf16 %v7948_v6, %v7946_v55  ;;  %v6568_v54 = vadd.f32 %v6567_v59, %v12596_v17  ;;  %v6569_v31 = vpop.f32.mrb[122].mxu0  ;;  %v7466_v26 = vpop.f32.mrb[232].mxu1 }
 0x725   : > { %v6570_v60 = vadd.f32 %v6569_v31, %v12593_v33  ;;  %v7467_v53 = vadd.f32 %v7466_v26, %v13138_v37  ;;  %v6571_v15 = vpop.f32.mrb[123].mxu0  ;;  %v7468_v29 = vpop.f32.mrb[233].mxu1  ;;  %v6832_v51 = vmax.f32 %v6566_v50, 0.0 }
 0x726   : > { %v6572_v4 = vadd.f32 %v6571_v15, %v12596_v17  ;;  %v7469_v45 = vadd.f32 %v7468_v29, %v13142_v39  ;;  %v7470_v52 = vpop.f32.mrb[234].mxu1  ;;  %8596 = vmatprep.mubr.bf16.mxu0 %v8152_v63  ;;  %v6833_v40 = vmax.f32 %v6568_v54, 0.0  ;;  %v13532_v63 = vld [vmem:[#allocation2] ss:$0 sm:$0xff] }
 0x727   : > { %v6834_v1 = vmax.f32 %v6570_v60, 0.0  ;;  %v7471_v36 = vadd.f32 %v7470_v52, %v13138_v37  ;;  %v7472_v11 = vpop.f32.mrb[235].mxu1  ;;  %8597 = vmatmul.mubr.bf16.gmra.mrb[228].mxu0 %v8151_v13  ;;  %v7949_v49 = vmax.f32 %v7467_v53, 0.0 }
 0x728   : > { %v6835_v44 = vmax.f32 %v6572_v4, 0.0  ;;  %v7473_v27 = vadd.f32 %v7472_v11, %v13142_v39  ;;  %v7950_v16 = vmax.f32 %v7469_v45, 0.0 }
 0x729   : > { %v13518_v48 = vpack.c.bf16 %v6834_v1, %v6832_v51  ;;  %v7951_v9 = vmax.f32 %v7471_v36, 0.0  ;;  %7735 = vmatmul.mubr.bf16.gmra.mrb[84].mxu1 %v13392_v20 }
 0x72a   : > { %v7952_v62 = vmax.f32 %v7473_v27, 0.0  ;;  %v6575_v8 = vpop.f32.mrb[124].mxu0  ;;  %7744 = vmatprep.mubr.bf16.mxu1 %v13410_v19  ;;  %v13522_v34 = vpack.c.bf16 %v6835_v44, %v6833_v40 }
 0x72b   : > { %v8153_v24 = vpack.c.bf16 %v7951_v9, %v7949_v49  ;;  %v6576_v5 = vadd.f32 %v6575_v8, %v12593_v33  ;;  %v6577_v38 = vpop.f32.mrb[125].mxu0 }
 0x72c   : > { %v8154_v23 = vpack.c.bf16 %v7952_v62, %v7950_v16  ;;  %v6578_v14 = vadd.f32 %v6577_v38, %v12596_v17  ;;  %v6579_v7 = vpop.f32.mrb[126].mxu0  ;;  %v7476_v22 = vpop.f32.mrb[236].mxu1 }
 0x72d   : > { %v6580_v25 = vadd.f32 %v6579_v7, %v12593_v33  ;;  %v7477_v20 = vadd.f32 %v7476_v22, %v13138_v37  ;;  %v6581_v10 = vpop.f32.mrb[127].mxu0  ;;  %v7478_v30 = vpop.f32.mrb[237].mxu1  ;;  %v6836_v55 = vmax.f32 %v6576_v5, 0.0 }
 0x72e   : > { %v6582_v42 = vadd.f32 %v6581_v10, %v12596_v17  ;;  %v7479_v19 = vadd.f32 %v7478_v30, %v13142_v39  ;;  %v7480_v12 = vpop.f32.mrb[238].mxu1  ;;  %8604 = vmatprep.mubr.bf16.mxu0 %v8154_v23  ;;  %v6837_v50 = vmax.f32 %v6578_v14, 0.0 }
 0x72f   : > { %v6838_v6 = vmax.f32 %v6580_v25, 0.0  ;;  %v7481_v28 = vadd.f32 %v7480_v12, %v13138_v37  ;;  %v7482_v13 = vpop.f32.mrb[239].mxu1  ;;  %8605 = vmatmul.mubr.bf16.gmra.mrb[232].mxu0 %v8153_v24  ;;  %v7953_v17 = vmax.f32 %v7477_v20, 0.0 }
 0x730   : > { %v6839_v59 = vmax.f32 %v6582_v42, 0.0  ;;  %v7483_v33 = vadd.f32 %v7482_v13, %v13142_v39  ;;  %v7954_v26 = vmax.f32 %v7479_v19, 0.0 }
 0x731   : > { %v13534_v54 = vpack.c.bf16 %v6838_v6, %v6836_v55  ;;  %v7955_v31 = vmax.f32 %v7481_v28, 0.0  ;;  %7745 = vmatmul.mubr.bf16.gmra.mrb[88].mxu1 %v13406_v35 }
 0x732   : > { %v7956_v60 = vmax.f32 %v7483_v33, 0.0  ;;  %7754 = vmatprep.mubr.bf16.mxu1 %v13424_v3  ;;  %v8398_v53 = vpop.f32.mrb[128].mxu0  ;;  %v13545_v15 = vpack.c.bf16 %v6839_v59, %v6837_v50 }
 0x733   : > { %v8155_v29 = vpack.c.bf16 %v7955_v31, %v7953_v17  ;;  %v8399_v4 = vadd.f32 %v13532_v63, %v8398_v53  ;;  %v8400_v35 = vpop.f32.mrb[129].mxu0 }
 0x734   : > { %v8156_v45 = vpack.c.bf16 %v7956_v60, %v7954_v26  ;;  %v7486_v52 = vpop.f32.mrb[240].mxu1  ;;  %v8401_v51 = vpop.f32.mrb[130].mxu0 }
 0x735   : > { %8910 = vst.msk [vmem:[%s13543_s28] sm:$0xff] %vm8909_vm0, %v8399_v4  ;;  %v7487_v3 = vadd.f32 %v7486_v52, %v13138_v37  ;;  %v8402_v1 = vadd.f32 %v13532_v63, %v8401_v51  ;;  %v7488_v36 = vpop.f32.mrb[241].mxu1  ;;  %v8403_v11 = vpop.f32.mrb[131].mxu0 }
 0x736   : > { %v7489_v40 = vadd.f32 %v7488_v36, %v13142_v39  ;;  %v7490_v44 = vpop.f32.mrb[242].mxu1  ;;  %8612 = vmatprep.mubr.bf16.mxu0 %v8156_v45 }
 0x737   : > { %8911 = vst.msk [vmem:[%s13543_s28 + $0x8] sm:$0xff] %vm8909_vm0, %v8402_v1  ;;  %v7491_v27 = vadd.f32 %v7490_v44, %v13138_v37  ;;  %v7492_v49 = vpop.f32.mrb[243].mxu1  ;;  %8613 = vmatmul.mubr.bf16.gmra.mrb[236].mxu0 %v8155_v29  ;;  %v7957_v16 = vmax.f32 %v7487_v3, 0.0 }
 0x738   : > { %v7493_v9 = vadd.f32 %v7492_v49, %v13142_v39  ;;  %v7958_v8 = vmax.f32 %v7489_v40, 0.0 }
 0x739   : > { %v7959_v62 = vmax.f32 %v7491_v27, 0.0  ;;  %7755 = vmatmul.mubr.bf16.gmra.mrb[92].mxu1 %v13420_v21 }
 0x73a   : > { %v7960_v24 = vmax.f32 %v7493_v9, 0.0  ;;  %7764 = vmatprep.mubr.bf16.mxu1 %v13438_v46  ;;  %v8406_v5 = vpop.f32.mrb[132].mxu0 }
 0x73b   : > { %v8157_v38 = vpack.c.bf16 %v7959_v62, %v7957_v16  ;;  %v8407_v23 = vadd.f32 %v13532_v63, %v8406_v5  ;;  %v8408_v14 = vpop.f32.mrb[133].mxu0 }
 0x73c   : > { %v8158_v7 = vpack.c.bf16 %v7960_v24, %v7958_v8  ;;  %v7496_v22 = vpop.f32.mrb[244].mxu1  ;;  %v8409_v25 = vpop.f32.mrb[134].mxu0 }
 0x73d   : > { %8912 = vst.msk [vmem:[%s13543_s28 + $0x10] sm:$0xff] %vm8909_vm0, %v8407_v23  ;;  %v7497_v20 = vadd.f32 %v7496_v22, %v13138_v37  ;;  %v8410_v10 = vadd.f32 %v13532_v63, %v8409_v25  ;;  %v7498_v21 = vpop.f32.mrb[245].mxu1  ;;  %v8411_v30 = vpop.f32.mrb[135].mxu0 }
 0x73e   : > { %v7499_v42 = vadd.f32 %v7498_v21, %v13142_v39  ;;  %v7500_v46 = vpop.f32.mrb[246].mxu1  ;;  %8620 = vmatprep.mubr.bf16.mxu0 %v8158_v7 }
 0x73f   : > { %8913 = vst.msk [vmem:[%s13543_s28 + $0x18] sm:$0xff] %vm8909_vm0, %v8410_v10  ;;  %v7501_v19 = vadd.f32 %v7500_v46, %v13138_v37  ;;  %v7502_v12 = vpop.f32.mrb[247].mxu1  ;;  %8621 = vmatmul.mubr.bf16.gmra.mrb[240].mxu0 %v8157_v38  ;;  %v7961_v6 = vmax.f32 %v7497_v20, 0.0 }
 0x740   : > { %v7503_v55 = vadd.f32 %v7502_v12, %v13142_v39  ;;  %v7962_v13 = vmax.f32 %v7499_v42, 0.0 }
 0x741   : > { %v7963_v28 = vmax.f32 %v7501_v19, 0.0  ;;  %7765 = vmatmul.mubr.bf16.gmra.mrb[96].mxu1 %v13434_v58 }
 0x742   : > { %v7964_v50 = vmax.f32 %v7503_v55, 0.0  ;;  %7774 = vmatprep.mubr.bf16.mxu1 %v13452_v61  ;;  %v8414_v59 = vpop.f32.mrb[136].mxu0 }
 0x743   : > { %v8159_v33 = vpack.c.bf16 %v7963_v28, %v7961_v6  ;;  %v8415_v17 = vadd.f32 %v13532_v63, %v8414_v59  ;;  %v8416_v31 = vpop.f32.mrb[137].mxu0 }
 0x744   : > { %v8160_v26 = vpack.c.bf16 %v7964_v50, %v7962_v13  ;;  %v7506_v60 = vpop.f32.mrb[248].mxu1  ;;  %v8417_v53 = vpop.f32.mrb[138].mxu0 }
 0x745   : > { %8914 = vst.msk [vmem:[%s13543_s28 + $0x20] sm:$0xff] %vm8909_vm0, %v8415_v17  ;;  %v7507_v29 = vadd.f32 %v7506_v60, %v13138_v37  ;;  %v8418_v4 = vadd.f32 %v13532_v63, %v8417_v53  ;;  %v7508_v58 = vpop.f32.mrb[249].mxu1  ;;  %v8419_v35 = vpop.f32.mrb[139].mxu0 }
 0x746   : > { %v7509_v45 = vadd.f32 %v7508_v58, %v13142_v39  ;;  %v7510_v61 = vpop.f32.mrb[250].mxu1  ;;  %8628 = vmatprep.mubr.bf16.mxu0 %v8160_v26 }
 0x747   : > { %8915 = vst.msk [vmem:[%s13543_s28 + $0x28] sm:$0xff] %vm8909_vm0, %v8418_v4  ;;  %v7511_v52 = vadd.f32 %v7510_v61, %v13138_v37  ;;  %v7512_v51 = vpop.f32.mrb[251].mxu1  ;;  %8629 = vmatmul.mubr.bf16.gmra.mrb[244].mxu0 %v8159_v33  ;;  %v7965_v1 = vmax.f32 %v7507_v29, 0.0 }
 0x748   : > { %v7513_v3 = vadd.f32 %v7512_v51, %v13142_v39  ;;  %v7966_v11 = vmax.f32 %v7509_v45, 0.0 }
 0x749   : > { %v7967_v36 = vmax.f32 %v7511_v52, 0.0  ;;  %7775 = vmatmul.mubr.bf16.gmra.mrb[100].mxu1 %v13448_v18 }
 0x74a   : > { %v7968_v40 = vmax.f32 %v7513_v3, 0.0  ;;  %7784 = vmatprep.mubr.bf16.mxu1 %v13466_v57  ;;  %v8422_v44 = vpop.f32.mrb[140].mxu0 }
 0x74b   : > { %v8161_v27 = vpack.c.bf16 %v7967_v36, %v7965_v1  ;;  %v8423_v49 = vadd.f32 %v13532_v63, %v8422_v44  ;;  %v8424_v9 = vpop.f32.mrb[141].mxu0 }
 0x74c   : > { %v8162_v16 = vpack.c.bf16 %v7968_v40, %v7966_v11  ;;  %v7516_v62 = vpop.f32.mrb[252].mxu1  ;;  %v8425_v8 = vpop.f32.mrb[142].mxu0 }
 0x74d   : > { %8916 = vst.msk [vmem:[%s13543_s28 + $0x30] sm:$0xff] %vm8909_vm0, %v8423_v49  ;;  %v7517_v24 = vadd.f32 %v7516_v62, %v13138_v37  ;;  %v8426_v5 = vadd.f32 %v13532_v63, %v8425_v8  ;;  %v7518_v18 = vpop.f32.mrb[253].mxu1  ;;  %v8427_v38 = vpop.f32.mrb[143].mxu0 }
 0x74e   : > { %v7519_v23 = vadd.f32 %v7518_v18, %v13142_v39  ;;  %v7520_v57 = vpop.f32.mrb[254].mxu1  ;;  %8636 = vmatprep.mubr.bf16.mxu0 %v8162_v16 }
 0x74f   : > { %8917 = vst.msk [vmem:[%s13543_s28 + $0x38] sm:$0xff] %vm8909_vm0, %v8426_v5  ;;  %v7521_v14 = vadd.f32 %v7520_v57, %v13138_v37  ;;  %v7522_v7 = vpop.f32.mrb[255].mxu1  ;;  %8637 = vmatmul.mubr.bf16.gmra.mrb[248].mxu0 %v8161_v27  ;;  %v7969_v25 = vmax.f32 %v7517_v24, 0.0 }
 0x750   : > { %v7523_v22 = vadd.f32 %v7522_v7, %v13142_v39  ;;  %v7970_v10 = vmax.f32 %v7519_v23, 0.0 }
 0x751   : > { %v7971_v20 = vmax.f32 %v7521_v14, 0.0  ;;  %7785 = vmatmul.mubr.bf16.gmra.mrb[104].mxu1 %v13462_v32 }
 0x752   : > { %v7972_v21 = vmax.f32 %v7523_v22, 0.0  ;;  %7794 = vmatprep.mubr.bf16.mxu1 %v13480_v47  ;;  %v8430_v30 = vpop.f32.mrb[144].mxu0 }
 0x753   : > { %v8163_v42 = vpack.c.bf16 %v7971_v20, %v7969_v25  ;;  %v8431_v46 = vadd.f32 %v13532_v63, %v8430_v30  ;;  %v8432_v19 = vpop.f32.mrb[145].mxu0 }
 0x754   : > { %v8164_v12 = vpack.c.bf16 %v7972_v21, %v7970_v10  ;;  %v7526_v55 = vpop.f32.mrb[0].mxu1  ;;  %v8433_v6 = vpop.f32.mrb[146].mxu0 }
 0x755   : > { %8918 = vst.msk [vmem:[%s13543_s28 + $0x40] sm:$0xff] %vm8909_vm0, %v8431_v46  ;;  %v7527_v28 = vadd.f32 %v7526_v55, %v13138_v37  ;;  %v8434_v13 = vadd.f32 %v13532_v63, %v8433_v6  ;;  %v7528_v32 = vpop.f32.mrb[1].mxu1  ;;  %v8435_v50 = vpop.f32.mrb[147].mxu0 }
 0x756   : > { %v7529_v59 = vadd.f32 %v7528_v32, %v13142_v39  ;;  %v7530_v47 = vpop.f32.mrb[2].mxu1  ;;  %8644 = vmatprep.mubr.bf16.mxu0 %v8164_v12 }
 0x757   : > { %8919 = vst.msk [vmem:[%s13543_s28 + $0x48] sm:$0xff] %vm8909_vm0, %v8434_v13  ;;  %v7531_v33 = vadd.f32 %v7530_v47, %v13138_v37  ;;  %v7532_v17 = vpop.f32.mrb[3].mxu1  ;;  %8645 = vmatmul.mubr.bf16.gmra.mrb[252].mxu0 %v8163_v42  ;;  %v7973_v26 = vmax.f32 %v7527_v28, 0.0 }
 0x758   : > { %v7533_v31 = vadd.f32 %v7532_v17, %v13142_v39  ;;  %v7974_v53 = vmax.f32 %v7529_v59, 0.0 }
 0x759   : > { %v7975_v60 = vmax.f32 %v7531_v33, 0.0  ;;  %7795 = vmatmul.mubr.bf16.gmra.mrb[108].mxu1 %v13476_v43 }
 0x75a   : > { %v7976_v29 = vmax.f32 %v7533_v31, 0.0  ;;  %7804 = vmatprep.mubr.bf16.mxu1 %v13494_v0  ;;  %v8438_v4 = vpop.f32.mrb[148].mxu0 }
 0x75b   : > { %v8165_v58 = vpack.c.bf16 %v7975_v60, %v7973_v26  ;;  %v8439_v35 = vadd.f32 %v13532_v63, %v8438_v4  ;;  %v8440_v45 = vpop.f32.mrb[149].mxu0 }
 0x75c   : > { %v8166_v61 = vpack.c.bf16 %v7976_v29, %v7974_v53  ;;  %v7536_v52 = vpop.f32.mrb[4].mxu1  ;;  %v8441_v51 = vpop.f32.mrb[150].mxu0 }
 0x75d   : > { %8920 = vst.msk [vmem:[%s13543_s28 + $0x50] sm:$0xff] %vm8909_vm0, %v8439_v35  ;;  %v7537_v3 = vadd.f32 %v7536_v52, %v13138_v37  ;;  %v8442_v1 = vadd.f32 %v13532_v63, %v8441_v51  ;;  %v7538_v43 = vpop.f32.mrb[5].mxu1  ;;  %v8443_v36 = vpop.f32.mrb[151].mxu0 }
 0x75e   : > { %v7539_v11 = vadd.f32 %v7538_v43, %v13142_v39  ;;  %v7540_v0 = vpop.f32.mrb[6].mxu1  ;;  %8652 = vmatprep.mubr.bf16.mxu0 %v8166_v61 }
 0x75f   : > { %8921 = vst.msk [vmem:[%s13543_s28 + $0x58] sm:$0xff] %vm8909_vm0, %v8442_v1  ;;  %v7541_v40 = vadd.f32 %v7540_v0, %v13138_v37  ;;  %v7542_v44 = vpop.f32.mrb[7].mxu1  ;;  %8653 = vmatmul.mubr.bf16.gmra.mrb[0].mxu0 %v8165_v58  ;;  %v7977_v49 = vmax.f32 %v7537_v3, 0.0 }
 0x760   : > { %v7543_v27 = vadd.f32 %v7542_v44, %v13142_v39  ;;  %v7978_v16 = vmax.f32 %v7539_v11, 0.0 }
 0x761   : > { %v7979_v9 = vmax.f32 %v7541_v40, 0.0  ;;  %7805 = vmatmul.mubr.bf16.gmra.mrb[112].mxu1 %v13490_v2 }
 0x762   : > { %v7980_v62 = vmax.f32 %v7543_v27, 0.0  ;;  %7814 = vmatprep.mubr.bf16.mxu1 %v13508_v41  ;;  %v8446_v8 = vpop.f32.mrb[152].mxu0 }
 0x763   : > { %v8167_v24 = vpack.c.bf16 %v7979_v9, %v7977_v49  ;;  %v8447_v5 = vadd.f32 %v13532_v63, %v8446_v8  ;;  %v8448_v18 = vpop.f32.mrb[153].mxu0 }
 0x764   : > { %v8168_v38 = vpack.c.bf16 %v7980_v62, %v7978_v16  ;;  %v7546_v23 = vpop.f32.mrb[8].mxu1  ;;  %v8449_v57 = vpop.f32.mrb[154].mxu0 }
 0x765   : > { %8922 = vst.msk [vmem:[%s13543_s28 + $0x60] sm:$0xff] %vm8909_vm0, %v8447_v5  ;;  %v7547_v14 = vadd.f32 %v7546_v23, %v13138_v37  ;;  %v8450_v7 = vadd.f32 %v13532_v63, %v8449_v57  ;;  %v7548_v2 = vpop.f32.mrb[9].mxu1  ;;  %v8451_v22 = vpop.f32.mrb[155].mxu0 }
 0x766   : > { %v7549_v25 = vadd.f32 %v7548_v2, %v13142_v39  ;;  %v7550_v41 = vpop.f32.mrb[10].mxu1  ;;  %8660 = vmatprep.mubr.bf16.mxu0 %v8168_v38 }
 0x767   : > { %8923 = vst.msk [vmem:[%s13543_s28 + $0x68] sm:$0xff] %vm8909_vm0, %v8450_v7  ;;  %v7551_v20 = vadd.f32 %v7550_v41, %v13138_v37  ;;  %v7552_v10 = vpop.f32.mrb[11].mxu1  ;;  %8661 = vmatmul.mubr.bf16.gmra.mrb[4].mxu0 %v8167_v24  ;;  %v7981_v30 = vmax.f32 %v7547_v14, 0.0 }
 0x768   : > { %v7553_v21 = vadd.f32 %v7552_v10, %v13142_v39  ;;  %v7982_v46 = vmax.f32 %v7549_v25, 0.0 }
 0x769   : > { %v7983_v42 = vmax.f32 %v7551_v20, 0.0  ;;  %7815 = vmatmul.mubr.bf16.gmra.mrb[116].mxu1 %v13504_v56 }
 0x76a   : > { %v7984_v19 = vmax.f32 %v7553_v21, 0.0  ;;  %7824 = vmatprep.mubr.bf16.mxu1 %v13522_v34  ;;  %v8454_v12 = vpop.f32.mrb[156].mxu0 }
 0x76b   : > { %v8169_v55 = vpack.c.bf16 %v7983_v42, %v7981_v30  ;;  %v8455_v6 = vadd.f32 %v13532_v63, %v8454_v12  ;;  %v8456_v28 = vpop.f32.mrb[157].mxu0 }
 0x76c   : > { %v8170_v13 = vpack.c.bf16 %v7984_v19, %v7982_v46  ;;  %v7556_v32 = vpop.f32.mrb[12].mxu1  ;;  %v8457_v50 = vpop.f32.mrb[158].mxu0 }
 0x76d   : > { %8924 = vst.msk [vmem:[%s13543_s28 + $0x70] sm:$0xff] %vm8909_vm0, %v8455_v6  ;;  %v7557_v59 = vadd.f32 %v7556_v32, %v13138_v37  ;;  %v8458_v47 = vadd.f32 %v13532_v63, %v8457_v50  ;;  %v7558_v56 = vpop.f32.mrb[13].mxu1  ;;  %v8459_v33 = vpop.f32.mrb[159].mxu0 }
 0x76e   : > { %v7559_v17 = vadd.f32 %v7558_v56, %v13142_v39  ;;  %v7560_v34 = vpop.f32.mrb[14].mxu1  ;;  %8668 = vmatprep.mubr.bf16.mxu0 %v8170_v13 }
 0x76f   : > { %8925 = vst.msk [vmem:[%s13543_s28 + $0x78] sm:$0xff] %vm8909_vm0, %v8458_v47  ;;  %v7561_v31 = vadd.f32 %v7560_v34, %v13138_v37  ;;  %v7562_v26 = vpop.f32.mrb[15].mxu1  ;;  %8669 = vmatmul.mubr.bf16.gmra.mrb[8].mxu0 %v8169_v55  ;;  %v7985_v53 = vmax.f32 %v7557_v59, 0.0 }
 0x770   : > { %v7563_v60 = vadd.f32 %v7562_v26, %v13142_v39  ;;  %v7986_v4 = vmax.f32 %v7559_v17, 0.0 }
 0x771   : > { %v7987_v29 = vmax.f32 %v7561_v31, 0.0  ;;  %7825 = vmatmul.mubr.bf16.gmra.mrb[120].mxu1 %v13518_v48 }
 0x772   : > { %v7988_v58 = vmax.f32 %v7563_v60, 0.0  ;;  %7834 = vmatprep.mubr.bf16.mxu1 %v13545_v15  ;;  %v8462_v35 = vpop.f32.mrb[160].mxu0 }
 0x773   : > { %v8171_v45 = vpack.c.bf16 %v7987_v29, %v7985_v53  ;;  %v8463_v61 = vadd.f32 %v13532_v63, %v8462_v35  ;;  %v8464_v52 = vpop.f32.mrb[161].mxu0 }
 0x774   : > { %v8172_v51 = vpack.c.bf16 %v7988_v58, %v7986_v4  ;;  %v7566_v3 = vpop.f32.mrb[16].mxu1  ;;  %v8465_v1 = vpop.f32.mrb[162].mxu0 }
 0x775   : > { %8926 = vst.msk [vmem:[%s13543_s28 + $0x80] sm:$0xff] %vm8909_vm0, %v8463_v61  ;;  %v7567_v43 = vadd.f32 %v7566_v3, %v13138_v37  ;;  %v8466_v36 = vadd.f32 %v13532_v63, %v8465_v1  ;;  %v7568_v48 = vpop.f32.mrb[17].mxu1  ;;  %v8467_v11 = vpop.f32.mrb[163].mxu0 }
 0x776   : > { %v7569_v0 = vadd.f32 %v7568_v48, %v13142_v39  ;;  %v7570_v15 = vpop.f32.mrb[18].mxu1  ;;  %8676 = vmatprep.mubr.bf16.mxu0 %v8172_v51 }
 0x777   : > { %8927 = vst.msk [vmem:[%s13543_s28 + $0x88] sm:$0xff] %vm8909_vm0, %v8466_v36  ;;  %v7571_v40 = vadd.f32 %v7570_v15, %v13138_v37  ;;  %v7572_v44 = vpop.f32.mrb[19].mxu1  ;;  %8677 = vmatmul.mubr.bf16.gmra.mrb[12].mxu0 %v8171_v45  ;;  %v7989_v49 = vmax.f32 %v7567_v43, 0.0 }
 0x778   : > { %v7573_v27 = vadd.f32 %v7572_v44, %v13142_v39  ;;  %v7990_v16 = vmax.f32 %v7569_v0, 0.0 }
 0x779   : > { %v7991_v9 = vmax.f32 %v7571_v40, 0.0  ;;  %7835 = vmatmul.mubr.bf16.gmra.mrb[124].mxu1 %v13534_v54 }
 0x77a   : > { %v7992_v62 = vmax.f32 %v7573_v27, 0.0  ;;  %v8470_v8 = vpop.f32.mrb[164].mxu0 }
 0x77b   : > { %v8173_v24 = vpack.c.bf16 %v7991_v9, %v7989_v49  ;;  %v8471_v5 = vadd.f32 %v13532_v63, %v8470_v8  ;;  %v8472_v18 = vpop.f32.mrb[165].mxu0 }
 0x77c   : > { %v8174_v38 = vpack.c.bf16 %v7992_v62, %v7990_v16  ;;  %v7576_v23 = vpop.f32.mrb[20].mxu1  ;;  %v8473_v57 = vpop.f32.mrb[166].mxu0 }
 0x77d   : > { %8928 = vst.msk [vmem:[%s13543_s28 + $0x90] sm:$0xff] %vm8909_vm0, %v8471_v5  ;;  %v7577_v14 = vadd.f32 %v7576_v23, %v13138_v37  ;;  %v8474_v7 = vadd.f32 %v13532_v63, %v8473_v57  ;;  %v7578_v2 = vpop.f32.mrb[21].mxu1  ;;  %v8475_v22 = vpop.f32.mrb[167].mxu0 }
 0x77e   : > { %v7579_v54 = vadd.f32 %v7578_v2, %v13142_v39  ;;  %v7580_v25 = vpop.f32.mrb[22].mxu1  ;;  %8684 = vmatprep.mubr.bf16.mxu0 %v8174_v38 }
 0x77f   : > { %8929 = vst.msk [vmem:[%s13543_s28 + $0x98] sm:$0xff] %vm8909_vm0, %v8474_v7  ;;  %v7581_v41 = vadd.f32 %v7580_v25, %v13138_v37  ;;  %v7582_v20 = vpop.f32.mrb[23].mxu1  ;;  %8685 = vmatmul.mubr.bf16.gmra.mrb[16].mxu0 %v8173_v24  ;;  %v7993_v21 = vmax.f32 %v7577_v14, 0.0 }
 0x780   : > { %v7583_v10 = vadd.f32 %v7582_v20, %v13142_v39  ;;  %v7994_v42 = vmax.f32 %v7579_v54, 0.0 }
 0x781   : > { %v7995_v30 = vmax.f32 %v7581_v41, 0.0 }
 0x782   : > { %v7996_v46 = vmax.f32 %v7583_v10, 0.0  ;;  %v8478_v19 = vpop.f32.mrb[168].mxu0 }
 0x783   : > { %v8175_v12 = vpack.c.bf16 %v7995_v30, %v7993_v21  ;;  %v8479_v55 = vadd.f32 %v13532_v63, %v8478_v19  ;;  %v8480_v6 = vpop.f32.mrb[169].mxu0 }
 0x784   : > { %v8176_v28 = vpack.c.bf16 %v7996_v46, %v7994_v42  ;;  %v7586_v13 = vpop.f32.mrb[24].mxu1  ;;  %v8481_v32 = vpop.f32.mrb[170].mxu0 }
 0x785   : > { %8930 = vst.msk [vmem:[%s13543_s28 + $0xa0] sm:$0xff] %vm8909_vm0, %v8479_v55  ;;  %v7587_v50 = vadd.f32 %v7586_v13, %v13138_v37  ;;  %v8482_v59 = vadd.f32 %v13532_v63, %v8481_v32  ;;  %v7588_v47 = vpop.f32.mrb[25].mxu1  ;;  %v8483_v56 = vpop.f32.mrb[171].mxu0 }
 0x786   : > { %v7589_v33 = vadd.f32 %v7588_v47, %v13142_v39  ;;  %v7590_v17 = vpop.f32.mrb[26].mxu1  ;;  %8692 = vmatprep.mubr.bf16.mxu0 %v8176_v28 }
 0x787   : > { %8931 = vst.msk [vmem:[%s13543_s28 + $0xa8] sm:$0xff] %vm8909_vm0, %v8482_v59  ;;  %v7591_v34 = vadd.f32 %v7590_v17, %v13138_v37  ;;  %v7592_v31 = vpop.f32.mrb[27].mxu1  ;;  %8693 = vmatmul.mubr.bf16.gmra.mrb[20].mxu0 %v8175_v12  ;;  %v7997_v60 = vmax.f32 %v7587_v50, 0.0 }
 0x788   : > { %v7593_v26 = vadd.f32 %v7592_v31, %v13142_v39  ;;  %v7998_v29 = vmax.f32 %v7589_v33, 0.0 }
 0x789   : > { %v7999_v53 = vmax.f32 %v7591_v34, 0.0 }
 0x78a   : > { %v8000_v4 = vmax.f32 %v7593_v26, 0.0  ;;  %v8486_v58 = vpop.f32.mrb[172].mxu0 }
 0x78b   : > { %v8177_v35 = vpack.c.bf16 %v7999_v53, %v7997_v60  ;;  %v8487_v45 = vadd.f32 %v13532_v63, %v8486_v58  ;;  %v8488_v61 = vpop.f32.mrb[173].mxu0 }
 0x78c   : > { %v8178_v52 = vpack.c.bf16 %v8000_v4, %v7998_v29  ;;  %v7596_v51 = vpop.f32.mrb[28].mxu1  ;;  %v8489_v3 = vpop.f32.mrb[174].mxu0 }
 0x78d   : > { %8932 = vst.msk [vmem:[%s13543_s28 + $0xb0] sm:$0xff] %vm8909_vm0, %v8487_v45  ;;  %v7597_v1 = vadd.f32 %v7596_v51, %v13138_v37  ;;  %v8490_v43 = vadd.f32 %v13532_v63, %v8489_v3  ;;  %v7598_v36 = vpop.f32.mrb[29].mxu1  ;;  %v8491_v48 = vpop.f32.mrb[175].mxu0 }
 0x78e   : > { %v7599_v11 = vadd.f32 %v7598_v36, %v13142_v39  ;;  %v7600_v0 = vpop.f32.mrb[30].mxu1  ;;  %8700 = vmatprep.mubr.bf16.mxu0 %v8178_v52 }
 0x78f   : > { %8933 = vst.msk [vmem:[%s13543_s28 + $0xb8] sm:$0xff] %vm8909_vm0, %v8490_v43  ;;  %v7601_v15 = vadd.f32 %v7600_v0, %v13138_v37  ;;  %v7602_v40 = vpop.f32.mrb[31].mxu1  ;;  %8701 = vmatmul.mubr.bf16.gmra.mrb[24].mxu0 %v8177_v35  ;;  %v8001_v27 = vmax.f32 %v7597_v1, 0.0 }
 0x790   : > { %v7603_v44 = vadd.f32 %v7602_v40, %v13142_v39  ;;  %v8002_v9 = vmax.f32 %v7599_v11, 0.0 }
 0x791   : > { %v8003_v49 = vmax.f32 %v7601_v15, 0.0 }
 0x792   : > { %v8004_v16 = vmax.f32 %v7603_v44, 0.0  ;;  %v8494_v62 = vpop.f32.mrb[176].mxu0 }
 0x793   : > { %v8179_v8 = vpack.c.bf16 %v8003_v49, %v8001_v27  ;;  %v8495_v24 = vadd.f32 %v13532_v63, %v8494_v62  ;;  %v8496_v5 = vpop.f32.mrb[177].mxu0 }
 0x794   : > { %v8180_v18 = vpack.c.bf16 %v8004_v16, %v8002_v9  ;;  %v7606_v38 = vpop.f32.mrb[32].mxu1  ;;  %v8497_v23 = vpop.f32.mrb[178].mxu0 }
 0x795   : > { %8934 = vst.msk [vmem:[%s13543_s28 + $0xc0] sm:$0xff] %vm8909_vm0, %v8495_v24  ;;  %v7607_v57 = vadd.f32 %v7606_v38, %v13138_v37  ;;  %v8498_v14 = vadd.f32 %v13532_v63, %v8497_v23  ;;  %v7608_v7 = vpop.f32.mrb[33].mxu1  ;;  %v8499_v2 = vpop.f32.mrb[179].mxu0 }
 0x796   : > { %v7609_v22 = vadd.f32 %v7608_v7, %v13142_v39  ;;  %v7610_v54 = vpop.f32.mrb[34].mxu1  ;;  %8708 = vmatprep.mubr.bf16.mxu0 %v8180_v18 }
 0x797   : > { %8935 = vst.msk [vmem:[%s13543_s28 + $0xc8] sm:$0xff] %vm8909_vm0, %v8498_v14  ;;  %v7611_v25 = vadd.f32 %v7610_v54, %v13138_v37  ;;  %v7612_v41 = vpop.f32.mrb[35].mxu1  ;;  %8709 = vmatmul.mubr.bf16.gmra.mrb[28].mxu0 %v8179_v8  ;;  %v8005_v10 = vmax.f32 %v7607_v57, 0.0 }
 0x798   : > { %v7613_v20 = vadd.f32 %v7612_v41, %v13142_v39  ;;  %v8006_v30 = vmax.f32 %v7609_v22, 0.0 }
 0x799   : > { %v8007_v21 = vmax.f32 %v7611_v25, 0.0 }
 0x79a   : > { %v8008_v42 = vmax.f32 %v7613_v20, 0.0  ;;  %v8502_v46 = vpop.f32.mrb[180].mxu0 }
 0x79b   : > { %v8181_v19 = vpack.c.bf16 %v8007_v21, %v8005_v10  ;;  %v8503_v12 = vadd.f32 %v13532_v63, %v8502_v46  ;;  %v8504_v55 = vpop.f32.mrb[181].mxu0 }
 0x79c   : > { %v8182_v6 = vpack.c.bf16 %v8008_v42, %v8006_v30  ;;  %v7616_v28 = vpop.f32.mrb[36].mxu1  ;;  %v8505_v13 = vpop.f32.mrb[182].mxu0 }
 0x79d   : > { %8936 = vst.msk [vmem:[%s13543_s28 + $0xd0] sm:$0xff] %vm8909_vm0, %v8503_v12  ;;  %v7617_v32 = vadd.f32 %v7616_v28, %v13138_v37  ;;  %v8506_v50 = vadd.f32 %v13532_v63, %v8505_v13  ;;  %v7618_v59 = vpop.f32.mrb[37].mxu1  ;;  %v8507_v47 = vpop.f32.mrb[183].mxu0 }
 0x79e   : > { %v7619_v56 = vadd.f32 %v7618_v59, %v13142_v39  ;;  %v7620_v33 = vpop.f32.mrb[38].mxu1  ;;  %8716 = vmatprep.mubr.bf16.mxu0 %v8182_v6 }
 0x79f   : > { %8937 = vst.msk [vmem:[%s13543_s28 + $0xd8] sm:$0xff] %vm8909_vm0, %v8506_v50  ;;  %v7621_v17 = vadd.f32 %v7620_v33, %v13138_v37  ;;  %v7622_v34 = vpop.f32.mrb[39].mxu1  ;;  %8717 = vmatmul.mubr.bf16.gmra.mrb[32].mxu0 %v8181_v19  ;;  %v8009_v26 = vmax.f32 %v7617_v32, 0.0 }
 0x7a0   : > { %v7623_v31 = vadd.f32 %v7622_v34, %v13142_v39  ;;  %v8010_v53 = vmax.f32 %v7619_v56, 0.0 }
 0x7a1   : > { %v8011_v60 = vmax.f32 %v7621_v17, 0.0 }
 0x7a2   : > { %v8012_v29 = vmax.f32 %v7623_v31, 0.0  ;;  %v8510_v4 = vpop.f32.mrb[184].mxu0 }
 0x7a3   : > { %v8183_v58 = vpack.c.bf16 %v8011_v60, %v8009_v26  ;;  %v8511_v35 = vadd.f32 %v13532_v63, %v8510_v4  ;;  %v8512_v45 = vpop.f32.mrb[185].mxu0 }
 0x7a4   : > { %v8184_v61 = vpack.c.bf16 %v8012_v29, %v8010_v53  ;;  %v7626_v52 = vpop.f32.mrb[40].mxu1  ;;  %v8513_v51 = vpop.f32.mrb[186].mxu0 }
 0x7a5   : > { %8938 = vst.msk [vmem:[%s13543_s28 + $0xe0] sm:$0xff] %vm8909_vm0, %v8511_v35  ;;  %v7627_v3 = vadd.f32 %v7626_v52, %v13138_v37  ;;  %v8514_v1 = vadd.f32 %v13532_v63, %v8513_v51  ;;  %v7628_v43 = vpop.f32.mrb[41].mxu1  ;;  %v8515_v36 = vpop.f32.mrb[187].mxu0 }
 0x7a6   : > { %v7629_v48 = vadd.f32 %v7628_v43, %v13142_v39  ;;  %v7630_v11 = vpop.f32.mrb[42].mxu1  ;;  %8724 = vmatprep.mubr.bf16.mxu0 %v8184_v61 }
 0x7a7   : > { %8939 = vst.msk [vmem:[%s13543_s28 + $0xe8] sm:$0xff] %vm8909_vm0, %v8514_v1  ;;  %v7631_v0 = vadd.f32 %v7630_v11, %v13138_v37  ;;  %v7632_v15 = vpop.f32.mrb[43].mxu1  ;;  %8725 = vmatmul.mubr.bf16.gmra.mrb[36].mxu0 %v8183_v58  ;;  %v8013_v44 = vmax.f32 %v7627_v3, 0.0 }
 0x7a8   : > { %v7633_v40 = vadd.f32 %v7632_v15, %v13142_v39  ;;  %v8014_v49 = vmax.f32 %v7629_v48, 0.0 }
 0x7a9   : > { %v8015_v27 = vmax.f32 %v7631_v0, 0.0 }
 0x7aa   : > { %v8016_v9 = vmax.f32 %v7633_v40, 0.0  ;;  %v8518_v16 = vpop.f32.mrb[188].mxu0 }
 0x7ab   : > { %v8185_v62 = vpack.c.bf16 %v8015_v27, %v8013_v44  ;;  %v8519_v8 = vadd.f32 %v13532_v63, %v8518_v16  ;;  %v8520_v24 = vpop.f32.mrb[189].mxu0 }
 0x7ac   : > { %v8186_v5 = vpack.c.bf16 %v8016_v9, %v8014_v49  ;;  %v7636_v18 = vpop.f32.mrb[44].mxu1  ;;  %v8521_v38 = vpop.f32.mrb[190].mxu0 }
 0x7ad   : > { %8940 = vst.msk [vmem:[%s13543_s28 + $0xf0] sm:$0xff] %vm8909_vm0, %v8519_v8  ;;  %v7637_v23 = vadd.f32 %v7636_v18, %v13138_v37  ;;  %v8522_v57 = vadd.f32 %v13532_v63, %v8521_v38  ;;  %v7638_v14 = vpop.f32.mrb[45].mxu1  ;;  %v8523_v7 = vpop.f32.mrb[191].mxu0 }
 0x7ae   : > { %v7639_v2 = vadd.f32 %v7638_v14, %v13142_v39  ;;  %v7640_v22 = vpop.f32.mrb[46].mxu1  ;;  %8732 = vmatprep.mubr.bf16.mxu0 %v8186_v5 }
 0x7af   : > { %8941 = vst.msk [vmem:[%s13543_s28 + $0xf8] sm:$0xff] %vm8909_vm0, %v8522_v57  ;;  %v7641_v54 = vadd.f32 %v7640_v22, %v13138_v37  ;;  %v7642_v25 = vpop.f32.mrb[47].mxu1  ;;  %8733 = vmatmul.mubr.bf16.gmra.mrb[40].mxu0 %v8185_v62  ;;  %v8017_v20 = vmax.f32 %v7637_v23, 0.0 }
 0x7b0   : > { %v7643_v41 = vadd.f32 %v7642_v25, %v13142_v39  ;;  %v8018_v21 = vmax.f32 %v7639_v2, 0.0 }
 0x7b1   : > { %v8019_v10 = vmax.f32 %v7641_v54, 0.0 }
 0x7b2   : > { %v8020_v30 = vmax.f32 %v7643_v41, 0.0  ;;  %v8526_v42 = vpop.f32.mrb[192].mxu0 }
 0x7b3   : > { %v8187_v46 = vpack.c.bf16 %v8019_v10, %v8017_v20  ;;  %v8527_v19 = vadd.f32 %v13532_v63, %v8526_v42  ;;  %v8528_v12 = vpop.f32.mrb[193].mxu0 }
 0x7b4   : > { %v8188_v55 = vpack.c.bf16 %v8020_v30, %v8018_v21  ;;  %v7646_v6 = vpop.f32.mrb[48].mxu1  ;;  %v8529_v28 = vpop.f32.mrb[194].mxu0 }
 0x7b5   : > { %8942 = vst.msk [vmem:[%s13543_s28 + $0x100] sm:$0xff] %vm8909_vm0, %v8527_v19  ;;  %v7647_v13 = vadd.f32 %v7646_v6, %v13138_v37  ;;  %v8530_v32 = vadd.f32 %v13532_v63, %v8529_v28  ;;  %v7648_v50 = vpop.f32.mrb[49].mxu1  ;;  %v8531_v59 = vpop.f32.mrb[195].mxu0 }
 0x7b6   : > { %v7649_v47 = vadd.f32 %v7648_v50, %v13142_v39  ;;  %v7650_v56 = vpop.f32.mrb[50].mxu1  ;;  %8740 = vmatprep.mubr.bf16.mxu0 %v8188_v55 }
 0x7b7   : > { %8943 = vst.msk [vmem:[%s13543_s28 + $0x108] sm:$0xff] %vm8909_vm0, %v8530_v32  ;;  %v7651_v33 = vadd.f32 %v7650_v56, %v13138_v37  ;;  %v7652_v17 = vpop.f32.mrb[51].mxu1  ;;  %8741 = vmatmul.mubr.bf16.gmra.mrb[44].mxu0 %v8187_v46  ;;  %v8021_v31 = vmax.f32 %v7647_v13, 0.0 }
 0x7b8   : > { %v7653_v34 = vadd.f32 %v7652_v17, %v13142_v39  ;;  %v8022_v60 = vmax.f32 %v7649_v47, 0.0 }
 0x7b9   : > { %v8023_v26 = vmax.f32 %v7651_v33, 0.0 }
 0x7ba   : > { %v8024_v53 = vmax.f32 %v7653_v34, 0.0  ;;  %v8534_v29 = vpop.f32.mrb[196].mxu0 }
 0x7bb   : > { %v8189_v4 = vpack.c.bf16 %v8023_v26, %v8021_v31  ;;  %v8535_v58 = vadd.f32 %v13532_v63, %v8534_v29  ;;  %v8536_v35 = vpop.f32.mrb[197].mxu0 }
 0x7bc   : > { %v8190_v45 = vpack.c.bf16 %v8024_v53, %v8022_v60  ;;  %v7656_v61 = vpop.f32.mrb[52].mxu1  ;;  %v8537_v52 = vpop.f32.mrb[198].mxu0 }
 0x7bd   : > { %8944 = vst.msk [vmem:[%s13543_s28 + $0x110] sm:$0xff] %vm8909_vm0, %v8535_v58  ;;  %v7657_v51 = vadd.f32 %v7656_v61, %v13138_v37  ;;  %v8538_v3 = vadd.f32 %v13532_v63, %v8537_v52  ;;  %v7658_v1 = vpop.f32.mrb[53].mxu1  ;;  %v8539_v43 = vpop.f32.mrb[199].mxu0 }
 0x7be   : > { %v7659_v36 = vadd.f32 %v7658_v1, %v13142_v39  ;;  %v7660_v48 = vpop.f32.mrb[54].mxu1  ;;  %8748 = vmatprep.mubr.bf16.mxu0 %v8190_v45 }
 0x7bf   : > { %8945 = vst.msk [vmem:[%s13543_s28 + $0x118] sm:$0xff] %vm8909_vm0, %v8538_v3  ;;  %v7661_v11 = vadd.f32 %v7660_v48, %v13138_v37  ;;  %v7662_v0 = vpop.f32.mrb[55].mxu1  ;;  %8749 = vmatmul.mubr.bf16.gmra.mrb[48].mxu0 %v8189_v4  ;;  %v8025_v40 = vmax.f32 %v7657_v51, 0.0  ;;  %v13768_v51 = vld [vmem:[#allocation2] ss:$0 sm:$0xff] }
 0x7c0   : > { %v7663_v15 = vadd.f32 %v7662_v0, %v13142_v39  ;;  %v8026_v27 = vmax.f32 %v7659_v36, 0.0 }
 0x7c1   : > { %v8027_v44 = vmax.f32 %v7661_v11, 0.0 }
 0x7c2   : > { %v8028_v49 = vmax.f32 %v7663_v15, 0.0  ;;  %v8542_v9 = vpop.f32.mrb[200].mxu0 }
 0x7c3   : > { %v8191_v16 = vpack.c.bf16 %v8027_v44, %v8025_v40  ;;  %v8543_v62 = vadd.f32 %v13532_v63, %v8542_v9  ;;  %v8544_v8 = vpop.f32.mrb[201].mxu0 }
 0x7c4   : > { %v8192_v24 = vpack.c.bf16 %v8028_v49, %v8026_v27  ;;  %v7666_v5 = vpop.f32.mrb[56].mxu1  ;;  %v8545_v18 = vpop.f32.mrb[202].mxu0 }
 0x7c5   : > { %8946 = vst.msk [vmem:[%s13543_s28 + $0x120] sm:$0xff] %vm8909_vm0, %v8543_v62  ;;  %v7667_v38 = vadd.f32 %v7666_v5, %v13138_v37  ;;  %v8546_v23 = vadd.f32 %v13532_v63, %v8545_v18  ;;  %v7668_v57 = vpop.f32.mrb[57].mxu1  ;;  %v8547_v14 = vpop.f32.mrb[203].mxu0 }
 0x7c6   : > { %v7669_v7 = vadd.f32 %v7668_v57, %v13142_v39  ;;  %v7670_v2 = vpop.f32.mrb[58].mxu1  ;;  %8756 = vmatprep.mubr.bf16.mxu0 %v8192_v24 }
 0x7c7   : > { %8947 = vst.msk [vmem:[%s13543_s28 + $0x128] sm:$0xff] %vm8909_vm0, %v8546_v23  ;;  %v7671_v22 = vadd.f32 %v7670_v2, %v13138_v37  ;;  %v7672_v54 = vpop.f32.mrb[59].mxu1  ;;  %8757 = vmatmul.mubr.bf16.gmra.mrb[52].mxu0 %v8191_v16  ;;  %v8029_v41 = vmax.f32 %v7667_v38, 0.0 }
 0x7c8   : > { %v7673_v25 = vadd.f32 %v7672_v54, %v13142_v39  ;;  %v8030_v10 = vmax.f32 %v7669_v7, 0.0 }
 0x7c9   : > { %v8031_v20 = vmax.f32 %v7671_v22, 0.0 }
 0x7ca   : > { %v8032_v21 = vmax.f32 %v7673_v25, 0.0  ;;  %v8550_v30 = vpop.f32.mrb[204].mxu0 }
 0x7cb   : > { %v8193_v42 = vpack.c.bf16 %v8031_v20, %v8029_v41  ;;  %v8551_v46 = vadd.f32 %v13532_v63, %v8550_v30  ;;  %v8552_v19 = vpop.f32.mrb[205].mxu0 }
 0x7cc   : > { %v8194_v12 = vpack.c.bf16 %v8032_v21, %v8030_v10  ;;  %v7676_v55 = vpop.f32.mrb[60].mxu1  ;;  %v8553_v6 = vpop.f32.mrb[206].mxu0 }
 0x7cd   : > { %8948 = vst.msk [vmem:[%s13543_s28 + $0x130] sm:$0xff] %vm8909_vm0, %v8551_v46  ;;  %v7677_v28 = vadd.f32 %v7676_v55, %v13138_v37  ;;  %v8554_v13 = vadd.f32 %v13532_v63, %v8553_v6  ;;  %v7678_v32 = vpop.f32.mrb[61].mxu1  ;;  %v8555_v50 = vpop.f32.mrb[207].mxu0 }
 0x7ce   : > { %v7679_v59 = vadd.f32 %v7678_v32, %v13142_v39  ;;  %v7680_v47 = vpop.f32.mrb[62].mxu1  ;;  %8764 = vmatprep.mubr.bf16.mxu0 %v8194_v12 }
 0x7cf   : > { %8949 = vst.msk [vmem:[%s13543_s28 + $0x138] sm:$0xff] %vm8909_vm0, %v8554_v13  ;;  %v7681_v56 = vadd.f32 %v7680_v47, %v13138_v37  ;;  %v7682_v33 = vpop.f32.mrb[63].mxu1  ;;  %8765 = vmatmul.mubr.bf16.gmra.mrb[56].mxu0 %v8193_v42  ;;  %v8033_v34 = vmax.f32 %v7677_v28, 0.0 }
 0x7d0   : > { %v7683_v17 = vadd.f32 %v7682_v33, %v13142_v39  ;;  %v8034_v26 = vmax.f32 %v7679_v59, 0.0 }
 0x7d1   : > { %v8035_v31 = vmax.f32 %v7681_v56, 0.0 }
 0x7d2   : > { %v8036_v60 = vmax.f32 %v7683_v17, 0.0  ;;  %v8558_v53 = vpop.f32.mrb[208].mxu0 }
 0x7d3   : > { %v8195_v29 = vpack.c.bf16 %v8035_v31, %v8033_v34  ;;  %v8559_v4 = vadd.f32 %v13532_v63, %v8558_v53  ;;  %v8560_v58 = vpop.f32.mrb[209].mxu0 }
 0x7d4   : > { %v8196_v35 = vpack.c.bf16 %v8036_v60, %v8034_v26  ;;  %v7686_v45 = vpop.f32.mrb[64].mxu1  ;;  %v8561_v61 = vpop.f32.mrb[210].mxu0 }
 0x7d5   : > { %8950 = vst.msk [vmem:[%s13543_s28 + $0x140] sm:$0xff] %vm8909_vm0, %v8559_v4  ;;  %v7687_v52 = vadd.f32 %v7686_v45, %v13138_v37  ;;  %v8562_v3 = vadd.f32 %v13768_v51, %v8561_v61  ;;  %v7688_v1 = vpop.f32.mrb[65].mxu1  ;;  %v8563_v43 = vpop.f32.mrb[211].mxu0 }
 0x7d6   : > { %v7689_v36 = vadd.f32 %v7688_v1, %v13142_v39  ;;  %v7690_v48 = vpop.f32.mrb[66].mxu1  ;;  %8772 = vmatprep.mubr.bf16.mxu0 %v8196_v35 }
 0x7d7   : > { %8951 = vst.msk [vmem:[%s13543_s28 + $0x148] sm:$0xff] %vm8909_vm0, %v8562_v3  ;;  %v7691_v63 = vadd.f32 %v7690_v48, %v13138_v37  ;;  %v7692_v11 = vpop.f32.mrb[67].mxu1  ;;  %8773 = vmatmul.mubr.bf16.gmra.mrb[60].mxu0 %v8195_v29  ;;  %v8037_v15 = vmax.f32 %v7687_v52, 0.0 }
 0x7d8   : > { %v7693_v0 = vadd.f32 %v7692_v11, %v13142_v39  ;;  %v8038_v44 = vmax.f32 %v7689_v36, 0.0 }
 0x7d9   : > { %v8039_v40 = vmax.f32 %v7691_v63, 0.0 }
 0x7da   : > { %v8040_v27 = vmax.f32 %v7693_v0, 0.0  ;;  %v8566_v49 = vpop.f32.mrb[212].mxu0 }
 0x7db   : > { %v8197_v9 = vpack.c.bf16 %v8039_v40, %v8037_v15  ;;  %v8567_v16 = vadd.f32 %v13768_v51, %v8566_v49  ;;  %v8568_v62 = vpop.f32.mrb[213].mxu0 }
 0x7dc   : > { %v8198_v8 = vpack.c.bf16 %v8040_v27, %v8038_v44  ;;  %v7696_v24 = vpop.f32.mrb[68].mxu1  ;;  %v8569_v5 = vpop.f32.mrb[214].mxu0 }
 0x7dd   : > { %8952 = vst.msk [vmem:[%s13543_s28 + $0x150] sm:$0xff] %vm8909_vm0, %v8567_v16  ;;  %v7697_v18 = vadd.f32 %v7696_v24, %v13138_v37  ;;  %v8570_v38 = vadd.f32 %v13768_v51, %v8569_v5  ;;  %v7698_v23 = vpop.f32.mrb[69].mxu1  ;;  %v8571_v57 = vpop.f32.mrb[215].mxu0 }
 0x7de   : > { %v7699_v14 = vadd.f32 %v7698_v23, %v13142_v39  ;;  %v7700_v7 = vpop.f32.mrb[70].mxu1  ;;  %8780 = vmatprep.mubr.bf16.mxu0 %v8198_v8 }
 0x7df   : > { %8953 = vst.msk [vmem:[%s13543_s28 + $0x158] sm:$0xff] %vm8909_vm0, %v8570_v38  ;;  %v7701_v2 = vadd.f32 %v7700_v7, %v13138_v37  ;;  %v7702_v22 = vpop.f32.mrb[71].mxu1  ;;  %8781 = vmatmul.mubr.bf16.gmra.mrb[64].mxu0 %v8197_v9  ;;  %v8041_v25 = vmax.f32 %v7697_v18, 0.0 }
 0x7e0   : > { %v7703_v54 = vadd.f32 %v7702_v22, %v13142_v39  ;;  %v8042_v20 = vmax.f32 %v7699_v14, 0.0 }
 0x7e1   : > { %v8043_v41 = vmax.f32 %v7701_v2, 0.0 }
 0x7e2   : > { %v8044_v10 = vmax.f32 %v7703_v54, 0.0  ;;  %v8574_v21 = vpop.f32.mrb[216].mxu0 }
 0x7e3   : > { %v8199_v30 = vpack.c.bf16 %v8043_v41, %v8041_v25  ;;  %v8575_v42 = vadd.f32 %v13768_v51, %v8574_v21  ;;  %v8576_v46 = vpop.f32.mrb[217].mxu0 }
 0x7e4   : > { %v8200_v19 = vpack.c.bf16 %v8044_v10, %v8042_v20  ;;  %v7706_v12 = vpop.f32.mrb[72].mxu1  ;;  %v8577_v55 = vpop.f32.mrb[218].mxu0 }
 0x7e5   : > { %8954 = vst.msk [vmem:[%s13543_s28 + $0x160] sm:$0xff] %vm8909_vm0, %v8575_v42  ;;  %v7707_v6 = vadd.f32 %v7706_v12, %v13138_v37  ;;  %v8578_v28 = vadd.f32 %v13768_v51, %v8577_v55  ;;  %v7708_v13 = vpop.f32.mrb[73].mxu1  ;;  %v8579_v32 = vpop.f32.mrb[219].mxu0 }
 0x7e6   : > { %v7709_v50 = vadd.f32 %v7708_v13, %v13142_v39  ;;  %v7710_v59 = vpop.f32.mrb[74].mxu1  ;;  %8788 = vmatprep.mubr.bf16.mxu0 %v8200_v19 }
 0x7e7   : > { %8955 = vst.msk [vmem:[%s13543_s28 + $0x168] sm:$0xff] %vm8909_vm0, %v8578_v28  ;;  %v7711_v47 = vadd.f32 %v7710_v59, %v13138_v37  ;;  %v7712_v56 = vpop.f32.mrb[75].mxu1  ;;  %8789 = vmatmul.mubr.bf16.gmra.mrb[68].mxu0 %v8199_v30  ;;  %v8045_v17 = vmax.f32 %v7707_v6, 0.0 }
 0x7e8   : > { %v7713_v33 = vadd.f32 %v7712_v56, %v13142_v39  ;;  %v8046_v31 = vmax.f32 %v7709_v50, 0.0 }
 0x7e9   : > { %v8047_v34 = vmax.f32 %v7711_v47, 0.0 }
 0x7ea   : > { %v8048_v26 = vmax.f32 %v7713_v33, 0.0  ;;  %v8582_v60 = vpop.f32.mrb[220].mxu0 }
 0x7eb   : > { %v8201_v53 = vpack.c.bf16 %v8047_v34, %v8045_v17  ;;  %v8583_v29 = vadd.f32 %v13768_v51, %v8582_v60  ;;  %v8584_v4 = vpop.f32.mrb[221].mxu0 }
 0x7ec   : > { %v8202_v58 = vpack.c.bf16 %v8048_v26, %v8046_v31  ;;  %v7716_v35 = vpop.f32.mrb[76].mxu1  ;;  %v8585_v45 = vpop.f32.mrb[222].mxu0 }
 0x7ed   : > { %8956 = vst.msk [vmem:[%s13543_s28 + $0x170] sm:$0xff] %vm8909_vm0, %v8583_v29  ;;  %v7717_v61 = vadd.f32 %v7716_v35, %v13138_v37  ;;  %v8586_v52 = vadd.f32 %v13768_v51, %v8585_v45  ;;  %v7718_v3 = vpop.f32.mrb[77].mxu1  ;;  %v8587_v1 = vpop.f32.mrb[223].mxu0 }
 0x7ee   : > { %v7719_v43 = vadd.f32 %v7718_v3, %v13142_v39  ;;  %v7720_v36 = vpop.f32.mrb[78].mxu1  ;;  %8796 = vmatprep.mubr.bf16.mxu0 %v8202_v58 }
 0x7ef   : > { %8957 = vst.msk [vmem:[%s13543_s28 + $0x178] sm:$0xff] %vm8909_vm0, %v8586_v52  ;;  %v7721_v48 = vadd.f32 %v7720_v36, %v13138_v37  ;;  %v7722_v63 = vpop.f32.mrb[79].mxu1  ;;  %8797 = vmatmul.mubr.bf16.gmra.mrb[72].mxu0 %v8201_v53  ;;  %v8049_v0 = vmax.f32 %v7717_v61, 0.0 }
 0x7f0   : > { %v7723_v11 = vadd.f32 %v7722_v63, %v13142_v39  ;;  %v8050_v40 = vmax.f32 %v7719_v43, 0.0 }
 0x7f1   : > { %v8051_v15 = vmax.f32 %v7721_v48, 0.0 }
 0x7f2   : > { %v8052_v44 = vmax.f32 %v7723_v11, 0.0  ;;  %v8590_v27 = vpop.f32.mrb[224].mxu0 }
 0x7f3   : > { %v8203_v49 = vpack.c.bf16 %v8051_v15, %v8049_v0  ;;  %v8591_v9 = vadd.f32 %v13768_v51, %v8590_v27  ;;  %v8592_v16 = vpop.f32.mrb[225].mxu0 }
 0x7f4   : > { %v8204_v62 = vpack.c.bf16 %v8052_v44, %v8050_v40  ;;  %v7726_v8 = vpop.f32.mrb[80].mxu1  ;;  %v8593_v24 = vpop.f32.mrb[226].mxu0 }
 0x7f5   : > { %8958 = vst.msk [vmem:[%s13543_s28 + $0x180] sm:$0xff] %vm8909_vm0, %v8591_v9  ;;  %v7727_v5 = vadd.f32 %v7726_v8, %v13138_v37  ;;  %v8594_v18 = vadd.f32 %v13768_v51, %v8593_v24  ;;  %v7728_v38 = vpop.f32.mrb[81].mxu1  ;;  %v8595_v23 = vpop.f32.mrb[227].mxu0 }
 0x7f6   : > { %v7729_v57 = vadd.f32 %v7728_v38, %v13142_v39  ;;  %v7730_v14 = vpop.f32.mrb[82].mxu1  ;;  %8804 = vmatprep.mubr.bf16.mxu0 %v8204_v62 }
 0x7f7   : > { %8959 = vst.msk [vmem:[%s13543_s28 + $0x188] sm:$0xff] %vm8909_vm0, %v8594_v18  ;;  %v7731_v7 = vadd.f32 %v7730_v14, %v13138_v37  ;;  %v7732_v2 = vpop.f32.mrb[83].mxu1  ;;  %8805 = vmatmul.mubr.bf16.gmra.mrb[76].mxu0 %v8203_v49  ;;  %v8053_v54 = vmax.f32 %v7727_v5, 0.0 }
 0x7f8   : > { %v7733_v22 = vadd.f32 %v7732_v2, %v13142_v39  ;;  %v8054_v41 = vmax.f32 %v7729_v57, 0.0 }
 0x7f9   : > { %v8055_v25 = vmax.f32 %v7731_v7, 0.0 }
 0x7fa   : > { %v8056_v20 = vmax.f32 %v7733_v22, 0.0  ;;  %v8598_v10 = vpop.f32.mrb[228].mxu0 }
 0x7fb   : > { %v8205_v21 = vpack.c.bf16 %v8055_v25, %v8053_v54  ;;  %v8599_v30 = vadd.f32 %v13768_v51, %v8598_v10  ;;  %v8600_v42 = vpop.f32.mrb[229].mxu0 }
 0x7fc   : > { %v8206_v46 = vpack.c.bf16 %v8056_v20, %v8054_v41  ;;  %v7736_v19 = vpop.f32.mrb[84].mxu1  ;;  %v8601_v12 = vpop.f32.mrb[230].mxu0 }
 0x7fd   : > { %8960 = vst.msk [vmem:[%s13543_s28 + $0x190] sm:$0xff] %vm8909_vm0, %v8599_v30  ;;  %v7737_v55 = vadd.f32 %v7736_v19, %v13138_v37  ;;  %v8602_v6 = vadd.f32 %v13768_v51, %v8601_v12  ;;  %v7738_v28 = vpop.f32.mrb[85].mxu1  ;;  %v8603_v13 = vpop.f32.mrb[231].mxu0 }
 0x7fe   : > { %v7739_v32 = vadd.f32 %v7738_v28, %v13142_v39  ;;  %v7740_v50 = vpop.f32.mrb[86].mxu1  ;;  %8812 = vmatprep.mubr.bf16.mxu0 %v8206_v46 }
 0x7ff   : > { %8961 = vst.msk [vmem:[%s13543_s28 + $0x198] sm:$0xff] %vm8909_vm0, %v8602_v6  ;;  %v7741_v59 = vadd.f32 %v7740_v50, %v13138_v37  ;;  %v7742_v47 = vpop.f32.mrb[87].mxu1  ;;  %8813 = vmatmul.mubr.bf16.gmra.mrb[80].mxu0 %v8205_v21  ;;  %v8057_v33 = vmax.f32 %v7737_v55, 0.0 }
 0x800   : > { %v7743_v56 = vadd.f32 %v7742_v47, %v13142_v39  ;;  %v8058_v34 = vmax.f32 %v7739_v32, 0.0 }
 0x801   : > { %v8059_v17 = vmax.f32 %v7741_v59, 0.0 }
 0x802   : > { %v8060_v31 = vmax.f32 %v7743_v56, 0.0  ;;  %v8606_v26 = vpop.f32.mrb[232].mxu0 }
 0x803   : > { %v8207_v60 = vpack.c.bf16 %v8059_v17, %v8057_v33  ;;  %v8607_v53 = vadd.f32 %v13768_v51, %v8606_v26  ;;  %v8608_v29 = vpop.f32.mrb[233].mxu0 }
 0x804   : > { %v8208_v4 = vpack.c.bf16 %v8060_v31, %v8058_v34  ;;  %v7746_v58 = vpop.f32.mrb[88].mxu1  ;;  %v8609_v35 = vpop.f32.mrb[234].mxu0 }
 0x805   : > { %8962 = vst.msk [vmem:[%s13543_s28 + $0x1a0] sm:$0xff] %vm8909_vm0, %v8607_v53  ;;  %v7747_v45 = vadd.f32 %v7746_v58, %v13138_v37  ;;  %v8610_v61 = vadd.f32 %v13768_v51, %v8609_v35  ;;  %v7748_v52 = vpop.f32.mrb[89].mxu1  ;;  %v8611_v3 = vpop.f32.mrb[235].mxu0 }
 0x806   : > { %v7749_v1 = vadd.f32 %v7748_v52, %v13142_v39  ;;  %v7750_v43 = vpop.f32.mrb[90].mxu1  ;;  %8820 = vmatprep.mubr.bf16.mxu0 %v8208_v4 }
 0x807   : > { %8963 = vst.msk [vmem:[%s13543_s28 + $0x1a8] sm:$0xff] %vm8909_vm0, %v8610_v61  ;;  %v7751_v36 = vadd.f32 %v7750_v43, %v13138_v37  ;;  %v7752_v48 = vpop.f32.mrb[91].mxu1  ;;  %8821 = vmatmul.mubr.bf16.gmra.mrb[84].mxu0 %v8207_v60  ;;  %v8061_v11 = vmax.f32 %v7747_v45, 0.0 }
 0x808   : > { %v7753_v63 = vadd.f32 %v7752_v48, %v13142_v39  ;;  %v8062_v15 = vmax.f32 %v7749_v1, 0.0 }
 0x809   : > { %v8063_v0 = vmax.f32 %v7751_v36, 0.0 }
 0x80a   : > { %v8064_v40 = vmax.f32 %v7753_v63, 0.0  ;;  %v8614_v44 = vpop.f32.mrb[236].mxu0 }
 0x80b   : > { %v8209_v27 = vpack.c.bf16 %v8063_v0, %v8061_v11  ;;  %v8615_v49 = vadd.f32 %v13768_v51, %v8614_v44  ;;  %v8616_v9 = vpop.f32.mrb[237].mxu0 }
 0x80c   : > { %v8210_v16 = vpack.c.bf16 %v8064_v40, %v8062_v15  ;;  %v7756_v62 = vpop.f32.mrb[92].mxu1  ;;  %v8617_v8 = vpop.f32.mrb[238].mxu0 }
 0x80d   : > { %8964 = vst.msk [vmem:[%s13543_s28 + $0x1b0] sm:$0xff] %vm8909_vm0, %v8615_v49  ;;  %v7757_v24 = vadd.f32 %v7756_v62, %v13138_v37  ;;  %v8618_v5 = vadd.f32 %v13768_v51, %v8617_v8  ;;  %v7758_v18 = vpop.f32.mrb[93].mxu1  ;;  %v8619_v38 = vpop.f32.mrb[239].mxu0 }
 0x80e   : > { %v7759_v23 = vadd.f32 %v7758_v18, %v13142_v39  ;;  %v7760_v57 = vpop.f32.mrb[94].mxu1  ;;  %8828 = vmatprep.mubr.bf16.mxu0 %v8210_v16 }
 0x80f   : > { %8965 = vst.msk [vmem:[%s13543_s28 + $0x1b8] sm:$0xff] %vm8909_vm0, %v8618_v5  ;;  %v7761_v14 = vadd.f32 %v7760_v57, %v13138_v37  ;;  %v7762_v7 = vpop.f32.mrb[95].mxu1  ;;  %8829 = vmatmul.mubr.bf16.gmra.mrb[88].mxu0 %v8209_v27  ;;  %v8065_v22 = vmax.f32 %v7757_v24, 0.0 }
 0x810   : > { %v7763_v2 = vadd.f32 %v7762_v7, %v13142_v39  ;;  %v8066_v25 = vmax.f32 %v7759_v23, 0.0 }
 0x811   : > { %v8067_v54 = vmax.f32 %v7761_v14, 0.0 }
 0x812   : > { %v8068_v41 = vmax.f32 %v7763_v2, 0.0  ;;  %v8622_v20 = vpop.f32.mrb[240].mxu0 }
 0x813   : > { %v8211_v10 = vpack.c.bf16 %v8067_v54, %v8065_v22  ;;  %v8623_v21 = vadd.f32 %v13768_v51, %v8622_v20  ;;  %v8624_v30 = vpop.f32.mrb[241].mxu0 }
 0x814   : > { %v8212_v42 = vpack.c.bf16 %v8068_v41, %v8066_v25  ;;  %v7766_v46 = vpop.f32.mrb[96].mxu1  ;;  %v8625_v19 = vpop.f32.mrb[242].mxu0 }
 0x815   : > { %8966 = vst.msk [vmem:[%s13543_s28 + $0x1c0] sm:$0xff] %vm8909_vm0, %v8623_v21  ;;  %v7767_v12 = vadd.f32 %v7766_v46, %v13138_v37  ;;  %v8626_v55 = vadd.f32 %v13768_v51, %v8625_v19  ;;  %v7768_v6 = vpop.f32.mrb[97].mxu1  ;;  %v8627_v28 = vpop.f32.mrb[243].mxu0 }
 0x816   : > { %v7769_v13 = vadd.f32 %v7768_v6, %v13142_v39  ;;  %v7770_v32 = vpop.f32.mrb[98].mxu1  ;;  %8836 = vmatprep.mubr.bf16.mxu0 %v8212_v42 }
 0x817   : > { %8967 = vst.msk [vmem:[%s13543_s28 + $0x1c8] sm:$0xff] %vm8909_vm0, %v8626_v55  ;;  %v7771_v50 = vadd.f32 %v7770_v32, %v13138_v37  ;;  %v7772_v59 = vpop.f32.mrb[99].mxu1  ;;  %8837 = vmatmul.mubr.bf16.gmra.mrb[92].mxu0 %v8211_v10  ;;  %v8069_v56 = vmax.f32 %v7767_v12, 0.0 }
 0x818   : > { %v7773_v47 = vadd.f32 %v7772_v59, %v13142_v39  ;;  %v8070_v17 = vmax.f32 %v7769_v13, 0.0 }
 0x819   : > { %v8071_v33 = vmax.f32 %v7771_v50, 0.0 }
 0x81a   : > { %v8072_v34 = vmax.f32 %v7773_v47, 0.0  ;;  %v8630_v31 = vpop.f32.mrb[244].mxu0 }
 0x81b   : > { %v8213_v26 = vpack.c.bf16 %v8071_v33, %v8069_v56  ;;  %v8631_v60 = vadd.f32 %v13768_v51, %v8630_v31  ;;  %v8632_v53 = vpop.f32.mrb[245].mxu0 }
 0x81c   : > { %v8214_v29 = vpack.c.bf16 %v8072_v34, %v8070_v17  ;;  %v7776_v4 = vpop.f32.mrb[100].mxu1  ;;  %v8633_v58 = vpop.f32.mrb[246].mxu0 }
 0x81d   : > { %8968 = vst.msk [vmem:[%s13543_s28 + $0x1d0] sm:$0xff] %vm8909_vm0, %v8631_v60  ;;  %v7777_v35 = vadd.f32 %v7776_v4, %v13138_v37  ;;  %v8634_v45 = vadd.f32 %v13768_v51, %v8633_v58  ;;  %v7778_v61 = vpop.f32.mrb[101].mxu1  ;;  %v8635_v52 = vpop.f32.mrb[247].mxu0 }
 0x81e   : > { %v7779_v3 = vadd.f32 %v7778_v61, %v13142_v39  ;;  %v7780_v1 = vpop.f32.mrb[102].mxu1  ;;  %8844 = vmatprep.mubr.bf16.mxu0 %v8214_v29 }
 0x81f   : > { %8969 = vst.msk [vmem:[%s13543_s28 + $0x1d8] sm:$0xff] %vm8909_vm0, %v8634_v45  ;;  %v7781_v43 = vadd.f32 %v7780_v1, %v13138_v37  ;;  %v7782_v36 = vpop.f32.mrb[103].mxu1  ;;  %8845 = vmatmul.mubr.bf16.gmra.mrb[96].mxu0 %v8213_v26  ;;  %v8073_v63 = vmax.f32 %v7777_v35, 0.0 }
 0x820   : > { %v7783_v48 = vadd.f32 %v7782_v36, %v13142_v39  ;;  %v8074_v0 = vmax.f32 %v7779_v3, 0.0 }
 0x821   : > { %v8075_v11 = vmax.f32 %v7781_v43, 0.0 }
 0x822   : > { %v8076_v15 = vmax.f32 %v7783_v48, 0.0  ;;  %v8638_v40 = vpop.f32.mrb[248].mxu0 }
 0x823   : > { %v8215_v44 = vpack.c.bf16 %v8075_v11, %v8073_v63  ;;  %v8639_v27 = vadd.f32 %v13768_v51, %v8638_v40  ;;  %v8640_v49 = vpop.f32.mrb[249].mxu0 }
 0x824   : > { %v8216_v9 = vpack.c.bf16 %v8076_v15, %v8074_v0  ;;  %v7786_v16 = vpop.f32.mrb[104].mxu1  ;;  %v8641_v62 = vpop.f32.mrb[250].mxu0 }
 0x825   : > { %8970 = vst.msk [vmem:[%s13543_s28 + $0x1e0] sm:$0xff] %vm8909_vm0, %v8639_v27  ;;  %v7787_v8 = vadd.f32 %v7786_v16, %v13138_v37  ;;  %v8642_v24 = vadd.f32 %v13768_v51, %v8641_v62  ;;  %v7788_v5 = vpop.f32.mrb[105].mxu1  ;;  %v8643_v18 = vpop.f32.mrb[251].mxu0 }
 0x826   : > { %v7789_v38 = vadd.f32 %v7788_v5, %v13142_v39  ;;  %v7790_v23 = vpop.f32.mrb[106].mxu1  ;;  %8852 = vmatprep.mubr.bf16.mxu0 %v8216_v9 }
 0x827   : > { %8971 = vst.msk [vmem:[%s13543_s28 + $0x1e8] sm:$0xff] %vm8909_vm0, %v8642_v24  ;;  %v7791_v57 = vadd.f32 %v7790_v23, %v13138_v37  ;;  %v7792_v14 = vpop.f32.mrb[107].mxu1  ;;  %8853 = vmatmul.mubr.bf16.gmra.mrb[100].mxu0 %v8215_v44  ;;  %v8077_v2 = vmax.f32 %v7787_v8, 0.0 }
 0x828   : > { %v7793_v7 = vadd.f32 %v7792_v14, %v13142_v39  ;;  %v8078_v54 = vmax.f32 %v7789_v38, 0.0 }
 0x829   : > { %v8079_v22 = vmax.f32 %v7791_v57, 0.0 }
 0x82a   : > { %v8080_v25 = vmax.f32 %v7793_v7, 0.0  ;;  %v8646_v41 = vpop.f32.mrb[252].mxu0 }
 0x82b   : > { %v8217_v20 = vpack.c.bf16 %v8079_v22, %v8077_v2  ;;  %v8647_v10 = vadd.f32 %v13768_v51, %v8646_v41  ;;  %v8648_v21 = vpop.f32.mrb[253].mxu0 }
 0x82c   : > { %v8218_v30 = vpack.c.bf16 %v8080_v25, %v8078_v54  ;;  %v7796_v42 = vpop.f32.mrb[108].mxu1  ;;  %v8649_v46 = vpop.f32.mrb[254].mxu0 }
 0x82d   : > { %8972 = vst.msk [vmem:[%s13543_s28 + $0x1f0] sm:$0xff] %vm8909_vm0, %v8647_v10  ;;  %v7797_v19 = vadd.f32 %v7796_v42, %v13138_v37  ;;  %v8650_v12 = vadd.f32 %v13768_v51, %v8649_v46  ;;  %v7798_v55 = vpop.f32.mrb[109].mxu1  ;;  %v8651_v6 = vpop.f32.mrb[255].mxu0 }
 0x82e   : > { %v7799_v28 = vadd.f32 %v7798_v55, %v13142_v39  ;;  %v7800_v13 = vpop.f32.mrb[110].mxu1  ;;  %8860 = vmatprep.mubr.bf16.mxu0 %v8218_v30 }
 0x82f   : > { %8973 = vst.msk [vmem:[%s13543_s28 + $0x1f8] sm:$0xff] %vm8909_vm0, %v8650_v12  ;;  %v7801_v32 = vadd.f32 %v7800_v13, %v13138_v37  ;;  %v7802_v50 = vpop.f32.mrb[111].mxu1  ;;  %8861 = vmatmul.mubr.bf16.gmra.mrb[104].mxu0 %v8217_v20  ;;  %v8081_v47 = vmax.f32 %v7797_v19, 0.0 }
 0x830   : > { %v7803_v59 = vadd.f32 %v7802_v50, %v13142_v39  ;;  %v8082_v33 = vmax.f32 %v7799_v28, 0.0 }
 0x831   : > { %v8083_v56 = vmax.f32 %v7801_v32, 0.0 }
 0x832   : > { %v8084_v17 = vmax.f32 %v7803_v59, 0.0  ;;  %v8654_v34 = vpop.f32.mrb[0].mxu0 }
 0x833   : > { %v8219_v31 = vpack.c.bf16 %v8083_v56, %v8081_v47  ;;  %v8655_v26 = vadd.f32 %v13768_v51, %v8654_v34  ;;  %v8656_v60 = vpop.f32.mrb[1].mxu0 }
 0x834   : > { %v8220_v53 = vpack.c.bf16 %v8084_v17, %v8082_v33  ;;  %v7806_v29 = vpop.f32.mrb[112].mxu1  ;;  %v8657_v4 = vpop.f32.mrb[2].mxu0 }
 0x835   : > { %8974 = vst.msk [vmem:[%s13543_s28 + $0x200] sm:$0xff] %vm8909_vm0, %v8655_v26  ;;  %v7807_v58 = vadd.f32 %v7806_v29, %v13138_v37  ;;  %v8658_v35 = vadd.f32 %v13768_v51, %v8657_v4  ;;  %v7808_v45 = vpop.f32.mrb[113].mxu1  ;;  %v8659_v61 = vpop.f32.mrb[3].mxu0 }
 0x836   : > { %v7809_v52 = vadd.f32 %v7808_v45, %v13142_v39  ;;  %v7810_v3 = vpop.f32.mrb[114].mxu1  ;;  %8868 = vmatprep.mubr.bf16.mxu0 %v8220_v53 }
 0x837   : > { %8975 = vst.msk [vmem:[%s13543_s28 + $0x208] sm:$0xff] %vm8909_vm0, %v8658_v35  ;;  %v7811_v1 = vadd.f32 %v7810_v3, %v13138_v37  ;;  %v7812_v43 = vpop.f32.mrb[115].mxu1  ;;  %8869 = vmatmul.mubr.bf16.gmra.mrb[108].mxu0 %v8219_v31  ;;  %v8085_v48 = vmax.f32 %v7807_v58, 0.0 }
 0x838   : > { %v7813_v36 = vadd.f32 %v7812_v43, %v13142_v39  ;;  %v8086_v11 = vmax.f32 %v7809_v52, 0.0 }
 0x839   : > { %v8087_v63 = vmax.f32 %v7811_v1, 0.0 }
 0x83a   : > { %v8088_v0 = vmax.f32 %v7813_v36, 0.0  ;;  %v8662_v15 = vpop.f32.mrb[4].mxu0 }
 0x83b   : > { %v8221_v40 = vpack.c.bf16 %v8087_v63, %v8085_v48  ;;  %v8663_v44 = vadd.f32 %v13768_v51, %v8662_v15  ;;  %v8664_v27 = vpop.f32.mrb[5].mxu0 }
 0x83c   : > { %v8222_v49 = vpack.c.bf16 %v8088_v0, %v8086_v11  ;;  %v7816_v9 = vpop.f32.mrb[116].mxu1  ;;  %v8665_v16 = vpop.f32.mrb[6].mxu0 }
 0x83d   : > { %8976 = vst.msk [vmem:[%s13543_s28 + $0x210] sm:$0xff] %vm8909_vm0, %v8663_v44  ;;  %v7817_v62 = vadd.f32 %v7816_v9, %v13138_v37  ;;  %v8666_v8 = vadd.f32 %v13768_v51, %v8665_v16  ;;  %v7818_v24 = vpop.f32.mrb[117].mxu1  ;;  %v8667_v5 = vpop.f32.mrb[7].mxu0 }
 0x83e   : > { %v7819_v18 = vadd.f32 %v7818_v24, %v13142_v39  ;;  %v7820_v38 = vpop.f32.mrb[118].mxu1  ;;  %8876 = vmatprep.mubr.bf16.mxu0 %v8222_v49 }
 0x83f   : > { %8977 = vst.msk [vmem:[%s13543_s28 + $0x218] sm:$0xff] %vm8909_vm0, %v8666_v8  ;;  %v7821_v23 = vadd.f32 %v7820_v38, %v13138_v37  ;;  %v7822_v57 = vpop.f32.mrb[119].mxu1  ;;  %8877 = vmatmul.mubr.bf16.gmra.mrb[112].mxu0 %v8221_v40  ;;  %v8089_v7 = vmax.f32 %v7817_v62, 0.0 }
 0x840   : > { %v7823_v14 = vadd.f32 %v7822_v57, %v13142_v39  ;;  %v8090_v22 = vmax.f32 %v7819_v18, 0.0 }
 0x841   : > { %v8091_v2 = vmax.f32 %v7821_v23, 0.0 }
 0x842   : > { %v8092_v54 = vmax.f32 %v7823_v14, 0.0  ;;  %v8670_v25 = vpop.f32.mrb[8].mxu0 }
 0x843   : > { %v8223_v41 = vpack.c.bf16 %v8091_v2, %v8089_v7  ;;  %v8671_v20 = vadd.f32 %v13768_v51, %v8670_v25  ;;  %v8672_v10 = vpop.f32.mrb[9].mxu0 }
 0x844   : > { %v8224_v21 = vpack.c.bf16 %v8092_v54, %v8090_v22  ;;  %v7826_v30 = vpop.f32.mrb[120].mxu1  ;;  %v8673_v42 = vpop.f32.mrb[10].mxu0 }
 0x845   : > { %8978 = vst.msk [vmem:[%s13543_s28 + $0x220] sm:$0xff] %vm8909_vm0, %v8671_v20  ;;  %v7827_v46 = vadd.f32 %v7826_v30, %v13138_v37  ;;  %v8674_v19 = vadd.f32 %v13768_v51, %v8673_v42  ;;  %v7828_v12 = vpop.f32.mrb[121].mxu1  ;;  %v8675_v55 = vpop.f32.mrb[11].mxu0 }
 0x846   : > { %v7829_v6 = vadd.f32 %v7828_v12, %v13142_v39  ;;  %v7830_v28 = vpop.f32.mrb[122].mxu1  ;;  %8884 = vmatprep.mubr.bf16.mxu0 %v8224_v21 }
 0x847   : > { %8979 = vst.msk [vmem:[%s13543_s28 + $0x228] sm:$0xff] %vm8909_vm0, %v8674_v19  ;;  %v7831_v13 = vadd.f32 %v7830_v28, %v13138_v37  ;;  %v7832_v32 = vpop.f32.mrb[123].mxu1  ;;  %8885 = vmatmul.mubr.bf16.gmra.mrb[116].mxu0 %v8223_v41  ;;  %v8093_v59 = vmax.f32 %v7827_v46, 0.0 }
 0x848   : > { %v7833_v50 = vadd.f32 %v7832_v32, %v13142_v39  ;;  %v8094_v56 = vmax.f32 %v7829_v6, 0.0 }
 0x849   : > { %v8095_v47 = vmax.f32 %v7831_v13, 0.0 }
 0x84a   : > { %v8096_v33 = vmax.f32 %v7833_v50, 0.0  ;;  %v8678_v17 = vpop.f32.mrb[12].mxu0 }
 0x84b   : > { %v8225_v34 = vpack.c.bf16 %v8095_v47, %v8093_v59  ;;  %v8679_v31 = vadd.f32 %v13768_v51, %v8678_v17  ;;  %v8680_v26 = vpop.f32.mrb[13].mxu0 }
 0x84c   : > { %v8226_v60 = vpack.c.bf16 %v8096_v33, %v8094_v56  ;;  %v7836_v53 = vpop.f32.mrb[124].mxu1  ;;  %v8681_v29 = vpop.f32.mrb[14].mxu0 }
 0x84d   : > { %8980 = vst.msk [vmem:[%s13543_s28 + $0x230] sm:$0xff] %vm8909_vm0, %v8679_v31  ;;  %v7837_v4 = vadd.f32 %v7836_v53, %v13138_v37  ;;  %v8682_v58 = vadd.f32 %v13768_v51, %v8681_v29  ;;  %v7838_v35 = vpop.f32.mrb[125].mxu1  ;;  %v8683_v45 = vpop.f32.mrb[15].mxu0 }
 0x84e   : > { %v7839_v61 = vadd.f32 %v7838_v35, %v13142_v39  ;;  %v7840_v52 = vpop.f32.mrb[126].mxu1  ;;  %8892 = vmatprep.mubr.bf16.mxu0 %v8226_v60 }
 0x84f   : > { %8981 = vst.msk [vmem:[%s13543_s28 + $0x238] sm:$0xff] %vm8909_vm0, %v8682_v58  ;;  %v7841_v3 = vadd.f32 %v7840_v52, %v13138_v37  ;;  %v7842_v1 = vpop.f32.mrb[127].mxu1  ;;  %8893 = vmatmul.mubr.bf16.gmra.mrb[120].mxu0 %v8225_v34  ;;  %v8097_v36 = vmax.f32 %v7837_v4, 0.0 }
 0x850   : > { %v7843_v43 = vadd.f32 %v7842_v1, %v13142_v39  ;;  %v8098_v63 = vmax.f32 %v7839_v61, 0.0 }
 0x851   : > { %v8099_v48 = vmax.f32 %v7841_v3, 0.0 }
 0x852   : > { %v8100_v11 = vmax.f32 %v7843_v43, 0.0  ;;  %v8686_v0 = vpop.f32.mrb[16].mxu0 }
 0x853   : > { %v8227_v15 = vpack.c.bf16 %v8099_v48, %v8097_v36  ;;  %v8687_v40 = vadd.f32 %v13768_v51, %v8686_v0  ;;  %v8688_v44 = vpop.f32.mrb[17].mxu0 }
 0x854   : > { %v8228_v27 = vpack.c.bf16 %v8100_v11, %v8098_v63  ;;  %v8689_v49 = vpop.f32.mrb[18].mxu0 }
 0x855   : > { %8982 = vst.msk [vmem:[%s13543_s28 + $0x240] sm:$0xff] %vm8909_vm0, %v8687_v40  ;;  %v8690_v37 = vadd.f32 %v13768_v51, %v8689_v49  ;;  %v8691_v9 = vpop.f32.mrb[19].mxu0 }
 0x856   : > { %8900 = vmatprep.mubr.bf16.mxu0 %v8228_v27 }
 0x857   : > { %8983 = vst.msk [vmem:[%s13543_s28 + $0x248] sm:$0xff] %vm8909_vm0, %v8690_v37  ;;  %8901 = vmatmul.mubr.bf16.gmra.mrb[124].mxu0 %v8227_v15 }
 0x85a   : > { %v8694_v39 = vpop.f32.mrb[20].mxu0 }
 0x85b   : > { %v8695_v16 = vadd.f32 %v13768_v51, %v8694_v39  ;;  %v8696_v62 = vpop.f32.mrb[21].mxu0 }
 0x85c   : > { %v8697_v8 = vpop.f32.mrb[22].mxu0 }
 0x85d   : > { %8984 = vst.msk [vmem:[%s13543_s28 + $0x250] sm:$0xff] %vm8909_vm0, %v8695_v16  ;;  %v8698_v24 = vadd.f32 %v13768_v51, %v8697_v8  ;;  %v8699_v5 = vpop.f32.mrb[23].mxu0 }
 0x85f   : > { %8985 = vst.msk [vmem:[%s13543_s28 + $0x258] sm:$0xff] %vm8909_vm0, %v8698_v24 }
 0x862   : > { %v8702_v18 = vpop.f32.mrb[24].mxu0 }
 0x863   : > { %v8703_v38 = vadd.f32 %v13768_v51, %v8702_v18  ;;  %v8704_v23 = vpop.f32.mrb[25].mxu0 }
 0x864   : > { %v8705_v57 = vpop.f32.mrb[26].mxu0 }
 0x865   : > { %8986 = vst.msk [vmem:[%s13543_s28 + $0x260] sm:$0xff] %vm8909_vm0, %v8703_v38  ;;  %v8706_v14 = vadd.f32 %v13768_v51, %v8705_v57  ;;  %v8707_v7 = vpop.f32.mrb[27].mxu0 }
 0x867   : > { %8987 = vst.msk [vmem:[%s13543_s28 + $0x268] sm:$0xff] %vm8909_vm0, %v8706_v14 }
 0x86a   : > { %v8710_v2 = vpop.f32.mrb[28].mxu0 }
 0x86b   : > { %v8711_v22 = vadd.f32 %v13768_v51, %v8710_v2  ;;  %v8712_v54 = vpop.f32.mrb[29].mxu0 }
 0x86c   : > { %v8713_v25 = vpop.f32.mrb[30].mxu0 }
 0x86d   : > { %8988 = vst.msk [vmem:[%s13543_s28 + $0x270] sm:$0xff] %vm8909_vm0, %v8711_v22  ;;  %v8714_v41 = vadd.f32 %v13768_v51, %v8713_v25  ;;  %v8715_v20 = vpop.f32.mrb[31].mxu0 }
 0x86f   : > { %8989 = vst.msk [vmem:[%s13543_s28 + $0x278] sm:$0xff] %vm8909_vm0, %v8714_v41 }
 0x872   : > { %v8718_v10 = vpop.f32.mrb[32].mxu0 }
 0x873   : > { %v8719_v21 = vadd.f32 %v13768_v51, %v8718_v10  ;;  %v8720_v30 = vpop.f32.mrb[33].mxu0 }
 0x874   : > { %v8721_v42 = vpop.f32.mrb[34].mxu0 }
 0x875   : > { %8990 = vst.msk [vmem:[%s13543_s28 + $0x280] sm:$0xff] %vm8909_vm0, %v8719_v21  ;;  %v8722_v46 = vadd.f32 %v13768_v51, %v8721_v42  ;;  %v8723_v19 = vpop.f32.mrb[35].mxu0 }
 0x877   : > { %8991 = vst.msk [vmem:[%s13543_s28 + $0x288] sm:$0xff] %vm8909_vm0, %v8722_v46 }
 0x87a   : > { %v8726_v12 = vpop.f32.mrb[36].mxu0 }
 0x87b   : > { %v8727_v55 = vadd.f32 %v13768_v51, %v8726_v12  ;;  %v8728_v6 = vpop.f32.mrb[37].mxu0 }
 0x87c   : > { %v8729_v28 = vpop.f32.mrb[38].mxu0 }
 0x87d   : > { %8992 = vst.msk [vmem:[%s13543_s28 + $0x290] sm:$0xff] %vm8909_vm0, %v8727_v55  ;;  %v8730_v13 = vadd.f32 %v13768_v51, %v8729_v28  ;;  %v8731_v32 = vpop.f32.mrb[39].mxu0 }
 0x87f   : > { %8993 = vst.msk [vmem:[%s13543_s28 + $0x298] sm:$0xff] %vm8909_vm0, %v8730_v13 }
 0x882   : > { %v8734_v50 = vpop.f32.mrb[40].mxu0 }
 0x883   : > { %v8735_v59 = vadd.f32 %v13768_v51, %v8734_v50  ;;  %v8736_v47 = vpop.f32.mrb[41].mxu0 }
 0x884   : > { %v8737_v56 = vpop.f32.mrb[42].mxu0 }
 0x885   : > { %8994 = vst.msk [vmem:[%s13543_s28 + $0x2a0] sm:$0xff] %vm8909_vm0, %v8735_v59  ;;  %v8738_v33 = vadd.f32 %v13768_v51, %v8737_v56  ;;  %v8739_v17 = vpop.f32.mrb[43].mxu0  ;;  %v14025_v59 = vld [vmem:[#allocation2] ss:$0 sm:$0xff] }
 0x887   : > { %8995 = vst.msk [vmem:[%s13543_s28 + $0x2a8] sm:$0xff] %vm8909_vm0, %v8738_v33 }
 0x88a   : > { %v8742_v34 = vpop.f32.mrb[44].mxu0 }
 0x88b   : > { %v8743_v31 = vadd.f32 %v13768_v51, %v8742_v34  ;;  %v8744_v26 = vpop.f32.mrb[45].mxu0 }
 0x88c   : > { %v8745_v60 = vpop.f32.mrb[46].mxu0 }
 0x88d   : > { %8996 = vst.msk [vmem:[%s13543_s28 + $0x2b0] sm:$0xff] %vm8909_vm0, %v8743_v31  ;;  %v8746_v53 = vadd.f32 %v13768_v51, %v8745_v60  ;;  %v8747_v29 = vpop.f32.mrb[47].mxu0 }
 0x88f   : > { %8997 = vst.msk [vmem:[%s13543_s28 + $0x2b8] sm:$0xff] %vm8909_vm0, %v8746_v53 }
 0x892   : > { %v8750_v4 = vpop.f32.mrb[48].mxu0 }
 0x893   : > { %v8751_v58 = vadd.f32 %v13768_v51, %v8750_v4  ;;  %v8752_v35 = vpop.f32.mrb[49].mxu0 }
 0x894   : > { %v8753_v45 = vpop.f32.mrb[50].mxu0 }
 0x895   : > { %8998 = vst.msk [vmem:[%s13543_s28 + $0x2c0] sm:$0xff] %vm8909_vm0, %v8751_v58  ;;  %v8754_v61 = vadd.f32 %v13768_v51, %v8753_v45  ;;  %v8755_v52 = vpop.f32.mrb[51].mxu0 }
 0x897   : > { %8999 = vst.msk [vmem:[%s13543_s28 + $0x2c8] sm:$0xff] %vm8909_vm0, %v8754_v61 }
 0x89a   : > { %v8758_v3 = vpop.f32.mrb[52].mxu0 }
 0x89b   : > { %v8759_v1 = vadd.f32 %v13768_v51, %v8758_v3  ;;  %v8760_v43 = vpop.f32.mrb[53].mxu0 }
 0x89c   : > { %v8761_v36 = vpop.f32.mrb[54].mxu0 }
 0x89d   : > { %9000 = vst.msk [vmem:[%s13543_s28 + $0x2d0] sm:$0xff] %vm8909_vm0, %v8759_v1  ;;  %v8762_v48 = vadd.f32 %v13768_v51, %v8761_v36  ;;  %v8763_v63 = vpop.f32.mrb[55].mxu0 }
 0x89f   : > { %9001 = vst.msk [vmem:[%s13543_s28 + $0x2d8] sm:$0xff] %vm8909_vm0, %v8762_v48 }
 0x8a2   : > { %v8766_v11 = vpop.f32.mrb[56].mxu0 }
 0x8a3   : > { %v8767_v0 = vadd.f32 %v13768_v51, %v8766_v11  ;;  %v8768_v15 = vpop.f32.mrb[57].mxu0 }
 0x8a4   : > { %v8769_v40 = vpop.f32.mrb[58].mxu0 }
 0x8a5   : > { %9002 = vst.msk [vmem:[%s13543_s28 + $0x2e0] sm:$0xff] %vm8909_vm0, %v8767_v0  ;;  %v8770_v44 = vadd.f32 %v13768_v51, %v8769_v40  ;;  %v8771_v27 = vpop.f32.mrb[59].mxu0 }
 0x8a7   : > { %9003 = vst.msk [vmem:[%s13543_s28 + $0x2e8] sm:$0xff] %vm8909_vm0, %v8770_v44 }
 0x8aa   : > { %v8774_v49 = vpop.f32.mrb[60].mxu0 }
 0x8ab   : > { %v8775_v37 = vadd.f32 %v13768_v51, %v8774_v49  ;;  %v8776_v9 = vpop.f32.mrb[61].mxu0 }
 0x8ac   : > { %v8777_v39 = vpop.f32.mrb[62].mxu0 }
 0x8ad   : > { %9004 = vst.msk [vmem:[%s13543_s28 + $0x2f0] sm:$0xff] %vm8909_vm0, %v8775_v37  ;;  %v8778_v16 = vadd.f32 %v13768_v51, %v8777_v39  ;;  %v8779_v62 = vpop.f32.mrb[63].mxu0 }
 0x8af   : > { %9005 = vst.msk [vmem:[%s13543_s28 + $0x2f8] sm:$0xff] %vm8909_vm0, %v8778_v16 }
 0x8b2   : > { %v8782_v8 = vpop.f32.mrb[64].mxu0 }
 0x8b3   : > { %v8783_v24 = vadd.f32 %v13768_v51, %v8782_v8  ;;  %v8784_v5 = vpop.f32.mrb[65].mxu0 }
 0x8b4   : > { %v8785_v18 = vpop.f32.mrb[66].mxu0 }
 0x8b5   : > { %9006 = vst.msk [vmem:[%s13543_s28 + $0x300] sm:$0xff] %vm8909_vm0, %v8783_v24  ;;  %v8786_v38 = vadd.f32 %v13768_v51, %v8785_v18  ;;  %v8787_v23 = vpop.f32.mrb[67].mxu0 }
 0x8b7   : > { %9007 = vst.msk [vmem:[%s13543_s28 + $0x308] sm:$0xff] %vm8909_vm0, %v8786_v38 }
 0x8ba   : > { %v8790_v57 = vpop.f32.mrb[68].mxu0 }
 0x8bb   : > { %v8791_v14 = vadd.f32 %v13768_v51, %v8790_v57  ;;  %v8792_v7 = vpop.f32.mrb[69].mxu0 }
 0x8bc   : > { %v8793_v2 = vpop.f32.mrb[70].mxu0 }
 0x8bd   : > { %9008 = vst.msk [vmem:[%s13543_s28 + $0x310] sm:$0xff] %vm8909_vm0, %v8791_v14  ;;  %v8794_v22 = vadd.f32 %v13768_v51, %v8793_v2  ;;  %v8795_v54 = vpop.f32.mrb[71].mxu0 }
 0x8bf   : > { %9009 = vst.msk [vmem:[%s13543_s28 + $0x318] sm:$0xff] %vm8909_vm0, %v8794_v22 }
 0x8c2   : > { %v8798_v25 = vpop.f32.mrb[72].mxu0 }
 0x8c3   : > { %v8799_v41 = vadd.f32 %v13768_v51, %v8798_v25  ;;  %v8800_v20 = vpop.f32.mrb[73].mxu0 }
 0x8c4   : > { %v8801_v10 = vpop.f32.mrb[74].mxu0 }
 0x8c5   : > { %9010 = vst.msk [vmem:[%s13543_s28 + $0x320] sm:$0xff] %vm8909_vm0, %v8799_v41  ;;  %v8802_v21 = vadd.f32 %v13768_v51, %v8801_v10  ;;  %v8803_v30 = vpop.f32.mrb[75].mxu0 }
 0x8c7   : > { %9011 = vst.msk [vmem:[%s13543_s28 + $0x328] sm:$0xff] %vm8909_vm0, %v8802_v21 }
 0x8ca   : > { %v8806_v42 = vpop.f32.mrb[76].mxu0 }
 0x8cb   : > { %v8807_v46 = vadd.f32 %v13768_v51, %v8806_v42  ;;  %v8808_v19 = vpop.f32.mrb[77].mxu0 }
 0x8cc   : > { %v8809_v12 = vpop.f32.mrb[78].mxu0 }
 0x8cd   : > { %9012 = vst.msk [vmem:[%s13543_s28 + $0x330] sm:$0xff] %vm8909_vm0, %v8807_v46  ;;  %v8810_v55 = vadd.f32 %v13768_v51, %v8809_v12  ;;  %v8811_v6 = vpop.f32.mrb[79].mxu0 }
 0x8cf   : > { %9013 = vst.msk [vmem:[%s13543_s28 + $0x338] sm:$0xff] %vm8909_vm0, %v8810_v55 }
 0x8d2   : > { %v8814_v28 = vpop.f32.mrb[80].mxu0 }
 0x8d3   : > { %v8815_v13 = vadd.f32 %v13768_v51, %v8814_v28  ;;  %v8816_v32 = vpop.f32.mrb[81].mxu0 }
 0x8d4   : > { %v8817_v50 = vpop.f32.mrb[82].mxu0 }
 0x8d5   : > { %9014 = vst.msk [vmem:[%s13543_s28 + $0x340] sm:$0xff] %vm8909_vm0, %v8815_v13  ;;  %v8818_v47 = vadd.f32 %v14025_v59, %v8817_v50  ;;  %v8819_v56 = vpop.f32.mrb[83].mxu0 }
 0x8d7   : > { %9015 = vst.msk [vmem:[%s13543_s28 + $0x348] sm:$0xff] %vm8909_vm0, %v8818_v47 }
 0x8da   : > { %v8822_v33 = vpop.f32.mrb[84].mxu0 }
 0x8db   : > { %v8823_v17 = vadd.f32 %v14025_v59, %v8822_v33  ;;  %v8824_v34 = vpop.f32.mrb[85].mxu0 }
 0x8dc   : > { %v8825_v31 = vpop.f32.mrb[86].mxu0 }
 0x8dd   : > { %9016 = vst.msk [vmem:[%s13543_s28 + $0x350] sm:$0xff] %vm8909_vm0, %v8823_v17  ;;  %v8826_v51 = vadd.f32 %v14025_v59, %v8825_v31  ;;  %v8827_v26 = vpop.f32.mrb[87].mxu0 }
 0x8df   : > { %9017 = vst.msk [vmem:[%s13543_s28 + $0x358] sm:$0xff] %vm8909_vm0, %v8826_v51 }
 0x8e2   : > { %v8830_v60 = vpop.f32.mrb[88].mxu0 }
 0x8e3   : > { %v8831_v53 = vadd.f32 %v14025_v59, %v8830_v60  ;;  %v8832_v29 = vpop.f32.mrb[89].mxu0 }
 0x8e4   : > { %v8833_v4 = vpop.f32.mrb[90].mxu0 }
 0x8e5   : > { %9018 = vst.msk [vmem:[%s13543_s28 + $0x360] sm:$0xff] %vm8909_vm0, %v8831_v53  ;;  %v8834_v58 = vadd.f32 %v14025_v59, %v8833_v4  ;;  %v8835_v35 = vpop.f32.mrb[91].mxu0 }
 0x8e7   : > { %9019 = vst.msk [vmem:[%s13543_s28 + $0x368] sm:$0xff] %vm8909_vm0, %v8834_v58 }
 0x8ea   : > { %v8838_v45 = vpop.f32.mrb[92].mxu0 }
 0x8eb   : > { %v8839_v61 = vadd.f32 %v14025_v59, %v8838_v45  ;;  %v8840_v52 = vpop.f32.mrb[93].mxu0 }
 0x8ec   : > { %v8841_v3 = vpop.f32.mrb[94].mxu0 }
 0x8ed   : > { %9020 = vst.msk [vmem:[%s13543_s28 + $0x370] sm:$0xff] %vm8909_vm0, %v8839_v61  ;;  %v8842_v1 = vadd.f32 %v14025_v59, %v8841_v3  ;;  %v8843_v43 = vpop.f32.mrb[95].mxu0 }
 0x8ef   : > { %9021 = vst.msk [vmem:[%s13543_s28 + $0x378] sm:$0xff] %vm8909_vm0, %v8842_v1 }
 0x8f2   : > { %v8846_v36 = vpop.f32.mrb[96].mxu0 }
 0x8f3   : > { %v8847_v48 = vadd.f32 %v14025_v59, %v8846_v36  ;;  %v8848_v63 = vpop.f32.mrb[97].mxu0 }
 0x8f4   : > { %v8849_v11 = vpop.f32.mrb[98].mxu0 }
 0x8f5   : > { %9022 = vst.msk [vmem:[%s13543_s28 + $0x380] sm:$0xff] %vm8909_vm0, %v8847_v48  ;;  %v8850_v0 = vadd.f32 %v14025_v59, %v8849_v11  ;;  %v8851_v15 = vpop.f32.mrb[99].mxu0 }
 0x8f7   : > { %9023 = vst.msk [vmem:[%s13543_s28 + $0x388] sm:$0xff] %vm8909_vm0, %v8850_v0 }
 0x8fa   : > { %v8854_v40 = vpop.f32.mrb[100].mxu0 }
 0x8fb   : > { %v8855_v44 = vadd.f32 %v14025_v59, %v8854_v40  ;;  %v8856_v27 = vpop.f32.mrb[101].mxu0 }
 0x8fc   : > { %v8857_v49 = vpop.f32.mrb[102].mxu0 }
 0x8fd   : > { %9024 = vst.msk [vmem:[%s13543_s28 + $0x390] sm:$0xff] %vm8909_vm0, %v8855_v44  ;;  %v8858_v37 = vadd.f32 %v14025_v59, %v8857_v49  ;;  %v8859_v9 = vpop.f32.mrb[103].mxu0 }
 0x8ff   : > { %9025 = vst.msk [vmem:[%s13543_s28 + $0x398] sm:$0xff] %vm8909_vm0, %v8858_v37 }
 0x902   : > { %v8862_v39 = vpop.f32.mrb[104].mxu0 }
 0x903   : > { %v8863_v16 = vadd.f32 %v14025_v59, %v8862_v39  ;;  %v8864_v62 = vpop.f32.mrb[105].mxu0 }
 0x904   : > { %v8865_v8 = vpop.f32.mrb[106].mxu0 }
 0x905   : > { %9026 = vst.msk [vmem:[%s13543_s28 + $0x3a0] sm:$0xff] %vm8909_vm0, %v8863_v16  ;;  %v8866_v24 = vadd.f32 %v14025_v59, %v8865_v8  ;;  %v8867_v5 = vpop.f32.mrb[107].mxu0 }
 0x907   : > { %9027 = vst.msk [vmem:[%s13543_s28 + $0x3a8] sm:$0xff] %vm8909_vm0, %v8866_v24 }
 0x90a   : > { %v8870_v18 = vpop.f32.mrb[108].mxu0 }
 0x90b   : > { %v8871_v38 = vadd.f32 %v14025_v59, %v8870_v18  ;;  %v8872_v23 = vpop.f32.mrb[109].mxu0 }
 0x90c   : > { %v8873_v57 = vpop.f32.mrb[110].mxu0 }
 0x90d   : > { %9028 = vst.msk [vmem:[%s13543_s28 + $0x3b0] sm:$0xff] %vm8909_vm0, %v8871_v38  ;;  %v8874_v14 = vadd.f32 %v14025_v59, %v8873_v57  ;;  %v8875_v7 = vpop.f32.mrb[111].mxu0 }
 0x90f   : > { %9029 = vst.msk [vmem:[%s13543_s28 + $0x3b8] sm:$0xff] %vm8909_vm0, %v8874_v14 }
 0x912   : > { %v8878_v2 = vpop.f32.mrb[112].mxu0 }
 0x913   : > { %v8879_v22 = vadd.f32 %v14025_v59, %v8878_v2  ;;  %v8880_v54 = vpop.f32.mrb[113].mxu0 }
 0x914   : > { %v8881_v25 = vpop.f32.mrb[114].mxu0 }
 0x915   : > { %9030 = vst.msk [vmem:[%s13543_s28 + $0x3c0] sm:$0xff] %vm8909_vm0, %v8879_v22  ;;  %v8882_v41 = vadd.f32 %v14025_v59, %v8881_v25  ;;  %v8883_v20 = vpop.f32.mrb[115].mxu0 }
 0x917   : > { %9031 = vst.msk [vmem:[%s13543_s28 + $0x3c8] sm:$0xff] %vm8909_vm0, %v8882_v41 }
 0x91a   : > { %v8886_v10 = vpop.f32.mrb[116].mxu0 }
 0x91b   : > { %v8887_v21 = vadd.f32 %v14025_v59, %v8886_v10  ;;  %v8888_v30 = vpop.f32.mrb[117].mxu0 }
 0x91c   : > { %v8889_v42 = vpop.f32.mrb[118].mxu0 }
 0x91d   : > { %9032 = vst.msk [vmem:[%s13543_s28 + $0x3d0] sm:$0xff] %vm8909_vm0, %v8887_v21  ;;  %v8890_v46 = vadd.f32 %v14025_v59, %v8889_v42  ;;  %v8891_v19 = vpop.f32.mrb[119].mxu0 }
 0x91f   : > { %9033 = vst.msk [vmem:[%s13543_s28 + $0x3d8] sm:$0xff] %vm8909_vm0, %v8890_v46 }
 0x922   : > { %v8894_v12 = vpop.f32.mrb[120].mxu0 }
 0x923   : > { %v8895_v55 = vadd.f32 %v14025_v59, %v8894_v12  ;;  %v8896_v6 = vpop.f32.mrb[121].mxu0 }
 0x924   : > { %v8897_v28 = vpop.f32.mrb[122].mxu0 }
 0x925   : > { %9034 = vst.msk [vmem:[%s13543_s28 + $0x3e0] sm:$0xff] %vm8909_vm0, %v8895_v55  ;;  %v8898_v13 = vadd.f32 %v14025_v59, %v8897_v28  ;;  %v8899_v32 = vpop.f32.mrb[123].mxu0 }
 0x927   : > { %9035 = vst.msk [vmem:[%s13543_s28 + $0x3e8] sm:$0xff] %vm8909_vm0, %v8898_v13 }
 0x92a   : > { %v8902_v50 = vpop.f32.mrb[124].mxu0 }
 0x92b   : > { %v8903_v47 = vadd.f32 %v14025_v59, %v8902_v50  ;;  %v8904_v56 = vpop.f32.mrb[125].mxu0 }
 0x92c   : > { %v8905_v33 = vpop.f32.mrb[126].mxu0 }
 0x92d   : > { %9036 = vst.msk [vmem:[%s13543_s28 + $0x3f0] sm:$0xff] %vm8909_vm0, %v8903_v47  ;;  %v8906_v17 = vadd.f32 %v14025_v59, %v8905_v33  ;;  %v8907_v34 = vpop.f32.mrb[127].mxu0 }
 0x92f   : > { %9037 = vst.msk [vmem:[%s13543_s28 + $0x3f8] sm:$0xff] %vm8909_vm0, %v8906_v17 }
 0x930 PF: > { %s25_s27 = sadd.s32 1, %s9668_s27  }
 0x931   : > { %p22_p4 = scmp.ge.s32.totalorder %s25_s27, 5  }
 0x933   :  { %24 = sbr.rel (!%p22_p4) target bundleno = 3 (0x3), region = 102 }

</bundles_post_ra>
